<compile_context>
chip_gen: v5e
topology: v5e:2x2
jax: 0.10.0
libtpu: 0.0.40
codegen_flags: <defaults>
</compile_context>

<pallas_src>
import jax
import jax.numpy as jnp
from jax.experimental import pallas as pl
from jax.experimental.pallas import tpu as pltpu

EPS = 1e-5


# ----------------------------------------------------------------------------
# Fused attention_branch_2 kernel.  One grid step processes `bt` samples:
#   y    = relu(WcT_folded @ x_b + shift)          [CO, HW]   (per sample)
#   xm   = mean_spatial(y)                         [CO, 1]
#   x2   = max_channel(xm)                         [1, 1]
#   h    = relu(fc1_wT @ xm + fc1_b)               [12, 1]
#   x_w  = fcw_wT @ h + fcw_b                      [1, 1]
#   a    = softmax(fc2_wT @ h + fc2_b, axis=0)     [CO, 1]
#   sat  = sigmoid(sum_c a[c] * y[c, :])           [1, HW]
# ----------------------------------------------------------------------------
def attention_branch_kernel(x_ref, wcT_ref, shift_ref,
                            fc1_wT_ref, fc1_bT_ref, fcw_wT_ref, fcw_b_ref,
                            fc2_wT_ref, fc2_bT_ref,
                            xw_ref, sat_ref, x2_ref):
    bt, _, hw = x_ref.shape
    inv_hw = 1.0 / hw

    wcT = wcT_ref[...]          # (CO, C)  bf16, BN-scale folded in
    shift = shift_ref[...]      # (CO, 1)  f32
    fc1_w = fc1_wT_ref[...]     # (12, CO)
    fc1_b = fc1_bT_ref[...]     # (12, 1)
    fcw_w = fcw_wT_ref[...]     # (1, 12)
    fcw_b = fcw_b_ref[...]      # (1, 1)
    fc2_w = fc2_wT_ref[...]     # (CO, 12)
    fc2_b = fc2_bT_ref[...]     # (CO, 1)

    # Static (unrolled) per-sample loop; bt is small (<= 8 by construction).
    for b in range(bt):
        # Projection: cast to bf16 in VMEM (input is streamed from HBM as f32
        # exactly once), contract over C=2048 on the MXU, accumulate in f32.
        xb = x_ref[b].astype(jnp.bfloat16)                            # (C, HW)
        y = jnp.dot(wcT, xb, preferred_element_type=jnp.float32)      # (CO, HW)
        y = jnp.maximum(y + shift, 0.0)                               # bias+BN+ReLU

        # Per-sample spatial mean (multiply by 1/HW) and channel max.
        xm = jnp.sum(y, axis=1, keepdims=True) * inv_hw               # (CO, 1)
        x2_ref[b, :, :] = jnp.max(xm, axis=0, keepdims=True)          # (1, 1)

        # Tiny fc chain in column orientation (no transposes needed).
        h = jnp.maximum(
            jnp.dot(fc1_w, xm, preferred_element_type=jnp.float32) + fc1_b,
            0.0)                                                      # (12, 1)
        xw_ref[b, :, :] = (jnp.dot(fcw_w, h,
                                   preferred_element_type=jnp.float32)
                           + fcw_b)                                   # (1, 1)

        logits = (jnp.dot(fc2_w, h, preferred_element_type=jnp.float32)
                  + fc2_b)                                            # (CO, 1)
        m = jnp.max(logits, axis=0, keepdims=True)
        e = jnp.exp(logits - m)
        a = e / jnp.sum(e, axis=0, keepdims=True)                     # softmax

        # Spatial attention map for this sample (lane axis = HW).
        s = jnp.sum(a * y, axis=0, keepdims=True)                     # (1, HW)
        sat_ref[b, :, :] = jax.nn.sigmoid(s)


# ----------------------------------------------------------------------------
# Wrapper helpers.
# ----------------------------------------------------------------------------
def _vmem_capacity_bytes():
    try:
        return int(pltpu.get_tpu_info().vmem_capacity_bytes)
    except Exception:
        return 64 * 1024 * 1024  # conservative fallback (v7x per-core VMEM)


def _pick_batch_tile(n, c, hw, co, vmem_cap):
    """Largest per-step batch tile such that (a) the grid keeps >= min(n, 4)
    steps (v7x megacore + pipelining) and (b) the full per-step working set
    fits a conservative, generation-aware VMEM budget."""
    lane = 128
    fixed = co * c * 2                                   # bf16 Wc (1 buffer)
    fixed += 6 * 8 * lane * 4 + 2 * co * lane * 4        # padded small consts

    def step_bytes(bt):
        b = 2 * bt * c * hw * 4          # input tile, double-buffered, f32
        b += c * hw * 4 + c * hw * 2     # possible f32 load temp + bf16 cast
        b += 3 * co * max(hw, lane) * 4  # y, a*y product, epilogue temps
        b += 2 * bt * max(hw, lane) * 4  # sat output block (double-buffered)
        b += 4 * bt * lane * 4           # xw / x2 output blocks
        return b

    budget = vmem_cap // 4
    min_grid = min(n, 4)
    best = 1
    for bt in range(1, min(n, 8) + 1):
        if n % bt or (n // bt) < min_grid:
            continue
        if fixed + step_bytes(bt) <= budget:
            best = bt
    return best, fixed + step_bytes(best)


def attention_branch_2_forward(x_nchw, p):
    """Pallas implementation of attention_branch_2.forward (eval mode)."""
    N, C, H, W = x_nchw.shape
    HW = H * W
    CO = p["w"].shape[1]  # 128

    bn = p["bn"]
    scale = bn["gamma"] / jnp.sqrt(bn["var"] + EPS)                  # (CO,)
    shift = ((p["b"] - bn["mean"]) * scale + bn["beta"]).reshape(CO, 1)
    # Fold BN scale into the conv weight (f32), transpose to (CO, C), cast bf16.
    wcT = jnp.transpose(p["w"] * scale[None, :]).astype(jnp.bfloat16)

    fc1_wT = jnp.transpose(p["fc1_w"])        # (12, CO)
    fc1_bT = p["fc1_b"].reshape(-1, 1)        # (12, 1)
    fcw_wT = jnp.transpose(p["fcw_w"])        # (1, 12)
    fcw_b2 = p["fcw_b"].reshape(1, 1)         # (1, 1)
    fc2_wT = jnp.transpose(p["fc2_w"])        # (CO, 12)
    fc2_bT = p["fc2_b"].reshape(-1, 1)        # (CO, 1)

    # Free reshape: NCHW is already [N, C, H*W]-contiguous.  The dominant
    # activation is read exactly once (f32) by the kernel — no transpose pass,
    # no extra HBM round-trip.
    x3 = x_nchw.reshape(N, C, HW)

    vmem_cap = _vmem_capacity_bytes()
    bt, vmem_est = _pick_batch_tile(N, C, HW, CO, vmem_cap)
    grid = (N // bt,)
    vmem_limit = int(min(vmem_cap * 3 // 4,
                         max(2 * vmem_est, 32 * 1024 * 1024)))

    def run(single_buffer_consts):
        def const(shape):
            kw = ({"pipeline_mode": pl.Buffered(1)}
                  if single_buffer_consts else {})
            return pl.BlockSpec(shape, lambda i: (0,) * len(shape), **kw)

        return pl.pallas_call(
            attention_branch_kernel,
            out_shape=(jax.ShapeDtypeStruct((N, 1, 1), jnp.float32),   # x_w
                       jax.ShapeDtypeStruct((N, 1, HW), jnp.float32),  # spatial
                       jax.ShapeDtypeStruct((N, 1, 1), jnp.float32)),  # x_2_p
            grid_spec=pltpu.PrefetchScalarGridSpec(
                num_scalar_prefetch=0,
                grid=grid,
                in_specs=[
                    pl.BlockSpec((bt, C, HW), lambda i: (i, 0, 0)),    # x tile
                    const((CO, C)),      # folded conv weight (bf16)
                    const((CO, 1)),      # shift
                    const((12, CO)),     # fc1_wT
                    const((12, 1)),      # fc1_b
                    const((1, 12)),      # fcw_wT
                    const((1, 1)),       # fcw_b
                    const((CO, 12)),     # fc2_wT
                    const((CO, 1)),      # fc2_b
                ],
                out_specs=(pl.BlockSpec((bt, 1, 1), lambda i: (i, 0, 0)),
                           pl.BlockSpec((bt, 1, HW), lambda i: (i, 0, 0)),
                           pl.BlockSpec((bt, 1, 1), lambda i: (i, 0, 0))),
            ),
            compiler_params=pltpu.CompilerParams(
                dimension_semantics=("parallel",),
                vmem_limit_bytes=vmem_limit),
        )(x3, wcT, shift, fc1_wT, fc1_bT, fcw_wT, fcw_b2, fc2_wT, fc2_bT)

    try:
        xw, sat, x2 = run(True)
    except Exception:
        # Fallback: single-buffering the constant blocks via pipeline_mode is a
        # pure VMEM optimization; retry with default double-buffering if this
        # JAX version rejects it.  Identical math.
        xw, sat, x2 = run(False)

    return xw.reshape(N, 1), sat.reshape(N, 1, H, W), x2.reshape(N, 1)


# ----------------------------------------------------------------------------
# Parameter construction + pure-JAX reference (mirrors PyTorch eval forward).
# ----------------------------------------------------------------------------
def make_bn(key, c):
    k = jax.random.split(key, 4)
    return {
        "gamma": 1.0 + 0.1 * jax.random.normal(k[0], (c,), jnp.float32),
        "beta": 0.1 * jax.random.normal(k[1], (c,), jnp.float32),
        "mean": 0.1 * jax.random.normal(k[2], (c,), jnp.float32),
        "var": 0.5 + jax.random.uniform(k[3], (c,), jnp.float32),
    }


def make_params(key):
    k = jax.random.split(key, 10)
    n = lambda kk, sh, s=0.02: s * jax.random.normal(kk, sh, jnp.float32)
    return {
        "w": n(k[0], (2048, 128)),          # 1x1 conv weight (in, out) layout
        "b": n(k[1], (128,)),               # conv bias
        "bn": make_bn(k[2], 128),           # BatchNorm2d(128), eval stats
        "fc1_w": n(k[3], (128, 12)), "fc1_b": n(k[4], (12,)),
        "fcw_w": n(k[5], (12, 1)),   "fcw_b": n(k[6], (1,)),
        "fc2_w": n(k[7], (12, 128)), "fc2_b": n(k[8], (128,)),
    }


def attention_branch_2_reference(x_nchw, p):
    N, C, H, W = x_nchw.shape
    HW = H * W
    xt = jnp.transpose(x_nchw, (0, 2, 3, 1)).reshape(N, HW, C)
    bn = p["bn"]
    y = xt @ p["w"] + p["b"]
    y = (y - bn["mean"]) / jnp.sqrt(bn["var"] + EPS) * bn["gamma"] + bn["beta"]
    y = jnp.maximum(y, 0.0)                                 # [N, HW, 128]
    xm = y.mean(axis=1)                                     # [N, 128]
    x2 = xm.max(axis=1, keepdims=True)                      # [N, 1]
    h = jnp.maximum(xm @ p["fc1_w"] + p["fc1_b"], 0.0)      # [N, 12]
    xw = h @ p["fcw_w"] + p["fcw_b"]                        # [N, 1]
    a = jax.nn.softmax(h @ p["fc2_w"] + p["fc2_b"], axis=1) # [N, 128]
    sat = jax.nn.sigmoid(jnp.sum(a[:, None, :] * y, axis=2))
    return xw, sat.reshape(N, 1, H, W), x2


if __name__ == "__main__":
    import numpy as np

    key = jax.random.PRNGKey(0)
    kx1, kx2, kp = jax.random.split(key, 3)
    params = make_params(kp)

    # attention_branch_2 input has 2048 channels (fixed by the conv).
    # First shape: small smoke test (bt=1, grid=2).  Second shape exercises
    # the multi-sample-per-step path (bt=2, grid=4).
    test_cases = ((kx1, (2, 2048, 8, 8)), (kx2, (8, 2048, 8, 8)))

    for kx, shape in test_cases:
        x = jax.random.normal(kx, shape, jnp.float32)
        out = jax.block_until_ready(attention_branch_2_forward(x, params))
        ref = jax.block_until_ready(attention_branch_2_reference(x, params))
        # Kernel runs the 2048->128 projection in bf16 (f32 accumulate);
        # tolerance reflects that (observed error ~1e-4).
        for o, r in zip(out, ref):
            np.testing.assert_allclose(np.asarray(o), np.asarray(r),
                                       rtol=5e-3, atol=5e-3)

    print("KERNEL_OK")
</pallas_src>

<mosaic_0001>
module attributes {stable_mosaic.version = 11 : i64} {
  func.func @attention_branch_kernel(%arg0: i32, %arg1: memref<1x2048x64xf32, #tpu.memory_space<vmem>>, %arg2: memref<128x2048xbf16, #tpu.memory_space<vmem>>, %arg3: memref<128x1xf32, #tpu.memory_space<vmem>>, %arg4: memref<12x128xf32, #tpu.memory_space<vmem>>, %arg5: memref<12x1xf32, #tpu.memory_space<vmem>>, %arg6: memref<1x12xf32, #tpu.memory_space<vmem>>, %arg7: memref<1x1xf32, #tpu.memory_space<vmem>>, %arg8: memref<128x12xf32, #tpu.memory_space<vmem>>, %arg9: memref<128x1xf32, #tpu.memory_space<vmem>>, %arg10: memref<1x1x1xf32, #tpu.memory_space<vmem>>, %arg11: memref<1x1x64xf32, #tpu.memory_space<vmem>>, %arg12: memref<1x1x1xf32, #tpu.memory_space<vmem>>) attributes {dimension_semantics = [#tpu.dimension_semantics<parallel>], iteration_bounds = array<i64: 2>, scalar_prefetch = 0 : i64, scratch_operands = 0 : i64, tpu.core_type = #tpu.core_type<tc>, window_params = [{transform_indices = @transform_0, window_bounds = array<i64: 1, 2048, 64>}, {pipeline_mode = #tpu.pipeline_mode<synchronous>, transform_indices = @transform_1, window_bounds = array<i64: 128, 2048>}, {pipeline_mode = #tpu.pipeline_mode<synchronous>, transform_indices = @transform_2, window_bounds = array<i64: 128, 1>}, {pipeline_mode = #tpu.pipeline_mode<synchronous>, transform_indices = @transform_3, window_bounds = array<i64: 12, 128>}, {pipeline_mode = #tpu.pipeline_mode<synchronous>, transform_indices = @transform_4, window_bounds = array<i64: 12, 1>}, {pipeline_mode = #tpu.pipeline_mode<synchronous>, transform_indices = @transform_5, window_bounds = array<i64: 1, 12>}, {pipeline_mode = #tpu.pipeline_mode<synchronous>, transform_indices = @transform_6, window_bounds = array<i64: 1, 1>}, {pipeline_mode = #tpu.pipeline_mode<synchronous>, transform_indices = @transform_7, window_bounds = array<i64: 128, 12>}, {pipeline_mode = #tpu.pipeline_mode<synchronous>, transform_indices = @transform_8, window_bounds = array<i64: 128, 1>}, {transform_indices = @transform_9, window_bounds = array<i64: 1, 1, 1>}, {transform_indices = @transform_10, window_bounds = array<i64: 1, 1, 64>}, {transform_indices = @transform_11, window_bounds = array<i64: 1, 1, 1>}]} {
    %c0 = arith.constant 0 : index
    %c0_0 = arith.constant 0 : index
    %0 = vector.load %arg2[%c0, %c0_0] : memref<128x2048xbf16, #tpu.memory_space<vmem>>, vector<128x2048xbf16>
    %c0_1 = arith.constant 0 : index
    %c0_2 = arith.constant 0 : index
    %1 = vector.load %arg3[%c0_1, %c0_2] : memref<128x1xf32, #tpu.memory_space<vmem>>, vector<128x1xf32>
    %c0_3 = arith.constant 0 : index
    %c0_4 = arith.constant 0 : index
    %2 = vector.load %arg4[%c0_3, %c0_4] : memref<12x128xf32, #tpu.memory_space<vmem>>, vector<12x128xf32>
    %c0_5 = arith.constant 0 : index
    %c0_6 = arith.constant 0 : index
    %3 = vector.load %arg5[%c0_5, %c0_6] : memref<12x1xf32, #tpu.memory_space<vmem>>, vector<12x1xf32>
    %c0_7 = arith.constant 0 : index
    %c0_8 = arith.constant 0 : index
    %4 = vector.load %arg6[%c0_7, %c0_8] : memref<1x12xf32, #tpu.memory_space<vmem>>, vector<1x12xf32>
    %c0_9 = arith.constant 0 : index
    %c0_10 = arith.constant 0 : index
    %5 = vector.load %arg7[%c0_9, %c0_10] : memref<1x1xf32, #tpu.memory_space<vmem>>, vector<1x1xf32>
    %c0_11 = arith.constant 0 : index
    %c0_12 = arith.constant 0 : index
    %6 = vector.load %arg8[%c0_11, %c0_12] : memref<128x12xf32, #tpu.memory_space<vmem>>, vector<128x12xf32>
    %c0_13 = arith.constant 0 : index
    %c0_14 = arith.constant 0 : index
    %7 = vector.load %arg9[%c0_13, %c0_14] : memref<128x1xf32, #tpu.memory_space<vmem>>, vector<128x1xf32>
    %c0_15 = arith.constant 0 : index
    %c0_16 = arith.constant 0 : index
    %c0_17 = arith.constant 0 : index
    %8 = vector.load %arg1[%c0_15, %c0_16, %c0_17] : memref<1x2048x64xf32, #tpu.memory_space<vmem>>, vector<1x2048x64xf32>
    %9 = vector.shape_cast %8 : vector<1x2048x64xf32> to vector<2048x64xf32>
    %10 = arith.truncf %9 : vector<2048x64xf32> to vector<2048x64xbf16>
    %cst = arith.constant dense<0.000000e+00> : vector<128x64xf32>
    %11 = tpu.matmul %0, %10, %cst {dimension_numbers = #tpu.dot_dimension_numbers<[1], [0], [0], [1], [0, 0, 1, 1], [], []>} : vector<128x2048xbf16>, vector<2048x64xbf16>, vector<128x64xf32> -> vector<128x64xf32>
    %12 = vector.broadcast %1 : vector<128x1xf32> to vector<128x64xf32>
    %13 = arith.addf %11, %12 : vector<128x64xf32>
    %cst_18 = arith.constant 0.000000e+00 : f32
    %14 = vector.broadcast %cst_18 : f32 to vector<128x64xf32>
    %15 = arith.maximumf %13, %14 : vector<128x64xf32>
    %cst_19 = arith.constant dense<0.000000e+00> : vector<128xf32>
    %16 = vector.multi_reduction <add>, %15, %cst_19 [1] : vector<128x64xf32> to vector<128xf32>
    %17 = vector.shape_cast %16 : vector<128xf32> to vector<128x1xf32>
    %cst_20 = arith.constant 1.562500e-02 : f32
    %18 = vector.broadcast %cst_20 : f32 to vector<128x1xf32>
    %19 = arith.mulf %17, %18 : vector<128x1xf32>
    %cst_21 = arith.constant dense<0xFF800000> : vector<1xf32>
    %20 = vector.multi_reduction <maximumf>, %19, %cst_21 [0] : vector<128x1xf32> to vector<1xf32>
    %21 = vector.shape_cast %20 : vector<1xf32> to vector<1x1xf32>
    %c0_22 = arith.constant 0 : index
    %c0_23 = arith.constant 0 : index
    %c0_24 = arith.constant 0 : index
    %22 = vector.load %arg12[%c0_22, %c0_23, %c0_24] : memref<1x1x1xf32, #tpu.memory_space<vmem>>, vector<1x1x1xf32>
    %23 = vector.shape_cast %22 : vector<1x1x1xf32> to vector<1x1xf32>
    %24 = vector.shape_cast %21 : vector<1x1xf32> to vector<1x1x1xf32>
    tpu.vector_store %arg12[%c0_22, %c0_23, %c0_24], %24 {strides = array<i32>} : memref<1x1x1xf32, #tpu.memory_space<vmem>>, vector<1x1x1xf32>,
    %cst_25 = arith.constant dense<0.000000e+00> : vector<12x1xf32>
    %25 = tpu.matmul %2, %19, %cst_25 {dimension_numbers = #tpu.dot_dimension_numbers<[1], [0], [0], [1], [0, 0, 1, 1], [], []>} : vector<12x128xf32>, vector<128x1xf32>, vector<12x1xf32> -> vector<12x1xf32>
    %26 = arith.addf %25, %3 : vector<12x1xf32>
    %cst_26 = arith.constant 0.000000e+00 : f32
    %27 = vector.broadcast %cst_26 : f32 to vector<12x1xf32>
    %28 = arith.maximumf %26, %27 : vector<12x1xf32>
    %cst_27 = arith.constant dense<0.000000e+00> : vector<1x1xf32>
    %29 = tpu.matmul %4, %28, %cst_27 {dimension_numbers = #tpu.dot_dimension_numbers<[1], [0], [0], [1], [0, 0, 1, 1], [], []>} : vector<1x12xf32>, vector<12x1xf32>, vector<1x1xf32> -> vector<1x1xf32>
    %30 = arith.addf %29, %5 : vector<1x1xf32>
    %c0_28 = arith.constant 0 : index
    %c0_29 = arith.constant 0 : index
    %c0_30 = arith.constant 0 : index
    %31 = vector.load %arg10[%c0_28, %c0_29, %c0_30] : memref<1x1x1xf32, #tpu.memory_space<vmem>>, vector<1x1x1xf32>
    %32 = vector.shape_cast %31 : vector<1x1x1xf32> to vector<1x1xf32>
    %33 = vector.shape_cast %30 : vector<1x1xf32> to vector<1x1x1xf32>
    tpu.vector_store %arg10[%c0_28, %c0_29, %c0_30], %33 {strides = array<i32>} : memref<1x1x1xf32, #tpu.memory_space<vmem>>, vector<1x1x1xf32>,
    %cst_31 = arith.constant dense<0.000000e+00> : vector<128x1xf32>
    %34 = tpu.matmul %6, %28, %cst_31 {dimension_numbers = #tpu.dot_dimension_numbers<[1], [0], [0], [1], [0, 0, 1, 1], [], []>} : vector<128x12xf32>, vector<12x1xf32>, vector<128x1xf32> -> vector<128x1xf32>
    %35 = arith.addf %34, %7 : vector<128x1xf32>
    %cst_32 = arith.constant dense<0xFF800000> : vector<1xf32>
    %36 = vector.multi_reduction <maximumf>, %35, %cst_32 [0] : vector<128x1xf32> to vector<1xf32>
    %37 = vector.shape_cast %36 : vector<1xf32> to vector<1x1xf32>
    %38 = vector.broadcast %37 : vector<1x1xf32> to vector<128x1xf32>
    %39 = arith.subf %35, %38 : vector<128x1xf32>
    %40 = math.exp %39 : vector<128x1xf32>
    %cst_33 = arith.constant dense<0.000000e+00> : vector<1xf32>
    %41 = vector.multi_reduction <add>, %40, %cst_33 [0] : vector<128x1xf32> to vector<1xf32>
    %42 = vector.shape_cast %41 : vector<1xf32> to vector<1x1xf32>
    %43 = vector.broadcast %42 : vector<1x1xf32> to vector<128x1xf32>
    %44 = arith.divf %40, %43 : vector<128x1xf32>
    %45 = vector.broadcast %44 : vector<128x1xf32> to vector<128x64xf32>
    %46 = arith.mulf %45, %15 : vector<128x64xf32>
    %cst_34 = arith.constant dense<0.000000e+00> : vector<64xf32>
    %47 = vector.multi_reduction <add>, %46, %cst_34 [0] : vector<128x64xf32> to vector<64xf32>
    %48 = vector.shape_cast %47 : vector<64xf32> to vector<1x64xf32>
    %49 = arith.negf %48 : vector<1x64xf32>
    %50 = math.exp %49 : vector<1x64xf32>
    %cst_35 = arith.constant 1.000000e+00 : f32
    %51 = vector.broadcast %cst_35 : f32 to vector<1x64xf32>
    %52 = arith.addf %51, %50 : vector<1x64xf32>
    %53 = arith.divf %51, %52 : vector<1x64xf32>
    %c0_36 = arith.constant 0 : index
    %c0_37 = arith.constant 0 : index
    %c0_38 = arith.constant 0 : index
    %54 = vector.load %arg11[%c0_36, %c0_37, %c0_38] : memref<1x1x64xf32, #tpu.memory_space<vmem>>, vector<1x1x64xf32>
    %55 = vector.shape_cast %54 : vector<1x1x64xf32> to vector<1x64xf32>
    %56 = vector.shape_cast %53 : vector<1x64xf32> to vector<1x1x64xf32>
    tpu.vector_store %arg11[%c0_36, %c0_37, %c0_38], %56 {strides = array<i32>} : memref<1x1x64xf32, #tpu.memory_space<vmem>>, vector<1x1x64xf32>,
    return
  }
  func.func @transform_0(%arg0: i32) -> (i32, i32, i32) {
    %c0_i32 = arith.constant 0 : i32
    %c0_i32_0 = arith.constant 0 : i32
    %c0_i32_1 = arith.constant 0 : i32
    return %arg0, %c0_i32, %c0_i32_0 : i32, i32, i32
  }
  func.func @transform_1(%arg0: i32) -> (i32, i32) {
    %c0_i32 = arith.constant 0 : i32
    %c0_i32_0 = arith.constant 0 : i32
    %c0_i32_1 = arith.constant 0 : i32
    return %c0_i32, %c0_i32_0 : i32, i32
  }
  func.func @transform_2(%arg0: i32) -> (i32, i32) {
    %c0_i32 = arith.constant 0 : i32
    %c0_i32_0 = arith.constant 0 : i32
    %c0_i32_1 = arith.constant 0 : i32
    return %c0_i32, %c0_i32_0 : i32, i32
  }
  func.func @transform_3(%arg0: i32) -> (i32, i32) {
    %c0_i32 = arith.constant 0 : i32
    %c0_i32_0 = arith.constant 0 : i32
    %c0_i32_1 = arith.constant 0 : i32
    return %c0_i32, %c0_i32_0 : i32, i32
  }
  func.func @transform_4(%arg0: i32) -> (i32, i32) {
    %c0_i32 = arith.constant 0 : i32
    %c0_i32_0 = arith.constant 0 : i32
    %c0_i32_1 = arith.constant 0 : i32
    return %c0_i32, %c0_i32_0 : i32, i32
  }
  func.func @transform_5(%arg0: i32) -> (i32, i32) {
    %c0_i32 = arith.constant 0 : i32
    %c0_i32_0 = arith.constant 0 : i32
    %c0_i32_1 = arith.constant 0 : i32
    return %c0_i32, %c0_i32_0 : i32, i32
  }
  func.func @transform_6(%arg0: i32) -> (i32, i32) {
    %c0_i32 = arith.constant 0 : i32
    %c0_i32_0 = arith.constant 0 : i32
    %c0_i32_1 = arith.constant 0 : i32
    return %c0_i32, %c0_i32_0 : i32, i32
  }
  func.func @transform_7(%arg0: i32) -> (i32, i32) {
    %c0_i32 = arith.constant 0 : i32
    %c0_i32_0 = arith.constant 0 : i32
    %c0_i32_1 = arith.constant 0 : i32
    return %c0_i32, %c0_i32_0 : i32, i32
  }
  func.func @transform_8(%arg0: i32) -> (i32, i32) {
    %c0_i32 = arith.constant 0 : i32
    %c0_i32_0 = arith.constant 0 : i32
    %c0_i32_1 = arith.constant 0 : i32
    return %c0_i32, %c0_i32_0 : i32, i32
  }
  func.func @transform_9(%arg0: i32) -> (i32, i32, i32) {
    %c0_i32 = arith.constant 0 : i32
    %c0_i32_0 = arith.constant 0 : i32
    %c0_i32_1 = arith.constant 0 : i32
    return %arg0, %c0_i32, %c0_i32_0 : i32, i32, i32
  }
  func.func @transform_10(%arg0: i32) -> (i32, i32, i32) {
    %c0_i32 = arith.constant 0 : i32
    %c0_i32_0 = arith.constant 0 : i32
    %c0_i32_1 = arith.constant 0 : i32
    return %arg0, %c0_i32, %c0_i32_0 : i32, i32, i32
  }
  func.func @transform_11(%arg0: i32) -> (i32, i32, i32) {
    %c0_i32 = arith.constant 0 : i32
    %c0_i32_0 = arith.constant 0 : i32
    %c0_i32_1 = arith.constant 0 : i32
    return %arg0, %c0_i32, %c0_i32_0 : i32, i32, i32
  }
}

module attributes {stable_mosaic.version = 11 : i64} {
  func.func @attention_branch_kernel(%arg0: i32, %arg1: memref<1x2048x64xf32, #tpu.memory_space<vmem>>, %arg2: memref<128x2048xbf16, #tpu.memory_space<vmem>>, %arg3: memref<128x1xf32, #tpu.memory_space<vmem>>, %arg4: memref<12x128xf32, #tpu.memory_space<vmem>>, %arg5: memref<12x1xf32, #tpu.memory_space<vmem>>, %arg6: memref<1x12xf32, #tpu.memory_space<vmem>>, %arg7: memref<1x1xf32, #tpu.memory_space<vmem>>, %arg8: memref<128x12xf32, #tpu.memory_space<vmem>>, %arg9: memref<128x1xf32, #tpu.memory_space<vmem>>, %arg10: memref<1x1x1xf32, #tpu.memory_space<vmem>>, %arg11: memref<1x1x64xf32, #tpu.memory_space<vmem>>, %arg12: memref<1x1x1xf32, #tpu.memory_space<vmem>>) attributes {dimension_semantics = [#tpu.dimension_semantics<parallel>], iteration_bounds = array<i64: 2>, scalar_prefetch = 0 : i64, scratch_operands = 0 : i64, tpu.core_type = #tpu.core_type<tc>, window_params = [{transform_indices = @transform_0, window_bounds = array<i64: 1, 2048, 64>}, {pipeline_mode = #tpu.pipeline_mode<synchronous>, transform_indices = @transform_1, window_bounds = array<i64: 128, 2048>}, {pipeline_mode = #tpu.pipeline_mode<synchronous>, transform_indices = @transform_2, window_bounds = array<i64: 128, 1>}, {pipeline_mode = #tpu.pipeline_mode<synchronous>, transform_indices = @transform_3, window_bounds = array<i64: 12, 128>}, {pipeline_mode = #tpu.pipeline_mode<synchronous>, transform_indices = @transform_4, window_bounds = array<i64: 12, 1>}, {pipeline_mode = #tpu.pipeline_mode<synchronous>, transform_indices = @transform_5, window_bounds = array<i64: 1, 12>}, {pipeline_mode = #tpu.pipeline_mode<synchronous>, transform_indices = @transform_6, window_bounds = array<i64: 1, 1>}, {pipeline_mode = #tpu.pipeline_mode<synchronous>, transform_indices = @transform_7, window_bounds = array<i64: 128, 12>}, {pipeline_mode = #tpu.pipeline_mode<synchronous>, transform_indices = @transform_8, window_bounds = array<i64: 128, 1>}, {transform_indices = @transform_9, window_bounds = array<i64: 1, 1, 1>}, {transform_indices = @transform_10, window_bounds = array<i64: 1, 1, 64>}, {transform_indices = @transform_11, window_bounds = array<i64: 1, 1, 1>}]} {
    %c0 = arith.constant 0 : index
    %c0_0 = arith.constant 0 : index
    %0 = vector.load %arg2[%c0, %c0_0] : memref<128x2048xbf16, #tpu.memory_space<vmem>>, vector<128x2048xbf16>
    %c0_1 = arith.constant 0 : index
    %c0_2 = arith.constant 0 : index
    %1 = vector.load %arg3[%c0_1, %c0_2] : memref<128x1xf32, #tpu.memory_space<vmem>>, vector<128x1xf32>
    %c0_3 = arith.constant 0 : index
    %c0_4 = arith.constant 0 : index
    %2 = vector.load %arg4[%c0_3, %c0_4] : memref<12x128xf32, #tpu.memory_space<vmem>>, vector<12x128xf32>
    %c0_5 = arith.constant 0 : index
    %c0_6 = arith.constant 0 : index
    %3 = vector.load %arg5[%c0_5, %c0_6] : memref<12x1xf32, #tpu.memory_space<vmem>>, vector<12x1xf32>
    %c0_7 = arith.constant 0 : index
    %c0_8 = arith.constant 0 : index
    %4 = vector.load %arg6[%c0_7, %c0_8] : memref<1x12xf32, #tpu.memory_space<vmem>>, vector<1x12xf32>
    %c0_9 = arith.constant 0 : index
    %c0_10 = arith.constant 0 : index
    %5 = vector.load %arg7[%c0_9, %c0_10] : memref<1x1xf32, #tpu.memory_space<vmem>>, vector<1x1xf32>
    %c0_11 = arith.constant 0 : index
    %c0_12 = arith.constant 0 : index
    %6 = vector.load %arg8[%c0_11, %c0_12] : memref<128x12xf32, #tpu.memory_space<vmem>>, vector<128x12xf32>
    %c0_13 = arith.constant 0 : index
    %c0_14 = arith.constant 0 : index
    %7 = vector.load %arg9[%c0_13, %c0_14] : memref<128x1xf32, #tpu.memory_space<vmem>>, vector<128x1xf32>
    %c0_15 = arith.constant 0 : index
    %c0_16 = arith.constant 0 : index
    %c0_17 = arith.constant 0 : index
    %8 = vector.load %arg1[%c0_15, %c0_16, %c0_17] : memref<1x2048x64xf32, #tpu.memory_space<vmem>>, vector<1x2048x64xf32>
    %9 = vector.shape_cast %8 : vector<1x2048x64xf32> to vector<2048x64xf32>
    %10 = arith.truncf %9 : vector<2048x64xf32> to vector<2048x64xbf16>
    %cst = arith.constant dense<0.000000e+00> : vector<128x64xf32>
    %11 = tpu.matmul %0, %10, %cst {dimension_numbers = #tpu.dot_dimension_numbers<[1], [0], [0], [1], [0, 0, 1, 1], [], []>} : vector<128x2048xbf16>, vector<2048x64xbf16>, vector<128x64xf32> -> vector<128x64xf32>
    %12 = vector.broadcast %1 : vector<128x1xf32> to vector<128x64xf32>
    %13 = arith.addf %11, %12 : vector<128x64xf32>
    %cst_18 = arith.constant 0.000000e+00 : f32
    %14 = vector.broadcast %cst_18 : f32 to vector<128x64xf32>
    %15 = arith.maximumf %13, %14 : vector<128x64xf32>
    %cst_19 = arith.constant dense<0.000000e+00> : vector<128xf32>
    %16 = vector.multi_reduction <add>, %15, %cst_19 [1] : vector<128x64xf32> to vector<128xf32>
    %17 = vector.shape_cast %16 : vector<128xf32> to vector<128x1xf32>
    %cst_20 = arith.constant 1.562500e-02 : f32
    %18 = vector.broadcast %cst_20 : f32 to vector<128x1xf32>
    %19 = arith.mulf %17, %18 : vector<128x1xf32>
    %cst_21 = arith.constant dense<0xFF800000> : vector<1xf32>
    %20 = vector.multi_reduction <maximumf>, %19, %cst_21 [0] : vector<128x1xf32> to vector<1xf32>
    %21 = vector.shape_cast %20 : vector<1xf32> to vector<1x1xf32>
    %c0_22 = arith.constant 0 : index
    %c0_23 = arith.constant 0 : index
    %c0_24 = arith.constant 0 : index
    %22 = vector.load %arg12[%c0_22, %c0_23, %c0_24] : memref<1x1x1xf32, #tpu.memory_space<vmem>>, vector<1x1x1xf32>
    %23 = vector.shape_cast %22 : vector<1x1x1xf32> to vector<1x1xf32>
    %24 = vector.shape_cast %21 : vector<1x1xf32> to vector<1x1x1xf32>
    tpu.vector_store %arg12[%c0_22, %c0_23, %c0_24], %24 {strides = array<i32>} : memref<1x1x1xf32, #tpu.memory_space<vmem>>, vector<1x1x1xf32>,
    %cst_25 = arith.constant dense<0.000000e+00> : vector<12x1xf32>
    %25 = tpu.matmul %2, %19, %cst_25 {dimension_numbers = #tpu.dot_dimension_numbers<[1], [0], [0], [1], [0, 0, 1, 1], [], []>} : vector<12x128xf32>, vector<128x1xf32>, vector<12x1xf32> -> vector<12x1xf32>
    %26 = arith.addf %25, %3 : vector<12x1xf32>
    %cst_26 = arith.constant 0.000000e+00 : f32
    %27 = vector.broadcast %cst_26 : f32 to vector<12x1xf32>
    %28 = arith.maximumf %26, %27 : vector<12x1xf32>
    %cst_27 = arith.constant dense<0.000000e+00> : vector<1x1xf32>
    %29 = tpu.matmul %4, %28, %cst_27 {dimension_numbers = #tpu.dot_dimension_numbers<[1], [0], [0], [1], [0, 0, 1, 1], [], []>} : vector<1x12xf32>, vector<12x1xf32>, vector<1x1xf32> -> vector<1x1xf32>
    %30 = arith.addf %29, %5 : vector<1x1xf32>
    %c0_28 = arith.constant 0 : index
    %c0_29 = arith.constant 0 : index
    %c0_30 = arith.constant 0 : index
    %31 = vector.load %arg10[%c0_28, %c0_29, %c0_30] : memref<1x1x1xf32, #tpu.memory_space<vmem>>, vector<1x1x1xf32>
    %32 = vector.shape_cast %31 : vector<1x1x1xf32> to vector<1x1xf32>
    %33 = vector.shape_cast %30 : vector<1x1xf32> to vector<1x1x1xf32>
    tpu.vector_store %arg10[%c0_28, %c0_29, %c0_30], %33 {strides = array<i32>} : memref<1x1x1xf32, #tpu.memory_space<vmem>>, vector<1x1x1xf32>,
    %cst_31 = arith.constant dense<0.000000e+00> : vector<128x1xf32>
    %34 = tpu.matmul %6, %28, %cst_31 {dimension_numbers = #tpu.dot_dimension_numbers<[1], [0], [0], [1], [0, 0, 1, 1], [], []>} : vector<128x12xf32>, vector<12x1xf32>, vector<128x1xf32> -> vector<128x1xf32>
    %35 = arith.addf %34, %7 : vector<128x1xf32>
    %cst_32 = arith.constant dense<0xFF800000> : vector<1xf32>
    %36 = vector.multi_reduction <maximumf>, %35, %cst_32 [0] : vector<128x1xf32> to vector<1xf32>
    %37 = vector.shape_cast %36 : vector<1xf32> to vector<1x1xf32>
    %38 = vector.broadcast %37 : vector<1x1xf32> to vector<128x1xf32>
    %39 = arith.subf %35, %38 : vector<128x1xf32>
    %40 = math.exp %39 : vector<128x1xf32>
    %cst_33 = arith.constant dense<0.000000e+00> : vector<1xf32>
    %41 = vector.multi_reduction <add>, %40, %cst_33 [0] : vector<128x1xf32> to vector<1xf32>
    %42 = vector.shape_cast %41 : vector<1xf32> to vector<1x1xf32>
    %43 = vector.broadcast %42 : vector<1x1xf32> to vector<128x1xf32>
    %44 = arith.divf %40, %43 : vector<128x1xf32>
    %45 = vector.broadcast %44 : vector<128x1xf32> to vector<128x64xf32>
    %46 = arith.mulf %45, %15 : vector<128x64xf32>
    %cst_34 = arith.constant dense<0.000000e+00> : vector<64xf32>
    %47 = vector.multi_reduction <add>, %46, %cst_34 [0] : vector<128x64xf32> to vector<64xf32>
    %48 = vector.shape_cast %47 : vector<64xf32> to vector<1x64xf32>
    %49 = arith.negf %48 : vector<1x64xf32>
    %50 = math.exp %49 : vector<1x64xf32>
    %cst_35 = arith.constant 1.000000e+00 : f32
    %51 = vector.broadcast %cst_35 : f32 to vector<1x64xf32>
    %52 = arith.addf %51, %50 : vector<1x64xf32>
    %53 = arith.divf %51, %52 : vector<1x64xf32>
    %c0_36 = arith.constant 0 : index
    %c0_37 = arith.constant 0 : index
    %c0_38 = arith.constant 0 : index
    %54 = vector.load %arg11[%c0_36, %c0_37, %c0_38] : memref<1x1x64xf32, #tpu.memory_space<vmem>>, vector<1x1x64xf32>
    %55 = vector.shape_cast %54 : vector<1x1x64xf32> to vector<1x64xf32>
    %56 = vector.shape_cast %53 : vector<1x64xf32> to vector<1x1x64xf32>
    tpu.vector_store %arg11[%c0_36, %c0_37, %c0_38], %56 {strides = array<i32>} : memref<1x1x64xf32, #tpu.memory_space<vmem>>, vector<1x1x64xf32>,
    return
  }
  func.func @transform_0(%arg0: i32) -> (i32, i32, i32) {
    %c0_i32 = arith.constant 0 : i32
    %c0_i32_0 = arith.constant 0 : i32
    %c0_i32_1 = arith.constant 0 : i32
    return %arg0, %c0_i32, %c0_i32_0 : i32, i32, i32
  }
  func.func @transform_1(%arg0: i32) -> (i32, i32) {
    %c0_i32 = arith.constant 0 : i32
    %c0_i32_0 = arith.constant 0 : i32
    %c0_i32_1 = arith.constant 0 : i32
    return %c0_i32, %c0_i32_0 : i32, i32
  }
  func.func @transform_2(%arg0: i32) -> (i32, i32) {
    %c0_i32 = arith.constant 0 : i32
    %c0_i32_0 = arith.constant 0 : i32
    %c0_i32_1 = arith.constant 0 : i32
    return %c0_i32, %c0_i32_0 : i32, i32
  }
  func.func @transform_3(%arg0: i32) -> (i32, i32) {
    %c0_i32 = arith.constant 0 : i32
    %c0_i32_0 = arith.constant 0 : i32
    %c0_i32_1 = arith.constant 0 : i32
    return %c0_i32, %c0_i32_0 : i32, i32
  }
  func.func @transform_4(%arg0: i32) -> (i32, i32) {
    %c0_i32 = arith.constant 0 : i32
    %c0_i32_0 = arith.constant 0 : i32
    %c0_i32_1 = arith.constant 0 : i32
    return %c0_i32, %c0_i32_0 : i32, i32
  }
  func.func @transform_5(%arg0: i32) -> (i32, i32) {
    %c0_i32 = arith.constant 0 : i32
    %c0_i32_0 = arith.constant 0 : i32
    %c0_i32_1 = arith.constant 0 : i32
    return %c0_i32, %c0_i32_0 : i32, i32
  }
  func.func @transform_6(%arg0: i32) -> (i32, i32) {
    %c0_i32 = arith.constant 0 : i32
    %c0_i32_0 = arith.constant 0 : i32
    %c0_i32_1 = arith.constant 0 : i32
    return %c0_i32, %c0_i32_0 : i32, i32
  }
  func.func @transform_7(%arg0: i32) -> (i32, i32) {
    %c0_i32 = arith.constant 0 : i32
    %c0_i32_0 = arith.constant 0 : i32
    %c0_i32_1 = arith.constant 0 : i32
    return %c0_i32, %c0_i32_0 : i32, i32
  }
  func.func @transform_8(%arg0: i32) -> (i32, i32) {
    %c0_i32 = arith.constant 0 : i32
    %c0_i32_0 = arith.constant 0 : i32
    %c0_i32_1 = arith.constant 0 : i32
    return %c0_i32, %c0_i32_0 : i32, i32
  }
  func.func @transform_9(%arg0: i32) -> (i32, i32, i32) {
    %c0_i32 = arith.constant 0 : i32
    %c0_i32_0 = arith.constant 0 : i32
    %c0_i32_1 = arith.constant 0 : i32
    return %arg0, %c0_i32, %c0_i32_0 : i32, i32, i32
  }
  func.func @transform_10(%arg0: i32) -> (i32, i32, i32) {
    %c0_i32 = arith.constant 0 : i32
    %c0_i32_0 = arith.constant 0 : i32
    %c0_i32_1 = arith.constant 0 : i32
    return %arg0, %c0_i32, %c0_i32_0 : i32, i32, i32
  }
  func.func @transform_11(%arg0: i32) -> (i32, i32, i32) {
    %c0_i32 = arith.constant 0 : i32
    %c0_i32_0 = arith.constant 0 : i32
    %c0_i32_1 = arith.constant 0 : i32
    return %arg0, %c0_i32, %c0_i32_0 : i32, i32, i32
  }
}

</mosaic_0001>

<bundles_post_ra>
// kernel: tpu_custom_call.1
= control target key start
LH: loop header
LB: loop body
LE: loop exit
PB: predicated region body
PF: predicated region fallthrough
CT: control target
= control target key end

     0   :  { %s6108_s0 = inlined_call_operand.vmem [shape: f32[2,2048,64], index: 0, kind: input, shape index: {}]   ;;  %s6109_s1 = inlined_call_operand.vmem [shape: bf16[128,2048], index: 1, kind: input, shape index: {}]   ;;  %s6110_s2 = inlined_call_operand.vmem [shape: f32[128,1], index: 2, kind: input, shape index: {}]   ;;  %s6111_s3 = inlined_call_operand.vmem [shape: f32[12,128], index: 3, kind: input, shape index: {}]   ;;  %s6112_s4 = inlined_call_operand.vmem [shape: f32[12,1], index: 4, kind: input, shape index: {}]   ;;  %s6113_s5 = inlined_call_operand.vmem [shape: f32[1,12], index: 5, kind: input, shape index: {}]   ;;  %s6114_s6 = inlined_call_operand.<no memory space> [shape: f32[1,1], index: 6, kind: input, shape index: {}]   ;;  %s6115_s7 = inlined_call_operand.vmem [shape: f32[128,12], index: 7, kind: input, shape index: {}]   ;;  %s6116_s8 = inlined_call_operand.vmem [shape: f32[128,1], index: 8, kind: input, shape index: {}]   ;;  %s6117_s9 = inlined_call_operand.vmem [shape: f32[2,1,1], index: 9, kind: output, shape index: {0}]   ;;  %s6118_s10 = inlined_call_operand.hbm [shape: f32[2,1,64], index: 10, kind: output, shape index: {1}]   ;;  %s6119_s11 = inlined_call_operand.vmem [shape: f32[2,1,1], index: 11, kind: output, shape index: {2}]  }
   0x1   :  { %6126 = sst [smem:[#allocation7_spill]] %s6108_s0  ;;  %v17_v0 = vstv %s6114_s6 }
   0x2   :  { %6127 = sst [smem:[#allocation8_spill]] %s6110_s2  ;;  %18 = vst [vmem:[#allocation2] sm:$0x1] %v17_v0 }
   0x3   :  { %19 = vsyncpa [#allocation4], 0 }
   0x4   :  { %21 = vsyncpa [#allocation4 + $0x1], 0  ;;  %s4065_s19 = smov 0   ;;  %s4067_s20 = smov 0  }
   0x5   :  { %s4069_s21 = smov 0   ;;  %s4071_s22 = smov 0  }
   0x6 LB: > { %s4086_s6 = sadd.s32 4294967295, %s3999_s22   ;;  %s3169_s23 = sadd.s32 4294967294, %s3999_s22   ;;  %s3999_s22 = sphi %s4071_s22, %s6143_s22   ;;  %s3995_s21 = sphi %s4069_s21, %s6142_s21   ;;  %s3991_s20 = sphi %s4067_s20, %s6141_s20   ;;  %s3987_s19 = sphi %s4065_s19, %s6140_s19  }
   0x7   : > { %s4090_s24 = sadd.s32 1, %s3999_s22   ;;  %s254_s25 = sadd.s32 1, %s3995_s21 }
   0x8   : > { %s251_s26 = ssub.s32 %s3999_s22, %s4090_s24  ;;  %p264_p0 = scmp.ne.s32.totalorder %s3995_s21, %s3991_s20 }
   0x9   : > { %p252_p1 = scmp.eq.s32.totalorder %s251_s26, 0  ;;  %p265_p2 = scmp.eq.s32.totalorder %s4086_s6, 1 }
   0xa   : > { %p270_p3 = scmp.ne.s32.totalorder %s3991_s20, %s3987_s19  ;;  %p271_p4 = scmp.eq.s32.totalorder %s3169_s23, 1 }
   0xb   : > { %s4101_s27 = scalar_select %p252_p1, %s3995_s21, %s254_s25  }
   0xc   : > { %p4103_p5 = por %p265_p2, %p264_p0  ;;  %p4107_p6 = por %p271_p4, %p270_p3 }
   0xd   : > { %6128 = sst [smem:[#allocation6_spill]] %s4101_s27  ;;  %p3172_p7 = scmp.ge.s32.totalorder %s3999_s22, 1 }
   0xe   : > { %p347_p8 = scmp.lt.s32.totalorder %s3999_s22, 3 }
  0x10   : > { %p348_p9 = pnand %p3172_p7, %p347_p8 }
  0x11   : > { %p392_p10 = scmp.lt.s32.totalorder (!%p348_p9), %s4086_s6, 1  ;;  %s6131_s2 = sld [smem:[#allocation8_spill]] (!%p348_p9) }
  0x12   : > { %351 = sbr.rel (%p348_p9) target bundleno = 1592 (0x638), region = 56  ;;  %s6132_s0 = sld [smem:[#allocation7_spill]] (!%p348_p9) }
  0x13   : > { %s3069_s23 = scalar_lea.hbm (!%p348_p9), %s6118_s10, %s4086_s6 }
  0x14   : > { %s3073_s26 = sshll.u32 (!%p348_p9), %s3069_s23, 4  ;;  %s3074_s26 = int_to_ptr.hbm [resolvable:$true] %s3073_s26 }
  0x15   : > { %s3951_s30 = sshra.s32 (!%p348_p9), %s3074_s26, 4  ;;  %s3952_s30 = int_to_ptr.hbm [resolvable:$true] %s3951_s30 }
  0x16   : > { %s3953_s12 = scalar_lea.hbm (!%p348_p9), %s3952_s30, 1  ;;  %p3958_p0 = scmp.lt.s32.totalorder (!%p348_p9), %s3952_s30, %s6118_s10 }
  0x17   : > { %v546_v1 = vld [vmem:[%s6131_s2 + $0x78] sm:$0xff]  ;;  %v4001_v2 = vmov 0   ;;  %s4118_s13 = scalar_select %p392_p10, %s4086_s6, 1  ;;  %v545_v6 = vld [vmem:[%s6131_s2 + $0x70] sm:$0xff]  ;;  %v540_v55 = vld [vmem:[%s6131_s2 + $0x48] sm:$0xff]  ;;  %vm2489_vm0 = vcmask 523264  }
  0x18   : > { %3896 = vset.pattern.permute.xlu0 %v4001_v2  ;;  %3897 = vset.pattern.permute.xlu1 %v4001_v2  ;;  %v544_v56 = vld [vmem:[%s6131_s2 + $0x68] sm:$0xff]  ;;  %vm2575_vm1 = vcmask 0   ;;  %vm2606_vm2 = vcmask 1043456   ;;  %vm2602_vm3 = vcmask 97280   ;;  %vm2744_vm4 = vcmask 7168   ;;  %p3954_p11 = scmp.ne.s32.totalorder %s3952_s30, %s3953_s12 }
  0x19   : > { %1046 = vperm.xlu0 %3896, %v546_v1   ;;  %3898 = vset.pattern.permute.xlu2 %v4001_v2  ;;  %s3709_s14 = sshll.u32 %s4118_s13, 11  ;;  %v542_v2 = vld [vmem:[%s6131_s2 + $0x58] sm:$0xff]  ;;  %s402_s25 = scalar_lea.vmem %s6119_s11, %s4118_s13  ;;  %vm3049_vm12 = vcmask 516096  }
  0x1a   : > { %s4124_s17 = scalar_lea.vmem %s6132_s0, %s3709_s14  ;;  %1036 = vperm.xlu1 %3897, %v544_v56   ;;  %1026 = vperm.xlu2 %3898, %v542_v2   ;;  %v3569_v56 = vld [vmem:[%s6109_s1 + $0x308] sm:$0xf]  ;;  %p3955_p12 = pnand %p3954_p11, %p4103_p5 }
  0x1b   : > { %v599_v3 = vld [vmem:[%s4124_s17 + $0x70] sm:$0xff]  ;;  %v600_v4 = vld [vmem:[%s4124_s17 + $0x78] sm:$0xff]  ;;  %v597_v13 = vld [vmem:[%s4124_s17 + $0x60] sm:$0xff]  ;;  %s3957_s0 = scalar_lea.hbm %s6118_s10, 2 }
  0x1c   : > { %v615_v5 = vld [vmem:[%s4124_s17 + $0xf0] sm:$0xff]  ;;  %v848_v7 = vpack.c.bf16 %v600_v4, %v599_v3  ;;  %v616_v8 = vld [vmem:[%s4124_s17 + $0xf8] sm:$0xff]  ;;  %v598_v14 = vld [vmem:[%s4124_s17 + $0x68] sm:$0xff]  ;;  %p3956_p13 = pneg %p3955_p12  ;;  %p3959_p1 = scmp.lt.s32.totalorder %s3957_s0, %s3953_s12 }
  0x1d   : > { %v631_v9 = vld [vmem:[%s4124_s17 + $0x170] sm:$0xff]  ;;  %v632_v10 = vld [vmem:[%s4124_s17 + $0x178] sm:$0xff]  ;;  %v856_v11 = vpack.c.bf16 %v616_v8, %v615_v5  ;;  %v613_v15 = vld [vmem:[%s4124_s17 + $0xe0] sm:$0xff]  ;;  %v847_v16 = vpack.c.bf16 %v598_v14, %v597_v13 }
  0x1e   : > { %v4135_v12 = vpack.c.bf16 %v632_v10, %v631_v9  ;;  %1689 = vmatpush.bf16.msra.mxu0 %v848_v7  ;;  %v614_v17 = vld [vmem:[%s4124_s17 + $0xe8] sm:$0xff]  ;;  %v629_v18 = vld [vmem:[%s4124_s17 + $0x160] sm:$0xff]  ;;  %v595_v22 = vld [vmem:[%s4124_s17 + $0x50] sm:$0xff]  ;;  %p3960_p2 = por %p3959_p1, %p3958_p0 }
  0x1f   : > { %v630_v19 = vld [vmem:[%s4124_s17 + $0x168] sm:$0xff]  ;;  %1738 = vmatpush.bf16.msra.mxu1 %v856_v11  ;;  %v855_v20 = vpack.c.bf16 %v614_v17, %v613_v15  ;;  %v596_v23 = vld [vmem:[%s4124_s17 + $0x58] sm:$0xff]  ;;  %v611_v24 = vld [vmem:[%s4124_s17 + $0xd0] sm:$0xff] }
  0x20   : > { %3839 = vmatpush.bf16.msra.mxu3 %v4135_v12  ;;  %v4144_v21 = vpack.c.bf16 %v630_v19, %v629_v18  ;;  %v612_v25 = vld [vmem:[%s4124_s17 + $0xd8] sm:$0xff]  ;;  %v627_v26 = vld [vmem:[%s4124_s17 + $0x150] sm:$0xff]  ;;  %3838 = vmatpush.bf16.msra.mxu2 %v4135_v12  ;;  %v846_v28 = vpack.c.bf16 %v596_v23, %v595_v22  ;;  %v593_v31 = vld [vmem:[%s4124_s17 + $0x40] sm:$0xff]  ;;  %p3961_p3 = pnand %p3960_p2, %p3956_p13 }
  0x21   : > { %v628_v27 = vld [vmem:[%s4124_s17 + $0x158] sm:$0xff]  ;;  %1041 = vperm.xlu0 %3896, %v545_v6   ;;  %v854_v29 = vpack.c.bf16 %v612_v25, %v611_v24  ;;  %v594_v32 = vld [vmem:[%s4124_s17 + $0x48] sm:$0xff]  ;;  %v609_v33 = vld [vmem:[%s4124_s17 + $0xc0] sm:$0xff] }
  0x22   : > { %1690 = vmatpush.bf16.msra.mxu0 %v847_v16  ;;  %v4154_v30 = vpack.c.bf16 %v628_v27, %v627_v26  ;;  %v610_v34 = vld [vmem:[%s4124_s17 + $0xc8] sm:$0xff]  ;;  %v625_v35 = vld [vmem:[%s4124_s17 + $0x140] sm:$0xff]  ;;  %v845_v37 = vpack.c.bf16 %v594_v32, %v593_v31  ;;  %v591_v40 = vld [vmem:[%s4124_s17 + $0x30] sm:$0xff] }
  0x23   : > { %1739 = vmatpush.bf16.msra.mxu1 %v855_v20  ;;  %v626_v36 = vld [vmem:[%s4124_s17 + $0x148] sm:$0xff]  ;;  %v853_v38 = vpack.c.bf16 %v610_v34, %v609_v33  ;;  %v592_v41 = vld [vmem:[%s4124_s17 + $0x38] sm:$0xff]  ;;  %v607_v42 = vld [vmem:[%s4124_s17 + $0xb0] sm:$0xff] }
  0x24   : > { %3841 = vmatpush.bf16.msra.mxu3 %v4144_v21  ;;  %3840 = vmatpush.bf16.msra.mxu2 %v4144_v21  ;;  %v4164_v39 = vpack.c.bf16 %v626_v36, %v625_v35  ;;  %v608_v43 = vld [vmem:[%s4124_s17 + $0xb8] sm:$0xff]  ;;  %v623_v44 = vld [vmem:[%s4124_s17 + $0x130] sm:$0xff]  ;;  %v844_v46 = vpack.c.bf16 %v592_v41, %v591_v40  ;;  %v589_v49 = vld [vmem:[%s4124_s17 + $0x20] sm:$0xff] }
  0x25   : > { %v624_v45 = vld [vmem:[%s4124_s17 + $0x138] sm:$0xff]  ;;  %v852_v47 = vpack.c.bf16 %v608_v43, %v607_v42  ;;  %v590_v50 = vld [vmem:[%s4124_s17 + $0x28] sm:$0xff]  ;;  %v605_v51 = vld [vmem:[%s4124_s17 + $0xa0] sm:$0xff] }
  0x26   : > { %1691 = vmatpush.bf16.msra.mxu0 %v846_v28  ;;  %v4174_v48 = vpack.c.bf16 %v624_v45, %v623_v44  ;;  %v606_v52 = vld [vmem:[%s4124_s17 + $0xa8] sm:$0xff]  ;;  %v621_v53 = vld [vmem:[%s4124_s17 + $0x120] sm:$0xff]  ;;  %v843_v57 = vpack.c.bf16 %v590_v50, %v589_v49  ;;  %v587_v60 = vld [vmem:[%s4124_s17 + $0x10] sm:$0xff] }
  0x27   : > { %1740 = vmatpush.bf16.msra.mxu1 %v854_v29  ;;  %v622_v54 = vld [vmem:[%s4124_s17 + $0x128] sm:$0xff]  ;;  %v851_v58 = vpack.c.bf16 %v606_v52, %v605_v51  ;;  %v588_v61 = vld [vmem:[%s4124_s17 + $0x18] sm:$0xff]  ;;  %v603_v62 = vld [vmem:[%s4124_s17 + $0x90] sm:$0xff] }
  0x28   : > { %3843 = vmatpush.bf16.msra.mxu3 %v4154_v30  ;;  %3842 = vmatpush.bf16.msra.mxu2 %v4154_v30  ;;  %v4190_v59 = vpack.c.bf16 %v622_v54, %v621_v53  ;;  %v604_v63 = vld [vmem:[%s4124_s17 + $0x98] sm:$0xff]  ;;  %v619_v0 = vld [vmem:[%s4124_s17 + $0x110] sm:$0xff]  ;;  %v842_v3 = vpack.c.bf16 %v588_v61, %v587_v60  ;;  %v585_v4 = vld [vmem:[%s4124_s17] sm:$0xff] }
  0x29   : > { %1016 = vperm.xlu0 %3896, %v540_v55   ;;  %v620_v1 = vld [vmem:[%s4124_s17 + $0x118] sm:$0xff]  ;;  %v586_v5 = vld [vmem:[%s4124_s17 + $0x8] sm:$0xff]  ;;  %v850_v6 = vpack.c.bf16 %v604_v63, %v603_v62  ;;  %v601_v8 = vld [vmem:[%s4124_s17 + $0x80] sm:$0xff] }
  0x2a   : > { %1692 = vmatpush.bf16.msra.mxu0 %v845_v37  ;;  %v4205_v7 = vpack.c.bf16 %v620_v1, %v619_v0  ;;  %v602_v9 = vld [vmem:[%s4124_s17 + $0x88] sm:$0xff]  ;;  %v537_v10 = vld [vmem:[%s6131_s2 + $0x30] sm:$0xff]  ;;  %v617_v11 = vld [vmem:[%s4124_s17 + $0x100] sm:$0xff]  ;;  %v841_v18 = vpack.c.bf16 %v586_v5, %v585_v4 }
  0x2b   : > { %1741 = vmatpush.bf16.msra.mxu1 %v853_v38  ;;  %v618_v13 = vld [vmem:[%s4124_s17 + $0x108] sm:$0xff]  ;;  %v3177_v14 = vld [vmem:[%s6109_s1] sm:$0xf]  ;;  %v647_v15 = vld [vmem:[%s4124_s17 + $0x1f0] sm:$0xff]  ;;  %v849_v23 = vpack.c.bf16 %v602_v9, %v601_v8 }
  0x2c   : > { %3845 = vmatpush.bf16.msra.mxu3 %v4164_v39  ;;  %3844 = vmatpush.bf16.msra.mxu2 %v4164_v39  ;;  %v648_v16 = vld [vmem:[%s4124_s17 + $0x1f8] sm:$0xff]  ;;  %v543_v17 = vld [vmem:[%s6131_s2 + $0x60] sm:$0xff]  ;;  %v4233_v24 = vpack.c.bf16 %v618_v13, %v617_v11  ;;  %v3505_v25 = vld [vmem:[%s6109_s1 + $0x288] sm:$0xf] }
  0x2d   : > { %v3718_v19 = vld [vmem:[%s6109_s1 + $0x3c] sm:$0xf0]  ;;  %v3710_v20 = vld [vmem:[%s6109_s1 + $0x4] sm:$0xf]  ;;  %v3799_v26 = vld [vmem:[%s6109_s1 + $0x2c4] sm:$0xf0]  ;;  %v872_v28 = vpack.c.bf16 %v648_v16, %v647_v15  ;;  %1031 = vperm.xlu1 %3897, %v543_v17  }
  0x2e   : > { %1693 = vmatpush.bf16.msra.mxu0 %v844_v46  ;;  %v3179_v22 = vld [vmem:[%s6109_s1 + $0x40] sm:$0xf0]  ;;  %v541_v27 = vld [vmem:[%s6131_s2 + $0x50] sm:$0xff]  ;;  %v3178_v29 = vor.u32 %v3718_v19, %v3177_v14  ;;  %v646_v32 = vld [vmem:[%s4124_s17 + $0x1e8] sm:$0xff]  ;;  %v3506_v34 = vor.u32 %v3799_v26, %v3505_v25 }
  0x2f   : > { %1742 = vmatpush.bf16.msra.mxu1 %v852_v47  ;;  %v645_v31 = vld [vmem:[%s4124_s17 + $0x1e0] sm:$0xff]  ;;  %v3182_v33 = vor.u32 %v3710_v20, %v3179_v22  ;;  %1021 = vperm.xlu2 %3898, %v541_v27   ;;  %v534_v35 = vld [vmem:[%s6131_s2 + $0x18] sm:$0xff]  ;;  %v643_v37 = vld [vmem:[%s4124_s17 + $0x1d0] sm:$0xff] }
  0x30   : > { %3847 = vmatpush.bf16.msra.mxu3 %v4174_v48  ;;  %3846 = vmatpush.bf16.msra.mxu2 %v4174_v48  ;;  %v871_v36 = vpack.c.bf16 %v646_v32, %v645_v31  ;;  %v644_v38 = vld [vmem:[%s4124_s17 + $0x1d8] sm:$0xff]  ;;  %v539_v40 = vld [vmem:[%s6131_s2 + $0x40] sm:$0xff]  ;;  %v3313_v42 = vld [vmem:[%s6109_s1 + $0x108] sm:$0xf] }
  0x31   : > { %1001 = vperm.xlu0 %3896, %v537_v10   ;;  %v538_v41 = vld [vmem:[%s6131_s2 + $0x38] sm:$0xff]  ;;  %v3751_v43 = vld [vmem:[%s6109_s1 + $0x144] sm:$0xf0]  ;;  %v870_v44 = vpack.c.bf16 %v644_v38, %v643_v37  ;;  %v641_v45 = vld [vmem:[%s4124_s17 + $0x1c0] sm:$0xff] }
  0x32   : > { %1694 = vmatpush.bf16.msra.mxu0 %v843_v57  ;;  %v642_v46 = vld [vmem:[%s4124_s17 + $0x1c8] sm:$0xff]  ;;  %v3241_v47 = vld [vmem:[%s6109_s1 + $0x80] sm:$0xf]  ;;  %v639_v51 = vld [vmem:[%s4124_s17 + $0x1b0] sm:$0xff] }
  0x33   : > { %1743 = vmatpush.bf16.msra.mxu1 %v851_v58  ;;  %v531_v49 = vld [vmem:[%s6131_s2] sm:$0xff]  ;;  %v869_v50 = vpack.c.bf16 %v642_v46, %v641_v45  ;;  %v640_v52 = vld [vmem:[%s4124_s17 + $0x1b8] sm:$0xff]  ;;  %v638_v62 = vld [vmem:[%s4124_s17 + $0x1a8] sm:$0xff] }
  0x34   : > { %3849 = vmatpush.bf16.msra.mxu3 %v4190_v59  ;;  %3848 = vmatpush.bf16.msra.mxu2 %v4190_v59  ;;  %v3734_v53 = vld [vmem:[%s6109_s1 + $0xbc] sm:$0xf0]  ;;  %v3726_v54 = vld [vmem:[%s6109_s1 + $0x84] sm:$0xf]  ;;  %v868_v58 = vpack.c.bf16 %v640_v52, %v639_v51  ;;  %v635_v2 = vld [vmem:[%s4124_s17 + $0x190] sm:$0xff] }
  0x35   : > { %1011 = vperm.xlu1 %3897, %v539_v40   ;;  %v3243_v55 = vld [vmem:[%s6109_s1 + $0xc0] sm:$0xf0]  ;;  %v3242_v60 = vor.u32 %v3734_v53, %v3241_v47  ;;  %v533_v4 = vld [vmem:[%s6131_s2 + $0x10] sm:$0xff]  ;;  %v3767_v5 = vld [vmem:[%s6109_s1 + $0x1c4] sm:$0xf0] }
  0x36   : > { %1695 = vmatpush.bf16.msra.mxu0 %v842_v3  ;;  %v535_v57 = vld [vmem:[%s6131_s2 + $0x20] sm:$0xff]  ;;  %v3246_v63 = vor.u32 %v3726_v54, %v3243_v55  ;;  %v636_v3 = vld [vmem:[%s4124_s17 + $0x198] sm:$0xff]  ;;  %v3831_v16 = vld [vmem:[%s6109_s1 + $0x3c4] sm:$0xf0] }
  0x37   : > { %1744 = vmatpush.bf16.msra.mxu1 %v850_v6  ;;  %1006 = vperm.xlu2 %3898, %v538_v41   ;;  %v637_v61 = vld [vmem:[%s4124_s17 + $0x1a0] sm:$0xff]  ;;  %v532_v6 = vld [vmem:[%s6131_s2 + $0x8] sm:$0xff]  ;;  %v866_v9 = vpack.c.bf16 %v636_v3, %v635_v2  ;;  %v660_v51 = vld [vmem:[%s4124_s17 + $0x258] sm:$0xff] }
  0x38   : > { %3851 = vmatpush.bf16.msra.mxu3 %v4205_v7  ;;  %3850 = vmatpush.bf16.msra.mxu2 %v4205_v7  ;;  %v867_v1 = vpack.c.bf16 %v638_v62, %v637_v61  ;;  %v633_v10 = vld [vmem:[%s4124_s17 + $0x180] sm:$0xff]  ;;  %v3441_v20 = vld [vmem:[%s6109_s1 + $0x208] sm:$0xf]  ;;  %v3727_v38 = vld [vmem:[%s6109_s1 + $0x8c] sm:$0xf] }
  0x39   : > { %986 = vperm.xlu0 %3896, %v534_v35   ;;  %v3305_v13 = vld [vmem:[%s6109_s1 + $0x100] sm:$0xf]  ;;  %v3742_v15 = vld [vmem:[%s6109_s1 + $0x104] sm:$0xf]  ;;  %v3783_v22 = vld [vmem:[%s6109_s1 + $0x244] sm:$0xf0] }
  0x3a   : > { %1696 = vmatpush.bf16.msra.mxu0 %v841_v18  ;;  %v3750_v14 = vld [vmem:[%s6109_s1 + $0x13c] sm:$0xf0]  ;;  %v3758_v26 = vld [vmem:[%s6109_s1 + $0x184] sm:$0xf]  ;;  %v3251_v40 = vld [vmem:[%s6109_s1 + $0xc8] sm:$0xf0] }
  0x3b   : > { %1745 = vmatpush.bf16.msra.mxu1 %v849_v23  ;;  %v3306_v17 = vor.u32 %v3750_v14, %v3305_v13  ;;  %v3442_v23 = vor.u32 %v3783_v22, %v3441_v20  ;;  %v3369_v25 = vld [vmem:[%s6109_s1 + $0x180] sm:$0xf]  ;;  %v3371_v27 = vld [vmem:[%s6109_s1 + $0x1c0] sm:$0xf0]  ;;  %v662_v47 = vld [vmem:[%s4124_s17 + $0x268] sm:$0xff] }
  0x3c   : > { %3853 = vmatpush.bf16.msra.mxu3 %v4233_v24  ;;  %3852 = vmatpush.bf16.msra.mxu2 %v4233_v24  ;;  %v3374_v32 = vor.u32 %v3758_v26, %v3371_v27  ;;  %v3782_v35 = vld [vmem:[%s6109_s1 + $0x23c] sm:$0xf0]  ;;  %v3435_v37 = vld [vmem:[%s6109_s1 + $0x240] sm:$0xf0]  ;;  %v658_v53 = vld [vmem:[%s4124_s17 + $0x248] sm:$0xff] }
  0x3d   : > { %1697 = vmatmul.bf16.vlgmr.msra.gmra.mxu0 %v3178_v29  ;;  %v3187_v29 = vld [vmem:[%s6109_s1 + $0x48] sm:$0xf0]  ;;  %v661_v46 = vld [vmem:[%s4124_s17 + $0x260] sm:$0xff]  ;;  %v656_v2 = vld [vmem:[%s4124_s17 + $0x238] sm:$0xff] }
  0x3e   : > { %1746 = vmatmul.bf16.vlgmr.msra.gmra.mxu1 %v3182_v33  ;;  %v3497_v54 = vld [vmem:[%s6109_s1 + $0x280] sm:$0xf]  ;;  %v3563_v14 = vld [vmem:[%s6109_s1 + $0x340] sm:$0xf0]  ;;  %v696_v22 = vld [vmem:[%s4124_s17 + $0x378] sm:$0xff] }
  0x3f   : > { %1787 = vmatpush.bf16.msrb.mxu1 %v4135_v12  ;;  %1820 = vmatmul.bf16.vlgmr.msra.gmra.mxu3 %v3506_v34  ;;  %v3314_v12 = vor.u32 %v3751_v43, %v3313_v42  ;;  %v3433_v34 = vld [vmem:[%s6109_s1 + $0x200] sm:$0xf]  ;;  %v3254_v43 = vor.u32 %v3727_v38, %v3251_v40  ;;  %v679_v26 = vld [vmem:[%s4124_s17 + $0x2f0] sm:$0xff]  ;;  %v680_v27 = vld [vmem:[%s4124_s17 + $0x2f8] sm:$0xff] }
  0x40   : > { %1836 = vmatpush.bf16.msrb.mxu3 %v872_v28  ;;  %991 = vperm.xlu2 %3898, %v535_v57   ;;  %v3711_v28 = vld [vmem:[%s6109_s1 + $0xc] sm:$0xf]  ;;  %v3434_v41 = vor.u32 %v3782_v35, %v3433_v34  ;;  %v3798_v55 = vld [vmem:[%s6109_s1 + $0x2bc] sm:$0xf0]  ;;  %v692_v38 = vld [vmem:[%s4124_s17 + $0x358] sm:$0xff] }
  0x41   : > { %1805 = vmatmul.bf16.vlgmr.msra.gmra.mxu2 %v3314_v12  ;;  %971 = vperm.xlu0 %3896, %v531_v49   ;;  %v3190_v33 = vor.u32 %v3711_v28, %v3187_v29  ;;  %v664_v12 = vld [vmem:[%s4124_s17 + $0x278] sm:$0xff]  ;;  %v879_v49 = vpack.c.bf16 %v662_v47, %v661_v46  ;;  %v3743_v57 = vld [vmem:[%s6109_s1 + $0x10c] sm:$0xf]  ;;  %v3498_v61 = vor.u32 %v3798_v55, %v3497_v54  ;;  %v693_v28 = vld [vmem:[%s4124_s17 + $0x360] sm:$0xff] }
  0x42   : > { %v888_v29 = vpack.c.bf16 %v680_v27, %v679_v26  ;;  %v677_v34 = vld [vmem:[%s4124_s17 + $0x2e0] sm:$0xff]  ;;  %v678_v35 = vld [vmem:[%s4124_s17 + $0x2e8] sm:$0xff] }
  0x43   : > { %1788 = vmatpush.bf16.msrb.mxu1 %v4144_v21  ;;  %v536_v21 = vld [vmem:[%s6131_s2 + $0x28] sm:$0xff]  ;;  %v673_v55 = vld [vmem:[%s4124_s17 + $0x2c0] sm:$0xff]  ;;  %s385_s2 = sand.u32 1, %s3991_s20  }
  0x44   : > { %1837 = vmatpush.bf16.msrb.mxu3 %v871_v36  ;;  %996 = vperm.xlu1 %3897, %v536_v21   ;;  %v3774_v36 = vld [vmem:[%s6109_s1 + $0x204] sm:$0xf]  ;;  %v690_v46 = vld [vmem:[%s4124_s17 + $0x348] sm:$0xff]  ;;  %s3055_s6 = scalar_lea.sflag [#allocation4], %s385_s2 }
  0x45   : > { %v3438_v42 = vor.u32 %v3774_v36, %v3435_v37  ;;  %v657_v21 = vld [vmem:[%s4124_s17 + $0x240] sm:$0xff]  ;;  %v691_v36 = vld [vmem:[%s4124_s17 + $0x350] sm:$0xff]  ;;  %v887_v37 = vpack.c.bf16 %v678_v35, %v677_v34  ;;  %v3185_v27 = vld [vmem:[%s6109_s1 + $0x8] sm:$0xf] }
  0x46   : > { %v681_v26 = vld [vmem:[%s4124_s17 + $0x300] sm:$0xff]  ;;  %v708_v34 = vld [vmem:[%s4124_s17 + $0x3d8] sm:$0xff]  ;;  %v3791_v35 = vld [vmem:[%s6109_s1 + $0x28c] sm:$0xf] }
  0x47   : > { %1789 = vmatpush.bf16.msrb.mxu1 %v4154_v30  ;;  %v3815_v30 = vld [vmem:[%s6109_s1 + $0x344] sm:$0xf0] }
  0x48   : > { %1838 = vmatpush.bf16.msrb.mxu3 %v870_v44  ;;  %v3570_v0 = vor.u32 %v3815_v30, %v3569_v56  ;;  %976 = vperm.xlu2 %3898, %v532_v6   ;;  %v663_v44 = vld [vmem:[%s4124_s17 + $0x270] sm:$0xff]  ;;  %v3790_v56 = vld [vmem:[%s6109_s1 + $0x284] sm:$0xf] }
  0x49   : > { %v880_v45 = vpack.c.bf16 %v664_v12, %v663_v44  ;;  %v3499_v30 = vld [vmem:[%s6109_s1 + $0x2c0] sm:$0xf0]  ;;  %v651_v6 = vld [vmem:[%s4124_s17 + $0x210] sm:$0xff]  ;;  %v676_v44 = vld [vmem:[%s4124_s17 + $0x2d8] sm:$0xff] }
  0x4a   : > { %v3502_v62 = vor.u32 %v3790_v56, %v3499_v30  ;;  %v689_v12 = vld [vmem:[%s4124_s17 + $0x340] sm:$0xff]  ;;  %v674_v56 = vld [vmem:[%s4124_s17 + $0x2c8] sm:$0xff]  ;;  %v687_v30 = vld [vmem:[%s4124_s17 + $0x330] sm:$0xff] }
  0x4b   : > { %1790 = vmatpush.bf16.msrb.mxu1 %v4164_v39  ;;  %v3377_v39 = vld [vmem:[%s6109_s1 + $0x188] sm:$0xf]  ;;  %1885 = vmatpush.bf16.msrb.mxu0 %v880_v45  ;;  %v893_v47 = vpack.c.bf16 %v690_v46, %v689_v12  ;;  %v3201_v12 = vld [vmem:[%s6109_s1 + $0x18] sm:$0xf] }
  0x4c   : > { %1839 = vmatpush.bf16.msrb.mxu3 %v869_v50  ;;  %v3378_v8 = vor.u32 %v3767_v5, %v3377_v39  ;;  %981 = vperm.xlu1 %3897, %v533_v4   ;;  %v659_v50 = vld [vmem:[%s4124_s17 + $0x250] sm:$0xff]  ;;  %v653_v4 = vld [vmem:[%s4124_s17 + $0x220] sm:$0xff]  ;;  %v654_v39 = vld [vmem:[%s4124_s17 + $0x228] sm:$0xff] }
  0x4d   : > { %1702 = vmatmul.bf16.gmra.mxu0 %v3242_v60  ;;  %v878_v52 = vpack.c.bf16 %v660_v51, %v659_v50  ;;  %v877_v60 = vpack.c.bf16 %v658_v53, %v657_v21  ;;  %v875_v5 = vpack.c.bf16 %v654_v39, %v653_v4  ;;  %v3830_v50 = vld [vmem:[%s6109_s1 + $0x3bc] sm:$0xf0]  ;;  %v3822_v51 = vld [vmem:[%s6109_s1 + $0x384] sm:$0xf]  ;;  %v3775_v21 = vld [vmem:[%s6109_s1 + $0x20c] sm:$0xf] }
  0x4e   : > { %1751 = vmatmul.bf16.gmra.mxu1 %v3246_v63  ;;  %v3443_v53 = vld [vmem:[%s6109_s1 + $0x248] sm:$0xf0]  ;;  %v672_v4 = vld [vmem:[%s4124_s17 + $0x2b8] sm:$0xff]  ;;  %v685_v39 = vld [vmem:[%s4124_s17 + $0x320] sm:$0xff] }
  0x4f   : > { %1791 = vmatpush.bf16.msrb.mxu1 %v4174_v48  ;;  %1825 = vmatmul.bf16.gmra.mxu3 %v3570_v0  ;;  %v634_v48 = vld [vmem:[%s4124_s17 + $0x188] sm:$0xff] }
  0x50   : > { %1840 = vmatpush.bf16.msrb.mxu3 %v868_v58  ;;  %v865_v11 = vpack.c.bf16 %v634_v48, %v633_v10  ;;  %1886 = vmatpush.bf16.msrb.mxu0 %v879_v49  ;;  %v3315_v58 = vld [vmem:[%s6109_s1 + $0x148] sm:$0xf0]  ;;  %v3561_v10 = vld [vmem:[%s6109_s1 + $0x300] sm:$0xf] }
  0x51   : > { %1810 = vmatmul.bf16.gmra.mxu2 %v3378_v8  ;;  %v3318_v63 = vor.u32 %v3743_v57, %v3315_v58  ;;  %v652_v8 = vld [vmem:[%s4124_s17 + $0x218] sm:$0xff]  ;;  %v3814_v48 = vld [vmem:[%s6109_s1 + $0x33c] sm:$0xf0]  ;;  %v885_v58 = vpack.c.bf16 %v674_v56, %v673_v55 }
  0x52   : > { %v3625_v49 = vld [vmem:[%s6109_s1 + $0x380] sm:$0xf] }
  0x53   : > { %1792 = vmatpush.bf16.msrb.mxu1 %v4190_v59  ;;  %v3307_v59 = vld [vmem:[%s6109_s1 + $0x140] sm:$0xf0]  ;;  %v3626_v57 = vor.u32 %v3830_v50, %v3625_v49  ;;  %v666_v49 = vld [vmem:[%s4124_s17 + $0x288] sm:$0xff] }
  0x54   : > { %1841 = vmatpush.bf16.msrb.mxu3 %v867_v1  ;;  %v3310_v18 = vor.u32 %v3742_v15, %v3307_v59  ;;  %1887 = vmatpush.bf16.msrb.mxu0 %v878_v52  ;;  %v655_v1 = vld [vmem:[%s4124_s17 + $0x230] sm:$0xff]  ;;  %v3759_v15 = vld [vmem:[%s6109_s1 + $0x18c] sm:$0xf]  ;;  %v3627_v52 = vld [vmem:[%s6109_s1 + $0x3c0] sm:$0xf0] }
  0x55   : > { %v876_v3 = vpack.c.bf16 %v656_v2, %v655_v1  ;;  %v3379_v59 = vld [vmem:[%s6109_s1 + $0x1c8] sm:$0xf0]  ;;  %v705_v50 = vld [vmem:[%s4124_s17 + $0x3c0] sm:$0xff] }
  0x57   : > { %1793 = vmatpush.bf16.msrb.mxu1 %v4205_v7  ;;  %v3633_v7 = vld [vmem:[%s6109_s1 + $0x388] sm:$0xf] }
  0x58   : > { %1842 = vmatpush.bf16.msrb.mxu3 %v866_v9  ;;  %v3634_v19 = vor.u32 %v3831_v16, %v3633_v7  ;;  %1888 = vmatpush.bf16.msrb.mxu0 %v877_v60  ;;  %v874_v9 = vpack.c.bf16 %v652_v8, %v651_v6  ;;  %v649_v16 = vld [vmem:[%s4124_s17 + $0x200] sm:$0xff]  ;;  %v688_v60 = vld [vmem:[%s4124_s17 + $0x338] sm:$0xff]  ;;  %v686_v6 = vld [vmem:[%s4124_s17 + $0x328] sm:$0xff] }
  0x59   : > { %v892_v1 = vpack.c.bf16 %v688_v60, %v687_v30  ;;  %v711_v8 = vld [vmem:[%s4124_s17 + $0x3f0] sm:$0xff] }
  0x5b   : > { %1794 = vmatpush.bf16.msrb.mxu1 %v4233_v24  ;;  %v3766_v24 = vld [vmem:[%s6109_s1 + $0x1bc] sm:$0xf0] }
  0x5c   : > { %1843 = vmatpush.bf16.msrb.mxu3 %v865_v11  ;;  %v3370_v31 = vor.u32 %v3766_v24, %v3369_v25  ;;  %1889 = vmatpush.bf16.msrb.mxu0 %v876_v3  ;;  %v3806_v11 = vld [vmem:[%s6109_s1 + $0x304] sm:$0xf]  ;;  %v3382_v25 = vor.u32 %v3759_v15, %v3379_v59  ;;  %v671_v3 = vld [vmem:[%s4124_s17 + $0x2b0] sm:$0xff] }
  0x5d   : > { %1707 = vmatmul.bf16.gmra.mxu0 %v3306_v17  ;;  %v650_v17 = vld [vmem:[%s4124_s17 + $0x208] sm:$0xff]  ;;  %v683_v15 = vld [vmem:[%s4124_s17 + $0x310] sm:$0xff] }
  0x5e   : > { %1756 = vmatmul.bf16.gmra.mxu1 %v3310_v18  ;;  %v695_v18 = vld [vmem:[%s4124_s17 + $0x370] sm:$0xff]  ;;  %v873_v20 = vpack.c.bf16 %v650_v17, %v649_v16  ;;  %v684_v17 = vld [vmem:[%s4124_s17 + $0x318] sm:$0xff] }
  0x5f   : > { %1830 = vmatmul.bf16.gmra.mxu3 %v3634_v19  ;;  %v3562_v19 = vor.u32 %v3814_v48, %v3561_v10  ;;  %v896_v24 = vpack.c.bf16 %v696_v22, %v695_v18  ;;  %1934 = vmatpush.bf16.msra.mxu1 %v888_v29  ;;  %v891_v10 = vpack.c.bf16 %v686_v6, %v685_v39  ;;  %v709_v18 = vld [vmem:[%s4124_s17 + $0x3e0] sm:$0xff]  ;;  %v702_v6 = vld [vmem:[%s4124_s17 + $0x3a8] sm:$0xff] }
  0x60   : > { %1890 = vmatpush.bf16.msrb.mxu0 %v875_v5  ;;  %v884_v5 = vpack.c.bf16 %v672_v4, %v671_v3 }
  0x61   : > { %1815 = vmatmul.bf16.gmra.mxu2 %v3442_v23  ;;  %v3566_v23 = vor.u32 %v3806_v11, %v3563_v14  ;;  %v669_v11 = vld [vmem:[%s4124_s17 + $0x2a0] sm:$0xff]  ;;  %v670_v14 = vld [vmem:[%s4124_s17 + $0x2a8] sm:$0xff] }
  0x62   : > { %1983 = vmatpush.bf16.msrb.mxu2 %v896_v24  ;;  %v883_v16 = vpack.c.bf16 %v670_v14, %v669_v11  ;;  %v668_v24 = vld [vmem:[%s4124_s17 + $0x298] sm:$0xff]  ;;  %v699_v14 = vld [vmem:[%s4124_s17 + $0x390] sm:$0xff] }
  0x63   : > { %1935 = vmatpush.bf16.msra.mxu1 %v887_v37  ;;  %v3720_v37 = vld [vmem:[%s6109_s1 + $0x4c] sm:$0xf0] }
  0x64   : > { %1891 = vmatpush.bf16.msrb.mxu0 %v874_v9  ;;  %v712_v9 = vld [vmem:[%s4124_s17 + $0x3f8] sm:$0xff] }
  0x65   : > { %v904_v48 = vpack.c.bf16 %v712_v9, %v711_v8 }
  0x67   : > { %2032 = vmatpush.bf16.msra.mxu3 %v904_v48 }
  0x68   : > { %1892 = vmatpush.bf16.msrb.mxu0 %v873_v20  ;;  %v890_v20 = vpack.c.bf16 %v684_v17, %v683_v15  ;;  %v700_v15 = vld [vmem:[%s4124_s17 + $0x398] sm:$0xff]  ;;  %v3249_v17 = vld [vmem:[%s6109_s1 + $0x88] sm:$0xf] }
  0x6d   : > { %1712 = vmatmul.bf16.gmra.mxu0 %v3370_v31  ;;  %v694_v31 = vld [vmem:[%s4124_s17 + $0x368] sm:$0xff] }
  0x6e   : > { %1761 = vmatmul.bf16.gmra.mxu1 %v3374_v32  ;;  %v895_v32 = vpack.c.bf16 %v694_v31, %v693_v28  ;;  %v3719_v28 = vld [vmem:[%s6109_s1 + $0x44] sm:$0xf0] }
  0x6f   : > { %1844 = vmatmul.bf16.vlgmr.msrb.gmra.mxu3 %v3190_v33  ;;  %v682_v31 = vld [vmem:[%s4124_s17 + $0x308] sm:$0xff]  ;;  %v3186_v56 = vor.u32 %v3719_v28, %v3185_v27  ;;  %v3737_v27 = vld [vmem:[%s6109_s1 + $0xd4] sm:$0xf0] }
  0x70   : > { %1984 = vmatpush.bf16.msrb.mxu2 %v895_v32  ;;  %v707_v32 = vld [vmem:[%s4124_s17 + $0x3d0] sm:$0xff] }
  0x74   : > { %v4437_v7 = vpop.permute.xlu2 %1026 }
  0x7d   : > { %1717 = vmatmul.bf16.gmra.mxu0 %v3434_v41 }
  0x7e   : > { %1766 = vmatmul.bf16.gmra.mxu1 %v3438_v42  ;;  %v894_v42 = vpack.c.bf16 %v692_v38, %v691_v36  ;;  %v3193_v36 = vld [vmem:[%s6109_s1 + $0x10] sm:$0xf] }
  0x7f   : > { %1849 = vmatmul.bf16.gmra.mxu3 %v3254_v43  ;;  %v675_v43 = vld [vmem:[%s4124_s17 + $0x2d0] sm:$0xff] }
  0x80   : > { %v886_v45 = vpack.c.bf16 %v676_v44, %v675_v43  ;;  %1985 = vmatpush.bf16.msrb.mxu2 %v894_v42  ;;  %v889_v42 = vpack.c.bf16 %v682_v31, %v681_v26  ;;  %v902_v43 = vpack.c.bf16 %v708_v34, %v707_v32  ;;  %v3507_v44 = vld [vmem:[%s6109_s1 + $0x2c8] sm:$0xf0]  ;;  %v3265_v26 = vld [vmem:[%s6109_s1 + $0x98] sm:$0xf]  ;;  %v697_v31 = vld [vmem:[%s4124_s17 + $0x380] sm:$0xff] }
  0x81   : > { %v3510_v30 = vor.u32 %v3791_v35, %v3507_v44  ;;  %v698_v32 = vld [vmem:[%s4124_s17 + $0x388] sm:$0xff] }
  0x82   : > { %1936 = vmatpush.bf16.msra.mxu1 %v886_v45  ;;  %v3721_v45 = vld [vmem:[%s6109_s1 + $0x54] sm:$0xf0] }
  0x83   : > { %v3202_v46 = vor.u32 %v3721_v45, %v3201_v12 }
  0x84   : > { %1986 = vmatpush.bf16.msrb.mxu2 %v893_v47  ;;  %v665_v47 = vld [vmem:[%s4124_s17 + $0x280] sm:$0xff] }
  0x86   : > { %1937 = vmatpush.bf16.msra.mxu1 %v885_v58 }
  0x88   : > { %1987 = vmatpush.bf16.msrb.mxu2 %v892_v1 }
  0x89   : > { %v4453_v40 = vpop.permute.xlu2 %1021 }
  0x8a   : > { %1938 = vmatpush.bf16.msra.mxu1 %v884_v5  ;;  %v701_v5 = vld [vmem:[%s4124_s17 + $0x3a0] sm:$0xff] }
  0x8b   : > { %v4409_v0 = vpop.permute.xlu0 %1046  ;;  %v899_v9 = vpack.c.bf16 %v702_v6, %v701_v5 }
  0x8c   : > { %v4455_v41 = vpop.permute.xlu1 %1036  ;;  %1988 = vmatpush.bf16.msrb.mxu2 %v891_v10 }
  0x8d   : > { %1722 = vmatmul.bf16.gmra.mxu0 %v3498_v61  ;;  %v3630_v61 = vor.u32 %v3822_v51, %v3627_v52  ;;  %v3194_v51 = vor.u32 %v3720_v37, %v3193_v36  ;;  %v897_v36 = vpack.c.bf16 %v698_v32, %v697_v31 }
  0x8e   : > { %1771 = vmatmul.bf16.gmra.mxu1 %v3502_v62  ;;  %v3446_v62 = vor.u32 %v3775_v21, %v3443_v53  ;;  %v881_v21 = vpack.c.bf16 %v666_v49, %v665_v47  ;;  %v706_v53 = vld [vmem:[%s4124_s17 + $0x3c8] sm:$0xff] }
  0x8f   : > { %1854 = vmatmul.bf16.gmra.mxu3 %v3318_v63  ;;  %1939 = vmatpush.bf16.msra.mxu1 %v883_v16 }
  0x90   : > { %1989 = vmatpush.bf16.msrb.mxu2 %v890_v20  ;;  %v3807_v20 = vld [vmem:[%s6109_s1 + $0x30c] sm:$0xf] }
  0x91   : > { %v4487_v2 = vpop.permute.xlu2 %1006 }
  0x93   : > { %v4426_v13 = vpop.permute.xlu0 %1041 }
  0x94   : > { %1990 = vmatpush.bf16.msrb.mxu2 %v889_v42 }
  0x97   : > { %1991 = vmatmul.bf16.vlgmr.msrb.gmra.mxu2 %v3202_v46 }
  0x9a   : > { %v4526_v38 = vpop.permute.xlu2 %991 }
  0x9b   : > { %v4447_v33 = vpop.permute.xlu0 %1016 }
  0x9d   : > { %1727 = vmatmul.bf16.gmra.mxu0 %v3562_v19  ;;  %v710_v19 = vld [vmem:[%s4124_s17 + $0x3e8] sm:$0xff] }
  0x9e   : > { %1776 = vmatmul.bf16.gmra.mxu1 %v3566_v23  ;;  %v903_v22 = vpack.c.bf16 %v710_v19, %v709_v18  ;;  %v3735_v18 = vld [vmem:[%s6109_s1 + $0xc4] sm:$0xf0]  ;;  %v898_v19 = vpack.c.bf16 %v700_v15, %v699_v14 }
  0x9f   : > { %1859 = vmatmul.bf16.gmra.mxu3 %v3382_v25  ;;  %v4485_v63 = vpop.permute.xlu1 %1031  ;;  %v667_v25 = vld [vmem:[%s4124_s17 + $0x290] sm:$0xff]  ;;  %v3250_v42 = vor.u32 %v3735_v18, %v3249_v17 }
  0xa0   : > { %2033 = vmatpush.bf16.msra.mxu3 %v903_v22  ;;  %v882_v29 = vpack.c.bf16 %v668_v24, %v667_v25  ;;  %v3257_v22 = vld [vmem:[%s6109_s1 + $0x90] sm:$0xf]  ;;  %v3571_v24 = vld [vmem:[%s6109_s1 + $0x348] sm:$0xf0] }
  0xa1   : > { %v3736_v25 = vld [vmem:[%s6109_s1 + $0xcc] sm:$0xf0] }
  0xa2   : > { %1940 = vmatpush.bf16.msra.mxu1 %v882_v29  ;;  %v977_v39 = vpop.permute.xlu2 %976  ;;  %v3266_v29 = vor.u32 %v3737_v27, %v3265_v26  ;;  %v3258_v35 = vor.u32 %v3736_v25, %v3257_v22  ;;  %v3728_v22 = vld [vmem:[%s6109_s1 + $0x94] sm:$0xf]  ;;  %v3393_v26 = vld [vmem:[%s6109_s1 + $0x198] sm:$0xf] }
  0xa3   : > { %v4479_v54 = vpop.permute.xlu0 %1001  ;;  %v3259_v25 = vld [vmem:[%s6109_s1 + $0xd0] sm:$0xf0]  ;;  %v3769_v27 = vld [vmem:[%s6109_s1 + $0x1d4] sm:$0xf0] }
  0xa4   : > { %2034 = vmatpush.bf16.msra.mxu3 %v902_v43  ;;  %v3574_v43 = vor.u32 %v3807_v20, %v3571_v24  ;;  %v3768_v20 = vld [vmem:[%s6109_s1 + $0x1cc] sm:$0xf0]  ;;  %v3203_v24 = vld [vmem:[%s6109_s1 + $0x58] sm:$0xf0] }
  0xa6   : > { %1941 = vmatpush.bf16.msra.mxu1 %v881_v21  ;;  %v3635_v21 = vld [vmem:[%s6109_s1 + $0x3c8] sm:$0xf0] }
  0xa7   : > { %v4503_v23 = vpop.permute.xlu1 %1011  ;;  %1996 = vmatmul.bf16.gmra.mxu2 %v3266_v29 }
  0xab   : > { %v4498_v59 = vpop.permute.xlu0 %986 }
  0xad   : > { %1732 = vmatmul.bf16.gmra.mxu0 %v3626_v57  ;;  %v901_v57 = vpack.c.bf16 %v706_v53, %v705_v50  ;;  %v3321_v53 = vld [vmem:[%s6109_s1 + $0x110] sm:$0xf] }
  0xae   : > { %1781 = vmatmul.bf16.gmra.mxu1 %v3630_v61  ;;  %v703_v61 = vld [vmem:[%s4124_s17 + $0x3b0] sm:$0xff] }
  0xaf   : > { %1864 = vmatmul.bf16.gmra.mxu3 %v3446_v62  ;;  %v704_v62 = vld [vmem:[%s4124_s17 + $0x3b8] sm:$0xff] }
  0xb0   : > { %2035 = vmatpush.bf16.msra.mxu3 %v901_v57  ;;  %v900_v4 = vpack.c.bf16 %v704_v62, %v703_v61  ;;  %v3329_v57 = vld [vmem:[%s6109_s1 + $0x118] sm:$0xf] }
  0xb3   : > { %v972_v52 = vpop.permute.xlu0 %971 }
  0xb4   : > { %2036 = vmatpush.bf16.msra.mxu3 %v900_v4 }
  0xb6   : > { %v4545_v3 = vpop.permute.xlu1 %996 }
  0xb8   : > { %2037 = vmatpush.bf16.msra.mxu3 %v899_v9 }
  0xba   : > { %v1698_v55 = vpop.f32.mrf.mxu0 }
  0xbb   : > { %v1747_v58 = vpop.f32.mrf.mxu1  ;;  %v1699_v60 = vadd.f32 %v1698_v55, %v972_v52  ;;  %v3823_v52 = vld [vmem:[%s6109_s1 + $0x38c] sm:$0xf]  ;;  %v3752_v55 = vld [vmem:[%s6109_s1 + $0x14c] sm:$0xf0] }
  0xbc   : > { %2038 = vmatpush.bf16.msra.mxu3 %v898_v19  ;;  %v3322_v62 = vor.u32 %v3752_v55, %v3321_v53  ;;  %v3784_v55 = vld [vmem:[%s6109_s1 + $0x24c] sm:$0xf0] }
  0xbd   : > { %1893 = vmatmul.bf16.vlgmr.msrb.gmra.mxu0 %v3194_v51  ;;  %v4543_v1 = vadd.f32 %v1747_v58, %v1699_v60  ;;  %v3753_v58 = vld [vmem:[%s6109_s1 + $0x154] sm:$0xf0] }
  0xbe   : > { %1795 = vmatmul.bf16.vlgmr.msrb.gmra.mxu1 %v3186_v56  ;;  %v982_v28 = vpop.permute.xlu1 %981  ;;  %v3330_v60 = vor.u32 %v3753_v58, %v3329_v57  ;;  %v3457_v57 = vld [vmem:[%s6109_s1 + $0x218] sm:$0xf] }
  0xbf   : > { %1869 = vmatmul.bf16.gmra.mxu3 %v3510_v30  ;;  %v3195_v30 = vld [vmem:[%s6109_s1 + $0x50] sm:$0xf0]  ;;  %v3785_v58 = vld [vmem:[%s6109_s1 + $0x254] sm:$0xf0] }
  0xc0   : > { %2039 = vmatpush.bf16.msra.mxu3 %v897_v36  ;;  %2001 = vmatmul.bf16.gmra.mxu2 %v3330_v60  ;;  %v3458_v60 = vor.u32 %v3785_v58, %v3457_v57 }
  0xc2   : > { %v4549_v8 = vpop.f32.mrf.mxu3  ;;  %v1700_v10 = vpop.f32.mrf.mxu0 }
  0xc3   : > { %v1749_v48 = vpop.f32.mrf.mxu1  ;;  %v1701_v11 = vadd.f32 %v1700_v10, %v977_v39  ;;  %v3638_v39 = vor.u32 %v3823_v52, %v3635_v21 }
  0xc4   : > { %v1806_v56 = vpop.f32.mrf.mxu2 }
  0xc5   : > { %v4553_v16 = vadd.f32 %v1749_v48, %v1701_v11 }
  0xca   : > { %v4581_v34 = vpop.f32.mrf.mxu3  ;;  %v1703_v37 = vpop.f32.mrf.mxu0 }
  0xcb   : > { %v1752_v44 = vpop.f32.mrf.mxu1  ;;  %v1704_v12 = vadd.f32 %v1703_v37, %v982_v28  ;;  %v3394_v28 = vor.u32 %v3769_v27, %v3393_v26 }
  0xcc   : > { %v4619_v11 = vpop.f32.mrf.mxu2 }
  0xcd   : > { %1898 = vmatmul.bf16.gmra.mxu0 %v3258_v35  ;;  %v4583_v45 = vadd.f32 %v1752_v44, %v1704_v12  ;;  %v3262_v35 = vor.u32 %v3728_v22, %v3259_v25  ;;  %v725_v25 = vld [vmem:[%s4124_s17 + $0x460] sm:$0xff] }
  0xce   : > { %1800 = vmatmul.bf16.gmra.mxu1 %v3250_v42 }
  0xcf   : > { %1874 = vmatmul.bf16.gmra.mxu3 %v3574_v43 }
  0xd0   : > { %2006 = vmatmul.bf16.gmra.mxu2 %v3394_v28 }
  0xd2   : > { %v4585_v46 = vpop.f32.mrf.mxu3  ;;  %v1705_v47 = vpop.f32.mrf.mxu0 }
  0xd3   : > { %v1706_v49 = vadd.f32 %v1705_v47, %v4498_v59  ;;  %v1754_v50 = vpop.f32.mrf.mxu1  ;;  %v3712_v59 = vld [vmem:[%s6109_s1 + $0x14] sm:$0xf] }
  0xd4   : > { %v3198_v5 = vor.u32 %v3712_v59, %v3195_v30  ;;  %v1811_v37 = vpop.f32.mrf.mxu2  ;;  %v3744_v59 = vld [vmem:[%s6109_s1 + $0x114] sm:$0xf]  ;;  %v3267_v30 = vld [vmem:[%s6109_s1 + $0xd8] sm:$0xf0] }
  0xd5   : > { %v4588_v51 = vadd.f32 %v1754_v50, %v1706_v49 }
  0xda   : > { %v4614_v61 = vpop.f32.mrf.mxu3  ;;  %v1708_v4 = vpop.f32.mrf.mxu0 }
  0xdb   : > { %v1709_v6 = vadd.f32 %v1708_v4, %v4526_v38  ;;  %v1757_v9 = vpop.f32.mrf.mxu1  ;;  %v3385_v38 = vld [vmem:[%s6109_s1 + $0x190] sm:$0xf] }
  0xdc   : > { %v3386_v31 = vor.u32 %v3768_v20, %v3385_v38  ;;  %v4658_v21 = vpop.f32.mrf.mxu2 }
  0xdd   : > { %v1758_v10 = vadd.f32 %v1757_v9, %v1709_v6  ;;  %1903 = vmatmul.bf16.gmra.mxu0 %v3322_v62 }
  0xde   : > { %1942 = vmatmul.bf16.vlgmr.msra.gmra.mxu1 %v3198_v5 }
  0xdf   : > { %1879 = vmatmul.bf16.gmra.mxu3 %v3638_v39  ;;  %v4617_v48 = vadd.f32 %v1806_v56, %v1758_v10  ;;  %v3729_v56 = vld [vmem:[%s6109_s1 + $0x9c] sm:$0xf] }
  0xe0   : > { %v3270_v6 = vor.u32 %v3729_v56, %v3267_v30  ;;  %2011 = vmatmul.bf16.gmra.mxu2 %v3458_v60 }
  0xe2   : > { %v4621_v14 = vpop.f32.mrf.mxu3  ;;  %v1710_v15 = vpop.f32.mrf.mxu0 }
  0xe3   : > { %v1711_v17 = vadd.f32 %v1710_v15, %v4545_v3  ;;  %v1759_v18 = vpop.f32.mrf.mxu1  ;;  %v3713_v3 = vld [vmem:[%s6109_s1 + $0x1c] sm:$0xf] }
  0xe4   : > { %v3206_v36 = vor.u32 %v3713_v3, %v3203_v24  ;;  %v1816_v38 = vpop.f32.mrf.mxu2  ;;  %v726_v3 = vld [vmem:[%s4124_s17 + $0x468] sm:$0xff] }
  0xe5   : > { %v4624_v19 = vadd.f32 %v1759_v18, %v1711_v17  ;;  %v727_v17 = vld [vmem:[%s4124_s17 + $0x470] sm:$0xff]  ;;  %v728_v18 = vld [vmem:[%s4124_s17 + $0x478] sm:$0xff] }
  0xe6   : > { %v912_v20 = vpack.c.bf16 %v728_v18, %v727_v17  ;;  %v718_v17 = vld [vmem:[%s4124_s17 + $0x428] sm:$0xff] }
  0xe8   : > { %2081 = vmatpush.bf16.msra.mxu0 %v912_v20 }
  0xea   : > { %v4650_v29 = vpop.f32.mrf.mxu3  ;;  %v1713_v32 = vpop.f32.mrf.mxu0 }
  0xeb   : > { %v1714_v42 = vadd.f32 %v1713_v32, %v4479_v54  ;;  %v1762_v43 = vpop.f32.mrf.mxu1  ;;  %v3449_v54 = vld [vmem:[%s6109_s1 + $0x210] sm:$0xf]  ;;  %v724_v32 = vld [vmem:[%s4124_s17 + $0x458] sm:$0xff] }
  0xec   : > { %v3450_v4 = vor.u32 %v3784_v55, %v3449_v54  ;;  %v721_v55 = vld [vmem:[%s4124_s17 + $0x440] sm:$0xff] }
  0xed   : > { %v1763_v44 = vadd.f32 %v1762_v43, %v1714_v42  ;;  %1908 = vmatmul.bf16.gmra.mxu0 %v3386_v31  ;;  %v723_v31 = vld [vmem:[%s4124_s17 + $0x450] sm:$0xff] }
  0xee   : > { %1947 = vmatmul.bf16.gmra.mxu1 %v3262_v35  ;;  %v910_v42 = vpack.c.bf16 %v724_v32, %v723_v31  ;;  %v3387_v43 = vld [vmem:[%s6109_s1 + $0x1d0] sm:$0xf0] }
  0xef   : > { %2040 = vmatmul.bf16.vlgmr.msra.gmra.mxu3 %v3206_v36  ;;  %v4653_v12 = vadd.f32 %v1811_v37, %v1763_v44  ;;  %v3513_v36 = vld [vmem:[%s6109_s1 + $0x290] sm:$0xf]  ;;  %v3745_v44 = vld [vmem:[%s6109_s1 + $0x11c] sm:$0xf]  ;;  %v3451_v32 = vld [vmem:[%s6109_s1 + $0x250] sm:$0xf0] }
  0xf0   : > { %v3800_v37 = vld [vmem:[%s6109_s1 + $0x2cc] sm:$0xf0] }
  0xf1   : > { %v3514_v56 = vor.u32 %v3800_v37, %v3513_v36  ;;  %v3761_v36 = vld [vmem:[%s6109_s1 + $0x19c] sm:$0xf] }
  0xf2   : > { %v4655_v47 = vpop.f32.mrf.mxu3  ;;  %v1715_v49 = vpop.f32.mrf.mxu0  ;;  %v3395_v37 = vld [vmem:[%s6109_s1 + $0x1d8] sm:$0xf0] }
  0xf3   : > { %v1716_v50 = vadd.f32 %v1715_v49, %v4487_v2  ;;  %v1764_v52 = vpop.f32.mrf.mxu1  ;;  %v3323_v2 = vld [vmem:[%s6109_s1 + $0x150] sm:$0xf0]  ;;  %v3331_v49 = vld [vmem:[%s6109_s1 + $0x158] sm:$0xf0] }
  0xf4   : > { %v3326_v5 = vor.u32 %v3744_v59, %v3323_v2  ;;  %v722_v59 = vld [vmem:[%s4124_s17 + $0x448] sm:$0xff]  ;;  %v3334_v60 = vor.u32 %v3745_v44, %v3331_v49  ;;  %v713_v49 = vld [vmem:[%s4124_s17 + $0x400] sm:$0xff] }
  0xf5   : > { %v4660_v53 = vadd.f32 %v1764_v52, %v1716_v50  ;;  %v3521_v50 = vld [vmem:[%s6109_s1 + $0x298] sm:$0xf]  ;;  %v909_v30 = vpack.c.bf16 %v722_v59, %v721_v55 }
  0xf6   : > { %v3801_v52 = vld [vmem:[%s6109_s1 + $0x2d4] sm:$0xf0] }
  0xf7   : > { %v3522_v54 = vor.u32 %v3801_v52, %v3521_v50  ;;  %v714_v50 = vld [vmem:[%s4124_s17 + $0x408] sm:$0xff]  ;;  %v759_v52 = vld [vmem:[%s4124_s17 + $0x570] sm:$0xff] }
  0xf8   : > { %v905_v59 = vpack.c.bf16 %v714_v50, %v713_v49  ;;  %v3515_v49 = vld [vmem:[%s6109_s1 + $0x2d0] sm:$0xf0]  ;;  %v3777_v50 = vld [vmem:[%s6109_s1 + $0x21c] sm:$0xf] }
  0xf9   : > { %2016 = vmatmul.bf16.gmra.mxu2 %v3522_v54 }
  0xfa   : > { %v4686_v62 = vpop.f32.mrf.mxu3  ;;  %v1718_v39 = vpop.f32.mrf.mxu0 }
  0xfb   : > { %v1719_v9 = vadd.f32 %v1718_v39, %v4503_v23  ;;  %v1767_v10 = vpop.f32.mrf.mxu1  ;;  %v911_v23 = vpack.c.bf16 %v726_v3, %v725_v25 }
  0xfd   : > { %v1768_v15 = vadd.f32 %v1767_v10, %v1719_v9  ;;  %1913 = vmatmul.bf16.gmra.mxu0 %v3450_v4  ;;  %v720_v9 = vld [vmem:[%s4124_s17 + $0x438] sm:$0xff] }
  0xfe   : > { %1952 = vmatmul.bf16.gmra.mxu1 %v3326_v5  ;;  %2082 = vmatpush.bf16.msra.mxu0 %v911_v23  ;;  %v715_v23 = vld [vmem:[%s4124_s17 + $0x410] sm:$0xff] }
  0xff   : > { %2045 = vmatmul.bf16.gmra.mxu3 %v3270_v6  ;;  %v4691_v22 = vadd.f32 %v1816_v38, %v1768_v15  ;;  %v719_v6 = vld [vmem:[%s4124_s17 + $0x430] sm:$0xff]  ;;  %v717_v15 = vld [vmem:[%s4124_s17 + $0x420] sm:$0xff] }
 0x100   : > { %v908_v10 = vpack.c.bf16 %v720_v9, %v719_v6  ;;  %v907_v38 = vpack.c.bf16 %v718_v17, %v717_v15  ;;  %v743_v6 = vld [vmem:[%s4124_s17 + $0x4f0] sm:$0xff]  ;;  %v744_v9 = vld [vmem:[%s4124_s17 + $0x4f8] sm:$0xff]  ;;  %v758_v17 = vld [vmem:[%s4124_s17 + $0x568] sm:$0xff] }
 0x101   : > { %v920_v15 = vpack.c.bf16 %v744_v9, %v743_v6  ;;  %v752_v9 = vld [vmem:[%s4124_s17 + $0x538] sm:$0xff] }
 0x102   : > { %v4695_v24 = vpop.f32.mrf.mxu3  ;;  %v1720_v26 = vpop.f32.mrf.mxu0  ;;  %2083 = vmatpush.bf16.msra.mxu0 %v910_v42  ;;  %v3585_v42 = vld [vmem:[%s6109_s1 + $0x318] sm:$0xf] }
 0x103   : > { %v1721_v27 = vadd.f32 %v1720_v26, %v4447_v33  ;;  %v1769_v28 = vpop.f32.mrf.mxu1  ;;  %v3760_v33 = vld [vmem:[%s6109_s1 + $0x194] sm:$0xf]  ;;  %v716_v26 = vld [vmem:[%s4124_s17 + $0x418] sm:$0xff]  ;;  %2130 = vmatpush.bf16.msrb.mxu1 %v920_v15 }
 0x104   : > { %v3390_v58 = vor.u32 %v3760_v33, %v3387_v43  ;;  %v906_v31 = vpack.c.bf16 %v716_v26, %v715_v23  ;;  %v3817_v33 = vld [vmem:[%s6109_s1 + $0x354] sm:$0xf0]  ;;  %v1809_v43 = vadd.f32 %v4619_v11, %v4624_v19 }
 0x105   : > { %v4700_v35 = vadd.f32 %v1769_v28, %v1721_v27  ;;  %v3577_v28 = vld [vmem:[%s6109_s1 + $0x310] sm:$0xf]  ;;  %v3586_v44 = vor.u32 %v3817_v33, %v3585_v42  ;;  %v756_v23 = vld [vmem:[%s4124_s17 + $0x558] sm:$0xff] }
 0x106   : > { %2084 = vmatpush.bf16.msra.mxu0 %v909_v30  ;;  %v3641_v33 = vld [vmem:[%s6109_s1 + $0x390] sm:$0xf] }
 0x109   : > { %2021 = vmatmul.bf16.gmra.mxu2 %v3586_v44  ;;  %v3792_v44 = vld [vmem:[%s6109_s1 + $0x294] sm:$0xf] }
 0x10a   : > { %v4728_v2 = vpop.f32.mrf.mxu3  ;;  %v1723_v57 = vpop.f32.mrf.mxu0  ;;  %2085 = vmatpush.bf16.msra.mxu0 %v908_v10  ;;  %v757_v10 = vld [vmem:[%s4124_s17 + $0x560] sm:$0xff] }
 0x10b   : > { %v1724_v4 = vadd.f32 %v1723_v57, %v4453_v40  ;;  %v1772_v39 = vpop.f32.mrf.mxu1 }
 0x10d   : > { %v4731_v5 = vadd.f32 %v1772_v39, %v1724_v4  ;;  %1918 = vmatmul.bf16.gmra.mxu0 %v3514_v56  ;;  %v760_v56 = vld [vmem:[%s4124_s17 + $0x578] sm:$0xff] }
 0x10e   : > { %1957 = vmatmul.bf16.gmra.mxu1 %v3390_v58  ;;  %2086 = vmatpush.bf16.msra.mxu0 %v907_v38  ;;  %v928_v4 = vpack.c.bf16 %v760_v56, %v759_v52  ;;  %v742_v38 = vld [vmem:[%s4124_s17 + $0x4e8] sm:$0xff]  ;;  %v1814_v56 = vadd.f32 %v4658_v21, %v4660_v53 }
 0x10f   : > { %2050 = vmatmul.bf16.gmra.mxu3 %v3334_v60  ;;  %v3398_v60 = vor.u32 %v3761_v36, %v3395_v37  ;;  %v740_v36 = vld [vmem:[%s4124_s17 + $0x4d8] sm:$0xff]  ;;  %v753_v37 = vld [vmem:[%s4124_s17 + $0x540] sm:$0xff] }
 0x110   : > { %2179 = vmatpush.bf16.msra.mxu2 %v928_v4  ;;  %v751_v4 = vld [vmem:[%s4124_s17 + $0x530] sm:$0xff] }
 0x111   : > { %v924_v21 = vpack.c.bf16 %v752_v9, %v751_v4  ;;  %v772_v9 = vld [vmem:[%s4124_s17 + $0x5d8] sm:$0xff] }
 0x112   : > { %v1855_v18 = vpop.f32.mrf.mxu3  ;;  %v1725_v20 = vpop.f32.mrf.mxu0  ;;  %2087 = vmatpush.bf16.msra.mxu0 %v906_v31 }
 0x113   : > { %v4738_v40 = vadd.f32 %v1855_v18, %v4617_v48  ;;  %v1726_v25 = vadd.f32 %v1725_v20, %v4437_v7  ;;  %v1774_v3 = vpop.f32.mrf.mxu1  ;;  %v3816_v48 = vld [vmem:[%s6109_s1 + $0x34c] sm:$0xf0]  ;;  %v3776_v7 = vld [vmem:[%s6109_s1 + $0x214] sm:$0xf]  ;;  %v741_v18 = vld [vmem:[%s4124_s17 + $0x4e0] sm:$0xff] }
 0x114   : > { %v3578_v55 = vor.u32 %v3816_v48, %v3577_v28  ;;  %v3454_v58 = vor.u32 %v3776_v7, %v3451_v32  ;;  %v755_v20 = vld [vmem:[%s4124_s17 + $0x550] sm:$0xff] }
 0x115   : > { %v4743_v27 = vadd.f32 %v1774_v3, %v1726_v25  ;;  %v919_v3 = vpack.c.bf16 %v742_v38, %v741_v18  ;;  %v926_v48 = vpack.c.bf16 %v756_v23, %v755_v20  ;;  %v739_v32 = vld [vmem:[%s4124_s17 + $0x4d0] sm:$0xff] }
 0x116   : > { %2088 = vmatpush.bf16.msra.mxu0 %v905_v59  ;;  %v3833_v59 = vld [vmem:[%s6109_s1 + $0x3d4] sm:$0xf0]  ;;  %v735_v20 = vld [vmem:[%s4124_s17 + $0x4b0] sm:$0xff] }
 0x117   : > { %2131 = vmatpush.bf16.msrb.mxu1 %v919_v3  ;;  %v749_v3 = vld [vmem:[%s4124_s17 + $0x520] sm:$0xff] }
 0x11a   : > { %v1857_v54 = vpop.f32.mrf.mxu3  ;;  %v1728_v57 = vpop.f32.mrf.mxu0 }
 0x11b   : > { %v4775_v30 = vadd.f32 %v1857_v54, %v1809_v43  ;;  %v1729_v11 = vadd.f32 %v1728_v57, %v4485_v63  ;;  %v1777_v19 = vpop.f32.mrf.mxu1  ;;  %v927_v63 = vpack.c.bf16 %v758_v17, %v757_v10  ;;  %v754_v43 = vld [vmem:[%s4124_s17 + $0x548] sm:$0xff]  ;;  %v3459_v54 = vld [vmem:[%s6109_s1 + $0x258] sm:$0xf0]  ;;  %v3518_v17 = vor.u32 %v3792_v44, %v3515_v49 }
 0x11c   : > { %v925_v52 = vpack.c.bf16 %v754_v43, %v753_v37  ;;  %v747_v37 = vld [vmem:[%s4124_s17 + $0x510] sm:$0xff]  ;;  %v773_v43 = vld [vmem:[%s4124_s17 + $0x5e0] sm:$0xff]  ;;  %v774_v44 = vld [vmem:[%s4124_s17 + $0x5e8] sm:$0xff] }
 0x11d   : > { %v4778_v39 = vadd.f32 %v1777_v19, %v1729_v11  ;;  %1923 = vmatmul.bf16.gmra.mxu0 %v3578_v55  ;;  %2180 = vmatpush.bf16.msra.mxu2 %v927_v63  ;;  %v3649_v55 = vld [vmem:[%s6109_s1 + $0x398] sm:$0xf]  ;;  %v3462_v63 = vor.u32 %v3777_v50, %v3459_v54  ;;  %v935_v54 = vpack.c.bf16 %v774_v44, %v773_v43 }
 0x11e   : > { %1962 = vmatmul.bf16.gmra.mxu1 %v3454_v58  ;;  %v3650_v57 = vor.u32 %v3833_v59, %v3649_v55  ;;  %v737_v58 = vld [vmem:[%s4124_s17 + $0x4c0] sm:$0xff] }
 0x11f   : > { %2055 = vmatmul.bf16.gmra.mxu3 %v3398_v60  ;;  %v738_v60 = vld [vmem:[%s4124_s17 + $0x4c8] sm:$0xff] }
 0x120   : > { %v917_v6 = vpack.c.bf16 %v738_v60, %v737_v58  ;;  %2026 = vmatmul.bf16.gmra.mxu2 %v3650_v57  ;;  %v732_v57 = vld [vmem:[%s4124_s17 + $0x498] sm:$0xff]  ;;  %v745_v58 = vld [vmem:[%s4124_s17 + $0x500] sm:$0xff]  ;;  %v1818_v60 = vpop.f32.mrf.mxu2 }
 0x121   : > { %2181 = vmatpush.bf16.msra.mxu2 %v926_v48  ;;  %v776_v48 = vld [vmem:[%s4124_s17 + $0x5f8] sm:$0xff] }
 0x122   : > { %v1860_v25 = vpop.f32.mrf.mxu3  ;;  %v1730_v28 = vpop.f32.mrf.mxu0 }
 0x123   : > { %v4789_v26 = vadd.f32 %v1860_v25, %v4653_v12  ;;  %v1731_v31 = vadd.f32 %v1730_v28, %v4455_v41  ;;  %v1779_v7 = vpop.f32.mrf.mxu1  ;;  %v3832_v12 = vld [vmem:[%s6109_s1 + $0x3cc] sm:$0xf0]  ;;  %v918_v41 = vpack.c.bf16 %v740_v36, %v739_v32  ;;  %v736_v25 = vld [vmem:[%s4124_s17 + $0x4b8] sm:$0xff]  ;;  %v733_v32 = vld [vmem:[%s4124_s17 + $0x4a0] sm:$0xff] }
 0x124   : > { %v3642_v19 = vor.u32 %v3832_v12, %v3641_v33  ;;  %v916_v23 = vpack.c.bf16 %v736_v25, %v735_v20  ;;  %v775_v28 = vld [vmem:[%s4124_s17 + $0x5f0] sm:$0xff]  ;;  %v734_v36 = vld [vmem:[%s4124_s17 + $0x4a8] sm:$0xff] }
 0x125   : > { %v4795_v42 = vadd.f32 %v1779_v7, %v1731_v31  ;;  %2132 = vmatpush.bf16.msrb.mxu1 %v918_v41  ;;  %2182 = vmatpush.bf16.msra.mxu2 %v925_v52  ;;  %v936_v7 = vpack.c.bf16 %v776_v48, %v775_v28  ;;  %v915_v12 = vpack.c.bf16 %v734_v36, %v733_v32  ;;  %v748_v41 = vld [vmem:[%s4124_s17 + $0x518] sm:$0xff]  ;;  %v3217_v20 = vld [vmem:[%s6109_s1 + $0x28] sm:$0xf]  ;;  %v769_v48 = vld [vmem:[%s4124_s17 + $0x5c0] sm:$0xff] }
 0x126   : > { %v922_v52 = vpack.c.bf16 %v748_v41, %v747_v37  ;;  %v3723_v25 = vld [vmem:[%s6109_s1 + $0x64] sm:$0xf0] }
 0x127   : > { %2228 = vmatpush.bf16.msrb.mxu3 %v936_v7  ;;  %v730_v28 = vld [vmem:[%s4124_s17 + $0x488] sm:$0xff] }
 0x128   : > { %v770_v36 = vld [vmem:[%s4124_s17 + $0x5c8] sm:$0xff] }
 0x129   : > { %2133 = vmatpush.bf16.msrb.mxu1 %v917_v6  ;;  %2183 = vmatpush.bf16.msra.mxu2 %v924_v21  ;;  %v771_v6 = vld [vmem:[%s4124_s17 + $0x5d0] sm:$0xff]  ;;  %v933_v43 = vpack.c.bf16 %v770_v36, %v769_v48 }
 0x12a   : > { %v1862_v11 = vpop.f32.mrf.mxu3  ;;  %v1733_v15 = vpop.f32.mrf.mxu0 }
 0x12b   : > { %v4828_v10 = vadd.f32 %v1862_v11, %v1814_v56  ;;  %v1734_v53 = vadd.f32 %v1733_v15, %v4426_v13  ;;  %v1782_v18 = vpop.f32.mrf.mxu1  ;;  %v750_v13 = vld [vmem:[%s4124_s17 + $0x528] sm:$0xff]  ;;  %v731_v56 = vld [vmem:[%s4124_s17 + $0x490] sm:$0xff]  ;;  %2229 = vmatpush.bf16.msrb.mxu3 %v935_v54  ;;  %v3793_v15 = vld [vmem:[%s6109_s1 + $0x29c] sm:$0xf] }
 0x12c   : > { %v923_v31 = vpack.c.bf16 %v750_v13, %v749_v3  ;;  %v3579_v11 = vld [vmem:[%s6109_s1 + $0x350] sm:$0xf0]  ;;  %v1819_v3 = vadd.f32 %v1818_v60, %v4700_v35  ;;  %v729_v13 = vld [vmem:[%s4124_s17 + $0x480] sm:$0xff] }
 0x12d   : > { %v4831_v38 = vadd.f32 %v1782_v18, %v1734_v53  ;;  %1928 = vmatmul.bf16.gmra.mxu0 %v3642_v19  ;;  %2134 = vmatpush.bf16.msrb.mxu1 %v916_v23  ;;  %v746_v19 = vld [vmem:[%s4124_s17 + $0x508] sm:$0xff]  ;;  %v934_v53 = vpack.c.bf16 %v772_v9, %v771_v6  ;;  %v3523_v18 = vld [vmem:[%s6109_s1 + $0x2d8] sm:$0xf0]  ;;  %v3218_v23 = vor.u32 %v3723_v25, %v3217_v20  ;;  %v763_v6 = vld [vmem:[%s4124_s17 + $0x590] sm:$0xff] }
 0x12e   : > { %1967 = vmatmul.bf16.gmra.mxu1 %v3518_v17  ;;  %2184 = vmatpush.bf16.msra.mxu2 %v923_v31  ;;  %v3209_v17 = vld [vmem:[%s6109_s1 + $0x20] sm:$0xf]  ;;  %v921_v21 = vpack.c.bf16 %v746_v19, %v745_v58  ;;  %v913_v32 = vpack.c.bf16 %v730_v28, %v729_v13  ;;  %v3526_v41 = vor.u32 %v3793_v15, %v3523_v18  ;;  %v766_v58 = vld [vmem:[%s4124_s17 + $0x5a8] sm:$0xff]  ;;  %v764_v9 = vld [vmem:[%s4124_s17 + $0x598] sm:$0xff] }
 0x12f   : > { %2060 = vmatmul.bf16.gmra.mxu3 %v3462_v63  ;;  %v3722_v63 = vld [vmem:[%s6109_s1 + $0x5c] sm:$0xf0]  ;;  %v3824_v15 = vld [vmem:[%s6109_s1 + $0x394] sm:$0xf]  ;;  %v3739_v20 = vld [vmem:[%s6109_s1 + $0xe4] sm:$0xf0] }
 0x130   : > { %v3210_v7 = vor.u32 %v3722_v63, %v3209_v17  ;;  %2230 = vmatpush.bf16.msrb.mxu3 %v934_v53  ;;  %v3273_v63 = vld [vmem:[%s6109_s1 + $0xa0] sm:$0xf]  ;;  %v3587_v53 = vld [vmem:[%s6109_s1 + $0x358] sm:$0xf0]  ;;  %v762_v28 = vld [vmem:[%s4124_s17 + $0x588] sm:$0xff] }
 0x131   : > { %2135 = vmatpush.bf16.msrb.mxu1 %v915_v12  ;;  %v761_v13 = vld [vmem:[%s4124_s17 + $0x580] sm:$0xff] }
 0x132   : > { %v1865_v33 = vpop.f32.mrf.mxu3  ;;  %v1735_v50 = vpop.f32.mrf.mxu0  ;;  %2185 = vmatpush.bf16.msra.mxu2 %v922_v52  ;;  %v768_v52 = vld [vmem:[%s4124_s17 + $0x5b8] sm:$0xff] }
 0x133   : > { %v4846_v49 = vadd.f32 %v1865_v33, %v4691_v22  ;;  %v1736_v55 = vadd.f32 %v1735_v50, %v4409_v0  ;;  %v1784_v59 = vpop.f32.mrf.mxu1  ;;  %v3808_v22 = vld [vmem:[%s6109_s1 + $0x314] sm:$0xf]  ;;  %v914_v0 = vpack.c.bf16 %v732_v57, %v731_v56  ;;  %v765_v57 = vld [vmem:[%s4124_s17 + $0x5a0] sm:$0xff] }
 0x134   : > { %v3582_v12 = vor.u32 %v3808_v22, %v3579_v11  ;;  %2231 = vmatpush.bf16.msrb.mxu3 %v933_v43  ;;  %v767_v50 = vld [vmem:[%s4124_s17 + $0x5b0] sm:$0xff]  ;;  %v931_v22 = vpack.c.bf16 %v766_v58, %v765_v57  ;;  %v3211_v58 = vld [vmem:[%s6109_s1 + $0x60] sm:$0xf0] }
 0x135   : > { %v4852_v4 = vadd.f32 %v1784_v59, %v1736_v55  ;;  %2136 = vmatpush.bf16.msrb.mxu1 %v914_v0  ;;  %v932_v55 = vpack.c.bf16 %v768_v52, %v767_v50  ;;  %v4892_v59 = vpop.f32.mrf.mxu2 }
 0x136   : > { %2186 = vmatpush.bf16.msra.mxu2 %v921_v21  ;;  %v3738_v21 = vld [vmem:[%s6109_s1 + $0xdc] sm:$0xf0] }
 0x138   : > { %2232 = vmatpush.bf16.msrb.mxu3 %v932_v55 }
 0x139   : > { %2187 = vmatmul.bf16.vlgmr.msra.gmra.mxu2 %v3218_v23  ;;  %2137 = vmatpush.bf16.msrb.mxu1 %v913_v32 }
 0x13a   : > { %v1867_v31 = vpop.f32.mrf.mxu3  ;;  %v1894_v33 = vpop.f32.mrf.mxu0 }
 0x13b   : > { %v4886_v37 = vadd.f32 %v1867_v31, %v1819_v3  ;;  %v1796_v35 = vpop.f32.mrf.mxu1  ;;  %v1824_v3 = vadd.f32 %v4581_v34, %v4743_v27  ;;  %v3274_v31 = vor.u32 %v3738_v21, %v3273_v63 }
 0x13c   : > { %v1797_v44 = vadd.f32 %v1796_v35, %v4543_v1  ;;  %v1822_v1 = vadd.f32 %v4549_v8, %v4731_v5  ;;  %v3643_v8 = vld [vmem:[%s6109_s1 + $0x3d0] sm:$0xf0]  ;;  %2233 = vmatpush.bf16.msrb.mxu3 %v931_v22  ;;  %v930_v5 = vpack.c.bf16 %v764_v9, %v763_v6  ;;  %v3755_v22 = vld [vmem:[%s6109_s1 + $0x164] sm:$0xf0] }
 0x13d   : > { %2089 = vmatmul.bf16.vlgmr.msra.gmra.mxu0 %v3210_v7  ;;  %v4924_v18 = vpop.f32.mrf.mxu2  ;;  %v929_v7 = vpack.c.bf16 %v762_v28, %v761_v13  ;;  %v3770_v13 = vld [vmem:[%s6109_s1 + $0x1dc] sm:$0xf0]  ;;  %v3219_v28 = vld [vmem:[%s6109_s1 + $0x68] sm:$0xf0] }
 0x13e   : > { %v1846_v54 = vadd.f32 %v4655_v47, %v1797_v44  ;;  %1972 = vmatmul.bf16.gmra.mxu1 %v3582_v12  ;;  %v1827_v44 = vadd.f32 %v4585_v46, %v4778_v39  ;;  %v3337_v46 = vld [vmem:[%s6109_s1 + $0x120] sm:$0xf] }
 0x13f   : > { %2065 = vmatmul.bf16.gmra.mxu3 %v3526_v41  ;;  %v3754_v39 = vld [vmem:[%s6109_s1 + $0x15c] sm:$0xf0] }
 0x140   : > { %v4894_v56 = vadd.f32 %v1894_v33, %v1846_v54  ;;  %2234 = vmatpush.bf16.msrb.mxu3 %v930_v5  ;;  %v3646_v33 = vor.u32 %v3824_v15, %v3643_v8  ;;  %v3338_v9 = vor.u32 %v3754_v39, %v3337_v46 }
 0x142   : > { %v1870_v60 = vpop.f32.mrf.mxu3  ;;  %v1896_v47 = vpop.f32.mrf.mxu0 }
 0x143   : > { %v4900_v11 = vadd.f32 %v1870_v60, %v1822_v1  ;;  %v1798_v0 = vpop.f32.mrf.mxu1  ;;  %v3825_v1 = vld [vmem:[%s6109_s1 + $0x39c] sm:$0xf] }
 0x144   : > { %v1799_v19 = vadd.f32 %v1798_v0, %v4553_v16  ;;  %v3809_v16 = vld [vmem:[%s6109_s1 + $0x31c] sm:$0xf]  ;;  %2235 = vmatpush.bf16.msrb.mxu3 %v929_v7  ;;  %v1829_v0 = vadd.f32 %v4614_v61, %v4795_v42  ;;  %v1832_v42 = vadd.f32 %v4621_v14, %v4831_v38  ;;  %v3730_v38 = vld [vmem:[%s6109_s1 + $0xa4] sm:$0xf]  ;;  %v1834_v7 = vadd.f32 %v4650_v29, %v4852_v4 }
 0x145   : > { %v3590_v12 = vor.u32 %v3809_v16, %v3587_v53  ;;  %v4942_v27 = vpop.f32.mrf.mxu2 }
 0x146   : > { %v1848_v17 = vadd.f32 %v4686_v62, %v1799_v19  ;;  %v3281_v62 = vld [vmem:[%s6109_s1 + $0xa8] sm:$0xf] }
 0x147   : > { %v3282_v23 = vor.u32 %v3739_v20, %v3281_v62 }
 0x148   : > { %v4932_v25 = vadd.f32 %v1896_v47, %v1848_v17 }
 0x149   : > { %2192 = vmatmul.bf16.gmra.mxu2 %v3282_v23 }
 0x14a   : > { %v1872_v48 = vpop.f32.mrf.mxu3  ;;  %v1899_v36 = vpop.f32.mrf.mxu0 }
 0x14b   : > { %v4938_v32 = vadd.f32 %v1872_v48, %v1824_v3  ;;  %v1801_v41 = vpop.f32.mrf.mxu1 }
 0x14c   : > { %v1802_v43 = vadd.f32 %v1801_v41, %v4583_v45 }
 0x14d   : > { %2094 = vmatmul.bf16.gmra.mxu0 %v3274_v31  ;;  %v4968_v60 = vpop.f32.mrf.mxu2  ;;  %v3771_v31 = vld [vmem:[%s6109_s1 + $0x1e4] sm:$0xf0] }
 0x14e   : > { %v1851_v34 = vadd.f32 %v4695_v24, %v1802_v43  ;;  %1977 = vmatmul.bf16.gmra.mxu1 %v3646_v33  ;;  %v3651_v24 = vld [vmem:[%s6109_s1 + $0x3d8] sm:$0xf0] }
 0x14f   : > { %2070 = vmatmul.bf16.gmra.mxu3 %v3590_v12  ;;  %v3654_v5 = vor.u32 %v3825_v1, %v3651_v24 }
 0x150   : > { %v1900_v35 = vadd.f32 %v1899_v36, %v1851_v34 }
 0x152   : > { %v1875_v50 = vpop.f32.mrf.mxu3  ;;  %v1901_v54 = vpop.f32.mrf.mxu0 }
 0x153   : > { %v4946_v52 = vadd.f32 %v1875_v50, %v1827_v44  ;;  %v1803_v55 = vpop.f32.mrf.mxu1 }
 0x154   : > { %v1804_v45 = vadd.f32 %v1803_v55, %v4588_v51  ;;  %v3714_v51 = vld [vmem:[%s6109_s1 + $0x24] sm:$0xf] }
 0x155   : > { %v3214_v17 = vor.u32 %v3714_v51, %v3211_v58  ;;  %v4985_v61 = vpop.f32.mrf.mxu2  ;;  %v3746_v51 = vld [vmem:[%s6109_s1 + $0x124] sm:$0xf]  ;;  %v3731_v58 = vld [vmem:[%s6109_s1 + $0xac] sm:$0xf] }
 0x156   : > { %v1853_v57 = vadd.f32 %v4728_v2, %v1804_v45  ;;  %v3345_v2 = vld [vmem:[%s6109_s1 + $0x128] sm:$0xf] }
 0x157   : > { %v3346_v19 = vor.u32 %v3755_v22, %v3345_v2  ;;  %v3283_v2 = vld [vmem:[%s6109_s1 + $0xe8] sm:$0xf0] }
 0x158   : > { %v1902_v47 = vadd.f32 %v1901_v54, %v1853_v57 }
 0x159   : > { %2197 = vmatmul.bf16.gmra.mxu2 %v3346_v19 }
 0x15a   : > { %v1877_v6 = vpop.f32.mrf.mxu3  ;;  %v1904_v8 = vpop.f32.mrf.mxu0 }
 0x15b   : > { %v4978_v15 = vadd.f32 %v1877_v6, %v1829_v0  ;;  %v4981_v16 = vadd.f32 %v1904_v8, %v4738_v40  ;;  %v1943_v63 = vpop.f32.mrf.mxu1 }
 0x15c   : > { %v1944_v21 = vadd.f32 %v1943_v63, %v4894_v56 }
 0x15d   : > { %2099 = vmatmul.bf16.gmra.mxu0 %v3338_v9  ;;  %v5014_v48 = vpop.f32.mrf.mxu2 }
 0x15e   : > { %v1993_v53 = vadd.f32 %v4892_v59, %v1944_v21  ;;  %2138 = vmatmul.bf16.vlgmr.msrb.gmra.mxu1 %v3214_v17  ;;  %v3401_v59 = vld [vmem:[%s6109_s1 + $0x1a0] sm:$0xf]  ;;  %v3286_v17 = vor.u32 %v3731_v58, %v3283_v2 }
 0x15f   : > { %2075 = vmatmul.bf16.gmra.mxu3 %v3654_v5  ;;  %v3402_v12 = vor.u32 %v3770_v13, %v3401_v59  ;;  %v789_v59 = vld [vmem:[%s4124_s17 + $0x660] sm:$0xff] }
 0x162   : > { %v1880_v62 = vpop.f32.mrf.mxu3  ;;  %v1906_v3 = vpop.f32.mrf.mxu0 }
 0x163   : > { %v4989_v20 = vadd.f32 %v1880_v62, %v1832_v42  ;;  %v4992_v40 = vadd.f32 %v1906_v3, %v4775_v30  ;;  %v1945_v23 = vpop.f32.mrf.mxu1  ;;  %v3275_v30 = vld [vmem:[%s6109_s1 + $0xe0] sm:$0xf0]  ;;  %v791_v42 = vld [vmem:[%s4124_s17 + $0x670] sm:$0xff]  ;;  %v792_v62 = vld [vmem:[%s4124_s17 + $0x678] sm:$0xff] }
 0x164   : > { %v1946_v56 = vadd.f32 %v1945_v23, %v4932_v25  ;;  %v3715_v25 = vld [vmem:[%s6109_s1 + $0x2c] sm:$0xf]  ;;  %v3278_v34 = vor.u32 %v3730_v38, %v3275_v30  ;;  %v944_v23 = vpack.c.bf16 %v792_v62, %v791_v42  ;;  %v779_v42 = vld [vmem:[%s4124_s17 + $0x610] sm:$0xff]  ;;  %v780_v62 = vld [vmem:[%s4124_s17 + $0x618] sm:$0xff] }
 0x165   : > { %v3222_v44 = vor.u32 %v3715_v25, %v3219_v28  ;;  %v5030_v29 = vpop.f32.mrf.mxu2  ;;  %v787_v28 = vld [vmem:[%s4124_s17 + $0x650] sm:$0xff] }
 0x166   : > { %v1995_v14 = vadd.f32 %v4924_v18, %v1946_v56  ;;  %v3409_v18 = vld [vmem:[%s6109_s1 + $0x1a8] sm:$0xf]  ;;  %2277 = vmatpush.bf16.msrb.mxu0 %v944_v23  ;;  %v3593_v23 = vld [vmem:[%s6109_s1 + $0x320] sm:$0xf] }
 0x167   : > { %v3410_v36 = vor.u32 %v3771_v31, %v3409_v18  ;;  %v788_v18 = vld [vmem:[%s4124_s17 + $0x658] sm:$0xff]  ;;  %v3529_v31 = vld [vmem:[%s6109_s1 + $0x2a0] sm:$0xf] }
 0x169   : > { %2202 = vmatmul.bf16.gmra.mxu2 %v3410_v36  ;;  %v942_v36 = vpack.c.bf16 %v788_v18, %v787_v28  ;;  %v777_v28 = vld [vmem:[%s4124_s17 + $0x600] sm:$0xff]  ;;  %v778_v18 = vld [vmem:[%s4124_s17 + $0x608] sm:$0xff] }
 0x16a   : > { %v1882_v33 = vpop.f32.mrf.mxu3  ;;  %v1909_v43 = vpop.f32.mrf.mxu0 }
 0x16b   : > { %v5024_v41 = vadd.f32 %v1882_v33, %v1834_v7  ;;  %v5027_v50 = vadd.f32 %v1909_v43, %v4789_v26  ;;  %v1948_v54 = vpop.f32.mrf.mxu1  ;;  %v3802_v7 = vld [vmem:[%s6109_s1 + $0x2dc] sm:$0xf0]  ;;  %v3403_v33 = vld [vmem:[%s6109_s1 + $0x1e0] sm:$0xf0]  ;;  %v3347_v43 = vld [vmem:[%s6109_s1 + $0x168] sm:$0xf0] }
 0x16c   : > { %v1949_v55 = vadd.f32 %v1948_v54, %v1900_v35  ;;  %v3465_v35 = vld [vmem:[%s6109_s1 + $0x220] sm:$0xf] }
 0x16d   : > { %2104 = vmatmul.bf16.gmra.mxu0 %v3402_v12  ;;  %v5056_v22 = vpop.f32.mrf.mxu2  ;;  %v3747_v12 = vld [vmem:[%s6109_s1 + $0x12c] sm:$0xf] }
 0x16e   : > { %v1998_v45 = vadd.f32 %v4942_v27, %v1949_v55  ;;  %2143 = vmatmul.bf16.gmra.mxu1 %v3278_v34  ;;  %v3786_v27 = vld [vmem:[%s6109_s1 + $0x25c] sm:$0xf0] }
 0x16f   : > { %2236 = vmatmul.bf16.vlgmr.msrb.gmra.mxu3 %v3222_v44  ;;  %v3466_v6 = vor.u32 %v3786_v27, %v3465_v35  ;;  %v3803_v44 = vld [vmem:[%s6109_s1 + $0x2e4] sm:$0xf0]  ;;  %v785_v55 = vld [vmem:[%s4124_s17 + $0x640] sm:$0xff] }
 0x172   : > { %v2041_v4 = vpop.f32.mrf.mxu3  ;;  %v1911_v24 = vpop.f32.mrf.mxu0 }
 0x173   : > { %v5032_v1 = vadd.f32 %v2041_v4, %v1993_v53  ;;  %v5035_v57 = vadd.f32 %v1911_v24, %v4828_v10  ;;  %v1950_v46 = vpop.f32.mrf.mxu1  ;;  %v3339_v10 = vld [vmem:[%s6109_s1 + $0x160] sm:$0xf0]  ;;  %v3530_v24 = vor.u32 %v3802_v7, %v3529_v31  ;;  %v823_v31 = vld [vmem:[%s4124_s17 + $0x770] sm:$0xff] }
 0x174   : > { %v1951_v26 = vadd.f32 %v1950_v46, %v1902_v47  ;;  %v3787_v47 = vld [vmem:[%s6109_s1 + $0x264] sm:$0xf0]  ;;  %v3342_v5 = vor.u32 %v3746_v51, %v3339_v10  ;;  %v3350_v51 = vor.u32 %v3747_v12, %v3347_v43 }
 0x175   : > { %v5073_v56 = vpop.f32.mrf.mxu2 }
 0x176   : > { %v2000_v39 = vadd.f32 %v4968_v60, %v1951_v26  ;;  %v3473_v60 = vld [vmem:[%s6109_s1 + $0x228] sm:$0xf] }
 0x177   : > { %v3474_v0 = vor.u32 %v3787_v47, %v3473_v60  ;;  %v783_v60 = vld [vmem:[%s4124_s17 + $0x630] sm:$0xff]  ;;  %v784_v47 = vld [vmem:[%s4124_s17 + $0x638] sm:$0xff] }
 0x179   : > { %2207 = vmatmul.bf16.gmra.mxu2 %v3474_v0 }
 0x17a   : > { %v2043_v19 = vpop.f32.mrf.mxu3  ;;  %v1914_v8 = vpop.f32.mrf.mxu0 }
 0x17b   : > { %v5064_v9 = vadd.f32 %v2043_v19, %v1995_v14  ;;  %v5067_v63 = vadd.f32 %v1914_v8, %v4846_v49  ;;  %v1953_v21 = vpop.f32.mrf.mxu1  ;;  %v790_v49 = vld [vmem:[%s4124_s17 + $0x668] sm:$0xff] }
 0x17c   : > { %v1954_v53 = vadd.f32 %v1953_v21, %v4981_v16  ;;  %v943_v14 = vpack.c.bf16 %v790_v49, %v789_v59  ;;  %v938_v59 = vpack.c.bf16 %v780_v62, %v779_v42  ;;  %v3467_v49 = vld [vmem:[%s6109_s1 + $0x260] sm:$0xf0]  ;;  %v804_v42 = vld [vmem:[%s4124_s17 + $0x6d8] sm:$0xff] }
 0x17d   : > { %2109 = vmatmul.bf16.gmra.mxu0 %v3466_v6  ;;  %v5106_v34 = vpop.f32.mrf.mxu2  ;;  %v782_v6 = vld [vmem:[%s4124_s17 + $0x628] sm:$0xff]  ;;  %v817_v62 = vld [vmem:[%s4124_s17 + $0x740] sm:$0xff] }
 0x17e   : > { %v2003_v3 = vadd.f32 %v4985_v61, %v1954_v53  ;;  %2148 = vmatmul.bf16.gmra.mxu1 %v3342_v5  ;;  %2278 = vmatpush.bf16.msrb.mxu0 %v943_v14  ;;  %v3411_v14 = vld [vmem:[%s6109_s1 + $0x1e8] sm:$0xf0] }
 0x17f   : > { %2241 = vmatmul.bf16.gmra.mxu3 %v3286_v17 }
 0x182   : > { %v2046_v13 = vpop.f32.mrf.mxu3  ;;  %v1916_v16 = vpop.f32.mrf.mxu0  ;;  %2279 = vmatpush.bf16.msrb.mxu0 %v942_v36 }
 0x183   : > { %v5077_v38 = vadd.f32 %v2046_v13, %v1998_v45  ;;  %v5080_v30 = vadd.f32 %v1916_v16, %v4886_v37  ;;  %v1955_v25 = vpop.f32.mrf.mxu1  ;;  %v786_v45 = vld [vmem:[%s4124_s17 + $0x648] sm:$0xff] }
 0x184   : > { %v1956_v61 = vadd.f32 %v1955_v25, %v4992_v40  ;;  %v3762_v40 = vld [vmem:[%s6109_s1 + $0x1a4] sm:$0xf]  ;;  %v941_v46 = vpack.c.bf16 %v786_v45, %v785_v55  ;;  %v3763_v13 = vld [vmem:[%s6109_s1 + $0x1ac] sm:$0xf]  ;;  %v3819_v25 = vld [vmem:[%s6109_s1 + $0x364] sm:$0xf0] }
 0x185   : > { %v3406_v27 = vor.u32 %v3762_v40, %v3403_v33  ;;  %v5127_v19 = vpop.f32.mrf.mxu2  ;;  %v937_v40 = vpack.c.bf16 %v778_v18, %v777_v28  ;;  %v824_v33 = vld [vmem:[%s4124_s17 + $0x778] sm:$0xff]  ;;  %v801_v28 = vld [vmem:[%s4124_s17 + $0x6c0] sm:$0xff]  ;;  %v802_v18 = vld [vmem:[%s4124_s17 + $0x6c8] sm:$0xff] }
 0x186   : > { %v5092_v37 = vadd.f32 %v5014_v48, %v1956_v61  ;;  %v3537_v48 = vld [vmem:[%s6109_s1 + $0x2a8] sm:$0xf]  ;;  %2280 = vmatpush.bf16.msrb.mxu0 %v941_v46  ;;  %v821_v46 = vld [vmem:[%s4124_s17 + $0x760] sm:$0xff] }
 0x187   : > { %v3538_v54 = vor.u32 %v3803_v44, %v3537_v48  ;;  %v3414_v44 = vor.u32 %v3763_v13, %v3411_v14  ;;  %v3475_v14 = vld [vmem:[%s6109_s1 + $0x268] sm:$0xf0] }
 0x189   : > { %2212 = vmatmul.bf16.gmra.mxu2 %v3538_v54  ;;  %v960_v54 = vpack.c.bf16 %v824_v33, %v823_v31  ;;  %v815_v31 = vld [vmem:[%s4124_s17 + $0x730] sm:$0xff]  ;;  %v816_v33 = vld [vmem:[%s4124_s17 + $0x738] sm:$0xff] }
 0x18a   : > { %v2048_v4 = vpop.f32.mrf.mxu3  ;;  %v1919_v35 = vpop.f32.mrf.mxu0 }
 0x18b   : > { %v5116_v26 = vadd.f32 %v2048_v4, %v2000_v39  ;;  %v5119_v10 = vadd.f32 %v1919_v35, %v4900_v11  ;;  %v1958_v58 = vpop.f32.mrf.mxu1  ;;  %v940_v39 = vpack.c.bf16 %v784_v47, %v783_v60  ;;  %v781_v11 = vld [vmem:[%s4124_s17 + $0x620] sm:$0xff]  ;;  %2375 = vmatpush.bf16.msrb.mxu2 %v960_v54  ;;  %v819_v60 = vld [vmem:[%s4124_s17 + $0x750] sm:$0xff] }
 0x18c   : > { %v1959_v2 = vadd.f32 %v1958_v58, %v5027_v50  ;;  %v939_v50 = vpack.c.bf16 %v782_v6, %v781_v11  ;;  %v805_v58 = vld [vmem:[%s4124_s17 + $0x6e0] sm:$0xff] }
 0x18d   : > { %2114 = vmatmul.bf16.gmra.mxu0 %v3530_v24  ;;  %v5160_v16 = vpop.f32.mrf.mxu2  ;;  %v808_v24 = vld [vmem:[%s4124_s17 + $0x6f8] sm:$0xff] }
 0x18e   : > { %v5125_v0 = vadd.f32 %v5030_v29, %v1959_v2  ;;  %2153 = vmatmul.bf16.gmra.mxu1 %v3406_v27  ;;  %2281 = vmatpush.bf16.msrb.mxu0 %v940_v39  ;;  %v822_v27 = vld [vmem:[%s4124_s17 + $0x768] sm:$0xff] }
 0x18f   : > { %2246 = vmatmul.bf16.gmra.mxu3 %v3350_v51  ;;  %v806_v2 = vld [vmem:[%s4124_s17 + $0x6e8] sm:$0xff] }
 0x190   : > { %v951_v39 = vpack.c.bf16 %v806_v2, %v805_v58  ;;  %v840_v58 = vld [vmem:[%s4124_s17 + $0x7f8] sm:$0xff] }
 0x192   : > { %v2051_v8 = vpop.f32.mrf.mxu3  ;;  %v1921_v17 = vpop.f32.mrf.mxu0  ;;  %2282 = vmatpush.bf16.msrb.mxu0 %v939_v50 }
 0x193   : > { %v5131_v5 = vadd.f32 %v2051_v8, %v2003_v3  ;;  %v5134_v21 = vadd.f32 %v1921_v17, %v4938_v32  ;;  %v1960_v29 = vpop.f32.mrf.mxu1  ;;  %v3818_v3 = vld [vmem:[%s6109_s1 + $0x35c] sm:$0xf0] }
 0x194   : > { %v1961_v53 = vadd.f32 %v1960_v29, %v5035_v57  ;;  %v3778_v57 = vld [vmem:[%s6109_s1 + $0x224] sm:$0xf]  ;;  %v3594_v36 = vor.u32 %v3818_v3, %v3593_v23  ;;  %v3657_v23 = vld [vmem:[%s6109_s1 + $0x3a0] sm:$0xf]  ;;  %v818_v3 = vld [vmem:[%s4124_s17 + $0x748] sm:$0xff] }
 0x195   : > { %v3470_v48 = vor.u32 %v3778_v57, %v3467_v49  ;;  %v5186_v51 = vpop.f32.mrf.mxu2  ;;  %v3531_v57 = vld [vmem:[%s6109_s1 + $0x2e0] sm:$0xf0]  ;;  %v3779_v49 = vld [vmem:[%s6109_s1 + $0x22c] sm:$0xf]  ;;  %v957_v13 = vpack.c.bf16 %v818_v3, %v817_v62 }
 0x196   : > { %v5146_v32 = vadd.f32 %v5056_v22, %v1961_v53  ;;  %v3601_v22 = vld [vmem:[%s6109_s1 + $0x328] sm:$0xf]  ;;  %2283 = vmatpush.bf16.msrb.mxu0 %v938_v59  ;;  %v803_v53 = vld [vmem:[%s4124_s17 + $0x6d0] sm:$0xff]  ;;  %v3794_v59 = vld [vmem:[%s6109_s1 + $0x2a4] sm:$0xf]  ;;  %v3478_v54 = vor.u32 %v3779_v49, %v3475_v14 }
 0x197   : > { %v3602_v61 = vor.u32 %v3819_v25, %v3601_v22  ;;  %v3665_v22 = vld [vmem:[%s6109_s1 + $0x3a8] sm:$0xf]  ;;  %v796_v49 = vld [vmem:[%s4124_s17 + $0x698] sm:$0xff]  ;;  %v3595_v14 = vld [vmem:[%s6109_s1 + $0x360] sm:$0xf0] }
 0x198   : > { %v3835_v25 = vld [vmem:[%s6109_s1 + $0x3e4] sm:$0xf0] }
 0x199   : > { %2217 = vmatmul.bf16.gmra.mxu2 %v3602_v61  ;;  %v3666_v61 = vor.u32 %v3835_v25, %v3665_v22  ;;  %v835_v25 = vld [vmem:[%s4124_s17 + $0x7d0] sm:$0xff] }
 0x19a   : > { %v2053_v7 = vpop.f32.mrf.mxu3  ;;  %v1924_v43 = vpop.f32.mrf.mxu0  ;;  %2284 = vmatpush.bf16.msrb.mxu0 %v937_v40  ;;  %v949_v40 = vpack.c.bf16 %v802_v18, %v801_v28  ;;  %v3795_v28 = vld [vmem:[%s6109_s1 + $0x2ac] sm:$0xf]  ;;  %v3225_v18 = vld [vmem:[%s6109_s1 + $0x30] sm:$0xf] }
 0x19b   : > { %v5173_v12 = vadd.f32 %v2053_v7, %v5092_v37  ;;  %v5176_v55 = vadd.f32 %v1924_v43, %v4946_v52  ;;  %v1963_v45 = vpop.f32.mrf.mxu1  ;;  %v807_v37 = vld [vmem:[%s4124_s17 + $0x6f0] sm:$0xff] }
 0x19c   : > { %v1964_v4 = vadd.f32 %v1963_v45, %v5067_v63  ;;  %v952_v52 = vpack.c.bf16 %v808_v24, %v807_v37  ;;  %v959_v63 = vpack.c.bf16 %v822_v27, %v821_v46  ;;  %v956_v45 = vpack.c.bf16 %v816_v33, %v815_v31  ;;  %v800_v46 = vld [vmem:[%s4124_s17 + $0x6b8] sm:$0xff]  ;;  %v3724_v31 = vld [vmem:[%s6109_s1 + $0x6c] sm:$0xf0] }
 0x19d   : > { %2119 = vmatmul.bf16.gmra.mxu0 %v3594_v36  ;;  %v3233_v33 = vld [vmem:[%s6109_s1 + $0x38] sm:$0xf] }
 0x19e   : > { %v5183_v35 = vadd.f32 %v5073_v56, %v1964_v4  ;;  %2158 = vmatmul.bf16.gmra.mxu1 %v3470_v48  ;;  %2376 = vmatpush.bf16.msrb.mxu2 %v959_v63  ;;  %v820_v56 = vld [vmem:[%s4124_s17 + $0x758] sm:$0xff]  ;;  %v814_v63 = vld [vmem:[%s4124_s17 + $0x728] sm:$0xff] }
 0x19f   : > { %2251 = vmatmul.bf16.gmra.mxu3 %v3414_v44  ;;  %2326 = vmatpush.bf16.msra.mxu1 %v952_v52  ;;  %v958_v8 = vpack.c.bf16 %v820_v56, %v819_v60  ;;  %v3534_v44 = vor.u32 %v3794_v59, %v3531_v57  ;;  %v813_v52 = vld [vmem:[%s4124_s17 + $0x720] sm:$0xff]  ;;  %v798_v56 = vld [vmem:[%s4124_s17 + $0x6a8] sm:$0xff]  ;;  %v795_v57 = vld [vmem:[%s4124_s17 + $0x690] sm:$0xff] }
 0x1a0   : > { %v955_v60 = vpack.c.bf16 %v814_v63, %v813_v52  ;;  %v946_v22 = vpack.c.bf16 %v796_v49, %v795_v57  ;;  %v834_v52 = vld [vmem:[%s4124_s17 + $0x7c8] sm:$0xff]  ;;  %v828_v57 = vld [vmem:[%s4124_s17 + $0x798] sm:$0xff]  ;;  %v3826_v49 = vld [vmem:[%s6109_s1 + $0x3a4] sm:$0xf] }
 0x1a2   : > { %v2056_v47 = vpop.f32.mrf.mxu3  ;;  %v1926_v6 = vpop.f32.mrf.mxu0  ;;  %2377 = vmatpush.bf16.msrb.mxu2 %v958_v8 }
 0x1a3   : > { %v5193_v11 = vadd.f32 %v2056_v47, %v5125_v0  ;;  %v5196_v50 = vadd.f32 %v1926_v6, %v4978_v15  ;;  %v1965_v17 = vpop.f32.mrf.mxu1  ;;  %2327 = vmatpush.bf16.msra.mxu1 %v951_v39  ;;  %v3834_v0 = vld [vmem:[%s6109_s1 + $0x3dc] sm:$0xf0]  ;;  %v950_v15 = vpack.c.bf16 %v804_v42, %v803_v53  ;;  %v811_v6 = vld [vmem:[%s4124_s17 + $0x710] sm:$0xff]  ;;  %v838_v53 = vld [vmem:[%s4124_s17 + $0x7e8] sm:$0xff] }
 0x1a4   : > { %v1966_v29 = vadd.f32 %v1965_v17, %v5080_v30  ;;  %v3658_v36 = vor.u32 %v3834_v0, %v3657_v23  ;;  %v797_v39 = vld [vmem:[%s4124_s17 + $0x6a0] sm:$0xff]  ;;  %v812_v17 = vld [vmem:[%s4124_s17 + $0x718] sm:$0xff] }
 0x1a5   : > { %v947_v8 = vpack.c.bf16 %v798_v56, %v797_v39  ;;  %v954_v23 = vpack.c.bf16 %v812_v17, %v811_v6  ;;  %v831_v6 = vld [vmem:[%s4124_s17 + $0x7b0] sm:$0xff] }
 0x1a6   : > { %v5210_v30 = vadd.f32 %v5106_v34, %v1966_v29  ;;  %v5224_v34 = vpop.f32.mrf.mxu2  ;;  %2378 = vmatpush.bf16.msrb.mxu2 %v957_v13  ;;  %v837_v29 = vld [vmem:[%s4124_s17 + $0x7e0] sm:$0xff] }
 0x1a7   : > { %2328 = vmatpush.bf16.msra.mxu1 %v950_v15  ;;  %v967_v0 = vpack.c.bf16 %v838_v53, %v837_v29  ;;  %v809_v13 = vld [vmem:[%s4124_s17 + $0x700] sm:$0xff] }
 0x1a8   : > { %v829_v29 = vld [vmem:[%s4124_s17 + $0x7a0] sm:$0xff] }
 0x1a9   : > { %2222 = vmatmul.bf16.gmra.mxu2 %v3666_v61 }
 0x1aa   : > { %v2058_v7 = vpop.f32.mrf.mxu3  ;;  %v1929_v48 = vpop.f32.mrf.mxu0  ;;  %2379 = vmatpush.bf16.msrb.mxu2 %v956_v45  ;;  %v794_v45 = vld [vmem:[%s4124_s17 + $0x688] sm:$0xff] }
 0x1ab   : > { %v5237_v43 = vadd.f32 %v2058_v7, %v5146_v32  ;;  %v5240_v4 = vadd.f32 %v1929_v48, %v4989_v20  ;;  %v1968_v37 = vpop.f32.mrf.mxu1  ;;  %2329 = vmatpush.bf16.msra.mxu1 %v949_v40  ;;  %v799_v32 = vld [vmem:[%s4124_s17 + $0x6b0] sm:$0xff]  ;;  %v3725_v48 = vld [vmem:[%s6109_s1 + $0x74] sm:$0xf0] }
 0x1ac   : > { %v1969_v24 = vadd.f32 %v1968_v37, %v5119_v10  ;;  %v948_v20 = vpack.c.bf16 %v800_v46, %v799_v32  ;;  %v839_v10 = vld [vmem:[%s4124_s17 + $0x7f0] sm:$0xff]  ;;  %v833_v37 = vld [vmem:[%s4124_s17 + $0x7c0] sm:$0xff]  ;;  %v3226_v32 = vor.u32 %v3724_v31, %v3225_v18  ;;  %v826_v18 = vld [vmem:[%s4124_s17 + $0x788] sm:$0xff] }
 0x1ad   : > { %2124 = vmatmul.bf16.gmra.mxu0 %v3658_v36  ;;  %v968_v47 = vpack.c.bf16 %v840_v58, %v839_v10 }
 0x1ae   : > { %v5247_v27 = vadd.f32 %v5127_v19, %v1969_v24  ;;  %2163 = vmatmul.bf16.gmra.mxu1 %v3534_v44  ;;  %v5252_v2 = vpop.f32.mrf.mxu2  ;;  %2380 = vmatpush.bf16.msrb.mxu2 %v955_v60  ;;  %v3234_v44 = vor.u32 %v3725_v48, %v3233_v33  ;;  %v965_v60 = vpack.c.bf16 %v834_v52, %v833_v37 }
 0x1af   : > { %2256 = vmatmul.bf16.gmra.mxu3 %v3478_v54  ;;  %2330 = vmatpush.bf16.msra.mxu1 %v948_v20  ;;  %v793_v54 = vld [vmem:[%s4124_s17 + $0x680] sm:$0xff] }
 0x1b0   : > { %2424 = vmatpush.bf16.msra.mxu3 %v968_v47  ;;  %v945_v46 = vpack.c.bf16 %v794_v45, %v793_v54 }
 0x1b2   : > { %v2061_v19 = vpop.f32.mrf.mxu3  ;;  %v1931_v62 = vpop.f32.mrf.mxu0  ;;  %2381 = vmatpush.bf16.msrb.mxu2 %v954_v23 }
 0x1b3   : > { %v5261_v42 = vadd.f32 %v2061_v19, %v5183_v35  ;;  %v5264_v15 = vadd.f32 %v1931_v62, %v5024_v41  ;;  %v1970_v3 = vpop.f32.mrf.mxu1  ;;  %2331 = vmatpush.bf16.msra.mxu1 %v947_v8  ;;  %v3810_v35 = vld [vmem:[%s6109_s1 + $0x324] sm:$0xf]  ;;  %v810_v41 = vld [vmem:[%s4124_s17 + $0x708] sm:$0xff]  ;;  %v832_v19 = vld [vmem:[%s4124_s17 + $0x7b8] sm:$0xff] }
 0x1b4   : > { %v1971_v59 = vadd.f32 %v1970_v3, %v5134_v21  ;;  %2425 = vmatpush.bf16.msra.mxu3 %v967_v0  ;;  %v836_v21 = vld [vmem:[%s4124_s17 + $0x7d8] sm:$0xff]  ;;  %v953_v7 = vpack.c.bf16 %v810_v41, %v809_v13  ;;  %v3598_v10 = vor.u32 %v3810_v35, %v3595_v14  ;;  %v964_v8 = vpack.c.bf16 %v832_v19, %v831_v6  ;;  %v3740_v14 = vld [vmem:[%s6109_s1 + $0xec] sm:$0xf0] }
 0x1b5   : > { %v966_v36 = vpack.c.bf16 %v836_v21, %v835_v25  ;;  %v3741_v25 = vld [vmem:[%s6109_s1 + $0xf4] sm:$0xf0] }
 0x1b6   : > { %v5280_v61 = vadd.f32 %v5160_v16, %v1971_v59  ;;  %v3539_v16 = vld [vmem:[%s6109_s1 + $0x2e8] sm:$0xf0]  ;;  %v5294_v40 = vpop.f32.mrf.mxu2  ;;  %2382 = vmatpush.bf16.msrb.mxu2 %v953_v7  ;;  %v827_v59 = vld [vmem:[%s4124_s17 + $0x790] sm:$0xff]  ;;  %v3757_v6 = vld [vmem:[%s6109_s1 + $0x174] sm:$0xf0] }
 0x1b7   : > { %2332 = vmatpush.bf16.msra.mxu1 %v946_v22  ;;  %v3542_v58 = vor.u32 %v3795_v28, %v3539_v16  ;;  %v962_v13 = vpack.c.bf16 %v828_v57, %v827_v59  ;;  %v3603_v22 = vld [vmem:[%s6109_s1 + $0x368] sm:$0xf0]  ;;  %v825_v28 = vld [vmem:[%s4124_s17 + $0x780] sm:$0xff] }
 0x1b8   : > { %2426 = vmatpush.bf16.msra.mxu3 %v966_v36  ;;  %v961_v36 = vpack.c.bf16 %v826_v18, %v825_v28 }
 0x1b9   : > { %2383 = vmatmul.bf16.vlgmr.msrb.gmra.mxu2 %v3234_v44 }
 0x1ba   : > { %v2063_v24 = vpop.f32.mrf.mxu3  ;;  %v2090_v63 = vpop.f32.mrf.mxu0 }
 0x1bb   : > { %v5307_v20 = vadd.f32 %v2063_v24, %v5210_v30  ;;  %v1973_v47 = vpop.f32.mrf.mxu1  ;;  %v5310_v39 = vadd.f32 %v2090_v63, %v5032_v1  ;;  %2333 = vmatpush.bf16.msra.mxu1 %v945_v46  ;;  %v830_v1 = vld [vmem:[%s4124_s17 + $0x7a8] sm:$0xff]  ;;  %s399_s17 = scalar_lea.vmem %s6117_s9, %s4118_s13  ;;  %s386_s13 = scalar_lea.vmem [#allocation3], %s385_s2 }
 0x1bc   : > { %v1974_v56 = vadd.f32 %v1973_v47, %v5176_v55  ;;  %2427 = vmatpush.bf16.msra.mxu3 %v965_v60  ;;  %v963_v55 = vpack.c.bf16 %v830_v1, %v829_v29  ;;  %v3353_v60 = vld [vmem:[%s6109_s1 + $0x130] sm:$0xf]  ;;  %v3227_v47 = vld [vmem:[%s6109_s1 + $0x70] sm:$0xf0] }
 0x1bd   : > { %2285 = vmatmul.bf16.vlgmr.msrb.gmra.mxu0 %v3226_v32 }
 0x1be   : > { %v2023_v30 = vadd.f32 %v5186_v51, %v1974_v56  ;;  %2168 = vmatmul.bf16.gmra.mxu1 %v3598_v10  ;;  %v5316_v17 = vpop.f32.mrf.mxu2 }
 0x1bf   : > { %2261 = vmatmul.bf16.gmra.mxu3 %v3542_v58 }
 0x1c0   : > { %2428 = vmatpush.bf16.msra.mxu3 %v964_v8 }
 0x1c2   : > { %v2066_v53 = vpop.f32.mrf.mxu3  ;;  %v2092_v23 = vpop.f32.mrf.mxu0 }
 0x1c3   : > { %v5321_v62 = vadd.f32 %v2066_v53, %v5247_v27  ;;  %v1975_v0 = vpop.f32.mrf.mxu1  ;;  %v5324_v3 = vadd.f32 %v2092_v23, %v5064_v9  ;;  %v3659_v27 = vld [vmem:[%s6109_s1 + $0x3e0] sm:$0xf0]  ;;  %v3811_v9 = vld [vmem:[%s6109_s1 + $0x32c] sm:$0xf] }
 0x1c4   : > { %v1976_v51 = vadd.f32 %v1975_v0, %v5196_v50  ;;  %2429 = vmatpush.bf16.msra.mxu3 %v963_v55  ;;  %v3289_v50 = vld [vmem:[%s6109_s1 + $0xb0] sm:$0xf]  ;;  %v3662_v48 = vor.u32 %v3826_v49, %v3659_v27  ;;  %v3606_v44 = vor.u32 %v3811_v9, %v3603_v22  ;;  %v3235_v22 = vld [vmem:[%s6109_s1 + $0x78] sm:$0xf0] }
 0x1c5   : > { %v3290_v7 = vor.u32 %v3740_v14, %v3289_v50  ;;  %v3732_v14 = vld [vmem:[%s6109_s1 + $0xb4] sm:$0xf] }
 0x1c6   : > { %v2025_v35 = vadd.f32 %v5224_v34, %v1976_v51  ;;  %v5348_v41 = vpop.f32.mrf.mxu2  ;;  %v3297_v34 = vld [vmem:[%s6109_s1 + $0xb8] sm:$0xf] }
 0x1c7   : > { %v3298_v21 = vor.u32 %v3741_v25, %v3297_v34  ;;  %v3773_v25 = vld [vmem:[%s6109_s1 + $0x1f4] sm:$0xf0] }
 0x1c8   : > { %2430 = vmatpush.bf16.msra.mxu3 %v962_v13 }
 0x1c9   : > { %2388 = vmatmul.bf16.gmra.mxu2 %v3298_v21 }
 0x1ca   : > { %v2068_v31 = vpop.f32.mrf.mxu3  ;;  %v2095_v33 = vpop.f32.mrf.mxu0 }
 0x1cb   : > { %v5359_v16 = vadd.f32 %v2068_v31, %v5280_v61  ;;  %v1978_v54 = vpop.f32.mrf.mxu1  ;;  %v5362_v45 = vadd.f32 %v2095_v33, %v5077_v38 }
 0x1cc   : > { %v1979_v37 = vadd.f32 %v1978_v54, %v5240_v4  ;;  %2431 = vmatpush.bf16.msra.mxu3 %v961_v36  ;;  %v3827_v4 = vld [vmem:[%s6109_s1 + $0x3ac] sm:$0xf] }
 0x1cd   : > { %2290 = vmatmul.bf16.gmra.mxu0 %v3290_v7 }
 0x1ce   : > { %v2028_v24 = vadd.f32 %v5252_v2, %v1979_v37  ;;  %2173 = vmatmul.bf16.gmra.mxu1 %v3662_v48  ;;  %v2193_v32 = vpop.f32.mrf.mxu2  ;;  %v3667_v2 = vld [vmem:[%s6109_s1 + $0x3e8] sm:$0xf0] }
 0x1cf   : > { %2266 = vmatmul.bf16.gmra.mxu3 %v3606_v44  ;;  %v3670_v53 = vor.u32 %v3827_v4, %v3667_v2 }
 0x1d2   : > { %v2071_v46 = vpop.f32.mrf.mxu3  ;;  %v2097_v52 = vpop.f32.mrf.mxu0 }
 0x1d3   : > { %v5366_v61 = vadd.f32 %v2071_v46, %v2023_v30  ;;  %v1980_v63 = vpop.f32.mrf.mxu1  ;;  %v5369_v10 = vadd.f32 %v2097_v52, %v5116_v26  ;;  %v3756_v26 = vld [vmem:[%s6109_s1 + $0x16c] sm:$0xf0] }
 0x1d4   : > { %v1981_v38 = vadd.f32 %v1980_v63, %v5264_v15  ;;  %v3716_v15 = vld [vmem:[%s6109_s1 + $0x34] sm:$0xf]  ;;  %v3354_v8 = vor.u32 %v3756_v26, %v3353_v60  ;;  %v3299_v60 = vld [vmem:[%s6109_s1 + $0xf8] sm:$0xf0] }
 0x1d5   : > { %v3230_v55 = vor.u32 %v3716_v15, %v3227_v47  ;;  %v3489_v15 = vld [vmem:[%s6109_s1 + $0x238] sm:$0xf] }
 0x1d6   : > { %v2030_v58 = vadd.f32 %v5294_v40, %v1981_v38  ;;  %v2195_v56 = vpop.f32.mrf.mxu2  ;;  %v3361_v40 = vld [vmem:[%s6109_s1 + $0x138] sm:$0xf] }
 0x1d7   : > { %v3362_v19 = vor.u32 %v3757_v6, %v3361_v40  ;;  %v3789_v47 = vld [vmem:[%s6109_s1 + $0x274] sm:$0xf0] }
 0x1d9   : > { %2393 = vmatmul.bf16.gmra.mxu2 %v3362_v19 }
 0x1da   : > { %v2073_v30 = vpop.f32.mrf.mxu3  ;;  %v2100_v1 = vpop.f32.mrf.mxu0 }
 0x1db   : > { %v5397_v29 = vadd.f32 %v2073_v30, %v2025_v35  ;;  %v5400_v23 = vadd.f32 %v2100_v1, %v5131_v5  ;;  %v2139_v0 = vpop.f32.mrf.mxu1 }
 0x1dc   : > { %v2140_v51 = vadd.f32 %v2139_v0, %v5310_v39  ;;  %v3417_v39 = vld [vmem:[%s6109_s1 + $0x1b0] sm:$0xf] }
 0x1dd   : > { %2295 = vmatmul.bf16.gmra.mxu0 %v3354_v8 }
 0x1de   : > { %v2189_v59 = vadd.f32 %v5316_v17, %v2140_v51  ;;  %2334 = vmatmul.bf16.vlgmr.msra.gmra.mxu1 %v3230_v55  ;;  %v2198_v57 = vpop.f32.mrf.mxu2  ;;  %v3772_v17 = vld [vmem:[%s6109_s1 + $0x1ec] sm:$0xf0] }
 0x1df   : > { %2271 = vmatmul.bf16.gmra.mxu3 %v3670_v53  ;;  %v3418_v18 = vor.u32 %v3772_v17, %v3417_v39  ;;  %v3545_v39 = vld [vmem:[%s6109_s1 + $0x2b0] sm:$0xf]  ;;  %v3764_v17 = vld [vmem:[%s6109_s1 + $0x1b4] sm:$0xf] }
 0x1e2   : > { %v2076_v49 = vpop.f32.mrf.mxu3  ;;  %v2102_v13 = vpop.f32.mrf.mxu0 }
 0x1e3   : > { %v5404_v27 = vadd.f32 %v2076_v49, %v2028_v24  ;;  %v5407_v35 = vadd.f32 %v2102_v13, %v5173_v12  ;;  %v2141_v9 = vpop.f32.mrf.mxu1  ;;  %v3291_v12 = vld [vmem:[%s6109_s1 + $0xf0] sm:$0xf0] }
 0x1e4   : > { %v2142_v5 = vadd.f32 %v2141_v9, %v5324_v3  ;;  %v3717_v3 = vld [vmem:[%s6109_s1 + $0x3c] sm:$0xf]  ;;  %v3294_v36 = vor.u32 %v3732_v14, %v3291_v12 }
 0x1e5   : > { %v3238_v33 = vor.u32 %v3717_v3, %v3235_v22  ;;  %v3363_v14 = vld [vmem:[%s6109_s1 + $0x178] sm:$0xf0]  ;;  %v3553_v3 = vld [vmem:[%s6109_s1 + $0x2b8] sm:$0xf] }
 0x1e6   : > { %v2191_v50 = vadd.f32 %v5348_v41, %v2142_v5  ;;  %v2200_v34 = vpop.f32.mrf.mxu2  ;;  %v3425_v41 = vld [vmem:[%s6109_s1 + $0x1b8] sm:$0xf] }
 0x1e7   : > { %v3426_v21 = vor.u32 %v3773_v25, %v3425_v41  ;;  %v3805_v22 = vld [vmem:[%s6109_s1 + $0x2f4] sm:$0xf0] }
 0x1e9   : > { %2398 = vmatmul.bf16.gmra.mxu2 %v3426_v21 }
 0x1ea   : > { %v2078_v28 = vpop.f32.mrf.mxu3  ;;  %v2105_v7 = vpop.f32.mrf.mxu0 }
 0x1eb   : > { %v5435_v31 = vadd.f32 %v2078_v28, %v2030_v58  ;;  %v5438_v48 = vadd.f32 %v2105_v7, %v5193_v11  ;;  %v2144_v44 = vpop.f32.mrf.mxu1  ;;  %v3748_v58 = vld [vmem:[%s6109_s1 + $0x134] sm:$0xf] }
 0x1ec   : > { %v2145_v54 = vadd.f32 %v2144_v44, %v5362_v45  ;;  %v3481_v45 = vld [vmem:[%s6109_s1 + $0x230] sm:$0xf] }
 0x1ed   : > { %2300 = vmatmul.bf16.gmra.mxu0 %v3418_v18 }
 0x1ee   : > { %v2194_v37 = vadd.f32 %v2193_v32, %v2145_v54  ;;  %2339 = vmatmul.bf16.gmra.mxu1 %v3294_v36  ;;  %v2203_v24 = vpop.f32.mrf.mxu2  ;;  %v3788_v32 = vld [vmem:[%s6109_s1 + $0x26c] sm:$0xf0] }
 0x1ef   : > { %2432 = vmatmul.bf16.vlgmr.msra.gmra.mxu3 %v3238_v33  ;;  %v3482_v6 = vor.u32 %v3788_v32, %v3481_v45 }
 0x1f2   : > { %v2237_v46 = vpop.f32.mrf.mxu3  ;;  %v2107_v63 = vpop.f32.mrf.mxu0 }
 0x1f3   : > { %v5441_v52 = vadd.f32 %v2237_v46, %v2189_v59  ;;  %v5444_v38 = vadd.f32 %v2107_v63, %v5237_v43  ;;  %v2146_v4 = vpop.f32.mrf.mxu1  ;;  %v3355_v43 = vld [vmem:[%s6109_s1 + $0x170] sm:$0xf0] }
 0x1f4   : > { %v2147_v11 = vadd.f32 %v2146_v4, %v5369_v10  ;;  %v3733_v10 = vld [vmem:[%s6109_s1 + $0xbc] sm:$0xf]  ;;  %v3358_v8 = vor.u32 %v3748_v58, %v3355_v43  ;;  %v3617_v43 = vld [vmem:[%s6109_s1 + $0x338] sm:$0xf] }
 0x1f5   : > { %v3302_v1 = vor.u32 %v3733_v10, %v3299_v60  ;;  %v3427_v58 = vld [vmem:[%s6109_s1 + $0x1f8] sm:$0xf0]  ;;  %v3821_v10 = vld [vmem:[%s6109_s1 + $0x374] sm:$0xf0] }
 0x1f6   : > { %v2196_v2 = vadd.f32 %v2195_v56, %v2147_v11  ;;  %v2205_v26 = vpop.f32.mrf.mxu2  ;;  %v3490_v56 = vor.u32 %v3789_v47, %v3489_v15  ;;  %v3618_v60 = vor.u32 %v3821_v10, %v3617_v43 }
 0x1f9   : > { %2403 = vmatmul.bf16.gmra.mxu2 %v3490_v56 }
 0x1fa   : > { %v2239_v40 = vpop.f32.mrf.mxu3  ;;  %v5473_v30 = vpop.f32.mrf.mxu0 }
 0x1fb   : > { %v5471_v19 = vadd.f32 %v2239_v40, %v2191_v50  ;;  %v2149_v53 = vpop.f32.mrf.mxu1  ;;  %v3419_v50 = vld [vmem:[%s6109_s1 + $0x1f0] sm:$0xf0] }
 0x1fc   : > { %v2150_v55 = vadd.f32 %v2149_v53, %v5400_v23  ;;  %v3804_v23 = vld [vmem:[%s6109_s1 + $0x2ec] sm:$0xf0]  ;;  %v3422_v18 = vor.u32 %v3764_v17, %v3419_v50  ;;  %v3491_v50 = vld [vmem:[%s6109_s1 + $0x278] sm:$0xf0] }
 0x1fd   : > { %2305 = vmatmul.bf16.gmra.mxu0 %v3482_v6  ;;  %v3546_v25 = vor.u32 %v3804_v23, %v3545_v39  ;;  %v3836_v17 = vld [vmem:[%s6109_s1 + $0x3ec] sm:$0xf0] }
 0x1fe   : > { %v2199_v0 = vadd.f32 %v2198_v57, %v2150_v55  ;;  %2344 = vmatmul.bf16.gmra.mxu1 %v3358_v8  ;;  %v5476_v51 = vpop.f32.mrf.mxu2 }
 0x1ff   : > { %2437 = vmatmul.bf16.gmra.mxu3 %v3302_v1 }
 0x202   : > { %v2242_v59 = vpop.f32.mrf.mxu3  ;;  %v2112_v13 = vpop.f32.mrf.mxu0 }
 0x203   : > { %v5478_v49 = vadd.f32 %v2242_v59, %v2194_v37  ;;  %v2151_v9 = vpop.f32.mrf.mxu1 }
 0x204   : > { %v2152_v5 = vadd.f32 %v2151_v9, %v5407_v35  ;;  %v3749_v35 = vld [vmem:[%s6109_s1 + $0x13c] sm:$0xf] }
 0x205   : > { %v3366_v7 = vor.u32 %v3749_v35, %v3363_v14  ;;  %v3681_v35 = vld [vmem:[%s6109_s1 + $0x3b8] sm:$0xf] }
 0x206   : > { %v2201_v57 = vadd.f32 %v2200_v34, %v2152_v5  ;;  %v5499_v12 = vpop.f32.mrf.mxu2  ;;  %v3554_v34 = vor.u32 %v3805_v22, %v3553_v3  ;;  %v3837_v14 = vld [vmem:[%s6109_s1 + $0x3f4] sm:$0xf0]  ;;  %v2111_v22 = vadd.f32 %v5473_v30, %v5261_v42 }
 0x207   : > { %v3682_v3 = vor.u32 %v3837_v14, %v3681_v35 }
 0x209   : > { %2408 = vmatmul.bf16.gmra.mxu2 %v3554_v34 }
 0x20a   : > { %v2244_v41 = vpop.f32.mrf.mxu3  ;;  %v2115_v28 = vpop.f32.mrf.mxu0 }
 0x20b   : > { %v5507_v21 = vadd.f32 %v2244_v41, %v2196_v2  ;;  %v2154_v36 = vpop.f32.mrf.mxu1  ;;  %v3780_v2 = vld [vmem:[%s6109_s1 + $0x234] sm:$0xf] }
 0x20c   : > { %v2155_v33 = vadd.f32 %v2154_v36, %v5438_v48  ;;  %v3609_v48 = vld [vmem:[%s6109_s1 + $0x330] sm:$0xf] }
 0x20d   : > { %2310 = vmatmul.bf16.gmra.mxu0 %v3546_v25  ;;  %v2116_v25 = vadd.f32 %v2115_v28, %v5321_v62 }
 0x20e   : > { %v2204_v44 = vadd.f32 %v2203_v24, %v2155_v33  ;;  %2349 = vmatmul.bf16.gmra.mxu1 %v3422_v18  ;;  %v5510_v54 = vpop.f32.mrf.mxu2  ;;  %v3820_v24 = vld [vmem:[%s6109_s1 + $0x36c] sm:$0xf0] }
 0x20f   : > { %2442 = vmatmul.bf16.gmra.mxu3 %v3366_v7  ;;  %v3610_v15 = vor.u32 %v3820_v24, %v3609_v48 }
 0x212   : > { %v2247_v37 = vpop.f32.mrf.mxu3  ;;  %v2117_v63 = vpop.f32.mrf.mxu0 }
 0x213   : > { %v5512_v46 = vadd.f32 %v2247_v37, %v2199_v0  ;;  %v5515_v4 = vadd.f32 %v2117_v63, %v5359_v16  ;;  %v2156_v11 = vpop.f32.mrf.mxu1  ;;  %v3483_v16 = vld [vmem:[%s6109_s1 + $0x270] sm:$0xf0]  ;;  %v2113_v0 = vadd.f32 %v2112_v13, %v5307_v20  ;;  %v3781_v13 = vld [vmem:[%s6109_s1 + $0x23c] sm:$0xf] }
 0x214   : > { %v2157_v45 = vadd.f32 %v2156_v11, %v5444_v38  ;;  %v3765_v38 = vld [vmem:[%s6109_s1 + $0x1bc] sm:$0xf]  ;;  %v3486_v6 = vor.u32 %v3780_v2, %v3483_v16  ;;  %v3796_v20 = vld [vmem:[%s6109_s1 + $0x2b4] sm:$0xf]  ;;  %v3494_v33 = vor.u32 %v3781_v13, %v3491_v50 }
 0x215   : > { %v3430_v8 = vor.u32 %v3765_v38, %v3427_v58  ;;  %v3611_v2 = vld [vmem:[%s6109_s1 + $0x370] sm:$0xf0]  ;;  %v3555_v16 = vld [vmem:[%s6109_s1 + $0x2f8] sm:$0xf0] }
 0x216   : > { %v2206_v32 = vadd.f32 %v2205_v26, %v2157_v45  ;;  %v5542_v47 = vpop.f32.mrf.mxu2 }
 0x219   : > { %2413 = vmatmul.bf16.gmra.mxu2 %v3618_v60 }
 0x21a   : > { %v2249_v26 = vpop.f32.mrf.mxu3  ;;  %v2120_v40 = vpop.f32.mrf.mxu0 }
 0x21b   : > { %v5544_v56 = vadd.f32 %v2249_v26, %v2201_v57  ;;  %v2121_v1 = vadd.f32 %v2120_v40, %v5366_v61  ;;  %v2159_v53 = vpop.f32.mrf.mxu1  ;;  %v3673_v61 = vld [vmem:[%s6109_s1 + $0x3b0] sm:$0xf] }
 0x21c   : > { %v3674_v41 = vor.u32 %v3836_v17, %v3673_v61  ;;  %v2160_v63 = vadd.f32 %v2159_v53, %v2111_v22 }
 0x21d   : > { %2315 = vmatmul.bf16.gmra.mxu0 %v3610_v15 }
 0x21e   : > { %2354 = vmatmul.bf16.gmra.mxu1 %v3486_v6  ;;  %v5551_v23 = vpop.f32.mrf.mxu2  ;;  %v2209_v42 = vadd.f32 %v5476_v51, %v2160_v63  ;;  %v3797_v51 = vld [vmem:[%s6109_s1 + $0x2bc] sm:$0xf] }
 0x21f   : > { %2447 = vmatmul.bf16.gmra.mxu3 %v3430_v8  ;;  %v3558_v60 = vor.u32 %v3797_v51, %v3555_v16 }
 0x222   : > { %v2252_v55 = vpop.f32.mrf.mxu3  ;;  %v2122_v9 = vpop.f32.mrf.mxu0 }
 0x223   : > { %v5548_v59 = vadd.f32 %v2252_v55, %v2204_v44  ;;  %v2123_v5 = vadd.f32 %v2122_v9, %v5397_v29  ;;  %v2161_v39 = vpop.f32.mrf.mxu1  ;;  %v3547_v29 = vld [vmem:[%s6109_s1 + $0x2f0] sm:$0xf0] }
 0x224   : > { %v2162_v57 = vadd.f32 %v2161_v39, %v2113_v0  ;;  %v3550_v36 = vor.u32 %v3796_v20, %v3547_v29 }
 0x226   : > { %v2220_v45 = vpop.f32.mrf.mxu2  ;;  %v2211_v38 = vadd.f32 %v5499_v12, %v2162_v57  ;;  %v3828_v57 = vld [vmem:[%s6109_s1 + $0x3b4] sm:$0xf] }
 0x229   : > { %2418 = vmatmul.bf16.gmra.mxu2 %v3682_v3 }
 0x22a   : > { %v2254_v34 = vpop.f32.mrf.mxu3  ;;  %v2125_v7 = vpop.f32.mrf.mxu0 }
 0x22b   : > { %v5580_v18 = vadd.f32 %v2254_v34, %v2206_v32  ;;  %v2126_v44 = vadd.f32 %v2125_v7, %v5404_v27  ;;  %v2164_v37 = vpop.f32.mrf.mxu1  ;;  %v3812_v27 = vld [vmem:[%s6109_s1 + $0x334] sm:$0xf] }
 0x22c   : > { %v2165_v11 = vadd.f32 %v2164_v37, %v2116_v25  ;;  %v3614_v10 = vor.u32 %v3812_v27, %v3611_v2 }
 0x22d   : > { %2320 = vmatmul.bf16.gmra.mxu0 %v3674_v41 }
 0x22e   : > { %2359 = vmatmul.bf16.gmra.mxu1 %v3550_v36  ;;  %v2214_v6 = vadd.f32 %v5510_v54, %v2165_v11  ;;  %v3813_v54 = vld [vmem:[%s6109_s1 + $0x33c] sm:$0xf] }
 0x22f   : > { %2452 = vmatmul.bf16.gmra.mxu3 %v3494_v33  ;;  %v3829_v33 = vld [vmem:[%s6109_s1 + $0x3bc] sm:$0xf] }
 0x232   : > { %v2257_v30 = vpop.f32.mrf.mxu3  ;;  %v2127_v62 = vpop.f32.mrf.mxu0 }
 0x233   : > { %v5584_v48 = vadd.f32 %v2257_v30, %v2209_v42  ;;  %v2128_v28 = vadd.f32 %v2127_v62, %v5435_v31  ;;  %v2166_v24 = vpop.f32.mrf.mxu1  ;;  %v2223_v31 = vpop.f32.mrf.mxu2 }
 0x234   : > { %v2167_v32 = vadd.f32 %v2166_v24, %v5515_v4 }
 0x236   : > { %v2216_v61 = vadd.f32 %v5542_v47, %v2167_v32 }
 0x23a   : > { %v2259_v4 = vpop.f32.mrf.mxu3  ;;  %v2286_v43 = vpop.f32.mrf.mxu0 }
 0x23b   : > { %v5601_v58 = vadd.f32 %v2259_v4, %v2211_v38  ;;  %v2169_v26 = vpop.f32.mrf.mxu1  ;;  %v2287_v15 = vadd.f32 %v2286_v43, %v5441_v52  ;;  %v2225_v53 = vpop.f32.mrf.mxu2  ;;  %v3675_v52 = vld [vmem:[%s6109_s1 + $0x3f0] sm:$0xf0] }
 0x23c   : > { %v2170_v40 = vadd.f32 %v2169_v26, %v2121_v1  ;;  %v3619_v1 = vld [vmem:[%s6109_s1 + $0x378] sm:$0xf0]  ;;  %v3678_v20 = vor.u32 %v3828_v57, %v3675_v52 }
 0x23d   : > { %v3622_v29 = vor.u32 %v3813_v54, %v3619_v1 }
 0x23e   : > { %2364 = vmatmul.bf16.gmra.mxu1 %v3614_v10  ;;  %v2219_v3 = vadd.f32 %v5551_v23, %v2170_v40 }
 0x23f   : > { %2457 = vmatmul.bf16.gmra.mxu3 %v3558_v60 }
 0x242   : > { %v2262_v8 = vpop.f32.mrf.mxu3  ;;  %v2288_v0 = vpop.f32.mrf.mxu0 }
 0x243   : > { %v5605_v55 = vadd.f32 %v2262_v8, %v2214_v6  ;;  %v2171_v12 = vpop.f32.mrf.mxu1  ;;  %v2289_v9 = vadd.f32 %v2288_v0, %v5471_v19  ;;  %v2384_v35 = vpop.f32.mrf.mxu2 }
 0x244   : > { %v2172_v39 = vadd.f32 %v2171_v12, %v2123_v5 }
 0x24a   : > { %v2264_v19 = vpop.f32.mrf.mxu3  ;;  %v2291_v17 = vpop.f32.mrf.mxu0 }
 0x24b   : > { %v5621_v5 = vadd.f32 %v2264_v19, %v2216_v61  ;;  %v2174_v13 = vpop.f32.mrf.mxu1  ;;  %v2292_v50 = vadd.f32 %v2291_v17, %v5478_v49  ;;  %v2386_v36 = vpop.f32.mrf.mxu2  ;;  %v3683_v49 = vld [vmem:[%s6109_s1 + $0x3f8] sm:$0xf0] }
 0x24c   : > { %v2175_v14 = vadd.f32 %v2174_v13, %v2126_v44  ;;  %v2221_v44 = vadd.f32 %v2220_v45, %v2172_v39  ;;  %v3686_v11 = vor.u32 %v3829_v33, %v3683_v49 }
 0x24e   : > { %2369 = vmatmul.bf16.gmra.mxu1 %v3678_v20 }
 0x24f   : > { %2462 = vmatmul.bf16.gmra.mxu3 %v3622_v29 }
 0x252   : > { %v2267_v22 = vpop.f32.mrf.mxu3  ;;  %v2293_v41 = vpop.f32.mrf.mxu0 }
 0x253   : > { %v5625_v34 = vadd.f32 %v2267_v22, %v2219_v3  ;;  %v2176_v47 = vpop.f32.mrf.mxu1  ;;  %v2294_v25 = vadd.f32 %v2293_v41, %v5507_v21  ;;  %v2389_v62 = vpop.f32.mrf.mxu2 }
 0x254   : > { %v2177_v7 = vadd.f32 %v2176_v47, %v2128_v28  ;;  %v2224_v28 = vadd.f32 %v2223_v31, %v2175_v14 }
 0x256   : > { %v2226_v16 = vadd.f32 %v2225_v53, %v2177_v7 }
 0x25a   : > { %v2269_v37 = vpop.f32.mrf.mxu3  ;;  %v2296_v63 = vpop.f32.mrf.mxu0 }
 0x25b   : > { %v5634_v23 = vadd.f32 %v2269_v37, %v2221_v44  ;;  %v2297_v42 = vadd.f32 %v2296_v63, %v5512_v46  ;;  %v2335_v30 = vpop.f32.mrf.mxu1  ;;  %v2391_v4 = vpop.f32.mrf.mxu2 }
 0x25c   : > { %v2336_v21 = vadd.f32 %v2335_v30, %v2287_v15 }
 0x25e   : > { %v2385_v15 = vadd.f32 %v2384_v35, %v2336_v21 }
 0x25f   : > { %2467 = vmatmul.bf16.gmra.mxu3 %v3686_v11 }
 0x262   : > { %v2272_v24 = vpop.f32.mrf.mxu3  ;;  %v2298_v27 = vpop.f32.mrf.mxu0 }
 0x263   : > { %v5637_v32 = vadd.f32 %v2272_v24, %v2224_v28  ;;  %v2299_v2 = vadd.f32 %v2298_v27, %v5544_v56  ;;  %v2337_v51 = vpop.f32.mrf.mxu1  ;;  %v2394_v0 = vpop.f32.mrf.mxu2 }
 0x264   : > { %v2338_v45 = vadd.f32 %v2337_v51, %v2289_v9 }
 0x266   : > { %v2387_v53 = vadd.f32 %v2386_v36, %v2338_v45 }
 0x26a   : > { %v2274_v38 = vpop.f32.mrf.mxu3  ;;  %v2301_v10 = vpop.f32.mrf.mxu0 }
 0x26b   : > { %v5640_v43 = vadd.f32 %v2274_v38, %v2226_v16  ;;  %v2302_v46 = vadd.f32 %v2301_v10, %v5548_v59  ;;  %v2340_v60 = vpop.f32.mrf.mxu1  ;;  %v2396_v1 = vpop.f32.mrf.mxu2 }
 0x26c   : > { %v2341_v26 = vadd.f32 %v2340_v60, %v2292_v50 }
 0x26e   : > { %v2390_v61 = vadd.f32 %v2389_v62, %v2341_v26 }
 0x272   : > { %v2433_v31 = vpop.f32.mrf.mxu3  ;;  %v2303_v6 = vpop.f32.mrf.mxu0 }
 0x273   : > { %v5643_v40 = vadd.f32 %v2433_v31, %v2385_v15  ;;  %v2304_v8 = vadd.f32 %v2303_v6, %v5580_v18  ;;  %v2342_v56 = vpop.f32.mrf.mxu1  ;;  %v2399_v18 = vpop.f32.mrf.mxu2 }
 0x274   : > { %v2343_v12 = vadd.f32 %v2342_v56, %v2294_v25 }
 0x276   : > { %v2392_v13 = vadd.f32 %v2391_v4, %v2343_v12 }
 0x27a   : > { %v2435_v9 = vpop.f32.mrf.mxu3  ;;  %v2306_v57 = vpop.f32.mrf.mxu0 }
 0x27b   : > { %v5646_v39 = vadd.f32 %v2435_v9, %v2387_v53  ;;  %v2307_v52 = vadd.f32 %v2306_v57, %v5584_v48  ;;  %v2345_v59 = vpop.f32.mrf.mxu1  ;;  %v2401_v47 = vpop.f32.mrf.mxu2 }
 0x27c   : > { %v2346_v54 = vadd.f32 %v2345_v59, %v2297_v42 }
 0x27e   : > { %v2395_v22 = vadd.f32 %v2394_v0, %v2346_v54 }
 0x282   : > { %v2438_v19 = vpop.f32.mrf.mxu3  ;;  %v2308_v28 = vpop.f32.mrf.mxu0 }
 0x283   : > { %v5649_v17 = vadd.f32 %v2438_v19, %v2390_v61  ;;  %v2347_v20 = vpop.f32.mrf.mxu1  ;;  %v2404_v63 = vpop.f32.mrf.mxu2 }
 0x284   : > { %v2348_v29 = vadd.f32 %v2347_v20, %v2299_v2 }
 0x286   : > { %v2397_v33 = vadd.f32 %v2396_v1, %v2348_v29 }
 0x28a   : > { %v2440_v50 = vpop.f32.mrf.mxu3  ;;  %v2311_v45 = vpop.f32.mrf.mxu0 }
 0x28b   : > { %v5651_v35 = vadd.f32 %v2440_v50, %v2392_v13  ;;  %v2350_v14 = vpop.f32.mrf.mxu1  ;;  %v2406_v27 = vpop.f32.mrf.mxu2 }
 0x28c   : > { %v2351_v3 = vadd.f32 %v2350_v14, %v2302_v46 }
 0x28e   : > { %v2400_v30 = vadd.f32 %v2399_v18, %v2351_v3  ;;  %v2309_v18 = vadd.f32 %v2308_v28, %v5601_v58  ;;  %v2312_v58 = vadd.f32 %v2311_v45, %v5605_v55 }
 0x292   : > { %v2443_v41 = vpop.f32.mrf.mxu3  ;;  %v2313_v46 = vpop.f32.mrf.mxu0 }
 0x293   : > { %v5653_v48 = vadd.f32 %v2443_v41, %v2395_v22  ;;  %v2352_v25 = vpop.f32.mrf.mxu1  ;;  %v2409_v10 = vpop.f32.mrf.mxu2 }
 0x294   : > { %v2353_v7 = vadd.f32 %v2352_v25, %v2304_v8 }
 0x296   : > { %v2402_v36 = vadd.f32 %v2401_v47, %v2353_v7 }
 0x29a   : > { %v2445_v49 = vpop.f32.mrf.mxu3  ;;  %v2316_v31 = vpop.f32.mrf.mxu0 }
 0x29b   : > { %v5655_v44 = vadd.f32 %v2445_v49, %v2397_v33  ;;  %v2355_v37 = vpop.f32.mrf.mxu1  ;;  %v2411_v15 = vpop.f32.mrf.mxu2  ;;  %v2317_v12 = vadd.f32 %v2316_v31, %v5625_v34 }
 0x29c   : > { %v2356_v11 = vadd.f32 %v2355_v37, %v2307_v52 }
 0x29e   : > { %v2405_v42 = vadd.f32 %v2404_v63, %v2356_v11 }
 0x2a2   : > { %v2448_v21 = vpop.f32.mrf.mxu3  ;;  %v2318_v53 = vpop.f32.mrf.mxu0 }
 0x2a3   : > { %v5657_v62 = vadd.f32 %v2448_v21, %v2400_v30  ;;  %v2357_v24 = vpop.f32.mrf.mxu1  ;;  %v2414_v56 = vpop.f32.mrf.mxu2  ;;  %v2319_v1 = vadd.f32 %v2318_v53, %v5634_v23 }
 0x2a4   : > { %v2358_v50 = vadd.f32 %v2357_v24, %v2309_v18 }
 0x2a6   : > { %v2407_v47 = vadd.f32 %v2406_v27, %v2358_v50  ;;  %v2478_v50 = vmax.f32 %v5655_v44, 0.0 }
 0x2aa   : > { %v2450_v2 = vpop.f32.mrf.mxu3  ;;  %v2321_v29 = vpop.f32.mrf.mxu0 }
 0x2ab   : > { %v5659_v51 = vadd.f32 %v2450_v2, %v2402_v36  ;;  %v2360_v16 = vpop.f32.mrf.mxu1  ;;  %v2416_v59 = vpop.f32.mrf.mxu2  ;;  %v2322_v23 = vadd.f32 %v2321_v29, %v5637_v32  ;;  %v2314_v2 = vadd.f32 %v2313_v46, %v5621_v5  ;;  %v2479_v5 = vmax.f32 %v5657_v62, 0.0 }
 0x2ac   : > { %v2361_v37 = vadd.f32 %v2360_v16, %v2312_v58 }
 0x2ad   : > { %v2508_v53 = vsel %vm2489_vm0, %v2479_v5, 0.0 }
 0x2ae   : > { %v2410_v28 = vadd.f32 %v2409_v10, %v2361_v37 }
 0x2b2   : > { %v2453_v38 = vpop.f32.mrf.mxu3  ;;  %v2323_v49 = vpop.f32.mrf.mxu0 }
 0x2b3   : > { %v5661_v4 = vadd.f32 %v2453_v38, %v2405_v42  ;;  %v2362_v60 = vpop.f32.mrf.mxu1  ;;  %v2419_v41 = vpop.f32.mrf.mxu2  ;;  %v2324_v42 = vadd.f32 %v2323_v49, %v5640_v43 }
 0x2b4   : > { %v2363_v38 = vadd.f32 %v2362_v60, %v2314_v2 }
 0x2b6   : > { %v2412_v46 = vadd.f32 %v2411_v15, %v2363_v38  ;;  %v2480_v15 = vmax.f32 %v5659_v51, 0.0 }
 0x2ba   : > { %v2455_v26 = vpop.f32.mrf.mxu3 }
 0x2bb   : > { %v2365_v8 = vpop.f32.mrf.mxu1  ;;  %v5677_v36 = vadd.f32 %v2455_v26, %v2407_v47  ;;  %v2421_v27 = vpop.f32.mrf.mxu2 }
 0x2bc   : > { %v2366_v9 = vadd.f32 %v2365_v8, %v2317_v12 }
 0x2bd   : > { %v6125_v30 = vmax.f32 %v5677_v36, 0.0  ;;  %v6133_v62 = vmax.f32 %v5677_v36, 0.0 }
 0x2be   : > { %v2415_v52 = vadd.f32 %v2414_v56, %v2366_v9  ;;  %v2476_v9 = vmax.f32 %v5651_v35, 0.0 }
 0x2bf   : > { %v2517_v43 = vsel %vm2489_vm0, %v6125_v30, 0.0 }
 0x2c2   : > { %v2458_v6 = vpop.f32.mrf.mxu3 }
 0x2c3   : > { %v2367_v57 = vpop.f32.mrf.mxu1  ;;  %v5688_v45 = vadd.f32 %v2458_v6, %v2410_v28 }
 0x2c4   : > { %v2368_v19 = vadd.f32 %v2367_v57, %v2319_v1  ;;  %v2481_v1 = vmax.f32 %v5661_v4, 0.0 }
 0x2c5   : > { %v2483_v31 = vmax.f32 %v5688_v45, 0.0 }
 0x2c6   : > { %v2417_v14 = vadd.f32 %v2416_v59, %v2368_v19  ;;  %v2499_v59 = vsel %vm2489_vm0, %v2476_v9, 0.0  ;;  %v2473_v19 = vmax.f32 %v5643_v40, 0.0  ;;  %v2514_v29 = vsel %vm2489_vm0, %v2481_v1, 0.0 }
 0x2c7   : > { %v2520_v60 = vsel %vm2489_vm0, %v2483_v31, 0.0 }
 0x2ca   : > { %v2460_v0 = vpop.f32.mrf.mxu3 }
 0x2cb   : > { %v2370_v13 = vpop.f32.mrf.mxu1  ;;  %v5701_v56 = vadd.f32 %v2460_v0, %v2412_v46 }
 0x2cc   : > { %v2371_v25 = vadd.f32 %v2370_v13, %v2322_v23  ;;  %v2474_v13 = vmax.f32 %v5646_v39, 0.0  ;;  %v2475_v23 = vmax.f32 %v5649_v17, 0.0 }
 0x2cd   : > { %v6124_v0 = vmax.f32 %v5701_v56, 0.0  ;;  %v6134_v4 = vmax.f32 %v5701_v56, 0.0 }
 0x2ce   : > { %v2420_v63 = vadd.f32 %v2419_v41, %v2371_v25  ;;  %v2496_v41 = vsel %vm2489_vm0, %v2475_v23, 0.0 }
 0x2cf   : > { %v2523_v57 = vsel %vm2489_vm0, %v6124_v0, 0.0 }
 0x2d2   : > { %v2463_v54 = vpop.f32.mrf.mxu3 }
 0x2d3   : > { %v5665_v61 = vadd.f32 %v2463_v54, %v2415_v52  ;;  %v2372_v32 = vpop.f32.mrf.mxu1  ;;  %v2511_v52 = vsel %vm2489_vm0, %v2480_v15, 0.0  ;;  %v2477_v54 = vmax.f32 %v5653_v48, 0.0 }
 0x2d4   : > { %v2373_v55 = vadd.f32 %v2372_v32, %v2324_v42 }
 0x2d5   : > { %v6122_v20 = vmax.f32 %v5665_v61, 0.0  ;;  %v2502_v18 = vsel %vm2489_vm0, %v2477_v54, 0.0  ;;  %v6136_v36 = vmax.f32 %v5665_v61, 0.0 }
 0x2d6   : > { %v2422_v10 = vadd.f32 %v2421_v27, %v2373_v55 }
 0x2d7   : > { %v2526_v34 = vsel %vm2489_vm0, %v6122_v20, 0.0 }
 0x2d8   : > { %2527 = vadd.xlane.f32.xlu2 %v2526_v34  ;;  %v2490_v34 = vsel %vm2489_vm0, %v2473_v19, 0.0 }
 0x2da   : > { %v2465_v3 = vpop.f32.mrf.mxu3 }
 0x2db   : > { %v5673_v22 = vadd.f32 %v2465_v3, %v2417_v14  ;;  %v2505_v14 = vsel %vm2489_vm0, %v2478_v50, 0.0  ;;  %v2493_v3 = vsel %vm2489_vm0, %v2474_v13, 0.0 }
 0x2dd   : > { %v6123_v7 = vmax.f32 %v5673_v22, 0.0  ;;  %v6135_v45 = vmax.f32 %v5673_v22, 0.0 }
 0x2df   : > { %v2529_v33 = vsel %vm2489_vm0, %v6123_v7, 0.0 }
 0x2e0   : > { %2530 = vadd.xlane.f32.xlu0 %v2529_v33 }
 0x2e2   : > { %v2468_v11 = vpop.f32.mrf.mxu3 }
 0x2e3   : > { %v5684_v21 = vadd.f32 %v2468_v11, %v2420_v63 }
 0x2e5   : > { %v6121_v24 = vmax.f32 %v5684_v21, 0.0  ;;  %v6137_v56 = vmax.f32 %v5684_v21, 0.0 }
 0x2e7   : > { %v2532_v16 = vsel %vm2489_vm0, %v6121_v24, 0.0 }
 0x2e8   : > { %2533 = vadd.xlane.f32.xlu2 %v2532_v16  ;;  %2518 = vadd.xlane.f32.xlu0 %v2517_v43 }
 0x2ea   : > { %v2470_v26 = vpop.f32.mrf.mxu3 }
 0x2eb   : > { %v5697_v8 = vadd.f32 %v2470_v26, %v2422_v10 }
 0x2ed   : > { %v6120_v6 = vmax.f32 %v5697_v8, 0.0  ;;  %v6138_v22 = vmax.f32 %v5697_v8, 0.0 }
 0x2ef   : > { %v2535_v12 = vsel %vm2489_vm0, %v6120_v6, 0.0 }
 0x2f0   : > { %2536 = vadd.xlane.f32.xlu1 %v2535_v12  ;;  %2521 = vadd.xlane.f32.xlu2 %v2520_v60 }
 0x2f1   : > { %2509 = vadd.xlane.f32.xlu0 %v2508_v53 }
 0x2f8   : > { %2524 = vadd.xlane.f32.xlu1 %v2523_v57  ;;  %2512 = vadd.xlane.f32.xlu2 %v2511_v52 }
 0x2f9   : > { %2500 = vadd.xlane.f32.xlu0 %v2499_v59 }
 0x300   : > { %2515 = vadd.xlane.f32.xlu1 %v2514_v29  ;;  %2503 = vadd.xlane.f32.xlu2 %v2502_v18 }
 0x301   : > { %2491 = vadd.xlane.f32.xlu0 %v2490_v34 }
 0x308   : > { %2506 = vadd.xlane.f32.xlu1 %v2505_v14  ;;  %2494 = vadd.xlane.f32.xlu2 %v2493_v3 }
 0x310   : > { %2497 = vadd.xlane.f32.xlu1 %v2496_v41 }
 0x34b   : > { %v2528_v47 = vpop.xlane.xlu2 %2527 }
 0x34c   : > { %v2550_v28 = vmul.f32 0.015625, %v2528_v47 }
 0x353   : > { %v2531_v25 = vpop.xlane.xlu0 %2530 }
 0x354   : > { %v2551_v42 = vmul.f32 0.015625, %v2531_v25 }
 0x35b   : > { %v2534_v58 = vpop.xlane.xlu2 %2533  ;;  %v2519_v33 = vpop.xlane.xlu0 %2518 }
 0x35c   : > { %v2552_v32 = vmul.f32 0.015625, %v2534_v58  ;;  %v2547_v43 = vmul.f32 0.015625, %v2519_v33 }
 0x363   : > { %v2537_v49 = vpop.xlane.xlu1 %2536  ;;  %v2522_v37 = vpop.xlane.xlu2 %2521 }
 0x364   : > { %v2553_v63 = vmul.f32 0.015625, %v2537_v49  ;;  %v2510_v11 = vpop.xlane.xlu0 %2509  ;;  %v2548_v16 = vmul.f32 0.015625, %v2522_v37 }
 0x365   : > { %v2544_v60 = vmul.f32 0.015625, %v2510_v11 }
 0x366   : > { %2577 = vmatpush.msra.mxu0 %v2553_v63 }
 0x368   : > { %2578 = vmatpush.msra.mxu0 %v2552_v32 }
 0x36a   : > { %2579 = vmatpush.msra.mxu0 %v2551_v42 }
 0x36b   : > { %v2525_v55 = vpop.xlane.xlu1 %2524  ;;  %v2513_v27 = vpop.xlane.xlu2 %2512 }
 0x36c   : > { %v2549_v2 = vmul.f32 0.015625, %v2525_v55  ;;  %2580 = vmatpush.msra.mxu0 %v2550_v28  ;;  %v2501_v38 = vpop.xlane.xlu0 %2500  ;;  %v2545_v12 = vmul.f32 0.015625, %v2513_v27 }
 0x36d   : > { %v2541_v18 = vmul.f32 0.015625, %v2501_v38  ;;  %v547_v38 = vld [vmem:[%s6111_s3] sm:$0xff] }
 0x36e   : > { %2581 = vmatpush.msra.mxu0 %v2549_v2 }
 0x36f   : > { %v2557_v41 = vmax.f32 %v2541_v18, %v2545_v12 }
 0x370   : > { %2582 = vmatpush.msra.mxu0 %v2548_v16 }
 0x371   : > { %v2561_v49 = vmax.f32 %v2557_v41, %v2549_v2  ;;  %v554_v41 = vld [vmem:[%s6115_s7 + $0x8] sm:$0xff] }
 0x372   : > { %2583 = vmatpush.msra.mxu0 %v2547_v43 }
 0x373   : > { %v2516_v10 = vpop.xlane.xlu1 %2515  ;;  %v2504_v26 = vpop.xlane.xlu2 %2503 }
 0x374   : > { %v2546_v46 = vmul.f32 0.015625, %v2516_v10  ;;  %v2492_v53 = vpop.xlane.xlu0 %2491  ;;  %v2542_v34 = vmul.f32 0.015625, %v2504_v26  ;;  %v2565_v10 = vmax.f32 %v2561_v49, %v2553_v63  ;;  %v558_v49 = vld [vmem:[%s6115_s7 + $0x28] sm:$0xff] }
 0x375   : > { %v2538_v14 = vmul.f32 0.015625, %v2492_v53 }
 0x376   : > { %2584 = vmatpush.msra.mxu0 %v2546_v46 }
 0x377   : > { %v2554_v47 = vmax.f32 %v2538_v14, %v2542_v34 }
 0x378   : > { %2585 = vmatpush.msra.mxu0 %v2545_v12 }
 0x379   : > { %v2558_v37 = vmax.f32 %v2554_v47, %v2546_v46  ;;  %v553_v47 = vld [vmem:[%s6115_s7] sm:$0xff] }
 0x37a   : > { %2586 = vmatpush.msra.mxu0 %v2544_v60 }
 0x37b   : > { %v2507_v57 = vpop.xlane.xlu1 %2506  ;;  %v2495_v52 = vpop.xlane.xlu2 %2494  ;;  %v2562_v26 = vmax.f32 %v2558_v37, %v2550_v28  ;;  %v549_v28 = vld [vmem:[%s6112_s4] sm:$0xff]  ;;  %v559_v37 = vld [vmem:[%s6115_s7 + $0x30] sm:$0xff] }
 0x37c   : > { %v2543_v59 = vmul.f32 0.015625, %v2507_v57  ;;  %v2539_v29 = vmul.f32 0.015625, %v2495_v52 }
 0x37e   : > { %2587 = vmatpush.msra.mxu0 %v2543_v59  ;;  %v2555_v3 = vmax.f32 %v2539_v29, %v2543_v59  ;;  %v550_v59 = vld [vmem:[%s6112_s4 + $0x8] sm:$0xf] }
 0x380   : > { %2588 = vmatpush.msra.mxu0 %v2542_v34  ;;  %v2559_v58 = vmax.f32 %v2555_v3, %v2547_v43 }
 0x382   : > { %2589 = vmatpush.msra.mxu0 %v2541_v18  ;;  %v2563_v55 = vmax.f32 %v2559_v58, %v2551_v42  ;;  %v548_v42 = vld [vmem:[%s6111_s3 + $0x8] sm:$0xf]  ;;  %v556_v58 = vld [vmem:[%s6115_s7 + $0x18] sm:$0xff] }
 0x383   : > { %v2498_v25 = vpop.xlane.xlu1 %2497 }
 0x384   : > { %v2540_v33 = vmul.f32 0.015625, %v2498_v25  ;;  %v2566_v53 = vmax.f32 %v2562_v26, %v2563_v55  ;;  %v555_v25 = vld [vmem:[%s6115_s7 + $0x10] sm:$0xff]  ;;  %v561_v55 = vld [vmem:[%s6115_s7 + $0x40] sm:$0xff] }
 0x385   : > { %v565_v26 = vld [vmem:[%s6115_s7 + $0x60] sm:$0xff] }
 0x386   : > { %v2556_v11 = vmax.f32 %v2540_v33, %v2544_v60  ;;  %2590 = vmatpush.msra.mxu0 %v2540_v33  ;;  %v557_v33 = vld [vmem:[%s6115_s7 + $0x20] sm:$0xff] }
 0x388   : > { %v2560_v27 = vmax.f32 %v2556_v11, %v2548_v16  ;;  %2591 = vmatpush.msra.mxu0 %v2539_v29  ;;  %v560_v11 = vld [vmem:[%s6115_s7 + $0x38] sm:$0xff] }
 0x38a   : > { %v2564_v12 = vmax.f32 %v2560_v27, %v2552_v32  ;;  %2592 = vmatpush.msra.mxu0 %v2538_v14  ;;  %v562_v27 = vld [vmem:[%s6115_s7 + $0x48] sm:$0xff] }
 0x38b   : > { %2593 = vmatmul.f32.vlgmr.msra.gmra.mxu0 %v547_v38  ;;  %v563_v38 = vld [vmem:[%s6115_s7 + $0x50] sm:$0xff] }
 0x38c   : > { %v2567_v43 = vmax.f32 %v2564_v12, %v2565_v10  ;;  %v564_v10 = vld [vmem:[%s6115_s7 + $0x58] sm:$0xff]  ;;  %v566_v12 = vld [vmem:[%s6115_s7 + $0x68] sm:$0xff] }
 0x38e   : > { %v2568_v57 = vmax.f32 %v2566_v53, %v2567_v43  ;;  %v567_v53 = vld [vmem:[%s6115_s7 + $0x70] sm:$0xff]  ;;  %v568_v43 = vld [vmem:[%s6115_s7 + $0x78] sm:$0xff] }
 0x390   : > { %v2569_v2 = vrot.slane %v2568_v57, 4 }
 0x392   : > { %v2570_v16 = vmax.f32 %v2568_v57, %v2569_v2 }
 0x393   : > { %2596 = vmatmul.f32.gmra.mxu0 %v548_v42 }
 0x394   : > { %v2571_v46 = vrot.slane %v2570_v16, 2 }
 0x396   : > { %v2572_v60 = vmax.f32 %v2570_v16, %v2571_v46  ;;  %v570_v46 = vld [vmem:[%s6116_s8 + $0x8] sm:$0xff] }
 0x398   : > { %v2573_v52 = vrot.slane %v2572_v60, 1 }
 0x39a   : > { %v2574_v63 = vmax.f32 %v2572_v60, %v2573_v52  ;;  %v574_v60 = vld [vmem:[%s6116_s8 + $0x28] sm:$0xff] }
 0x39c   : > { %2576 = vst.msk [vmem:[%s402_s25] sm:$0x1] %vm2575_vm1, %v2574_v63  ;;  %s3071_s25 = sshll.u32 %s386_s13, 4  ;;  %s3072_s25 = int_to_ptr.vmem [resolvable:$true] %s3071_s25 }
 0x408   : > { %v2594_v32 = vpop.f32.mrf.mxu0 }
 0x409   : > { %v2595_v18 = vadd.f32 %v2594_v32, %v549_v28 }
 0x40b   : > { %v2600_v3 = vmax.f32 %v2595_v18, 0.0 }
 0x410   : > { %v2597_v29 = vpop.f32.mrf.mxu0 }
 0x411   : > { %v2598_v34 = vadd.f32 %v2597_v29, %v550_v59  ;;  %v571_v29 = vld [vmem:[%s6116_s8 + $0x10] sm:$0xff] }
 0x413   : > { %v2601_v14 = vmax.f32 %v2598_v34, 0.0  ;;  %v575_v34 = vld [vmem:[%s6116_s8 + $0x30] sm:$0xff] }
 0x415   : > { %3687 = vmatpush.msk.msrb.mxu1 %vm2606_vm2, %v2601_v14  ;;  %3689 = vmatpush.msk.msrb.mxu0 %vm2606_vm2, %v2601_v14 }
 0x416   : > { %3854 = vmatpush.msk.msra.mxu2 %vm2606_vm2, %v2601_v14 }
 0x417   : > { %2625 = vmatpush.msrb.mxu1 %v2600_v3  ;;  %2694 = vmatpush.msrb.mxu0 %v2600_v3 }
 0x418   : > { %3855 = vmatpush.msra.mxu2 %v2600_v3  ;;  %3690 = vmatmul.msk.f32.vlgmr.msrb.gmra.mxu0 %vm2602_vm3, %v553_v47 }
 0x419   : > { %3691 = vmatmul.msk.f32.vlgmr.msra.gmra.mxu2 %vm2602_vm3, %v554_v41 }
 0x421   : > { %3692 = vmatmul.msk.f32.gmra.mxu2 %vm2602_vm3, %v555_v25 }
 0x429   : > { %3693 = vmatmul.msk.f32.gmra.mxu2 %vm2602_vm3, %v556_v58 }
 0x431   : > { %3694 = vmatmul.msk.f32.gmra.mxu2 %vm2602_vm3, %v557_v33 }
 0x439   : > { %3695 = vmatmul.msk.f32.gmra.mxu2 %vm2602_vm3, %v558_v49 }
 0x441   : > { %3696 = vmatmul.msk.f32.gmra.mxu2 %vm2602_vm3, %v559_v37 }
 0x449   : > { %3697 = vmatmul.msk.f32.gmra.mxu2 %vm2602_vm3, %v560_v11 }
 0x451   : > { %3698 = vmatmul.msk.f32.gmra.mxu2 %vm2602_vm3, %v561_v55 }
 0x459   : > { %3699 = vmatmul.msk.f32.gmra.mxu2 %vm2602_vm3, %v562_v27  ;;  %v573_v27 = vld [vmem:[%s6116_s8 + $0x20] sm:$0xff] }
 0x461   : > { %3700 = vmatmul.msk.f32.gmra.mxu2 %vm2602_vm3, %v563_v38  ;;  %v569_v38 = vld [vmem:[%s6116_s8] sm:$0xff] }
 0x469   : > { %3701 = vmatmul.msk.f32.gmra.mxu2 %vm2602_vm3, %v564_v10 }
 0x471   : > { %3702 = vmatmul.msk.f32.gmra.mxu2 %vm2602_vm3, %v565_v26  ;;  %v577_v26 = vld [vmem:[%s6116_s8 + $0x40] sm:$0xff] }
 0x479   : > { %3703 = vmatmul.msk.f32.gmra.mxu2 %vm2602_vm3, %v566_v12  ;;  %v578_v12 = vld [vmem:[%s6116_s8 + $0x48] sm:$0xff] }
 0x481   : > { %3704 = vmatmul.msk.f32.gmra.mxu2 %vm2602_vm3, %v567_v53 }
 0x489   : > { %3705 = vmatmul.msk.f32.gmra.mxu2 %vm2602_vm3, %v568_v43 }
 0x495   : > { %v2696_v10 = vpop.f32.mrf.mxu0 }
 0x49c   : > { %v2699_v57 = vpop.f32.mrf.mxu2 }
 0x49d   : > { %v5835_v52 = vadd.f32 %v2699_v57, %v570_v46  ;;  %v2697_v57 = vadd.f32 %v2696_v10, %v569_v38 }
 0x49f   : > { %v2746_v28 = vsel %vm2744_vm4, %v5835_v52, -inf }
 0x4a4   : > { %v2702_v2 = vpop.f32.mrf.mxu2 }
 0x4a5   : > { %v5849_v14 = vadd.f32 %v2702_v2, %v571_v29  ;;  %v581_v2 = vld [vmem:[%s6116_s8 + $0x60] sm:$0xff] }
 0x4a7   : > { %v2747_v47 = vsel %vm2744_vm4, %v5849_v14, -inf }
 0x4ac   : > { %v2705_v42 = vpop.f32.mrf.mxu2 }
 0x4b4   : > { %v2708_v16 = vpop.f32.mrf.mxu2 }
 0x4b5   : > { %v5869_v43 = vadd.f32 %v2708_v16, %v573_v27  ;;  %v582_v16 = vld [vmem:[%s6116_s8 + $0x68] sm:$0xff] }
 0x4bc   : > { %v2711_v63 = vpop.f32.mrf.mxu2 }
 0x4bd   : > { %v5837_v32 = vadd.f32 %v2711_v63, %v574_v60  ;;  %v2749_v63 = vsel %vm2744_vm4, %v5869_v43, -inf }
 0x4bf   : > { %v2751_v59 = vsel %vm2744_vm4, %v5837_v32, -inf }
 0x4c0   : > { %v2752_v18 = vmax.f32 %v2746_v28, %v2751_v59  ;;  %v2745_v59 = vsel %vm2744_vm4, %v2697_v57, -inf }
 0x4c4   : > { %v2714_v3 = vpop.f32.mrf.mxu2 }
 0x4c5   : > { %v5851_v41 = vadd.f32 %v2714_v3, %v575_v34 }
 0x4c7   : > { %v2753_v25 = vsel %vm2744_vm4, %v5851_v41, -inf }
 0x4c8   : > { %v2754_v58 = vmax.f32 %v2747_v47, %v2753_v25  ;;  %v2750_v47 = vmax.f32 %v2745_v59, %v2749_v63  ;;  %v579_v63 = vld [vmem:[%s6116_s8 + $0x50] sm:$0xff] }
 0x4cc   : > { %v2717_v33 = vpop.f32.mrf.mxu2 }
 0x4d4   : > { %v2720_v49 = vpop.f32.mrf.mxu2 }
 0x4d5   : > { %v5874_v46 = vadd.f32 %v2720_v49, %v577_v26 }
 0x4d7   : > { %v2757_v29 = vsel %vm2744_vm4, %v5874_v46, -inf }
 0x4d8   : > { %v2758_v27 = vmax.f32 %v2750_v47, %v2757_v29  ;;  %v583_v29 = vld [vmem:[%s6116_s8 + $0x70] sm:$0xff] }
 0x4dc   : > { %v2723_v37 = vpop.f32.mrf.mxu2 }
 0x4dd   : > { %v5876_v60 = vadd.f32 %v2723_v37, %v578_v12  ;;  %v576_v12 = vld [vmem:[%s6116_s8 + $0x38] sm:$0xff] }
 0x4df   : > { %v2759_v34 = vsel %vm2744_vm4, %v5876_v60, -inf }
 0x4e0   : > { %v2760_v37 = vmax.f32 %v2752_v18, %v2759_v34  ;;  %v580_v18 = vld [vmem:[%s6116_s8 + $0x58] sm:$0xff] }
 0x4e4   : > { %v2726_v11 = vpop.f32.mrf.mxu2 }
 0x4ec   : > { %v2729_v55 = vpop.f32.mrf.mxu2 }
 0x4ed   : > { %v5913_v47 = vadd.f32 %v2729_v55, %v580_v18 }
 0x4f4   : > { %v2732_v53 = vpop.f32.mrf.mxu2 }
 0x4f5   : > { %v5880_v28 = vadd.f32 %v2732_v53, %v581_v2  ;;  %v572_v2 = vld [vmem:[%s6116_s8 + $0x18] sm:$0xff] }
 0x4f6   : > { %v2706_v34 = vadd.f32 %v2705_v42, %v572_v2  ;;  %v2763_v42 = vsel %vm2744_vm4, %v5913_v47, -inf }
 0x4f7   : > { %v2765_v25 = vsel %vm2744_vm4, %v5880_v28, -inf }
 0x4f8   : > { %v2766_v26 = vmax.f32 %v2758_v27, %v2765_v25  ;;  %v584_v27 = vld [vmem:[%s6116_s8 + $0x78] sm:$0xff] }
 0x4fc   : > { %v2735_v3 = vpop.f32.mrf.mxu2 }
 0x4fd   : > { %v5892_v49 = vadd.f32 %v2735_v3, %v582_v16  ;;  %v2718_v16 = vadd.f32 %v2717_v33, %v576_v12  ;;  %v5911_v3 = vadd.f32 %v2726_v11, %v579_v63 }
 0x4ff   : > { %v2767_v38 = vsel %vm2744_vm4, %v5892_v49, -inf  ;;  %v2755_v25 = vsel %vm2744_vm4, %v2718_v16, -inf  ;;  %v2761_v33 = vsel %vm2744_vm4, %v5911_v3, -inf }
 0x500   : > { %v2768_v10 = vmax.f32 %v2760_v37, %v2767_v38  ;;  %v2748_v38 = vsel %vm2744_vm4, %v2706_v34, -inf  ;;  %v2762_v12 = vmax.f32 %v2754_v58, %v2761_v33 }
 0x501   : > { %v2756_v11 = vmax.f32 %v2748_v38, %v2755_v25 }
 0x502   : > { %v2773_v53 = vmax.f32 %v2766_v26, %v2768_v10 }
 0x503   : > { %v2764_v2 = vmax.f32 %v2756_v11, %v2763_v42 }
 0x504   : > { %v2738_v59 = vpop.f32.mrf.mxu2 }
 0x505   : > { %v5916_v37 = vadd.f32 %v2738_v59, %v583_v29 }
 0x507   : > { %v2769_v55 = vsel %vm2744_vm4, %v5916_v37, -inf }
 0x508   : > { %v2770_v18 = vmax.f32 %v2762_v12, %v2769_v55 }
 0x50c   : > { %v2741_v10 = vpop.f32.mrf.mxu2 }
 0x50d   : > { %v5928_v26 = vadd.f32 %v2741_v10, %v584_v27 }
 0x50f   : > { %v2771_v63 = vsel %vm2744_vm4, %v5928_v26, -inf }
 0x510   : > { %v2772_v59 = vmax.f32 %v2764_v2, %v2771_v63 }
 0x512   : > { %v2774_v29 = vmax.f32 %v2770_v18, %v2772_v59 }
 0x514   : > { %v2775_v6 = vmax.f32 %v2773_v53, %v2774_v29 }
 0x516   : > { %v2776_v24 = vrot.slane %v2775_v6, 4 }
 0x518   : > { %v2777_v20 = vmax.f32 %v2775_v6, %v2776_v24 }
 0x51a   : > { %v2778_v7 = vrot.slane %v2777_v20, 2 }
 0x51c   : > { %v2779_v0 = vmax.f32 %v2777_v20, %v2778_v7 }
 0x51e   : > { %v2780_v25 = vrot.slane %v2779_v0, 1 }
 0x520   : > { %v5932_v38 = vmax.f32 %v2779_v0, %v2780_v25 }
 0x522   : > { %v2782_v30 = vsub.f32 %v2697_v57, %v5932_v38  ;;  %v2783_v58 = vsub.f32 %v5835_v52, %v5932_v38  ;;  %v2784_v27 = vsub.f32 %v5849_v14, %v5932_v38  ;;  %v2785_v33 = vsub.f32 %v2706_v34, %v5932_v38 }
 0x523   : > { %v2786_v53 = vsub.f32 %v5869_v43, %v5932_v38  ;;  %v2787_v24 = vsub.f32 %v5837_v32, %v5932_v38  ;;  %v2788_v20 = vsub.f32 %v5851_v41, %v5932_v38  ;;  %v2789_v14 = vsub.f32 %v2718_v16, %v5932_v38 }
 0x524   : > { %v2798_v7 = vmul.f32 1.442695, %v2782_v30  ;;  %v2800_v6 = vmul.f32 1.442695, %v2783_v58  ;;  %v2802_v0 = vmul.f32 1.442695, %v2784_v27  ;;  %v2790_v43 = vsub.f32 %v5874_v46, %v5932_v38 }
 0x525   : > { %v2804_v57 = vmul.f32 1.442695, %v2785_v33  ;;  %v2806_v52 = vmul.f32 1.442695, %v2786_v53  ;;  %v2808_v34 = vmul.f32 1.442695, %v2787_v24  ;;  %v2791_v30 = vsub.f32 %v5876_v60, %v5932_v38 }
 0x526   : > { %3899 = vpow2.f32 %v2798_v7  ;;  %v2810_v32 = vmul.f32 1.442695, %v2788_v20  ;;  %v2812_v11 = vmul.f32 1.442695, %v2789_v14  ;;  %v2792_v12 = vsub.f32 %v5911_v3, %v5932_v38 }
 0x527   : > { %3901 = vpow2.f32 %v2800_v6  ;;  %v2814_v2 = vmul.f32 1.442695, %v2790_v43  ;;  %v2793_v59 = vsub.f32 %v5913_v47, %v5932_v38  ;;  %v2816_v29 = vmul.f32 1.442695, %v2791_v30 }
 0x528   : > { %3903 = vpow2.f32 %v2802_v0  ;;  %v2794_v3 = vsub.f32 %v5880_v28, %v5932_v38  ;;  %v2818_v33 = vmul.f32 1.442695, %v2792_v12  ;;  %v2795_v47 = vsub.f32 %v5892_v49, %v5932_v38 }
 0x529   : > { %3905 = vpow2.f32 %v2804_v57  ;;  %v2820_v7 = vmul.f32 1.442695, %v2793_v59  ;;  %v2796_v28 = vsub.f32 %v5916_v37, %v5932_v38  ;;  %v2797_v49 = vsub.f32 %v5928_v26, %v5932_v38 }
 0x52a   : > { %3907 = vpow2.f32 %v2806_v52  ;;  %v2822_v52 = vmul.f32 1.442695, %v2794_v3 }
 0x52b   : > { %3909 = vpow2.f32 %v2808_v34  ;;  %v2826_v37 = vmul.f32 1.442695, %v2796_v28 }
 0x52c   : > { %v5949_v42 = vpop.eup %3899  ;;  %3911 = vpow2.f32 %v2810_v32  ;;  %v2824_v32 = vmul.f32 1.442695, %v2795_v47 }
 0x52d   : > { %v5951_v41 = vpop.eup %3901  ;;  %v2830_v10 = vsel %vm2744_vm4, %v5949_v42, 0.0  ;;  %3913 = vpow2.f32 %v2812_v11 }
 0x52e   : > { %v5957_v16 = vpop.eup %3903  ;;  %v2831_v55 = vsel %vm2744_vm4, %v5951_v41, 0.0  ;;  %3915 = vpow2.f32 %v2814_v2 }
 0x52f   : > { %v5961_v46 = vpop.eup %3905  ;;  %v2832_v63 = vadd.f32 %v2831_v55, %v2830_v10  ;;  %v2833_v60 = vsel %vm2744_vm4, %v5957_v16, 0.0  ;;  %3917 = vpow2.f32 %v2816_v29 }
 0x530   : > { %v5967_v18 = vpop.eup %3907  ;;  %v2835_v58 = vsel %vm2744_vm4, %v5961_v46, 0.0  ;;  %3919 = vpow2.f32 %v2818_v33 }
 0x531   : > { %v2834_v25 = vadd.f32 %v2833_v60, %v2832_v63  ;;  %v5973_v27 = vpop.eup %3909  ;;  %v2837_v24 = vsel %vm2744_vm4, %v5967_v18, 0.0  ;;  %3921 = vpow2.f32 %v2820_v7  ;;  %v2828_v63 = vmul.f32 1.442695, %v2797_v49 }
 0x532   : > { %v5979_v20 = vpop.eup %3911  ;;  %v2839_v0 = vsel %vm2744_vm4, %v5973_v27, 0.0  ;;  %3923 = vpow2.f32 %v2822_v52 }
 0x533   : > { %v2836_v53 = vadd.f32 %v2835_v58, %v2834_v25  ;;  %v5985_v57 = vpop.eup %3913  ;;  %v2841_v34 = vsel %vm2744_vm4, %v5979_v20, 0.0  ;;  %3925 = vpow2.f32 %v2824_v32 }
 0x534   : > { %v5991_v43 = vpop.eup %3915  ;;  %v2843_v11 = vsel %vm2744_vm4, %v5985_v57, 0.0  ;;  %3927 = vpow2.f32 %v2826_v37 }
 0x535   : > { %v2838_v6 = vadd.f32 %v2837_v24, %v2836_v53  ;;  %v5997_v10 = vpop.eup %3917  ;;  %v2845_v12 = vsel %vm2744_vm4, %v5991_v43, 0.0  ;;  %3929 = vpow2.f32 %v2828_v63 }
 0x536   : > { %v3920_v2 = vpop.eup %3919  ;;  %v2847_v26 = vsel %vm2744_vm4, %v5997_v10, 0.0 }
 0x537   : > { %v2840_v14 = vadd.f32 %v2839_v0, %v2838_v6  ;;  %v3922_v38 = vpop.eup %3921  ;;  %v2849_v29 = vsel %vm2744_vm4, %v3920_v2, 0.0 }
 0x538   : > { %v3924_v25 = vpop.eup %3923  ;;  %v2851_v3 = vsel %vm2744_vm4, %v3922_v38, 0.0 }
 0x539   : > { %v2842_v30 = vadd.f32 %v2841_v34, %v2840_v14  ;;  %v3926_v33 = vpop.eup %3925  ;;  %v2853_v24 = vsel %vm2744_vm4, %v3924_v25, 0.0 }
 0x53a   : > { %v3928_v47 = vpop.eup %3927  ;;  %v2855_v6 = vsel %vm2744_vm4, %v3926_v33, 0.0 }
 0x53b   : > { %v2844_v55 = vadd.f32 %v2843_v11, %v2842_v30  ;;  %v3930_v0 = vpop.eup %3929  ;;  %v2857_v52 = vsel %vm2744_vm4, %v3928_v47, 0.0 }
 0x53c   : > { %v2859_v34 = vsel %vm2744_vm4, %v3930_v0, 0.0 }
 0x53d   : > { %v2846_v60 = vadd.f32 %v2845_v12, %v2844_v55 }
 0x53f   : > { %v2848_v59 = vadd.f32 %v2847_v26, %v2846_v60 }
 0x541   : > { %v2850_v58 = vadd.f32 %v2849_v29, %v2848_v59 }
 0x543   : > { %v2852_v53 = vadd.f32 %v2851_v3, %v2850_v58 }
 0x545   : > { %v2854_v7 = vadd.f32 %v2853_v24, %v2852_v53 }
 0x547   : > { %v2856_v28 = vadd.f32 %v2855_v6, %v2854_v7 }
 0x549   : > { %v2858_v14 = vadd.f32 %v2857_v52, %v2856_v28 }
 0x54b   : > { %v2860_v49 = vadd.f32 %v2859_v34, %v2858_v14 }
 0x54d   : > { %v2861_v32 = vrot.slane %v2860_v49, 4 }
 0x54f   : > { %v2862_v30 = vadd.f32 %v2861_v32, %v2860_v49 }
 0x551   : > { %v2863_v11 = vrot.slane %v2862_v30, 2 }
 0x553   : > { %v2864_v37 = vadd.f32 %v2863_v11, %v2862_v30 }
 0x555   : > { %v2865_v55 = vrot.slane %v2864_v37, 1 }
 0x557   : > { %v2866_v12 = vadd.f32 %v2865_v55, %v2864_v37 }
 0x559   : > { %3931 = vrcp.f32 %v2866_v12  ;;  %v2878_v59 = vand.u32 2147483648, %v2866_v12  ;;  %v2876_v58 = vand.u32 2147483647, %v2866_v12  ;;  %vm2872_vm6 = vweird.f32 %v2866_v12 }
 0x55b   : > { %v2879_v53 = vor.u32 1.1754944e-38, %v2878_v59  ;;  %vm2877_vm8 = vcmp.eq.f32.partialorder %v2876_v58, 8.507059e+37 }
 0x55f   : > { %v3932_v63 = vpop.eup %3931 }
 0x560   : > { %v2868_v60 = vmul.f32 %v3932_v63, %v2866_v12  ;;  %vm2873_vm5 = vweird.f32 %v3932_v63 }
 0x561   : > { %vm2874_vm7 = vmor %vm2872_vm6, %vm2873_vm5 }
 0x562   : > { %v2869_v26 = vsub.f32 1.0, %v2868_v60 }
 0x564   : > { %v2870_v29 = vmul.f32 %v3932_v63, %v2869_v26 }
 0x566   : > { %v2871_v3 = vadd.f32 %v3932_v63, %v2870_v29 }
 0x568   : > { %v2875_v24 = vsel %vm2874_vm7, %v3932_v63, %v2871_v3 }
 0x569   : > { %v2880_v7 = vsel %vm2877_vm8, %v2879_v53, %v2875_v24 }
 0x56a   : > { %v2883_v6 = vmul.f32 %v5957_v16, %v2880_v7  ;;  %v2882_v28 = vmul.f32 %v5951_v41, %v2880_v7  ;;  %v2881_v52 = vmul.f32 %v5949_v42, %v2880_v7  ;;  %v2885_v14 = vmul.f32 %v5967_v18, %v2880_v7 }
 0x56b   : > { %v2886_v34 = vmul.f32 %v5973_v27, %v2880_v7  ;;  %v2884_v49 = vmul.f32 %v5961_v46, %v2880_v7  ;;  %v2888_v32 = vmul.f32 %v5985_v57, %v2880_v7  ;;  %v2889_v30 = vmul.f32 %v5991_v43, %v2880_v7  ;;  %v551_v27 = vld [vmem:[%s6113_s5] sm:$0x1] }
 0x56c   : > { %2909 = vperm.xlu0 %3896, %v2883_v6   ;;  %2904 = vperm.xlu2 %3898, %v2882_v28   ;;  %v2887_v11 = vmul.f32 %v5979_v20, %v2880_v7  ;;  %v2891_v37 = vmul.f32 %v3920_v2, %v2880_v7  ;;  %v2892_v16 = vmul.f32 %v3922_v38, %v2880_v7 }
 0x56d   : > { %2899 = vperm.xlu1 %3897, %v2881_v52   ;;  %v2890_v41 = vmul.f32 %v5997_v10, %v2880_v7  ;;  %v2894_v42 = vmul.f32 %v3926_v33, %v2880_v7  ;;  %v2895_v55 = vmul.f32 %v3928_v47, %v2880_v7  ;;  %v2893_v18 = vmul.f32 %v3924_v25, %v2880_v7 }
 0x56e   : > { %v2896_v46 = vmul.f32 %v3930_v0, %v2880_v7  ;;  %3688 = vmatmul.msk.f32.vlgmr.msrb.gmra.mxu1 %vm2602_vm3, %v551_v27 }
 0x574   : > { %2919 = vperm.xlu0 %3896, %v2885_v14   ;;  %2924 = vperm.xlu2 %3898, %v2886_v34  }
 0x575   : > { %2914 = vperm.xlu1 %3897, %v2884_v49  }
 0x57c   : > { %2934 = vperm.xlu0 %3896, %v2888_v32   ;;  %2939 = vperm.xlu2 %3898, %v2889_v30  }
 0x57d   : > { %2929 = vperm.xlu1 %3897, %v2887_v11  }
 0x584   : > { %2949 = vperm.xlu0 %3896, %v2891_v37   ;;  %2954 = vperm.xlu2 %3898, %v2892_v16  }
 0x585   : > { %2944 = vperm.xlu1 %3897, %v2890_v41  }
 0x58c   : > { %2964 = vperm.xlu0 %3896, %v2894_v42   ;;  %2969 = vperm.xlu2 %3898, %v2895_v55  }
 0x58d   : > { %2959 = vperm.xlu1 %3897, %v2893_v18  }
 0x595   : > { %2974 = vperm.xlu1 %3897, %v2896_v46  }
 0x5c6   : > { %v2905_v20 = vpop.permute.xlu2 %2904 }
 0x5c7   : > { %v2978_v10 = vmul.f32 %v2905_v20, %v2474_v13 }
 0x5c9   : > { %v2994_v33 = vsel %vm2489_vm0, %v2978_v10, 0.0 }
 0x5ce   : > { %v2925_v25 = vpop.permute.xlu2 %2924 }
 0x5cf   : > { %v2982_v59 = vmul.f32 %v2925_v25, %v2478_v50 }
 0x5d1   : > { %v3002_v53 = vsel %vm2489_vm0, %v2982_v59, 0.0 }
 0x5de   : > { %v2910_v57 = vpop.permute.xlu0 %2909 }
 0x5df   : > { %v2900_v43 = vpop.permute.xlu1 %2899  ;;  %v2979_v47 = vmul.f32 %v2910_v57, %v2475_v23  ;;  %v2940_v23 = vpop.permute.xlu2 %2939 }
 0x5e0   : > { %v2977_v2 = vmul.f32 %v2900_v43, %v2473_v19  ;;  %v2985_v44 = vmul.f32 %v2940_v23, %v2481_v1 }
 0x5e1   : > { %v2996_v60 = vsel %vm2489_vm0, %v2979_v47, 0.0 }
 0x5e2   : > { %v2993_v38 = vsel %vm2489_vm0, %v2977_v2, 0.0  ;;  %v3008_v14 = vsel %vm2489_vm0, %v2985_v44, 0.0 }
 0x5e3   : > { %v2995_v0 = vadd.f32 %v2994_v33, %v2993_v38 }
 0x5e5   : > { %v2997_v19 = vadd.f32 %v2996_v60, %v2995_v0 }
 0x5e6   : > { %v2920_v12 = vpop.permute.xlu0 %2919 }
 0x5e7   : > { %v2915_v63 = vpop.permute.xlu1 %2914  ;;  %v2981_v39 = vmul.f32 %v2920_v12, %v2477_v54  ;;  %v2955_v28 = vpop.permute.xlu2 %2954 }
 0x5e8   : > { %v2980_v40 = vmul.f32 %v2915_v63, %v2476_v9  ;;  %v2988_v1 = vmul.f32 %v2955_v28, %v6134_v4 }
 0x5e9   : > { %v3000_v17 = vsel %vm2489_vm0, %v2981_v39, 0.0  ;;  %v552_v39 = vld [vmem:[#allocation2] sm:$0x1] }
 0x5ea   : > { %v2998_v13 = vsel %vm2489_vm0, %v2980_v40, 0.0  ;;  %v3014_v16 = vsel %vm2489_vm0, %v2988_v1, 0.0 }
 0x5eb   : > { %v2999_v26 = vadd.f32 %v2998_v13, %v2997_v19  ;;  %v2627_v8 = vpop.f32.mrf.mxu1 }
 0x5ec   : > { %v2628_v40 = vadd.f32 %v2627_v8, %v552_v39 }
 0x5ed   : > { %v3001_v29 = vadd.f32 %v3000_v17, %v2999_v26 }
 0x5ee   : > { %v2935_v58 = vpop.permute.xlu0 %2934  ;;  %2630 = vst.msk [vmem:[%s399_s17] sm:$0x1] %vm2575_vm1, %v2628_v40 }
 0x5ef   : > { %v2930_v3 = vpop.permute.xlu1 %2929  ;;  %v2984_v48 = vmul.f32 %v2935_v58, %v2480_v15  ;;  %v3003_v9 = vadd.f32 %v3002_v53, %v3001_v29  ;;  %v2970_v42 = vpop.permute.xlu2 %2969 }
 0x5f0   : > { %v2983_v35 = vmul.f32 %v2930_v3, %v2479_v5  ;;  %v2991_v27 = vmul.f32 %v2970_v42, %v6137_v56 }
 0x5f1   : > { %v3006_v50 = vsel %vm2489_vm0, %v2984_v48, 0.0 }
 0x5f2   : > { %v3004_v54 = vsel %vm2489_vm0, %v2983_v35, 0.0  ;;  %v3020_v10 = vsel %vm2489_vm0, %v2991_v27, 0.0 }
 0x5f3   : > { %v3005_v24 = vadd.f32 %v3004_v54, %v3003_v9 }
 0x5f5   : > { %v3007_v7 = vadd.f32 %v3006_v50, %v3005_v24 }
 0x5f6   : > { %v2950_v6 = vpop.permute.xlu0 %2949 }
 0x5f7   : > { %v2945_v52 = vpop.permute.xlu1 %2944  ;;  %v2987_v51 = vmul.f32 %v2950_v6, %v2483_v31  ;;  %v3009_v15 = vadd.f32 %v3008_v14, %v3007_v7 }
 0x5f8   : > { %v2986_v5 = vmul.f32 %v2945_v52, %v6133_v62 }
 0x5f9   : > { %v3012_v32 = vsel %vm2489_vm0, %v2987_v51, 0.0 }
 0x5fa   : > { %v3010_v34 = vsel %vm2489_vm0, %v2986_v5, 0.0 }
 0x5fb   : > { %v3011_v49 = vadd.f32 %v3010_v34, %v3009_v15 }
 0x5fd   : > { %v3013_v30 = vadd.f32 %v3012_v32, %v3011_v49 }
 0x5fe   : > { %v2965_v11 = vpop.permute.xlu0 %2964 }
 0x5ff   : > { %v2960_v37 = vpop.permute.xlu1 %2959  ;;  %v2990_v31 = vmul.f32 %v2965_v11, %v6135_v45  ;;  %v3015_v55 = vadd.f32 %v3014_v16, %v3013_v30 }
 0x600   : > { %v2989_v41 = vmul.f32 %v2960_v37, %v6136_v36 }
 0x601   : > { %v3018_v20 = vsel %vm2489_vm0, %v2990_v31, 0.0 }
 0x602   : > { %v3016_v18 = vsel %vm2489_vm0, %v2989_v41, 0.0 }
 0x603   : > { %v3017_v46 = vadd.f32 %v3016_v18, %v3015_v55 }
 0x605   : > { %v3019_v57 = vadd.f32 %v3018_v20, %v3017_v46 }
 0x607   : > { %v2975_v43 = vpop.permute.xlu1 %2974  ;;  %v3021_v61 = vadd.f32 %v3020_v10, %v3019_v57 }
 0x608   : > { %v2992_v2 = vmul.f32 %v2975_v43, %v6138_v22 }
 0x60a   : > { %v3022_v38 = vsel %vm2489_vm0, %v2992_v2, 0.0 }
 0x60b   : > { %v3023_v25 = vadd.f32 %v3022_v38, %v3021_v61 }
 0x60d   : > { %v3024_v33 = vrot.slane %v3023_v25, 4 }
 0x60f   : > { %v3025_v47 = vadd.f32 %v3024_v33, %v3023_v25 }
 0x611   : > { %v3026_v0 = vrot.slane %v3025_v47, 2 }
 0x613   : > { %v3027_v21 = vadd.f32 %v3026_v0, %v3025_v47 }
 0x615   : > { %v3028_v12 = vrot.slane %v3027_v21, 1 }
 0x617   : > { %v3029_v63 = vadd.f32 %v3028_v12, %v3027_v21 }
 0x619   : > { %v3706_v60 = vmul.f32 -1.442695, %v3029_v63 }
 0x61b   : > { %3933 = vpow2.f32 %v3706_v60 }
 0x621   : > { %v3934_v19 = vpop.eup %3933 }
 0x622   : > { %v3033_v13 = vadd.f32 1.0, %v3934_v19 }
 0x624   : > { %3935 = vrcp.f32 %v3033_v13  ;;  %v3045_v23 = vand.u32 2147483648, %v3033_v13  ;;  %v3043_v58 = vand.u32 2147483647, %v3033_v13  ;;  %vm3039_vm10 = vweird.f32 %v3033_v13 }
 0x626   : > { %v3046_v53 = vor.u32 1.1754944e-38, %v3045_v23  ;;  %vm3044_vm13 = vcmp.eq.f32.partialorder %v3043_v58, 8.507059e+37 }
 0x62a   : > { %v3936_v26 = vpop.eup %3935 }
 0x62b   : > { %v3035_v59 = vmul.f32 %v3936_v26, %v3033_v13  ;;  %vm3040_vm9 = vweird.f32 %v3936_v26 }
 0x62c   : > { %vm3041_vm11 = vmor %vm3039_vm10, %vm3040_vm9 }
 0x62d   : > { %v3036_v17 = vsub.f32 1.0, %v3035_v59 }
 0x62f   : > { %v3037_v29 = vmul.f32 %v3936_v26, %v3036_v17 }
 0x631   : > { %v3038_v3 = vadd.f32 %v3936_v26, %v3037_v29 }
 0x633   : > { %v3042_v48 = vsel %vm3041_vm11, %v3936_v26, %v3038_v3 }
 0x634   : > { %v3047_v35 = vsel %vm3044_vm13, %v3046_v53, %v3042_v48 }
 0x635   : > { %3050 = vst.msk [vmem:[%s386_s13] sm:$0x1] %vm3049_vm12, %v3047_v35 }
 0x636   : > { %3964 = shalt.err (!%p3961_p3)
}
 0x637   : > { %3856 = dma.vmem_to_hbm [thread:$0]  (%p4103_p5), %s3072_s25, 16, %s3074_s26, %s3055_s6  }
 0x638 PF: > { %p3862_p4 = scmp.ge.s32.totalorder %s3999_s22, 2  ;;  %s3094_s2 = sand.u32 1, %s3987_s19  }
 0x639   : > { %s3095_s27 = scalar_lea.sflag [#allocation4], %s3094_s2 }
 0x63a   : > { %p3859_p7 = pnand %p3862_p4, %p4107_p6 }
 0x63c   : > { %p3860_p8 = pneg %p3859_p7 }
 0x63e   : > { %3982 = dma.done.wait (%p3860_p8), %s3095_s27, 16  }
 0x63f   : > { %3984 = vsyncadd (%p3860_p8), %s3095_s27, 4294967280  ;;  %s6139_s18 = sld [smem:[#allocation6_spill]]  ;;  %p24_p9 = scmp.ge.s32.totalorder %s4090_s24, 4  }
 0x640   : > { %s6140_s19 = smov %s3991_s20  ;;  %s6141_s20 = smov %s3995_s21 }
 0x641   : > { %s6143_s22 = smov %s4090_s24  ;;  %26 = sbr.rel (!%p24_p9) target bundleno = 6 (0x6), region = 115 }
 0x645   : > { %s6142_s21 = smov %s6139_s18 }
 0x646   :  { %3106 = vsyncpa [#allocation4], 1 }
 0x647   :  { %3108 = vsyncpa [#allocation4 + $0x1], 1 }

// kernel: tpu_custom_call.1
= control target key start
LH: loop header
LB: loop body
LE: loop exit
PB: predicated region body
PF: predicated region fallthrough
CT: control target
= control target key end

     0   :  { %s6108_s0 = inlined_call_operand.vmem [shape: f32[2,2048,64], index: 0, kind: input, shape index: {}]   ;;  %s6109_s1 = inlined_call_operand.vmem [shape: bf16[128,2048], index: 1, kind: input, shape index: {}]   ;;  %s6110_s2 = inlined_call_operand.vmem [shape: f32[128,1], index: 2, kind: input, shape index: {}]   ;;  %s6111_s3 = inlined_call_operand.vmem [shape: f32[12,128], index: 3, kind: input, shape index: {}]   ;;  %s6112_s4 = inlined_call_operand.vmem [shape: f32[12,1], index: 4, kind: input, shape index: {}]   ;;  %s6113_s5 = inlined_call_operand.vmem [shape: f32[1,12], index: 5, kind: input, shape index: {}]   ;;  %s6114_s6 = inlined_call_operand.<no memory space> [shape: f32[1,1], index: 6, kind: input, shape index: {}]   ;;  %s6115_s7 = inlined_call_operand.vmem [shape: f32[128,12], index: 7, kind: input, shape index: {}]   ;;  %s6116_s8 = inlined_call_operand.vmem [shape: f32[128,1], index: 8, kind: input, shape index: {}]   ;;  %s6117_s9 = inlined_call_operand.vmem [shape: f32[2,1,1], index: 9, kind: output, shape index: {0}]   ;;  %s6118_s10 = inlined_call_operand.hbm [shape: f32[2,1,64], index: 10, kind: output, shape index: {1}]   ;;  %s6119_s11 = inlined_call_operand.vmem [shape: f32[2,1,1], index: 11, kind: output, shape index: {2}]  }
   0x1   :  { %6126 = sst [smem:[#allocation7_spill]] %s6108_s0  ;;  %v17_v0 = vstv %s6114_s6 }
   0x2   :  { %6127 = sst [smem:[#allocation8_spill]] %s6110_s2  ;;  %18 = vst [vmem:[#allocation2] sm:$0x1] %v17_v0 }
   0x3   :  { %19 = vsyncpa [#allocation4], 0 }
   0x4   :  { %21 = vsyncpa [#allocation4 + $0x1], 0  ;;  %s4065_s19 = smov 0   ;;  %s4067_s20 = smov 0  }
   0x5   :  { %s4069_s21 = smov 0   ;;  %s4071_s22 = smov 0  }
   0x6 LB: > { %s4086_s6 = sadd.s32 4294967295, %s3999_s22   ;;  %s3169_s23 = sadd.s32 4294967294, %s3999_s22   ;;  %s3999_s22 = sphi %s4071_s22, %s6143_s22   ;;  %s3995_s21 = sphi %s4069_s21, %s6142_s21   ;;  %s3991_s20 = sphi %s4067_s20, %s6141_s20   ;;  %s3987_s19 = sphi %s4065_s19, %s6140_s19  }
   0x7   : > { %s4090_s24 = sadd.s32 1, %s3999_s22   ;;  %s254_s25 = sadd.s32 1, %s3995_s21 }
   0x8   : > { %s251_s26 = ssub.s32 %s3999_s22, %s4090_s24  ;;  %p264_p0 = scmp.ne.s32.totalorder %s3995_s21, %s3991_s20 }
   0x9   : > { %p252_p1 = scmp.eq.s32.totalorder %s251_s26, 0  ;;  %p265_p2 = scmp.eq.s32.totalorder %s4086_s6, 1 }
   0xa   : > { %p270_p3 = scmp.ne.s32.totalorder %s3991_s20, %s3987_s19  ;;  %p271_p4 = scmp.eq.s32.totalorder %s3169_s23, 1 }
   0xb   : > { %s4101_s27 = scalar_select %p252_p1, %s3995_s21, %s254_s25  }
   0xc   : > { %p4103_p5 = por %p265_p2, %p264_p0  ;;  %p4107_p6 = por %p271_p4, %p270_p3 }
   0xd   : > { %6128 = sst [smem:[#allocation6_spill]] %s4101_s27  ;;  %p3172_p7 = scmp.ge.s32.totalorder %s3999_s22, 1 }
   0xe   : > { %p347_p8 = scmp.lt.s32.totalorder %s3999_s22, 3 }
  0x10   : > { %p348_p9 = pnand %p3172_p7, %p347_p8 }
  0x11   : > { %p392_p10 = scmp.lt.s32.totalorder (!%p348_p9), %s4086_s6, 1  ;;  %s6131_s2 = sld [smem:[#allocation8_spill]] (!%p348_p9) }
  0x12   : > { %351 = sbr.rel (%p348_p9) target bundleno = 1592 (0x638), region = 56  ;;  %s6132_s0 = sld [smem:[#allocation7_spill]] (!%p348_p9) }
  0x13   : > { %s3069_s23 = scalar_lea.hbm (!%p348_p9), %s6118_s10, %s4086_s6 }
  0x14   : > { %s3073_s26 = sshll.u32 (!%p348_p9), %s3069_s23, 4  ;;  %s3074_s26 = int_to_ptr.hbm [resolvable:$true] %s3073_s26 }
  0x15   : > { %s3951_s30 = sshra.s32 (!%p348_p9), %s3074_s26, 4  ;;  %s3952_s30 = int_to_ptr.hbm [resolvable:$true] %s3951_s30 }
  0x16   : > { %s3953_s12 = scalar_lea.hbm (!%p348_p9), %s3952_s30, 1  ;;  %p3958_p0 = scmp.lt.s32.totalorder (!%p348_p9), %s3952_s30, %s6118_s10 }
  0x17   : > { %v546_v1 = vld [vmem:[%s6131_s2 + $0x78] sm:$0xff]  ;;  %v4001_v2 = vmov 0   ;;  %s4118_s13 = scalar_select %p392_p10, %s4086_s6, 1  ;;  %v545_v6 = vld [vmem:[%s6131_s2 + $0x70] sm:$0xff]  ;;  %v540_v55 = vld [vmem:[%s6131_s2 + $0x48] sm:$0xff]  ;;  %vm2489_vm0 = vcmask 523264  }
  0x18   : > { %3896 = vset.pattern.permute.xlu0 %v4001_v2  ;;  %3897 = vset.pattern.permute.xlu1 %v4001_v2  ;;  %v544_v56 = vld [vmem:[%s6131_s2 + $0x68] sm:$0xff]  ;;  %vm2575_vm1 = vcmask 0   ;;  %vm2606_vm2 = vcmask 1043456   ;;  %vm2602_vm3 = vcmask 97280   ;;  %vm2744_vm4 = vcmask 7168   ;;  %p3954_p11 = scmp.ne.s32.totalorder %s3952_s30, %s3953_s12 }
  0x19   : > { %1046 = vperm.xlu0 %3896, %v546_v1   ;;  %3898 = vset.pattern.permute.xlu2 %v4001_v2  ;;  %s3709_s14 = sshll.u32 %s4118_s13, 11  ;;  %v542_v2 = vld [vmem:[%s6131_s2 + $0x58] sm:$0xff]  ;;  %s402_s25 = scalar_lea.vmem %s6119_s11, %s4118_s13  ;;  %vm3049_vm12 = vcmask 516096  }
  0x1a   : > { %s4124_s17 = scalar_lea.vmem %s6132_s0, %s3709_s14  ;;  %1036 = vperm.xlu1 %3897, %v544_v56   ;;  %1026 = vperm.xlu2 %3898, %v542_v2   ;;  %v3569_v56 = vld [vmem:[%s6109_s1 + $0x308] sm:$0xf]  ;;  %p3955_p12 = pnand %p3954_p11, %p4103_p5 }
  0x1b   : > { %v599_v3 = vld [vmem:[%s4124_s17 + $0x70] sm:$0xff]  ;;  %v600_v4 = vld [vmem:[%s4124_s17 + $0x78] sm:$0xff]  ;;  %v597_v13 = vld [vmem:[%s4124_s17 + $0x60] sm:$0xff]  ;;  %s3957_s0 = scalar_lea.hbm %s6118_s10, 2 }
  0x1c   : > { %v615_v5 = vld [vmem:[%s4124_s17 + $0xf0] sm:$0xff]  ;;  %v848_v7 = vpack.c.bf16 %v600_v4, %v599_v3  ;;  %v616_v8 = vld [vmem:[%s4124_s17 + $0xf8] sm:$0xff]  ;;  %v598_v14 = vld [vmem:[%s4124_s17 + $0x68] sm:$0xff]  ;;  %p3956_p13 = pneg %p3955_p12  ;;  %p3959_p1 = scmp.lt.s32.totalorder %s3957_s0, %s3953_s12 }
  0x1d   : > { %v631_v9 = vld [vmem:[%s4124_s17 + $0x170] sm:$0xff]  ;;  %v632_v10 = vld [vmem:[%s4124_s17 + $0x178] sm:$0xff]  ;;  %v856_v11 = vpack.c.bf16 %v616_v8, %v615_v5  ;;  %v613_v15 = vld [vmem:[%s4124_s17 + $0xe0] sm:$0xff]  ;;  %v847_v16 = vpack.c.bf16 %v598_v14, %v597_v13 }
  0x1e   : > { %v4135_v12 = vpack.c.bf16 %v632_v10, %v631_v9  ;;  %1689 = vmatpush.bf16.msra.mxu0 %v848_v7  ;;  %v614_v17 = vld [vmem:[%s4124_s17 + $0xe8] sm:$0xff]  ;;  %v629_v18 = vld [vmem:[%s4124_s17 + $0x160] sm:$0xff]  ;;  %v595_v22 = vld [vmem:[%s4124_s17 + $0x50] sm:$0xff]  ;;  %p3960_p2 = por %p3959_p1, %p3958_p0 }
  0x1f   : > { %v630_v19 = vld [vmem:[%s4124_s17 + $0x168] sm:$0xff]  ;;  %1738 = vmatpush.bf16.msra.mxu1 %v856_v11  ;;  %v855_v20 = vpack.c.bf16 %v614_v17, %v613_v15  ;;  %v596_v23 = vld [vmem:[%s4124_s17 + $0x58] sm:$0xff]  ;;  %v611_v24 = vld [vmem:[%s4124_s17 + $0xd0] sm:$0xff] }
  0x20   : > { %3839 = vmatpush.bf16.msra.mxu3 %v4135_v12  ;;  %v4144_v21 = vpack.c.bf16 %v630_v19, %v629_v18  ;;  %v612_v25 = vld [vmem:[%s4124_s17 + $0xd8] sm:$0xff]  ;;  %v627_v26 = vld [vmem:[%s4124_s17 + $0x150] sm:$0xff]  ;;  %3838 = vmatpush.bf16.msra.mxu2 %v4135_v12  ;;  %v846_v28 = vpack.c.bf16 %v596_v23, %v595_v22  ;;  %v593_v31 = vld [vmem:[%s4124_s17 + $0x40] sm:$0xff]  ;;  %p3961_p3 = pnand %p3960_p2, %p3956_p13 }
  0x21   : > { %v628_v27 = vld [vmem:[%s4124_s17 + $0x158] sm:$0xff]  ;;  %1041 = vperm.xlu0 %3896, %v545_v6   ;;  %v854_v29 = vpack.c.bf16 %v612_v25, %v611_v24  ;;  %v594_v32 = vld [vmem:[%s4124_s17 + $0x48] sm:$0xff]  ;;  %v609_v33 = vld [vmem:[%s4124_s17 + $0xc0] sm:$0xff] }
  0x22   : > { %1690 = vmatpush.bf16.msra.mxu0 %v847_v16  ;;  %v4154_v30 = vpack.c.bf16 %v628_v27, %v627_v26  ;;  %v610_v34 = vld [vmem:[%s4124_s17 + $0xc8] sm:$0xff]  ;;  %v625_v35 = vld [vmem:[%s4124_s17 + $0x140] sm:$0xff]  ;;  %v845_v37 = vpack.c.bf16 %v594_v32, %v593_v31  ;;  %v591_v40 = vld [vmem:[%s4124_s17 + $0x30] sm:$0xff] }
  0x23   : > { %1739 = vmatpush.bf16.msra.mxu1 %v855_v20  ;;  %v626_v36 = vld [vmem:[%s4124_s17 + $0x148] sm:$0xff]  ;;  %v853_v38 = vpack.c.bf16 %v610_v34, %v609_v33  ;;  %v592_v41 = vld [vmem:[%s4124_s17 + $0x38] sm:$0xff]  ;;  %v607_v42 = vld [vmem:[%s4124_s17 + $0xb0] sm:$0xff] }
  0x24   : > { %3841 = vmatpush.bf16.msra.mxu3 %v4144_v21  ;;  %3840 = vmatpush.bf16.msra.mxu2 %v4144_v21  ;;  %v4164_v39 = vpack.c.bf16 %v626_v36, %v625_v35  ;;  %v608_v43 = vld [vmem:[%s4124_s17 + $0xb8] sm:$0xff]  ;;  %v623_v44 = vld [vmem:[%s4124_s17 + $0x130] sm:$0xff]  ;;  %v844_v46 = vpack.c.bf16 %v592_v41, %v591_v40  ;;  %v589_v49 = vld [vmem:[%s4124_s17 + $0x20] sm:$0xff] }
  0x25   : > { %v624_v45 = vld [vmem:[%s4124_s17 + $0x138] sm:$0xff]  ;;  %v852_v47 = vpack.c.bf16 %v608_v43, %v607_v42  ;;  %v590_v50 = vld [vmem:[%s4124_s17 + $0x28] sm:$0xff]  ;;  %v605_v51 = vld [vmem:[%s4124_s17 + $0xa0] sm:$0xff] }
  0x26   : > { %1691 = vmatpush.bf16.msra.mxu0 %v846_v28  ;;  %v4174_v48 = vpack.c.bf16 %v624_v45, %v623_v44  ;;  %v606_v52 = vld [vmem:[%s4124_s17 + $0xa8] sm:$0xff]  ;;  %v621_v53 = vld [vmem:[%s4124_s17 + $0x120] sm:$0xff]  ;;  %v843_v57 = vpack.c.bf16 %v590_v50, %v589_v49  ;;  %v587_v60 = vld [vmem:[%s4124_s17 + $0x10] sm:$0xff] }
  0x27   : > { %1740 = vmatpush.bf16.msra.mxu1 %v854_v29  ;;  %v622_v54 = vld [vmem:[%s4124_s17 + $0x128] sm:$0xff]  ;;  %v851_v58 = vpack.c.bf16 %v606_v52, %v605_v51  ;;  %v588_v61 = vld [vmem:[%s4124_s17 + $0x18] sm:$0xff]  ;;  %v603_v62 = vld [vmem:[%s4124_s17 + $0x90] sm:$0xff] }
  0x28   : > { %3843 = vmatpush.bf16.msra.mxu3 %v4154_v30  ;;  %3842 = vmatpush.bf16.msra.mxu2 %v4154_v30  ;;  %v4190_v59 = vpack.c.bf16 %v622_v54, %v621_v53  ;;  %v604_v63 = vld [vmem:[%s4124_s17 + $0x98] sm:$0xff]  ;;  %v619_v0 = vld [vmem:[%s4124_s17 + $0x110] sm:$0xff]  ;;  %v842_v3 = vpack.c.bf16 %v588_v61, %v587_v60  ;;  %v585_v4 = vld [vmem:[%s4124_s17] sm:$0xff] }
  0x29   : > { %1016 = vperm.xlu0 %3896, %v540_v55   ;;  %v620_v1 = vld [vmem:[%s4124_s17 + $0x118] sm:$0xff]  ;;  %v586_v5 = vld [vmem:[%s4124_s17 + $0x8] sm:$0xff]  ;;  %v850_v6 = vpack.c.bf16 %v604_v63, %v603_v62  ;;  %v601_v8 = vld [vmem:[%s4124_s17 + $0x80] sm:$0xff] }
  0x2a   : > { %1692 = vmatpush.bf16.msra.mxu0 %v845_v37  ;;  %v4205_v7 = vpack.c.bf16 %v620_v1, %v619_v0  ;;  %v602_v9 = vld [vmem:[%s4124_s17 + $0x88] sm:$0xff]  ;;  %v537_v10 = vld [vmem:[%s6131_s2 + $0x30] sm:$0xff]  ;;  %v617_v11 = vld [vmem:[%s4124_s17 + $0x100] sm:$0xff]  ;;  %v841_v18 = vpack.c.bf16 %v586_v5, %v585_v4 }
  0x2b   : > { %1741 = vmatpush.bf16.msra.mxu1 %v853_v38  ;;  %v618_v13 = vld [vmem:[%s4124_s17 + $0x108] sm:$0xff]  ;;  %v3177_v14 = vld [vmem:[%s6109_s1] sm:$0xf]  ;;  %v647_v15 = vld [vmem:[%s4124_s17 + $0x1f0] sm:$0xff]  ;;  %v849_v23 = vpack.c.bf16 %v602_v9, %v601_v8 }
  0x2c   : > { %3845 = vmatpush.bf16.msra.mxu3 %v4164_v39  ;;  %3844 = vmatpush.bf16.msra.mxu2 %v4164_v39  ;;  %v648_v16 = vld [vmem:[%s4124_s17 + $0x1f8] sm:$0xff]  ;;  %v543_v17 = vld [vmem:[%s6131_s2 + $0x60] sm:$0xff]  ;;  %v4233_v24 = vpack.c.bf16 %v618_v13, %v617_v11  ;;  %v3505_v25 = vld [vmem:[%s6109_s1 + $0x288] sm:$0xf] }
  0x2d   : > { %v3718_v19 = vld [vmem:[%s6109_s1 + $0x3c] sm:$0xf0]  ;;  %v3710_v20 = vld [vmem:[%s6109_s1 + $0x4] sm:$0xf]  ;;  %v3799_v26 = vld [vmem:[%s6109_s1 + $0x2c4] sm:$0xf0]  ;;  %v872_v28 = vpack.c.bf16 %v648_v16, %v647_v15  ;;  %1031 = vperm.xlu1 %3897, %v543_v17  }
  0x2e   : > { %1693 = vmatpush.bf16.msra.mxu0 %v844_v46  ;;  %v3179_v22 = vld [vmem:[%s6109_s1 + $0x40] sm:$0xf0]  ;;  %v541_v27 = vld [vmem:[%s6131_s2 + $0x50] sm:$0xff]  ;;  %v3178_v29 = vor.u32 %v3718_v19, %v3177_v14  ;;  %v646_v32 = vld [vmem:[%s4124_s17 + $0x1e8] sm:$0xff]  ;;  %v3506_v34 = vor.u32 %v3799_v26, %v3505_v25 }
  0x2f   : > { %1742 = vmatpush.bf16.msra.mxu1 %v852_v47  ;;  %v645_v31 = vld [vmem:[%s4124_s17 + $0x1e0] sm:$0xff]  ;;  %v3182_v33 = vor.u32 %v3710_v20, %v3179_v22  ;;  %1021 = vperm.xlu2 %3898, %v541_v27   ;;  %v534_v35 = vld [vmem:[%s6131_s2 + $0x18] sm:$0xff]  ;;  %v643_v37 = vld [vmem:[%s4124_s17 + $0x1d0] sm:$0xff] }
  0x30   : > { %3847 = vmatpush.bf16.msra.mxu3 %v4174_v48  ;;  %3846 = vmatpush.bf16.msra.mxu2 %v4174_v48  ;;  %v871_v36 = vpack.c.bf16 %v646_v32, %v645_v31  ;;  %v644_v38 = vld [vmem:[%s4124_s17 + $0x1d8] sm:$0xff]  ;;  %v539_v40 = vld [vmem:[%s6131_s2 + $0x40] sm:$0xff]  ;;  %v3313_v42 = vld [vmem:[%s6109_s1 + $0x108] sm:$0xf] }
  0x31   : > { %1001 = vperm.xlu0 %3896, %v537_v10   ;;  %v538_v41 = vld [vmem:[%s6131_s2 + $0x38] sm:$0xff]  ;;  %v3751_v43 = vld [vmem:[%s6109_s1 + $0x144] sm:$0xf0]  ;;  %v870_v44 = vpack.c.bf16 %v644_v38, %v643_v37  ;;  %v641_v45 = vld [vmem:[%s4124_s17 + $0x1c0] sm:$0xff] }
  0x32   : > { %1694 = vmatpush.bf16.msra.mxu0 %v843_v57  ;;  %v642_v46 = vld [vmem:[%s4124_s17 + $0x1c8] sm:$0xff]  ;;  %v3241_v47 = vld [vmem:[%s6109_s1 + $0x80] sm:$0xf]  ;;  %v639_v51 = vld [vmem:[%s4124_s17 + $0x1b0] sm:$0xff] }
  0x33   : > { %1743 = vmatpush.bf16.msra.mxu1 %v851_v58  ;;  %v531_v49 = vld [vmem:[%s6131_s2] sm:$0xff]  ;;  %v869_v50 = vpack.c.bf16 %v642_v46, %v641_v45  ;;  %v640_v52 = vld [vmem:[%s4124_s17 + $0x1b8] sm:$0xff]  ;;  %v638_v62 = vld [vmem:[%s4124_s17 + $0x1a8] sm:$0xff] }
  0x34   : > { %3849 = vmatpush.bf16.msra.mxu3 %v4190_v59  ;;  %3848 = vmatpush.bf16.msra.mxu2 %v4190_v59  ;;  %v3734_v53 = vld [vmem:[%s6109_s1 + $0xbc] sm:$0xf0]  ;;  %v3726_v54 = vld [vmem:[%s6109_s1 + $0x84] sm:$0xf]  ;;  %v868_v58 = vpack.c.bf16 %v640_v52, %v639_v51  ;;  %v635_v2 = vld [vmem:[%s4124_s17 + $0x190] sm:$0xff] }
  0x35   : > { %1011 = vperm.xlu1 %3897, %v539_v40   ;;  %v3243_v55 = vld [vmem:[%s6109_s1 + $0xc0] sm:$0xf0]  ;;  %v3242_v60 = vor.u32 %v3734_v53, %v3241_v47  ;;  %v533_v4 = vld [vmem:[%s6131_s2 + $0x10] sm:$0xff]  ;;  %v3767_v5 = vld [vmem:[%s6109_s1 + $0x1c4] sm:$0xf0] }
  0x36   : > { %1695 = vmatpush.bf16.msra.mxu0 %v842_v3  ;;  %v535_v57 = vld [vmem:[%s6131_s2 + $0x20] sm:$0xff]  ;;  %v3246_v63 = vor.u32 %v3726_v54, %v3243_v55  ;;  %v636_v3 = vld [vmem:[%s4124_s17 + $0x198] sm:$0xff]  ;;  %v3831_v16 = vld [vmem:[%s6109_s1 + $0x3c4] sm:$0xf0] }
  0x37   : > { %1744 = vmatpush.bf16.msra.mxu1 %v850_v6  ;;  %1006 = vperm.xlu2 %3898, %v538_v41   ;;  %v637_v61 = vld [vmem:[%s4124_s17 + $0x1a0] sm:$0xff]  ;;  %v532_v6 = vld [vmem:[%s6131_s2 + $0x8] sm:$0xff]  ;;  %v866_v9 = vpack.c.bf16 %v636_v3, %v635_v2  ;;  %v660_v51 = vld [vmem:[%s4124_s17 + $0x258] sm:$0xff] }
  0x38   : > { %3851 = vmatpush.bf16.msra.mxu3 %v4205_v7  ;;  %3850 = vmatpush.bf16.msra.mxu2 %v4205_v7  ;;  %v867_v1 = vpack.c.bf16 %v638_v62, %v637_v61  ;;  %v633_v10 = vld [vmem:[%s4124_s17 + $0x180] sm:$0xff]  ;;  %v3441_v20 = vld [vmem:[%s6109_s1 + $0x208] sm:$0xf]  ;;  %v3727_v38 = vld [vmem:[%s6109_s1 + $0x8c] sm:$0xf] }
  0x39   : > { %986 = vperm.xlu0 %3896, %v534_v35   ;;  %v3305_v13 = vld [vmem:[%s6109_s1 + $0x100] sm:$0xf]  ;;  %v3742_v15 = vld [vmem:[%s6109_s1 + $0x104] sm:$0xf]  ;;  %v3783_v22 = vld [vmem:[%s6109_s1 + $0x244] sm:$0xf0] }
  0x3a   : > { %1696 = vmatpush.bf16.msra.mxu0 %v841_v18  ;;  %v3750_v14 = vld [vmem:[%s6109_s1 + $0x13c] sm:$0xf0]  ;;  %v3758_v26 = vld [vmem:[%s6109_s1 + $0x184] sm:$0xf]  ;;  %v3251_v40 = vld [vmem:[%s6109_s1 + $0xc8] sm:$0xf0] }
  0x3b   : > { %1745 = vmatpush.bf16.msra.mxu1 %v849_v23  ;;  %v3306_v17 = vor.u32 %v3750_v14, %v3305_v13  ;;  %v3442_v23 = vor.u32 %v3783_v22, %v3441_v20  ;;  %v3369_v25 = vld [vmem:[%s6109_s1 + $0x180] sm:$0xf]  ;;  %v3371_v27 = vld [vmem:[%s6109_s1 + $0x1c0] sm:$0xf0]  ;;  %v662_v47 = vld [vmem:[%s4124_s17 + $0x268] sm:$0xff] }
  0x3c   : > { %3853 = vmatpush.bf16.msra.mxu3 %v4233_v24  ;;  %3852 = vmatpush.bf16.msra.mxu2 %v4233_v24  ;;  %v3374_v32 = vor.u32 %v3758_v26, %v3371_v27  ;;  %v3782_v35 = vld [vmem:[%s6109_s1 + $0x23c] sm:$0xf0]  ;;  %v3435_v37 = vld [vmem:[%s6109_s1 + $0x240] sm:$0xf0]  ;;  %v658_v53 = vld [vmem:[%s4124_s17 + $0x248] sm:$0xff] }
  0x3d   : > { %1697 = vmatmul.bf16.vlgmr.msra.gmra.mxu0 %v3178_v29  ;;  %v3187_v29 = vld [vmem:[%s6109_s1 + $0x48] sm:$0xf0]  ;;  %v661_v46 = vld [vmem:[%s4124_s17 + $0x260] sm:$0xff]  ;;  %v656_v2 = vld [vmem:[%s4124_s17 + $0x238] sm:$0xff] }
  0x3e   : > { %1746 = vmatmul.bf16.vlgmr.msra.gmra.mxu1 %v3182_v33  ;;  %v3497_v54 = vld [vmem:[%s6109_s1 + $0x280] sm:$0xf]  ;;  %v3563_v14 = vld [vmem:[%s6109_s1 + $0x340] sm:$0xf0]  ;;  %v696_v22 = vld [vmem:[%s4124_s17 + $0x378] sm:$0xff] }
  0x3f   : > { %1787 = vmatpush.bf16.msrb.mxu1 %v4135_v12  ;;  %1820 = vmatmul.bf16.vlgmr.msra.gmra.mxu3 %v3506_v34  ;;  %v3314_v12 = vor.u32 %v3751_v43, %v3313_v42  ;;  %v3433_v34 = vld [vmem:[%s6109_s1 + $0x200] sm:$0xf]  ;;  %v3254_v43 = vor.u32 %v3727_v38, %v3251_v40  ;;  %v679_v26 = vld [vmem:[%s4124_s17 + $0x2f0] sm:$0xff]  ;;  %v680_v27 = vld [vmem:[%s4124_s17 + $0x2f8] sm:$0xff] }
  0x40   : > { %1836 = vmatpush.bf16.msrb.mxu3 %v872_v28  ;;  %991 = vperm.xlu2 %3898, %v535_v57   ;;  %v3711_v28 = vld [vmem:[%s6109_s1 + $0xc] sm:$0xf]  ;;  %v3434_v41 = vor.u32 %v3782_v35, %v3433_v34  ;;  %v3798_v55 = vld [vmem:[%s6109_s1 + $0x2bc] sm:$0xf0]  ;;  %v692_v38 = vld [vmem:[%s4124_s17 + $0x358] sm:$0xff] }
  0x41   : > { %1805 = vmatmul.bf16.vlgmr.msra.gmra.mxu2 %v3314_v12  ;;  %971 = vperm.xlu0 %3896, %v531_v49   ;;  %v3190_v33 = vor.u32 %v3711_v28, %v3187_v29  ;;  %v664_v12 = vld [vmem:[%s4124_s17 + $0x278] sm:$0xff]  ;;  %v879_v49 = vpack.c.bf16 %v662_v47, %v661_v46  ;;  %v3743_v57 = vld [vmem:[%s6109_s1 + $0x10c] sm:$0xf]  ;;  %v3498_v61 = vor.u32 %v3798_v55, %v3497_v54  ;;  %v693_v28 = vld [vmem:[%s4124_s17 + $0x360] sm:$0xff] }
  0x42   : > { %v888_v29 = vpack.c.bf16 %v680_v27, %v679_v26  ;;  %v677_v34 = vld [vmem:[%s4124_s17 + $0x2e0] sm:$0xff]  ;;  %v678_v35 = vld [vmem:[%s4124_s17 + $0x2e8] sm:$0xff] }
  0x43   : > { %1788 = vmatpush.bf16.msrb.mxu1 %v4144_v21  ;;  %v536_v21 = vld [vmem:[%s6131_s2 + $0x28] sm:$0xff]  ;;  %v673_v55 = vld [vmem:[%s4124_s17 + $0x2c0] sm:$0xff]  ;;  %s385_s2 = sand.u32 1, %s3991_s20  }
  0x44   : > { %1837 = vmatpush.bf16.msrb.mxu3 %v871_v36  ;;  %996 = vperm.xlu1 %3897, %v536_v21   ;;  %v3774_v36 = vld [vmem:[%s6109_s1 + $0x204] sm:$0xf]  ;;  %v690_v46 = vld [vmem:[%s4124_s17 + $0x348] sm:$0xff]  ;;  %s3055_s6 = scalar_lea.sflag [#allocation4], %s385_s2 }
  0x45   : > { %v3438_v42 = vor.u32 %v3774_v36, %v3435_v37  ;;  %v657_v21 = vld [vmem:[%s4124_s17 + $0x240] sm:$0xff]  ;;  %v691_v36 = vld [vmem:[%s4124_s17 + $0x350] sm:$0xff]  ;;  %v887_v37 = vpack.c.bf16 %v678_v35, %v677_v34  ;;  %v3185_v27 = vld [vmem:[%s6109_s1 + $0x8] sm:$0xf] }
  0x46   : > { %v681_v26 = vld [vmem:[%s4124_s17 + $0x300] sm:$0xff]  ;;  %v708_v34 = vld [vmem:[%s4124_s17 + $0x3d8] sm:$0xff]  ;;  %v3791_v35 = vld [vmem:[%s6109_s1 + $0x28c] sm:$0xf] }
  0x47   : > { %1789 = vmatpush.bf16.msrb.mxu1 %v4154_v30  ;;  %v3815_v30 = vld [vmem:[%s6109_s1 + $0x344] sm:$0xf0] }
  0x48   : > { %1838 = vmatpush.bf16.msrb.mxu3 %v870_v44  ;;  %v3570_v0 = vor.u32 %v3815_v30, %v3569_v56  ;;  %976 = vperm.xlu2 %3898, %v532_v6   ;;  %v663_v44 = vld [vmem:[%s4124_s17 + $0x270] sm:$0xff]  ;;  %v3790_v56 = vld [vmem:[%s6109_s1 + $0x284] sm:$0xf] }
  0x49   : > { %v880_v45 = vpack.c.bf16 %v664_v12, %v663_v44  ;;  %v3499_v30 = vld [vmem:[%s6109_s1 + $0x2c0] sm:$0xf0]  ;;  %v651_v6 = vld [vmem:[%s4124_s17 + $0x210] sm:$0xff]  ;;  %v676_v44 = vld [vmem:[%s4124_s17 + $0x2d8] sm:$0xff] }
  0x4a   : > { %v3502_v62 = vor.u32 %v3790_v56, %v3499_v30  ;;  %v689_v12 = vld [vmem:[%s4124_s17 + $0x340] sm:$0xff]  ;;  %v674_v56 = vld [vmem:[%s4124_s17 + $0x2c8] sm:$0xff]  ;;  %v687_v30 = vld [vmem:[%s4124_s17 + $0x330] sm:$0xff] }
  0x4b   : > { %1790 = vmatpush.bf16.msrb.mxu1 %v4164_v39  ;;  %v3377_v39 = vld [vmem:[%s6109_s1 + $0x188] sm:$0xf]  ;;  %1885 = vmatpush.bf16.msrb.mxu0 %v880_v45  ;;  %v893_v47 = vpack.c.bf16 %v690_v46, %v689_v12  ;;  %v3201_v12 = vld [vmem:[%s6109_s1 + $0x18] sm:$0xf] }
  0x4c   : > { %1839 = vmatpush.bf16.msrb.mxu3 %v869_v50  ;;  %v3378_v8 = vor.u32 %v3767_v5, %v3377_v39  ;;  %981 = vperm.xlu1 %3897, %v533_v4   ;;  %v659_v50 = vld [vmem:[%s4124_s17 + $0x250] sm:$0xff]  ;;  %v653_v4 = vld [vmem:[%s4124_s17 + $0x220] sm:$0xff]  ;;  %v654_v39 = vld [vmem:[%s4124_s17 + $0x228] sm:$0xff] }
  0x4d   : > { %1702 = vmatmul.bf16.gmra.mxu0 %v3242_v60  ;;  %v878_v52 = vpack.c.bf16 %v660_v51, %v659_v50  ;;  %v877_v60 = vpack.c.bf16 %v658_v53, %v657_v21  ;;  %v875_v5 = vpack.c.bf16 %v654_v39, %v653_v4  ;;  %v3830_v50 = vld [vmem:[%s6109_s1 + $0x3bc] sm:$0xf0]  ;;  %v3822_v51 = vld [vmem:[%s6109_s1 + $0x384] sm:$0xf]  ;;  %v3775_v21 = vld [vmem:[%s6109_s1 + $0x20c] sm:$0xf] }
  0x4e   : > { %1751 = vmatmul.bf16.gmra.mxu1 %v3246_v63  ;;  %v3443_v53 = vld [vmem:[%s6109_s1 + $0x248] sm:$0xf0]  ;;  %v672_v4 = vld [vmem:[%s4124_s17 + $0x2b8] sm:$0xff]  ;;  %v685_v39 = vld [vmem:[%s4124_s17 + $0x320] sm:$0xff] }
  0x4f   : > { %1791 = vmatpush.bf16.msrb.mxu1 %v4174_v48  ;;  %1825 = vmatmul.bf16.gmra.mxu3 %v3570_v0  ;;  %v634_v48 = vld [vmem:[%s4124_s17 + $0x188] sm:$0xff] }
  0x50   : > { %1840 = vmatpush.bf16.msrb.mxu3 %v868_v58  ;;  %v865_v11 = vpack.c.bf16 %v634_v48, %v633_v10  ;;  %1886 = vmatpush.bf16.msrb.mxu0 %v879_v49  ;;  %v3315_v58 = vld [vmem:[%s6109_s1 + $0x148] sm:$0xf0]  ;;  %v3561_v10 = vld [vmem:[%s6109_s1 + $0x300] sm:$0xf] }
  0x51   : > { %1810 = vmatmul.bf16.gmra.mxu2 %v3378_v8  ;;  %v3318_v63 = vor.u32 %v3743_v57, %v3315_v58  ;;  %v652_v8 = vld [vmem:[%s4124_s17 + $0x218] sm:$0xff]  ;;  %v3814_v48 = vld [vmem:[%s6109_s1 + $0x33c] sm:$0xf0]  ;;  %v885_v58 = vpack.c.bf16 %v674_v56, %v673_v55 }
  0x52   : > { %v3625_v49 = vld [vmem:[%s6109_s1 + $0x380] sm:$0xf] }
  0x53   : > { %1792 = vmatpush.bf16.msrb.mxu1 %v4190_v59  ;;  %v3307_v59 = vld [vmem:[%s6109_s1 + $0x140] sm:$0xf0]  ;;  %v3626_v57 = vor.u32 %v3830_v50, %v3625_v49  ;;  %v666_v49 = vld [vmem:[%s4124_s17 + $0x288] sm:$0xff] }
  0x54   : > { %1841 = vmatpush.bf16.msrb.mxu3 %v867_v1  ;;  %v3310_v18 = vor.u32 %v3742_v15, %v3307_v59  ;;  %1887 = vmatpush.bf16.msrb.mxu0 %v878_v52  ;;  %v655_v1 = vld [vmem:[%s4124_s17 + $0x230] sm:$0xff]  ;;  %v3759_v15 = vld [vmem:[%s6109_s1 + $0x18c] sm:$0xf]  ;;  %v3627_v52 = vld [vmem:[%s6109_s1 + $0x3c0] sm:$0xf0] }
  0x55   : > { %v876_v3 = vpack.c.bf16 %v656_v2, %v655_v1  ;;  %v3379_v59 = vld [vmem:[%s6109_s1 + $0x1c8] sm:$0xf0]  ;;  %v705_v50 = vld [vmem:[%s4124_s17 + $0x3c0] sm:$0xff] }
  0x57   : > { %1793 = vmatpush.bf16.msrb.mxu1 %v4205_v7  ;;  %v3633_v7 = vld [vmem:[%s6109_s1 + $0x388] sm:$0xf] }
  0x58   : > { %1842 = vmatpush.bf16.msrb.mxu3 %v866_v9  ;;  %v3634_v19 = vor.u32 %v3831_v16, %v3633_v7  ;;  %1888 = vmatpush.bf16.msrb.mxu0 %v877_v60  ;;  %v874_v9 = vpack.c.bf16 %v652_v8, %v651_v6  ;;  %v649_v16 = vld [vmem:[%s4124_s17 + $0x200] sm:$0xff]  ;;  %v688_v60 = vld [vmem:[%s4124_s17 + $0x338] sm:$0xff]  ;;  %v686_v6 = vld [vmem:[%s4124_s17 + $0x328] sm:$0xff] }
  0x59   : > { %v892_v1 = vpack.c.bf16 %v688_v60, %v687_v30  ;;  %v711_v8 = vld [vmem:[%s4124_s17 + $0x3f0] sm:$0xff] }
  0x5b   : > { %1794 = vmatpush.bf16.msrb.mxu1 %v4233_v24  ;;  %v3766_v24 = vld [vmem:[%s6109_s1 + $0x1bc] sm:$0xf0] }
  0x5c   : > { %1843 = vmatpush.bf16.msrb.mxu3 %v865_v11  ;;  %v3370_v31 = vor.u32 %v3766_v24, %v3369_v25  ;;  %1889 = vmatpush.bf16.msrb.mxu0 %v876_v3  ;;  %v3806_v11 = vld [vmem:[%s6109_s1 + $0x304] sm:$0xf]  ;;  %v3382_v25 = vor.u32 %v3759_v15, %v3379_v59  ;;  %v671_v3 = vld [vmem:[%s4124_s17 + $0x2b0] sm:$0xff] }
  0x5d   : > { %1707 = vmatmul.bf16.gmra.mxu0 %v3306_v17  ;;  %v650_v17 = vld [vmem:[%s4124_s17 + $0x208] sm:$0xff]  ;;  %v683_v15 = vld [vmem:[%s4124_s17 + $0x310] sm:$0xff] }
  0x5e   : > { %1756 = vmatmul.bf16.gmra.mxu1 %v3310_v18  ;;  %v695_v18 = vld [vmem:[%s4124_s17 + $0x370] sm:$0xff]  ;;  %v873_v20 = vpack.c.bf16 %v650_v17, %v649_v16  ;;  %v684_v17 = vld [vmem:[%s4124_s17 + $0x318] sm:$0xff] }
  0x5f   : > { %1830 = vmatmul.bf16.gmra.mxu3 %v3634_v19  ;;  %v3562_v19 = vor.u32 %v3814_v48, %v3561_v10  ;;  %v896_v24 = vpack.c.bf16 %v696_v22, %v695_v18  ;;  %1934 = vmatpush.bf16.msra.mxu1 %v888_v29  ;;  %v891_v10 = vpack.c.bf16 %v686_v6, %v685_v39  ;;  %v709_v18 = vld [vmem:[%s4124_s17 + $0x3e0] sm:$0xff]  ;;  %v702_v6 = vld [vmem:[%s4124_s17 + $0x3a8] sm:$0xff] }
  0x60   : > { %1890 = vmatpush.bf16.msrb.mxu0 %v875_v5  ;;  %v884_v5 = vpack.c.bf16 %v672_v4, %v671_v3 }
  0x61   : > { %1815 = vmatmul.bf16.gmra.mxu2 %v3442_v23  ;;  %v3566_v23 = vor.u32 %v3806_v11, %v3563_v14  ;;  %v669_v11 = vld [vmem:[%s4124_s17 + $0x2a0] sm:$0xff]  ;;  %v670_v14 = vld [vmem:[%s4124_s17 + $0x2a8] sm:$0xff] }
  0x62   : > { %1983 = vmatpush.bf16.msrb.mxu2 %v896_v24  ;;  %v883_v16 = vpack.c.bf16 %v670_v14, %v669_v11  ;;  %v668_v24 = vld [vmem:[%s4124_s17 + $0x298] sm:$0xff]  ;;  %v699_v14 = vld [vmem:[%s4124_s17 + $0x390] sm:$0xff] }
  0x63   : > { %1935 = vmatpush.bf16.msra.mxu1 %v887_v37  ;;  %v3720_v37 = vld [vmem:[%s6109_s1 + $0x4c] sm:$0xf0] }
  0x64   : > { %1891 = vmatpush.bf16.msrb.mxu0 %v874_v9  ;;  %v712_v9 = vld [vmem:[%s4124_s17 + $0x3f8] sm:$0xff] }
  0x65   : > { %v904_v48 = vpack.c.bf16 %v712_v9, %v711_v8 }
  0x67   : > { %2032 = vmatpush.bf16.msra.mxu3 %v904_v48 }
  0x68   : > { %1892 = vmatpush.bf16.msrb.mxu0 %v873_v20  ;;  %v890_v20 = vpack.c.bf16 %v684_v17, %v683_v15  ;;  %v700_v15 = vld [vmem:[%s4124_s17 + $0x398] sm:$0xff]  ;;  %v3249_v17 = vld [vmem:[%s6109_s1 + $0x88] sm:$0xf] }
  0x6d   : > { %1712 = vmatmul.bf16.gmra.mxu0 %v3370_v31  ;;  %v694_v31 = vld [vmem:[%s4124_s17 + $0x368] sm:$0xff] }
  0x6e   : > { %1761 = vmatmul.bf16.gmra.mxu1 %v3374_v32  ;;  %v895_v32 = vpack.c.bf16 %v694_v31, %v693_v28  ;;  %v3719_v28 = vld [vmem:[%s6109_s1 + $0x44] sm:$0xf0] }
  0x6f   : > { %1844 = vmatmul.bf16.vlgmr.msrb.gmra.mxu3 %v3190_v33  ;;  %v682_v31 = vld [vmem:[%s4124_s17 + $0x308] sm:$0xff]  ;;  %v3186_v56 = vor.u32 %v3719_v28, %v3185_v27  ;;  %v3737_v27 = vld [vmem:[%s6109_s1 + $0xd4] sm:$0xf0] }
  0x70   : > { %1984 = vmatpush.bf16.msrb.mxu2 %v895_v32  ;;  %v707_v32 = vld [vmem:[%s4124_s17 + $0x3d0] sm:$0xff] }
  0x74   : > { %v4437_v7 = vpop.permute.xlu2 %1026 }
  0x7d   : > { %1717 = vmatmul.bf16.gmra.mxu0 %v3434_v41 }
  0x7e   : > { %1766 = vmatmul.bf16.gmra.mxu1 %v3438_v42  ;;  %v894_v42 = vpack.c.bf16 %v692_v38, %v691_v36  ;;  %v3193_v36 = vld [vmem:[%s6109_s1 + $0x10] sm:$0xf] }
  0x7f   : > { %1849 = vmatmul.bf16.gmra.mxu3 %v3254_v43  ;;  %v675_v43 = vld [vmem:[%s4124_s17 + $0x2d0] sm:$0xff] }
  0x80   : > { %v886_v45 = vpack.c.bf16 %v676_v44, %v675_v43  ;;  %1985 = vmatpush.bf16.msrb.mxu2 %v894_v42  ;;  %v889_v42 = vpack.c.bf16 %v682_v31, %v681_v26  ;;  %v902_v43 = vpack.c.bf16 %v708_v34, %v707_v32  ;;  %v3507_v44 = vld [vmem:[%s6109_s1 + $0x2c8] sm:$0xf0]  ;;  %v3265_v26 = vld [vmem:[%s6109_s1 + $0x98] sm:$0xf]  ;;  %v697_v31 = vld [vmem:[%s4124_s17 + $0x380] sm:$0xff] }
  0x81   : > { %v3510_v30 = vor.u32 %v3791_v35, %v3507_v44  ;;  %v698_v32 = vld [vmem:[%s4124_s17 + $0x388] sm:$0xff] }
  0x82   : > { %1936 = vmatpush.bf16.msra.mxu1 %v886_v45  ;;  %v3721_v45 = vld [vmem:[%s6109_s1 + $0x54] sm:$0xf0] }
  0x83   : > { %v3202_v46 = vor.u32 %v3721_v45, %v3201_v12 }
  0x84   : > { %1986 = vmatpush.bf16.msrb.mxu2 %v893_v47  ;;  %v665_v47 = vld [vmem:[%s4124_s17 + $0x280] sm:$0xff] }
  0x86   : > { %1937 = vmatpush.bf16.msra.mxu1 %v885_v58 }
  0x88   : > { %1987 = vmatpush.bf16.msrb.mxu2 %v892_v1 }
  0x89   : > { %v4453_v40 = vpop.permute.xlu2 %1021 }
  0x8a   : > { %1938 = vmatpush.bf16.msra.mxu1 %v884_v5  ;;  %v701_v5 = vld [vmem:[%s4124_s17 + $0x3a0] sm:$0xff] }
  0x8b   : > { %v4409_v0 = vpop.permute.xlu0 %1046  ;;  %v899_v9 = vpack.c.bf16 %v702_v6, %v701_v5 }
  0x8c   : > { %v4455_v41 = vpop.permute.xlu1 %1036  ;;  %1988 = vmatpush.bf16.msrb.mxu2 %v891_v10 }
  0x8d   : > { %1722 = vmatmul.bf16.gmra.mxu0 %v3498_v61  ;;  %v3630_v61 = vor.u32 %v3822_v51, %v3627_v52  ;;  %v3194_v51 = vor.u32 %v3720_v37, %v3193_v36  ;;  %v897_v36 = vpack.c.bf16 %v698_v32, %v697_v31 }
  0x8e   : > { %1771 = vmatmul.bf16.gmra.mxu1 %v3502_v62  ;;  %v3446_v62 = vor.u32 %v3775_v21, %v3443_v53  ;;  %v881_v21 = vpack.c.bf16 %v666_v49, %v665_v47  ;;  %v706_v53 = vld [vmem:[%s4124_s17 + $0x3c8] sm:$0xff] }
  0x8f   : > { %1854 = vmatmul.bf16.gmra.mxu3 %v3318_v63  ;;  %1939 = vmatpush.bf16.msra.mxu1 %v883_v16 }
  0x90   : > { %1989 = vmatpush.bf16.msrb.mxu2 %v890_v20  ;;  %v3807_v20 = vld [vmem:[%s6109_s1 + $0x30c] sm:$0xf] }
  0x91   : > { %v4487_v2 = vpop.permute.xlu2 %1006 }
  0x93   : > { %v4426_v13 = vpop.permute.xlu0 %1041 }
  0x94   : > { %1990 = vmatpush.bf16.msrb.mxu2 %v889_v42 }
  0x97   : > { %1991 = vmatmul.bf16.vlgmr.msrb.gmra.mxu2 %v3202_v46 }
  0x9a   : > { %v4526_v38 = vpop.permute.xlu2 %991 }
  0x9b   : > { %v4447_v33 = vpop.permute.xlu0 %1016 }
  0x9d   : > { %1727 = vmatmul.bf16.gmra.mxu0 %v3562_v19  ;;  %v710_v19 = vld [vmem:[%s4124_s17 + $0x3e8] sm:$0xff] }
  0x9e   : > { %1776 = vmatmul.bf16.gmra.mxu1 %v3566_v23  ;;  %v903_v22 = vpack.c.bf16 %v710_v19, %v709_v18  ;;  %v3735_v18 = vld [vmem:[%s6109_s1 + $0xc4] sm:$0xf0]  ;;  %v898_v19 = vpack.c.bf16 %v700_v15, %v699_v14 }
  0x9f   : > { %1859 = vmatmul.bf16.gmra.mxu3 %v3382_v25  ;;  %v4485_v63 = vpop.permute.xlu1 %1031  ;;  %v667_v25 = vld [vmem:[%s4124_s17 + $0x290] sm:$0xff]  ;;  %v3250_v42 = vor.u32 %v3735_v18, %v3249_v17 }
  0xa0   : > { %2033 = vmatpush.bf16.msra.mxu3 %v903_v22  ;;  %v882_v29 = vpack.c.bf16 %v668_v24, %v667_v25  ;;  %v3257_v22 = vld [vmem:[%s6109_s1 + $0x90] sm:$0xf]  ;;  %v3571_v24 = vld [vmem:[%s6109_s1 + $0x348] sm:$0xf0] }
  0xa1   : > { %v3736_v25 = vld [vmem:[%s6109_s1 + $0xcc] sm:$0xf0] }
  0xa2   : > { %1940 = vmatpush.bf16.msra.mxu1 %v882_v29  ;;  %v977_v39 = vpop.permute.xlu2 %976  ;;  %v3266_v29 = vor.u32 %v3737_v27, %v3265_v26  ;;  %v3258_v35 = vor.u32 %v3736_v25, %v3257_v22  ;;  %v3728_v22 = vld [vmem:[%s6109_s1 + $0x94] sm:$0xf]  ;;  %v3393_v26 = vld [vmem:[%s6109_s1 + $0x198] sm:$0xf] }
  0xa3   : > { %v4479_v54 = vpop.permute.xlu0 %1001  ;;  %v3259_v25 = vld [vmem:[%s6109_s1 + $0xd0] sm:$0xf0]  ;;  %v3769_v27 = vld [vmem:[%s6109_s1 + $0x1d4] sm:$0xf0] }
  0xa4   : > { %2034 = vmatpush.bf16.msra.mxu3 %v902_v43  ;;  %v3574_v43 = vor.u32 %v3807_v20, %v3571_v24  ;;  %v3768_v20 = vld [vmem:[%s6109_s1 + $0x1cc] sm:$0xf0]  ;;  %v3203_v24 = vld [vmem:[%s6109_s1 + $0x58] sm:$0xf0] }
  0xa6   : > { %1941 = vmatpush.bf16.msra.mxu1 %v881_v21  ;;  %v3635_v21 = vld [vmem:[%s6109_s1 + $0x3c8] sm:$0xf0] }
  0xa7   : > { %v4503_v23 = vpop.permute.xlu1 %1011  ;;  %1996 = vmatmul.bf16.gmra.mxu2 %v3266_v29 }
  0xab   : > { %v4498_v59 = vpop.permute.xlu0 %986 }
  0xad   : > { %1732 = vmatmul.bf16.gmra.mxu0 %v3626_v57  ;;  %v901_v57 = vpack.c.bf16 %v706_v53, %v705_v50  ;;  %v3321_v53 = vld [vmem:[%s6109_s1 + $0x110] sm:$0xf] }
  0xae   : > { %1781 = vmatmul.bf16.gmra.mxu1 %v3630_v61  ;;  %v703_v61 = vld [vmem:[%s4124_s17 + $0x3b0] sm:$0xff] }
  0xaf   : > { %1864 = vmatmul.bf16.gmra.mxu3 %v3446_v62  ;;  %v704_v62 = vld [vmem:[%s4124_s17 + $0x3b8] sm:$0xff] }
  0xb0   : > { %2035 = vmatpush.bf16.msra.mxu3 %v901_v57  ;;  %v900_v4 = vpack.c.bf16 %v704_v62, %v703_v61  ;;  %v3329_v57 = vld [vmem:[%s6109_s1 + $0x118] sm:$0xf] }
  0xb3   : > { %v972_v52 = vpop.permute.xlu0 %971 }
  0xb4   : > { %2036 = vmatpush.bf16.msra.mxu3 %v900_v4 }
  0xb6   : > { %v4545_v3 = vpop.permute.xlu1 %996 }
  0xb8   : > { %2037 = vmatpush.bf16.msra.mxu3 %v899_v9 }
  0xba   : > { %v1698_v55 = vpop.f32.mrf.mxu0 }
  0xbb   : > { %v1747_v58 = vpop.f32.mrf.mxu1  ;;  %v1699_v60 = vadd.f32 %v1698_v55, %v972_v52  ;;  %v3823_v52 = vld [vmem:[%s6109_s1 + $0x38c] sm:$0xf]  ;;  %v3752_v55 = vld [vmem:[%s6109_s1 + $0x14c] sm:$0xf0] }
  0xbc   : > { %2038 = vmatpush.bf16.msra.mxu3 %v898_v19  ;;  %v3322_v62 = vor.u32 %v3752_v55, %v3321_v53  ;;  %v3784_v55 = vld [vmem:[%s6109_s1 + $0x24c] sm:$0xf0] }
  0xbd   : > { %1893 = vmatmul.bf16.vlgmr.msrb.gmra.mxu0 %v3194_v51  ;;  %v4543_v1 = vadd.f32 %v1747_v58, %v1699_v60  ;;  %v3753_v58 = vld [vmem:[%s6109_s1 + $0x154] sm:$0xf0] }
  0xbe   : > { %1795 = vmatmul.bf16.vlgmr.msrb.gmra.mxu1 %v3186_v56  ;;  %v982_v28 = vpop.permute.xlu1 %981  ;;  %v3330_v60 = vor.u32 %v3753_v58, %v3329_v57  ;;  %v3457_v57 = vld [vmem:[%s6109_s1 + $0x218] sm:$0xf] }
  0xbf   : > { %1869 = vmatmul.bf16.gmra.mxu3 %v3510_v30  ;;  %v3195_v30 = vld [vmem:[%s6109_s1 + $0x50] sm:$0xf0]  ;;  %v3785_v58 = vld [vmem:[%s6109_s1 + $0x254] sm:$0xf0] }
  0xc0   : > { %2039 = vmatpush.bf16.msra.mxu3 %v897_v36  ;;  %2001 = vmatmul.bf16.gmra.mxu2 %v3330_v60  ;;  %v3458_v60 = vor.u32 %v3785_v58, %v3457_v57 }
  0xc2   : > { %v4549_v8 = vpop.f32.mrf.mxu3  ;;  %v1700_v10 = vpop.f32.mrf.mxu0 }
  0xc3   : > { %v1749_v48 = vpop.f32.mrf.mxu1  ;;  %v1701_v11 = vadd.f32 %v1700_v10, %v977_v39  ;;  %v3638_v39 = vor.u32 %v3823_v52, %v3635_v21 }
  0xc4   : > { %v1806_v56 = vpop.f32.mrf.mxu2 }
  0xc5   : > { %v4553_v16 = vadd.f32 %v1749_v48, %v1701_v11 }
  0xca   : > { %v4581_v34 = vpop.f32.mrf.mxu3  ;;  %v1703_v37 = vpop.f32.mrf.mxu0 }
  0xcb   : > { %v1752_v44 = vpop.f32.mrf.mxu1  ;;  %v1704_v12 = vadd.f32 %v1703_v37, %v982_v28  ;;  %v3394_v28 = vor.u32 %v3769_v27, %v3393_v26 }
  0xcc   : > { %v4619_v11 = vpop.f32.mrf.mxu2 }
  0xcd   : > { %1898 = vmatmul.bf16.gmra.mxu0 %v3258_v35  ;;  %v4583_v45 = vadd.f32 %v1752_v44, %v1704_v12  ;;  %v3262_v35 = vor.u32 %v3728_v22, %v3259_v25  ;;  %v725_v25 = vld [vmem:[%s4124_s17 + $0x460] sm:$0xff] }
  0xce   : > { %1800 = vmatmul.bf16.gmra.mxu1 %v3250_v42 }
  0xcf   : > { %1874 = vmatmul.bf16.gmra.mxu3 %v3574_v43 }
  0xd0   : > { %2006 = vmatmul.bf16.gmra.mxu2 %v3394_v28 }
  0xd2   : > { %v4585_v46 = vpop.f32.mrf.mxu3  ;;  %v1705_v47 = vpop.f32.mrf.mxu0 }
  0xd3   : > { %v1706_v49 = vadd.f32 %v1705_v47, %v4498_v59  ;;  %v1754_v50 = vpop.f32.mrf.mxu1  ;;  %v3712_v59 = vld [vmem:[%s6109_s1 + $0x14] sm:$0xf] }
  0xd4   : > { %v3198_v5 = vor.u32 %v3712_v59, %v3195_v30  ;;  %v1811_v37 = vpop.f32.mrf.mxu2  ;;  %v3744_v59 = vld [vmem:[%s6109_s1 + $0x114] sm:$0xf]  ;;  %v3267_v30 = vld [vmem:[%s6109_s1 + $0xd8] sm:$0xf0] }
  0xd5   : > { %v4588_v51 = vadd.f32 %v1754_v50, %v1706_v49 }
  0xda   : > { %v4614_v61 = vpop.f32.mrf.mxu3  ;;  %v1708_v4 = vpop.f32.mrf.mxu0 }
  0xdb   : > { %v1709_v6 = vadd.f32 %v1708_v4, %v4526_v38  ;;  %v1757_v9 = vpop.f32.mrf.mxu1  ;;  %v3385_v38 = vld [vmem:[%s6109_s1 + $0x190] sm:$0xf] }
  0xdc   : > { %v3386_v31 = vor.u32 %v3768_v20, %v3385_v38  ;;  %v4658_v21 = vpop.f32.mrf.mxu2 }
  0xdd   : > { %v1758_v10 = vadd.f32 %v1757_v9, %v1709_v6  ;;  %1903 = vmatmul.bf16.gmra.mxu0 %v3322_v62 }
  0xde   : > { %1942 = vmatmul.bf16.vlgmr.msra.gmra.mxu1 %v3198_v5 }
  0xdf   : > { %1879 = vmatmul.bf16.gmra.mxu3 %v3638_v39  ;;  %v4617_v48 = vadd.f32 %v1806_v56, %v1758_v10  ;;  %v3729_v56 = vld [vmem:[%s6109_s1 + $0x9c] sm:$0xf] }
  0xe0   : > { %v3270_v6 = vor.u32 %v3729_v56, %v3267_v30  ;;  %2011 = vmatmul.bf16.gmra.mxu2 %v3458_v60 }
  0xe2   : > { %v4621_v14 = vpop.f32.mrf.mxu3  ;;  %v1710_v15 = vpop.f32.mrf.mxu0 }
  0xe3   : > { %v1711_v17 = vadd.f32 %v1710_v15, %v4545_v3  ;;  %v1759_v18 = vpop.f32.mrf.mxu1  ;;  %v3713_v3 = vld [vmem:[%s6109_s1 + $0x1c] sm:$0xf] }
  0xe4   : > { %v3206_v36 = vor.u32 %v3713_v3, %v3203_v24  ;;  %v1816_v38 = vpop.f32.mrf.mxu2  ;;  %v726_v3 = vld [vmem:[%s4124_s17 + $0x468] sm:$0xff] }
  0xe5   : > { %v4624_v19 = vadd.f32 %v1759_v18, %v1711_v17  ;;  %v727_v17 = vld [vmem:[%s4124_s17 + $0x470] sm:$0xff]  ;;  %v728_v18 = vld [vmem:[%s4124_s17 + $0x478] sm:$0xff] }
  0xe6   : > { %v912_v20 = vpack.c.bf16 %v728_v18, %v727_v17  ;;  %v718_v17 = vld [vmem:[%s4124_s17 + $0x428] sm:$0xff] }
  0xe8   : > { %2081 = vmatpush.bf16.msra.mxu0 %v912_v20 }
  0xea   : > { %v4650_v29 = vpop.f32.mrf.mxu3  ;;  %v1713_v32 = vpop.f32.mrf.mxu0 }
  0xeb   : > { %v1714_v42 = vadd.f32 %v1713_v32, %v4479_v54  ;;  %v1762_v43 = vpop.f32.mrf.mxu1  ;;  %v3449_v54 = vld [vmem:[%s6109_s1 + $0x210] sm:$0xf]  ;;  %v724_v32 = vld [vmem:[%s4124_s17 + $0x458] sm:$0xff] }
  0xec   : > { %v3450_v4 = vor.u32 %v3784_v55, %v3449_v54  ;;  %v721_v55 = vld [vmem:[%s4124_s17 + $0x440] sm:$0xff] }
  0xed   : > { %v1763_v44 = vadd.f32 %v1762_v43, %v1714_v42  ;;  %1908 = vmatmul.bf16.gmra.mxu0 %v3386_v31  ;;  %v723_v31 = vld [vmem:[%s4124_s17 + $0x450] sm:$0xff] }
  0xee   : > { %1947 = vmatmul.bf16.gmra.mxu1 %v3262_v35  ;;  %v910_v42 = vpack.c.bf16 %v724_v32, %v723_v31  ;;  %v3387_v43 = vld [vmem:[%s6109_s1 + $0x1d0] sm:$0xf0] }
  0xef   : > { %2040 = vmatmul.bf16.vlgmr.msra.gmra.mxu3 %v3206_v36  ;;  %v4653_v12 = vadd.f32 %v1811_v37, %v1763_v44  ;;  %v3513_v36 = vld [vmem:[%s6109_s1 + $0x290] sm:$0xf]  ;;  %v3745_v44 = vld [vmem:[%s6109_s1 + $0x11c] sm:$0xf]  ;;  %v3451_v32 = vld [vmem:[%s6109_s1 + $0x250] sm:$0xf0] }
  0xf0   : > { %v3800_v37 = vld [vmem:[%s6109_s1 + $0x2cc] sm:$0xf0] }
  0xf1   : > { %v3514_v56 = vor.u32 %v3800_v37, %v3513_v36  ;;  %v3761_v36 = vld [vmem:[%s6109_s1 + $0x19c] sm:$0xf] }
  0xf2   : > { %v4655_v47 = vpop.f32.mrf.mxu3  ;;  %v1715_v49 = vpop.f32.mrf.mxu0  ;;  %v3395_v37 = vld [vmem:[%s6109_s1 + $0x1d8] sm:$0xf0] }
  0xf3   : > { %v1716_v50 = vadd.f32 %v1715_v49, %v4487_v2  ;;  %v1764_v52 = vpop.f32.mrf.mxu1  ;;  %v3323_v2 = vld [vmem:[%s6109_s1 + $0x150] sm:$0xf0]  ;;  %v3331_v49 = vld [vmem:[%s6109_s1 + $0x158] sm:$0xf0] }
  0xf4   : > { %v3326_v5 = vor.u32 %v3744_v59, %v3323_v2  ;;  %v722_v59 = vld [vmem:[%s4124_s17 + $0x448] sm:$0xff]  ;;  %v3334_v60 = vor.u32 %v3745_v44, %v3331_v49  ;;  %v713_v49 = vld [vmem:[%s4124_s17 + $0x400] sm:$0xff] }
  0xf5   : > { %v4660_v53 = vadd.f32 %v1764_v52, %v1716_v50  ;;  %v3521_v50 = vld [vmem:[%s6109_s1 + $0x298] sm:$0xf]  ;;  %v909_v30 = vpack.c.bf16 %v722_v59, %v721_v55 }
  0xf6   : > { %v3801_v52 = vld [vmem:[%s6109_s1 + $0x2d4] sm:$0xf0] }
  0xf7   : > { %v3522_v54 = vor.u32 %v3801_v52, %v3521_v50  ;;  %v714_v50 = vld [vmem:[%s4124_s17 + $0x408] sm:$0xff]  ;;  %v759_v52 = vld [vmem:[%s4124_s17 + $0x570] sm:$0xff] }
  0xf8   : > { %v905_v59 = vpack.c.bf16 %v714_v50, %v713_v49  ;;  %v3515_v49 = vld [vmem:[%s6109_s1 + $0x2d0] sm:$0xf0]  ;;  %v3777_v50 = vld [vmem:[%s6109_s1 + $0x21c] sm:$0xf] }
  0xf9   : > { %2016 = vmatmul.bf16.gmra.mxu2 %v3522_v54 }
  0xfa   : > { %v4686_v62 = vpop.f32.mrf.mxu3  ;;  %v1718_v39 = vpop.f32.mrf.mxu0 }
  0xfb   : > { %v1719_v9 = vadd.f32 %v1718_v39, %v4503_v23  ;;  %v1767_v10 = vpop.f32.mrf.mxu1  ;;  %v911_v23 = vpack.c.bf16 %v726_v3, %v725_v25 }
  0xfd   : > { %v1768_v15 = vadd.f32 %v1767_v10, %v1719_v9  ;;  %1913 = vmatmul.bf16.gmra.mxu0 %v3450_v4  ;;  %v720_v9 = vld [vmem:[%s4124_s17 + $0x438] sm:$0xff] }
  0xfe   : > { %1952 = vmatmul.bf16.gmra.mxu1 %v3326_v5  ;;  %2082 = vmatpush.bf16.msra.mxu0 %v911_v23  ;;  %v715_v23 = vld [vmem:[%s4124_s17 + $0x410] sm:$0xff] }
  0xff   : > { %2045 = vmatmul.bf16.gmra.mxu3 %v3270_v6  ;;  %v4691_v22 = vadd.f32 %v1816_v38, %v1768_v15  ;;  %v719_v6 = vld [vmem:[%s4124_s17 + $0x430] sm:$0xff]  ;;  %v717_v15 = vld [vmem:[%s4124_s17 + $0x420] sm:$0xff] }
 0x100   : > { %v908_v10 = vpack.c.bf16 %v720_v9, %v719_v6  ;;  %v907_v38 = vpack.c.bf16 %v718_v17, %v717_v15  ;;  %v743_v6 = vld [vmem:[%s4124_s17 + $0x4f0] sm:$0xff]  ;;  %v744_v9 = vld [vmem:[%s4124_s17 + $0x4f8] sm:$0xff]  ;;  %v758_v17 = vld [vmem:[%s4124_s17 + $0x568] sm:$0xff] }
 0x101   : > { %v920_v15 = vpack.c.bf16 %v744_v9, %v743_v6  ;;  %v752_v9 = vld [vmem:[%s4124_s17 + $0x538] sm:$0xff] }
 0x102   : > { %v4695_v24 = vpop.f32.mrf.mxu3  ;;  %v1720_v26 = vpop.f32.mrf.mxu0  ;;  %2083 = vmatpush.bf16.msra.mxu0 %v910_v42  ;;  %v3585_v42 = vld [vmem:[%s6109_s1 + $0x318] sm:$0xf] }
 0x103   : > { %v1721_v27 = vadd.f32 %v1720_v26, %v4447_v33  ;;  %v1769_v28 = vpop.f32.mrf.mxu1  ;;  %v3760_v33 = vld [vmem:[%s6109_s1 + $0x194] sm:$0xf]  ;;  %v716_v26 = vld [vmem:[%s4124_s17 + $0x418] sm:$0xff]  ;;  %2130 = vmatpush.bf16.msrb.mxu1 %v920_v15 }
 0x104   : > { %v3390_v58 = vor.u32 %v3760_v33, %v3387_v43  ;;  %v906_v31 = vpack.c.bf16 %v716_v26, %v715_v23  ;;  %v3817_v33 = vld [vmem:[%s6109_s1 + $0x354] sm:$0xf0]  ;;  %v1809_v43 = vadd.f32 %v4619_v11, %v4624_v19 }
 0x105   : > { %v4700_v35 = vadd.f32 %v1769_v28, %v1721_v27  ;;  %v3577_v28 = vld [vmem:[%s6109_s1 + $0x310] sm:$0xf]  ;;  %v3586_v44 = vor.u32 %v3817_v33, %v3585_v42  ;;  %v756_v23 = vld [vmem:[%s4124_s17 + $0x558] sm:$0xff] }
 0x106   : > { %2084 = vmatpush.bf16.msra.mxu0 %v909_v30  ;;  %v3641_v33 = vld [vmem:[%s6109_s1 + $0x390] sm:$0xf] }
 0x109   : > { %2021 = vmatmul.bf16.gmra.mxu2 %v3586_v44  ;;  %v3792_v44 = vld [vmem:[%s6109_s1 + $0x294] sm:$0xf] }
 0x10a   : > { %v4728_v2 = vpop.f32.mrf.mxu3  ;;  %v1723_v57 = vpop.f32.mrf.mxu0  ;;  %2085 = vmatpush.bf16.msra.mxu0 %v908_v10  ;;  %v757_v10 = vld [vmem:[%s4124_s17 + $0x560] sm:$0xff] }
 0x10b   : > { %v1724_v4 = vadd.f32 %v1723_v57, %v4453_v40  ;;  %v1772_v39 = vpop.f32.mrf.mxu1 }
 0x10d   : > { %v4731_v5 = vadd.f32 %v1772_v39, %v1724_v4  ;;  %1918 = vmatmul.bf16.gmra.mxu0 %v3514_v56  ;;  %v760_v56 = vld [vmem:[%s4124_s17 + $0x578] sm:$0xff] }
 0x10e   : > { %1957 = vmatmul.bf16.gmra.mxu1 %v3390_v58  ;;  %2086 = vmatpush.bf16.msra.mxu0 %v907_v38  ;;  %v928_v4 = vpack.c.bf16 %v760_v56, %v759_v52  ;;  %v742_v38 = vld [vmem:[%s4124_s17 + $0x4e8] sm:$0xff]  ;;  %v1814_v56 = vadd.f32 %v4658_v21, %v4660_v53 }
 0x10f   : > { %2050 = vmatmul.bf16.gmra.mxu3 %v3334_v60  ;;  %v3398_v60 = vor.u32 %v3761_v36, %v3395_v37  ;;  %v740_v36 = vld [vmem:[%s4124_s17 + $0x4d8] sm:$0xff]  ;;  %v753_v37 = vld [vmem:[%s4124_s17 + $0x540] sm:$0xff] }
 0x110   : > { %2179 = vmatpush.bf16.msra.mxu2 %v928_v4  ;;  %v751_v4 = vld [vmem:[%s4124_s17 + $0x530] sm:$0xff] }
 0x111   : > { %v924_v21 = vpack.c.bf16 %v752_v9, %v751_v4  ;;  %v772_v9 = vld [vmem:[%s4124_s17 + $0x5d8] sm:$0xff] }
 0x112   : > { %v1855_v18 = vpop.f32.mrf.mxu3  ;;  %v1725_v20 = vpop.f32.mrf.mxu0  ;;  %2087 = vmatpush.bf16.msra.mxu0 %v906_v31 }
 0x113   : > { %v4738_v40 = vadd.f32 %v1855_v18, %v4617_v48  ;;  %v1726_v25 = vadd.f32 %v1725_v20, %v4437_v7  ;;  %v1774_v3 = vpop.f32.mrf.mxu1  ;;  %v3816_v48 = vld [vmem:[%s6109_s1 + $0x34c] sm:$0xf0]  ;;  %v3776_v7 = vld [vmem:[%s6109_s1 + $0x214] sm:$0xf]  ;;  %v741_v18 = vld [vmem:[%s4124_s17 + $0x4e0] sm:$0xff] }
 0x114   : > { %v3578_v55 = vor.u32 %v3816_v48, %v3577_v28  ;;  %v3454_v58 = vor.u32 %v3776_v7, %v3451_v32  ;;  %v755_v20 = vld [vmem:[%s4124_s17 + $0x550] sm:$0xff] }
 0x115   : > { %v4743_v27 = vadd.f32 %v1774_v3, %v1726_v25  ;;  %v919_v3 = vpack.c.bf16 %v742_v38, %v741_v18  ;;  %v926_v48 = vpack.c.bf16 %v756_v23, %v755_v20  ;;  %v739_v32 = vld [vmem:[%s4124_s17 + $0x4d0] sm:$0xff] }
 0x116   : > { %2088 = vmatpush.bf16.msra.mxu0 %v905_v59  ;;  %v3833_v59 = vld [vmem:[%s6109_s1 + $0x3d4] sm:$0xf0]  ;;  %v735_v20 = vld [vmem:[%s4124_s17 + $0x4b0] sm:$0xff] }
 0x117   : > { %2131 = vmatpush.bf16.msrb.mxu1 %v919_v3  ;;  %v749_v3 = vld [vmem:[%s4124_s17 + $0x520] sm:$0xff] }
 0x11a   : > { %v1857_v54 = vpop.f32.mrf.mxu3  ;;  %v1728_v57 = vpop.f32.mrf.mxu0 }
 0x11b   : > { %v4775_v30 = vadd.f32 %v1857_v54, %v1809_v43  ;;  %v1729_v11 = vadd.f32 %v1728_v57, %v4485_v63  ;;  %v1777_v19 = vpop.f32.mrf.mxu1  ;;  %v927_v63 = vpack.c.bf16 %v758_v17, %v757_v10  ;;  %v754_v43 = vld [vmem:[%s4124_s17 + $0x548] sm:$0xff]  ;;  %v3459_v54 = vld [vmem:[%s6109_s1 + $0x258] sm:$0xf0]  ;;  %v3518_v17 = vor.u32 %v3792_v44, %v3515_v49 }
 0x11c   : > { %v925_v52 = vpack.c.bf16 %v754_v43, %v753_v37  ;;  %v747_v37 = vld [vmem:[%s4124_s17 + $0x510] sm:$0xff]  ;;  %v773_v43 = vld [vmem:[%s4124_s17 + $0x5e0] sm:$0xff]  ;;  %v774_v44 = vld [vmem:[%s4124_s17 + $0x5e8] sm:$0xff] }
 0x11d   : > { %v4778_v39 = vadd.f32 %v1777_v19, %v1729_v11  ;;  %1923 = vmatmul.bf16.gmra.mxu0 %v3578_v55  ;;  %2180 = vmatpush.bf16.msra.mxu2 %v927_v63  ;;  %v3649_v55 = vld [vmem:[%s6109_s1 + $0x398] sm:$0xf]  ;;  %v3462_v63 = vor.u32 %v3777_v50, %v3459_v54  ;;  %v935_v54 = vpack.c.bf16 %v774_v44, %v773_v43 }
 0x11e   : > { %1962 = vmatmul.bf16.gmra.mxu1 %v3454_v58  ;;  %v3650_v57 = vor.u32 %v3833_v59, %v3649_v55  ;;  %v737_v58 = vld [vmem:[%s4124_s17 + $0x4c0] sm:$0xff] }
 0x11f   : > { %2055 = vmatmul.bf16.gmra.mxu3 %v3398_v60  ;;  %v738_v60 = vld [vmem:[%s4124_s17 + $0x4c8] sm:$0xff] }
 0x120   : > { %v917_v6 = vpack.c.bf16 %v738_v60, %v737_v58  ;;  %2026 = vmatmul.bf16.gmra.mxu2 %v3650_v57  ;;  %v732_v57 = vld [vmem:[%s4124_s17 + $0x498] sm:$0xff]  ;;  %v745_v58 = vld [vmem:[%s4124_s17 + $0x500] sm:$0xff]  ;;  %v1818_v60 = vpop.f32.mrf.mxu2 }
 0x121   : > { %2181 = vmatpush.bf16.msra.mxu2 %v926_v48  ;;  %v776_v48 = vld [vmem:[%s4124_s17 + $0x5f8] sm:$0xff] }
 0x122   : > { %v1860_v25 = vpop.f32.mrf.mxu3  ;;  %v1730_v28 = vpop.f32.mrf.mxu0 }
 0x123   : > { %v4789_v26 = vadd.f32 %v1860_v25, %v4653_v12  ;;  %v1731_v31 = vadd.f32 %v1730_v28, %v4455_v41  ;;  %v1779_v7 = vpop.f32.mrf.mxu1  ;;  %v3832_v12 = vld [vmem:[%s6109_s1 + $0x3cc] sm:$0xf0]  ;;  %v918_v41 = vpack.c.bf16 %v740_v36, %v739_v32  ;;  %v736_v25 = vld [vmem:[%s4124_s17 + $0x4b8] sm:$0xff]  ;;  %v733_v32 = vld [vmem:[%s4124_s17 + $0x4a0] sm:$0xff] }
 0x124   : > { %v3642_v19 = vor.u32 %v3832_v12, %v3641_v33  ;;  %v916_v23 = vpack.c.bf16 %v736_v25, %v735_v20  ;;  %v775_v28 = vld [vmem:[%s4124_s17 + $0x5f0] sm:$0xff]  ;;  %v734_v36 = vld [vmem:[%s4124_s17 + $0x4a8] sm:$0xff] }
 0x125   : > { %v4795_v42 = vadd.f32 %v1779_v7, %v1731_v31  ;;  %2132 = vmatpush.bf16.msrb.mxu1 %v918_v41  ;;  %2182 = vmatpush.bf16.msra.mxu2 %v925_v52  ;;  %v936_v7 = vpack.c.bf16 %v776_v48, %v775_v28  ;;  %v915_v12 = vpack.c.bf16 %v734_v36, %v733_v32  ;;  %v748_v41 = vld [vmem:[%s4124_s17 + $0x518] sm:$0xff]  ;;  %v3217_v20 = vld [vmem:[%s6109_s1 + $0x28] sm:$0xf]  ;;  %v769_v48 = vld [vmem:[%s4124_s17 + $0x5c0] sm:$0xff] }
 0x126   : > { %v922_v52 = vpack.c.bf16 %v748_v41, %v747_v37  ;;  %v3723_v25 = vld [vmem:[%s6109_s1 + $0x64] sm:$0xf0] }
 0x127   : > { %2228 = vmatpush.bf16.msrb.mxu3 %v936_v7  ;;  %v730_v28 = vld [vmem:[%s4124_s17 + $0x488] sm:$0xff] }
 0x128   : > { %v770_v36 = vld [vmem:[%s4124_s17 + $0x5c8] sm:$0xff] }
 0x129   : > { %2133 = vmatpush.bf16.msrb.mxu1 %v917_v6  ;;  %2183 = vmatpush.bf16.msra.mxu2 %v924_v21  ;;  %v771_v6 = vld [vmem:[%s4124_s17 + $0x5d0] sm:$0xff]  ;;  %v933_v43 = vpack.c.bf16 %v770_v36, %v769_v48 }
 0x12a   : > { %v1862_v11 = vpop.f32.mrf.mxu3  ;;  %v1733_v15 = vpop.f32.mrf.mxu0 }
 0x12b   : > { %v4828_v10 = vadd.f32 %v1862_v11, %v1814_v56  ;;  %v1734_v53 = vadd.f32 %v1733_v15, %v4426_v13  ;;  %v1782_v18 = vpop.f32.mrf.mxu1  ;;  %v750_v13 = vld [vmem:[%s4124_s17 + $0x528] sm:$0xff]  ;;  %v731_v56 = vld [vmem:[%s4124_s17 + $0x490] sm:$0xff]  ;;  %2229 = vmatpush.bf16.msrb.mxu3 %v935_v54  ;;  %v3793_v15 = vld [vmem:[%s6109_s1 + $0x29c] sm:$0xf] }
 0x12c   : > { %v923_v31 = vpack.c.bf16 %v750_v13, %v749_v3  ;;  %v3579_v11 = vld [vmem:[%s6109_s1 + $0x350] sm:$0xf0]  ;;  %v1819_v3 = vadd.f32 %v1818_v60, %v4700_v35  ;;  %v729_v13 = vld [vmem:[%s4124_s17 + $0x480] sm:$0xff] }
 0x12d   : > { %v4831_v38 = vadd.f32 %v1782_v18, %v1734_v53  ;;  %1928 = vmatmul.bf16.gmra.mxu0 %v3642_v19  ;;  %2134 = vmatpush.bf16.msrb.mxu1 %v916_v23  ;;  %v746_v19 = vld [vmem:[%s4124_s17 + $0x508] sm:$0xff]  ;;  %v934_v53 = vpack.c.bf16 %v772_v9, %v771_v6  ;;  %v3523_v18 = vld [vmem:[%s6109_s1 + $0x2d8] sm:$0xf0]  ;;  %v3218_v23 = vor.u32 %v3723_v25, %v3217_v20  ;;  %v763_v6 = vld [vmem:[%s4124_s17 + $0x590] sm:$0xff] }
 0x12e   : > { %1967 = vmatmul.bf16.gmra.mxu1 %v3518_v17  ;;  %2184 = vmatpush.bf16.msra.mxu2 %v923_v31  ;;  %v3209_v17 = vld [vmem:[%s6109_s1 + $0x20] sm:$0xf]  ;;  %v921_v21 = vpack.c.bf16 %v746_v19, %v745_v58  ;;  %v913_v32 = vpack.c.bf16 %v730_v28, %v729_v13  ;;  %v3526_v41 = vor.u32 %v3793_v15, %v3523_v18  ;;  %v766_v58 = vld [vmem:[%s4124_s17 + $0x5a8] sm:$0xff]  ;;  %v764_v9 = vld [vmem:[%s4124_s17 + $0x598] sm:$0xff] }
 0x12f   : > { %2060 = vmatmul.bf16.gmra.mxu3 %v3462_v63  ;;  %v3722_v63 = vld [vmem:[%s6109_s1 + $0x5c] sm:$0xf0]  ;;  %v3824_v15 = vld [vmem:[%s6109_s1 + $0x394] sm:$0xf]  ;;  %v3739_v20 = vld [vmem:[%s6109_s1 + $0xe4] sm:$0xf0] }
 0x130   : > { %v3210_v7 = vor.u32 %v3722_v63, %v3209_v17  ;;  %2230 = vmatpush.bf16.msrb.mxu3 %v934_v53  ;;  %v3273_v63 = vld [vmem:[%s6109_s1 + $0xa0] sm:$0xf]  ;;  %v3587_v53 = vld [vmem:[%s6109_s1 + $0x358] sm:$0xf0]  ;;  %v762_v28 = vld [vmem:[%s4124_s17 + $0x588] sm:$0xff] }
 0x131   : > { %2135 = vmatpush.bf16.msrb.mxu1 %v915_v12  ;;  %v761_v13 = vld [vmem:[%s4124_s17 + $0x580] sm:$0xff] }
 0x132   : > { %v1865_v33 = vpop.f32.mrf.mxu3  ;;  %v1735_v50 = vpop.f32.mrf.mxu0  ;;  %2185 = vmatpush.bf16.msra.mxu2 %v922_v52  ;;  %v768_v52 = vld [vmem:[%s4124_s17 + $0x5b8] sm:$0xff] }
 0x133   : > { %v4846_v49 = vadd.f32 %v1865_v33, %v4691_v22  ;;  %v1736_v55 = vadd.f32 %v1735_v50, %v4409_v0  ;;  %v1784_v59 = vpop.f32.mrf.mxu1  ;;  %v3808_v22 = vld [vmem:[%s6109_s1 + $0x314] sm:$0xf]  ;;  %v914_v0 = vpack.c.bf16 %v732_v57, %v731_v56  ;;  %v765_v57 = vld [vmem:[%s4124_s17 + $0x5a0] sm:$0xff] }
 0x134   : > { %v3582_v12 = vor.u32 %v3808_v22, %v3579_v11  ;;  %2231 = vmatpush.bf16.msrb.mxu3 %v933_v43  ;;  %v767_v50 = vld [vmem:[%s4124_s17 + $0x5b0] sm:$0xff]  ;;  %v931_v22 = vpack.c.bf16 %v766_v58, %v765_v57  ;;  %v3211_v58 = vld [vmem:[%s6109_s1 + $0x60] sm:$0xf0] }
 0x135   : > { %v4852_v4 = vadd.f32 %v1784_v59, %v1736_v55  ;;  %2136 = vmatpush.bf16.msrb.mxu1 %v914_v0  ;;  %v932_v55 = vpack.c.bf16 %v768_v52, %v767_v50  ;;  %v4892_v59 = vpop.f32.mrf.mxu2 }
 0x136   : > { %2186 = vmatpush.bf16.msra.mxu2 %v921_v21  ;;  %v3738_v21 = vld [vmem:[%s6109_s1 + $0xdc] sm:$0xf0] }
 0x138   : > { %2232 = vmatpush.bf16.msrb.mxu3 %v932_v55 }
 0x139   : > { %2187 = vmatmul.bf16.vlgmr.msra.gmra.mxu2 %v3218_v23  ;;  %2137 = vmatpush.bf16.msrb.mxu1 %v913_v32 }
 0x13a   : > { %v1867_v31 = vpop.f32.mrf.mxu3  ;;  %v1894_v33 = vpop.f32.mrf.mxu0 }
 0x13b   : > { %v4886_v37 = vadd.f32 %v1867_v31, %v1819_v3  ;;  %v1796_v35 = vpop.f32.mrf.mxu1  ;;  %v1824_v3 = vadd.f32 %v4581_v34, %v4743_v27  ;;  %v3274_v31 = vor.u32 %v3738_v21, %v3273_v63 }
 0x13c   : > { %v1797_v44 = vadd.f32 %v1796_v35, %v4543_v1  ;;  %v1822_v1 = vadd.f32 %v4549_v8, %v4731_v5  ;;  %v3643_v8 = vld [vmem:[%s6109_s1 + $0x3d0] sm:$0xf0]  ;;  %2233 = vmatpush.bf16.msrb.mxu3 %v931_v22  ;;  %v930_v5 = vpack.c.bf16 %v764_v9, %v763_v6  ;;  %v3755_v22 = vld [vmem:[%s6109_s1 + $0x164] sm:$0xf0] }
 0x13d   : > { %2089 = vmatmul.bf16.vlgmr.msra.gmra.mxu0 %v3210_v7  ;;  %v4924_v18 = vpop.f32.mrf.mxu2  ;;  %v929_v7 = vpack.c.bf16 %v762_v28, %v761_v13  ;;  %v3770_v13 = vld [vmem:[%s6109_s1 + $0x1dc] sm:$0xf0]  ;;  %v3219_v28 = vld [vmem:[%s6109_s1 + $0x68] sm:$0xf0] }
 0x13e   : > { %v1846_v54 = vadd.f32 %v4655_v47, %v1797_v44  ;;  %1972 = vmatmul.bf16.gmra.mxu1 %v3582_v12  ;;  %v1827_v44 = vadd.f32 %v4585_v46, %v4778_v39  ;;  %v3337_v46 = vld [vmem:[%s6109_s1 + $0x120] sm:$0xf] }
 0x13f   : > { %2065 = vmatmul.bf16.gmra.mxu3 %v3526_v41  ;;  %v3754_v39 = vld [vmem:[%s6109_s1 + $0x15c] sm:$0xf0] }
 0x140   : > { %v4894_v56 = vadd.f32 %v1894_v33, %v1846_v54  ;;  %2234 = vmatpush.bf16.msrb.mxu3 %v930_v5  ;;  %v3646_v33 = vor.u32 %v3824_v15, %v3643_v8  ;;  %v3338_v9 = vor.u32 %v3754_v39, %v3337_v46 }
 0x142   : > { %v1870_v60 = vpop.f32.mrf.mxu3  ;;  %v1896_v47 = vpop.f32.mrf.mxu0 }
 0x143   : > { %v4900_v11 = vadd.f32 %v1870_v60, %v1822_v1  ;;  %v1798_v0 = vpop.f32.mrf.mxu1  ;;  %v3825_v1 = vld [vmem:[%s6109_s1 + $0x39c] sm:$0xf] }
 0x144   : > { %v1799_v19 = vadd.f32 %v1798_v0, %v4553_v16  ;;  %v3809_v16 = vld [vmem:[%s6109_s1 + $0x31c] sm:$0xf]  ;;  %2235 = vmatpush.bf16.msrb.mxu3 %v929_v7  ;;  %v1829_v0 = vadd.f32 %v4614_v61, %v4795_v42  ;;  %v1832_v42 = vadd.f32 %v4621_v14, %v4831_v38  ;;  %v3730_v38 = vld [vmem:[%s6109_s1 + $0xa4] sm:$0xf]  ;;  %v1834_v7 = vadd.f32 %v4650_v29, %v4852_v4 }
 0x145   : > { %v3590_v12 = vor.u32 %v3809_v16, %v3587_v53  ;;  %v4942_v27 = vpop.f32.mrf.mxu2 }
 0x146   : > { %v1848_v17 = vadd.f32 %v4686_v62, %v1799_v19  ;;  %v3281_v62 = vld [vmem:[%s6109_s1 + $0xa8] sm:$0xf] }
 0x147   : > { %v3282_v23 = vor.u32 %v3739_v20, %v3281_v62 }
 0x148   : > { %v4932_v25 = vadd.f32 %v1896_v47, %v1848_v17 }
 0x149   : > { %2192 = vmatmul.bf16.gmra.mxu2 %v3282_v23 }
 0x14a   : > { %v1872_v48 = vpop.f32.mrf.mxu3  ;;  %v1899_v36 = vpop.f32.mrf.mxu0 }
 0x14b   : > { %v4938_v32 = vadd.f32 %v1872_v48, %v1824_v3  ;;  %v1801_v41 = vpop.f32.mrf.mxu1 }
 0x14c   : > { %v1802_v43 = vadd.f32 %v1801_v41, %v4583_v45 }
 0x14d   : > { %2094 = vmatmul.bf16.gmra.mxu0 %v3274_v31  ;;  %v4968_v60 = vpop.f32.mrf.mxu2  ;;  %v3771_v31 = vld [vmem:[%s6109_s1 + $0x1e4] sm:$0xf0] }
 0x14e   : > { %v1851_v34 = vadd.f32 %v4695_v24, %v1802_v43  ;;  %1977 = vmatmul.bf16.gmra.mxu1 %v3646_v33  ;;  %v3651_v24 = vld [vmem:[%s6109_s1 + $0x3d8] sm:$0xf0] }
 0x14f   : > { %2070 = vmatmul.bf16.gmra.mxu3 %v3590_v12  ;;  %v3654_v5 = vor.u32 %v3825_v1, %v3651_v24 }
 0x150   : > { %v1900_v35 = vadd.f32 %v1899_v36, %v1851_v34 }
 0x152   : > { %v1875_v50 = vpop.f32.mrf.mxu3  ;;  %v1901_v54 = vpop.f32.mrf.mxu0 }
 0x153   : > { %v4946_v52 = vadd.f32 %v1875_v50, %v1827_v44  ;;  %v1803_v55 = vpop.f32.mrf.mxu1 }
 0x154   : > { %v1804_v45 = vadd.f32 %v1803_v55, %v4588_v51  ;;  %v3714_v51 = vld [vmem:[%s6109_s1 + $0x24] sm:$0xf] }
 0x155   : > { %v3214_v17 = vor.u32 %v3714_v51, %v3211_v58  ;;  %v4985_v61 = vpop.f32.mrf.mxu2  ;;  %v3746_v51 = vld [vmem:[%s6109_s1 + $0x124] sm:$0xf]  ;;  %v3731_v58 = vld [vmem:[%s6109_s1 + $0xac] sm:$0xf] }
 0x156   : > { %v1853_v57 = vadd.f32 %v4728_v2, %v1804_v45  ;;  %v3345_v2 = vld [vmem:[%s6109_s1 + $0x128] sm:$0xf] }
 0x157   : > { %v3346_v19 = vor.u32 %v3755_v22, %v3345_v2  ;;  %v3283_v2 = vld [vmem:[%s6109_s1 + $0xe8] sm:$0xf0] }
 0x158   : > { %v1902_v47 = vadd.f32 %v1901_v54, %v1853_v57 }
 0x159   : > { %2197 = vmatmul.bf16.gmra.mxu2 %v3346_v19 }
 0x15a   : > { %v1877_v6 = vpop.f32.mrf.mxu3  ;;  %v1904_v8 = vpop.f32.mrf.mxu0 }
 0x15b   : > { %v4978_v15 = vadd.f32 %v1877_v6, %v1829_v0  ;;  %v4981_v16 = vadd.f32 %v1904_v8, %v4738_v40  ;;  %v1943_v63 = vpop.f32.mrf.mxu1 }
 0x15c   : > { %v1944_v21 = vadd.f32 %v1943_v63, %v4894_v56 }
 0x15d   : > { %2099 = vmatmul.bf16.gmra.mxu0 %v3338_v9  ;;  %v5014_v48 = vpop.f32.mrf.mxu2 }
 0x15e   : > { %v1993_v53 = vadd.f32 %v4892_v59, %v1944_v21  ;;  %2138 = vmatmul.bf16.vlgmr.msrb.gmra.mxu1 %v3214_v17  ;;  %v3401_v59 = vld [vmem:[%s6109_s1 + $0x1a0] sm:$0xf]  ;;  %v3286_v17 = vor.u32 %v3731_v58, %v3283_v2 }
 0x15f   : > { %2075 = vmatmul.bf16.gmra.mxu3 %v3654_v5  ;;  %v3402_v12 = vor.u32 %v3770_v13, %v3401_v59  ;;  %v789_v59 = vld [vmem:[%s4124_s17 + $0x660] sm:$0xff] }
 0x162   : > { %v1880_v62 = vpop.f32.mrf.mxu3  ;;  %v1906_v3 = vpop.f32.mrf.mxu0 }
 0x163   : > { %v4989_v20 = vadd.f32 %v1880_v62, %v1832_v42  ;;  %v4992_v40 = vadd.f32 %v1906_v3, %v4775_v30  ;;  %v1945_v23 = vpop.f32.mrf.mxu1  ;;  %v3275_v30 = vld [vmem:[%s6109_s1 + $0xe0] sm:$0xf0]  ;;  %v791_v42 = vld [vmem:[%s4124_s17 + $0x670] sm:$0xff]  ;;  %v792_v62 = vld [vmem:[%s4124_s17 + $0x678] sm:$0xff] }
 0x164   : > { %v1946_v56 = vadd.f32 %v1945_v23, %v4932_v25  ;;  %v3715_v25 = vld [vmem:[%s6109_s1 + $0x2c] sm:$0xf]  ;;  %v3278_v34 = vor.u32 %v3730_v38, %v3275_v30  ;;  %v944_v23 = vpack.c.bf16 %v792_v62, %v791_v42  ;;  %v779_v42 = vld [vmem:[%s4124_s17 + $0x610] sm:$0xff]  ;;  %v780_v62 = vld [vmem:[%s4124_s17 + $0x618] sm:$0xff] }
 0x165   : > { %v3222_v44 = vor.u32 %v3715_v25, %v3219_v28  ;;  %v5030_v29 = vpop.f32.mrf.mxu2  ;;  %v787_v28 = vld [vmem:[%s4124_s17 + $0x650] sm:$0xff] }
 0x166   : > { %v1995_v14 = vadd.f32 %v4924_v18, %v1946_v56  ;;  %v3409_v18 = vld [vmem:[%s6109_s1 + $0x1a8] sm:$0xf]  ;;  %2277 = vmatpush.bf16.msrb.mxu0 %v944_v23  ;;  %v3593_v23 = vld [vmem:[%s6109_s1 + $0x320] sm:$0xf] }
 0x167   : > { %v3410_v36 = vor.u32 %v3771_v31, %v3409_v18  ;;  %v788_v18 = vld [vmem:[%s4124_s17 + $0x658] sm:$0xff]  ;;  %v3529_v31 = vld [vmem:[%s6109_s1 + $0x2a0] sm:$0xf] }
 0x169   : > { %2202 = vmatmul.bf16.gmra.mxu2 %v3410_v36  ;;  %v942_v36 = vpack.c.bf16 %v788_v18, %v787_v28  ;;  %v777_v28 = vld [vmem:[%s4124_s17 + $0x600] sm:$0xff]  ;;  %v778_v18 = vld [vmem:[%s4124_s17 + $0x608] sm:$0xff] }
 0x16a   : > { %v1882_v33 = vpop.f32.mrf.mxu3  ;;  %v1909_v43 = vpop.f32.mrf.mxu0 }
 0x16b   : > { %v5024_v41 = vadd.f32 %v1882_v33, %v1834_v7  ;;  %v5027_v50 = vadd.f32 %v1909_v43, %v4789_v26  ;;  %v1948_v54 = vpop.f32.mrf.mxu1  ;;  %v3802_v7 = vld [vmem:[%s6109_s1 + $0x2dc] sm:$0xf0]  ;;  %v3403_v33 = vld [vmem:[%s6109_s1 + $0x1e0] sm:$0xf0]  ;;  %v3347_v43 = vld [vmem:[%s6109_s1 + $0x168] sm:$0xf0] }
 0x16c   : > { %v1949_v55 = vadd.f32 %v1948_v54, %v1900_v35  ;;  %v3465_v35 = vld [vmem:[%s6109_s1 + $0x220] sm:$0xf] }
 0x16d   : > { %2104 = vmatmul.bf16.gmra.mxu0 %v3402_v12  ;;  %v5056_v22 = vpop.f32.mrf.mxu2  ;;  %v3747_v12 = vld [vmem:[%s6109_s1 + $0x12c] sm:$0xf] }
 0x16e   : > { %v1998_v45 = vadd.f32 %v4942_v27, %v1949_v55  ;;  %2143 = vmatmul.bf16.gmra.mxu1 %v3278_v34  ;;  %v3786_v27 = vld [vmem:[%s6109_s1 + $0x25c] sm:$0xf0] }
 0x16f   : > { %2236 = vmatmul.bf16.vlgmr.msrb.gmra.mxu3 %v3222_v44  ;;  %v3466_v6 = vor.u32 %v3786_v27, %v3465_v35  ;;  %v3803_v44 = vld [vmem:[%s6109_s1 + $0x2e4] sm:$0xf0]  ;;  %v785_v55 = vld [vmem:[%s4124_s17 + $0x640] sm:$0xff] }
 0x172   : > { %v2041_v4 = vpop.f32.mrf.mxu3  ;;  %v1911_v24 = vpop.f32.mrf.mxu0 }
 0x173   : > { %v5032_v1 = vadd.f32 %v2041_v4, %v1993_v53  ;;  %v5035_v57 = vadd.f32 %v1911_v24, %v4828_v10  ;;  %v1950_v46 = vpop.f32.mrf.mxu1  ;;  %v3339_v10 = vld [vmem:[%s6109_s1 + $0x160] sm:$0xf0]  ;;  %v3530_v24 = vor.u32 %v3802_v7, %v3529_v31  ;;  %v823_v31 = vld [vmem:[%s4124_s17 + $0x770] sm:$0xff] }
 0x174   : > { %v1951_v26 = vadd.f32 %v1950_v46, %v1902_v47  ;;  %v3787_v47 = vld [vmem:[%s6109_s1 + $0x264] sm:$0xf0]  ;;  %v3342_v5 = vor.u32 %v3746_v51, %v3339_v10  ;;  %v3350_v51 = vor.u32 %v3747_v12, %v3347_v43 }
 0x175   : > { %v5073_v56 = vpop.f32.mrf.mxu2 }
 0x176   : > { %v2000_v39 = vadd.f32 %v4968_v60, %v1951_v26  ;;  %v3473_v60 = vld [vmem:[%s6109_s1 + $0x228] sm:$0xf] }
 0x177   : > { %v3474_v0 = vor.u32 %v3787_v47, %v3473_v60  ;;  %v783_v60 = vld [vmem:[%s4124_s17 + $0x630] sm:$0xff]  ;;  %v784_v47 = vld [vmem:[%s4124_s17 + $0x638] sm:$0xff] }
 0x179   : > { %2207 = vmatmul.bf16.gmra.mxu2 %v3474_v0 }
 0x17a   : > { %v2043_v19 = vpop.f32.mrf.mxu3  ;;  %v1914_v8 = vpop.f32.mrf.mxu0 }
 0x17b   : > { %v5064_v9 = vadd.f32 %v2043_v19, %v1995_v14  ;;  %v5067_v63 = vadd.f32 %v1914_v8, %v4846_v49  ;;  %v1953_v21 = vpop.f32.mrf.mxu1  ;;  %v790_v49 = vld [vmem:[%s4124_s17 + $0x668] sm:$0xff] }
 0x17c   : > { %v1954_v53 = vadd.f32 %v1953_v21, %v4981_v16  ;;  %v943_v14 = vpack.c.bf16 %v790_v49, %v789_v59  ;;  %v938_v59 = vpack.c.bf16 %v780_v62, %v779_v42  ;;  %v3467_v49 = vld [vmem:[%s6109_s1 + $0x260] sm:$0xf0]  ;;  %v804_v42 = vld [vmem:[%s4124_s17 + $0x6d8] sm:$0xff] }
 0x17d   : > { %2109 = vmatmul.bf16.gmra.mxu0 %v3466_v6  ;;  %v5106_v34 = vpop.f32.mrf.mxu2  ;;  %v782_v6 = vld [vmem:[%s4124_s17 + $0x628] sm:$0xff]  ;;  %v817_v62 = vld [vmem:[%s4124_s17 + $0x740] sm:$0xff] }
 0x17e   : > { %v2003_v3 = vadd.f32 %v4985_v61, %v1954_v53  ;;  %2148 = vmatmul.bf16.gmra.mxu1 %v3342_v5  ;;  %2278 = vmatpush.bf16.msrb.mxu0 %v943_v14  ;;  %v3411_v14 = vld [vmem:[%s6109_s1 + $0x1e8] sm:$0xf0] }
 0x17f   : > { %2241 = vmatmul.bf16.gmra.mxu3 %v3286_v17 }
 0x182   : > { %v2046_v13 = vpop.f32.mrf.mxu3  ;;  %v1916_v16 = vpop.f32.mrf.mxu0  ;;  %2279 = vmatpush.bf16.msrb.mxu0 %v942_v36 }
 0x183   : > { %v5077_v38 = vadd.f32 %v2046_v13, %v1998_v45  ;;  %v5080_v30 = vadd.f32 %v1916_v16, %v4886_v37  ;;  %v1955_v25 = vpop.f32.mrf.mxu1  ;;  %v786_v45 = vld [vmem:[%s4124_s17 + $0x648] sm:$0xff] }
 0x184   : > { %v1956_v61 = vadd.f32 %v1955_v25, %v4992_v40  ;;  %v3762_v40 = vld [vmem:[%s6109_s1 + $0x1a4] sm:$0xf]  ;;  %v941_v46 = vpack.c.bf16 %v786_v45, %v785_v55  ;;  %v3763_v13 = vld [vmem:[%s6109_s1 + $0x1ac] sm:$0xf]  ;;  %v3819_v25 = vld [vmem:[%s6109_s1 + $0x364] sm:$0xf0] }
 0x185   : > { %v3406_v27 = vor.u32 %v3762_v40, %v3403_v33  ;;  %v5127_v19 = vpop.f32.mrf.mxu2  ;;  %v937_v40 = vpack.c.bf16 %v778_v18, %v777_v28  ;;  %v824_v33 = vld [vmem:[%s4124_s17 + $0x778] sm:$0xff]  ;;  %v801_v28 = vld [vmem:[%s4124_s17 + $0x6c0] sm:$0xff]  ;;  %v802_v18 = vld [vmem:[%s4124_s17 + $0x6c8] sm:$0xff] }
 0x186   : > { %v5092_v37 = vadd.f32 %v5014_v48, %v1956_v61  ;;  %v3537_v48 = vld [vmem:[%s6109_s1 + $0x2a8] sm:$0xf]  ;;  %2280 = vmatpush.bf16.msrb.mxu0 %v941_v46  ;;  %v821_v46 = vld [vmem:[%s4124_s17 + $0x760] sm:$0xff] }
 0x187   : > { %v3538_v54 = vor.u32 %v3803_v44, %v3537_v48  ;;  %v3414_v44 = vor.u32 %v3763_v13, %v3411_v14  ;;  %v3475_v14 = vld [vmem:[%s6109_s1 + $0x268] sm:$0xf0] }
 0x189   : > { %2212 = vmatmul.bf16.gmra.mxu2 %v3538_v54  ;;  %v960_v54 = vpack.c.bf16 %v824_v33, %v823_v31  ;;  %v815_v31 = vld [vmem:[%s4124_s17 + $0x730] sm:$0xff]  ;;  %v816_v33 = vld [vmem:[%s4124_s17 + $0x738] sm:$0xff] }
 0x18a   : > { %v2048_v4 = vpop.f32.mrf.mxu3  ;;  %v1919_v35 = vpop.f32.mrf.mxu0 }
 0x18b   : > { %v5116_v26 = vadd.f32 %v2048_v4, %v2000_v39  ;;  %v5119_v10 = vadd.f32 %v1919_v35, %v4900_v11  ;;  %v1958_v58 = vpop.f32.mrf.mxu1  ;;  %v940_v39 = vpack.c.bf16 %v784_v47, %v783_v60  ;;  %v781_v11 = vld [vmem:[%s4124_s17 + $0x620] sm:$0xff]  ;;  %2375 = vmatpush.bf16.msrb.mxu2 %v960_v54  ;;  %v819_v60 = vld [vmem:[%s4124_s17 + $0x750] sm:$0xff] }
 0x18c   : > { %v1959_v2 = vadd.f32 %v1958_v58, %v5027_v50  ;;  %v939_v50 = vpack.c.bf16 %v782_v6, %v781_v11  ;;  %v805_v58 = vld [vmem:[%s4124_s17 + $0x6e0] sm:$0xff] }
 0x18d   : > { %2114 = vmatmul.bf16.gmra.mxu0 %v3530_v24  ;;  %v5160_v16 = vpop.f32.mrf.mxu2  ;;  %v808_v24 = vld [vmem:[%s4124_s17 + $0x6f8] sm:$0xff] }
 0x18e   : > { %v5125_v0 = vadd.f32 %v5030_v29, %v1959_v2  ;;  %2153 = vmatmul.bf16.gmra.mxu1 %v3406_v27  ;;  %2281 = vmatpush.bf16.msrb.mxu0 %v940_v39  ;;  %v822_v27 = vld [vmem:[%s4124_s17 + $0x768] sm:$0xff] }
 0x18f   : > { %2246 = vmatmul.bf16.gmra.mxu3 %v3350_v51  ;;  %v806_v2 = vld [vmem:[%s4124_s17 + $0x6e8] sm:$0xff] }
 0x190   : > { %v951_v39 = vpack.c.bf16 %v806_v2, %v805_v58  ;;  %v840_v58 = vld [vmem:[%s4124_s17 + $0x7f8] sm:$0xff] }
 0x192   : > { %v2051_v8 = vpop.f32.mrf.mxu3  ;;  %v1921_v17 = vpop.f32.mrf.mxu0  ;;  %2282 = vmatpush.bf16.msrb.mxu0 %v939_v50 }
 0x193   : > { %v5131_v5 = vadd.f32 %v2051_v8, %v2003_v3  ;;  %v5134_v21 = vadd.f32 %v1921_v17, %v4938_v32  ;;  %v1960_v29 = vpop.f32.mrf.mxu1  ;;  %v3818_v3 = vld [vmem:[%s6109_s1 + $0x35c] sm:$0xf0] }
 0x194   : > { %v1961_v53 = vadd.f32 %v1960_v29, %v5035_v57  ;;  %v3778_v57 = vld [vmem:[%s6109_s1 + $0x224] sm:$0xf]  ;;  %v3594_v36 = vor.u32 %v3818_v3, %v3593_v23  ;;  %v3657_v23 = vld [vmem:[%s6109_s1 + $0x3a0] sm:$0xf]  ;;  %v818_v3 = vld [vmem:[%s4124_s17 + $0x748] sm:$0xff] }
 0x195   : > { %v3470_v48 = vor.u32 %v3778_v57, %v3467_v49  ;;  %v5186_v51 = vpop.f32.mrf.mxu2  ;;  %v3531_v57 = vld [vmem:[%s6109_s1 + $0x2e0] sm:$0xf0]  ;;  %v3779_v49 = vld [vmem:[%s6109_s1 + $0x22c] sm:$0xf]  ;;  %v957_v13 = vpack.c.bf16 %v818_v3, %v817_v62 }
 0x196   : > { %v5146_v32 = vadd.f32 %v5056_v22, %v1961_v53  ;;  %v3601_v22 = vld [vmem:[%s6109_s1 + $0x328] sm:$0xf]  ;;  %2283 = vmatpush.bf16.msrb.mxu0 %v938_v59  ;;  %v803_v53 = vld [vmem:[%s4124_s17 + $0x6d0] sm:$0xff]  ;;  %v3794_v59 = vld [vmem:[%s6109_s1 + $0x2a4] sm:$0xf]  ;;  %v3478_v54 = vor.u32 %v3779_v49, %v3475_v14 }
 0x197   : > { %v3602_v61 = vor.u32 %v3819_v25, %v3601_v22  ;;  %v3665_v22 = vld [vmem:[%s6109_s1 + $0x3a8] sm:$0xf]  ;;  %v796_v49 = vld [vmem:[%s4124_s17 + $0x698] sm:$0xff]  ;;  %v3595_v14 = vld [vmem:[%s6109_s1 + $0x360] sm:$0xf0] }
 0x198   : > { %v3835_v25 = vld [vmem:[%s6109_s1 + $0x3e4] sm:$0xf0] }
 0x199   : > { %2217 = vmatmul.bf16.gmra.mxu2 %v3602_v61  ;;  %v3666_v61 = vor.u32 %v3835_v25, %v3665_v22  ;;  %v835_v25 = vld [vmem:[%s4124_s17 + $0x7d0] sm:$0xff] }
 0x19a   : > { %v2053_v7 = vpop.f32.mrf.mxu3  ;;  %v1924_v43 = vpop.f32.mrf.mxu0  ;;  %2284 = vmatpush.bf16.msrb.mxu0 %v937_v40  ;;  %v949_v40 = vpack.c.bf16 %v802_v18, %v801_v28  ;;  %v3795_v28 = vld [vmem:[%s6109_s1 + $0x2ac] sm:$0xf]  ;;  %v3225_v18 = vld [vmem:[%s6109_s1 + $0x30] sm:$0xf] }
 0x19b   : > { %v5173_v12 = vadd.f32 %v2053_v7, %v5092_v37  ;;  %v5176_v55 = vadd.f32 %v1924_v43, %v4946_v52  ;;  %v1963_v45 = vpop.f32.mrf.mxu1  ;;  %v807_v37 = vld [vmem:[%s4124_s17 + $0x6f0] sm:$0xff] }
 0x19c   : > { %v1964_v4 = vadd.f32 %v1963_v45, %v5067_v63  ;;  %v952_v52 = vpack.c.bf16 %v808_v24, %v807_v37  ;;  %v959_v63 = vpack.c.bf16 %v822_v27, %v821_v46  ;;  %v956_v45 = vpack.c.bf16 %v816_v33, %v815_v31  ;;  %v800_v46 = vld [vmem:[%s4124_s17 + $0x6b8] sm:$0xff]  ;;  %v3724_v31 = vld [vmem:[%s6109_s1 + $0x6c] sm:$0xf0] }
 0x19d   : > { %2119 = vmatmul.bf16.gmra.mxu0 %v3594_v36  ;;  %v3233_v33 = vld [vmem:[%s6109_s1 + $0x38] sm:$0xf] }
 0x19e   : > { %v5183_v35 = vadd.f32 %v5073_v56, %v1964_v4  ;;  %2158 = vmatmul.bf16.gmra.mxu1 %v3470_v48  ;;  %2376 = vmatpush.bf16.msrb.mxu2 %v959_v63  ;;  %v820_v56 = vld [vmem:[%s4124_s17 + $0x758] sm:$0xff]  ;;  %v814_v63 = vld [vmem:[%s4124_s17 + $0x728] sm:$0xff] }
 0x19f   : > { %2251 = vmatmul.bf16.gmra.mxu3 %v3414_v44  ;;  %2326 = vmatpush.bf16.msra.mxu1 %v952_v52  ;;  %v958_v8 = vpack.c.bf16 %v820_v56, %v819_v60  ;;  %v3534_v44 = vor.u32 %v3794_v59, %v3531_v57  ;;  %v813_v52 = vld [vmem:[%s4124_s17 + $0x720] sm:$0xff]  ;;  %v798_v56 = vld [vmem:[%s4124_s17 + $0x6a8] sm:$0xff]  ;;  %v795_v57 = vld [vmem:[%s4124_s17 + $0x690] sm:$0xff] }
 0x1a0   : > { %v955_v60 = vpack.c.bf16 %v814_v63, %v813_v52  ;;  %v946_v22 = vpack.c.bf16 %v796_v49, %v795_v57  ;;  %v834_v52 = vld [vmem:[%s4124_s17 + $0x7c8] sm:$0xff]  ;;  %v828_v57 = vld [vmem:[%s4124_s17 + $0x798] sm:$0xff]  ;;  %v3826_v49 = vld [vmem:[%s6109_s1 + $0x3a4] sm:$0xf] }
 0x1a2   : > { %v2056_v47 = vpop.f32.mrf.mxu3  ;;  %v1926_v6 = vpop.f32.mrf.mxu0  ;;  %2377 = vmatpush.bf16.msrb.mxu2 %v958_v8 }
 0x1a3   : > { %v5193_v11 = vadd.f32 %v2056_v47, %v5125_v0  ;;  %v5196_v50 = vadd.f32 %v1926_v6, %v4978_v15  ;;  %v1965_v17 = vpop.f32.mrf.mxu1  ;;  %2327 = vmatpush.bf16.msra.mxu1 %v951_v39  ;;  %v3834_v0 = vld [vmem:[%s6109_s1 + $0x3dc] sm:$0xf0]  ;;  %v950_v15 = vpack.c.bf16 %v804_v42, %v803_v53  ;;  %v811_v6 = vld [vmem:[%s4124_s17 + $0x710] sm:$0xff]  ;;  %v838_v53 = vld [vmem:[%s4124_s17 + $0x7e8] sm:$0xff] }
 0x1a4   : > { %v1966_v29 = vadd.f32 %v1965_v17, %v5080_v30  ;;  %v3658_v36 = vor.u32 %v3834_v0, %v3657_v23  ;;  %v797_v39 = vld [vmem:[%s4124_s17 + $0x6a0] sm:$0xff]  ;;  %v812_v17 = vld [vmem:[%s4124_s17 + $0x718] sm:$0xff] }
 0x1a5   : > { %v947_v8 = vpack.c.bf16 %v798_v56, %v797_v39  ;;  %v954_v23 = vpack.c.bf16 %v812_v17, %v811_v6  ;;  %v831_v6 = vld [vmem:[%s4124_s17 + $0x7b0] sm:$0xff] }
 0x1a6   : > { %v5210_v30 = vadd.f32 %v5106_v34, %v1966_v29  ;;  %v5224_v34 = vpop.f32.mrf.mxu2  ;;  %2378 = vmatpush.bf16.msrb.mxu2 %v957_v13  ;;  %v837_v29 = vld [vmem:[%s4124_s17 + $0x7e0] sm:$0xff] }
 0x1a7   : > { %2328 = vmatpush.bf16.msra.mxu1 %v950_v15  ;;  %v967_v0 = vpack.c.bf16 %v838_v53, %v837_v29  ;;  %v809_v13 = vld [vmem:[%s4124_s17 + $0x700] sm:$0xff] }
 0x1a8   : > { %v829_v29 = vld [vmem:[%s4124_s17 + $0x7a0] sm:$0xff] }
 0x1a9   : > { %2222 = vmatmul.bf16.gmra.mxu2 %v3666_v61 }
 0x1aa   : > { %v2058_v7 = vpop.f32.mrf.mxu3  ;;  %v1929_v48 = vpop.f32.mrf.mxu0  ;;  %2379 = vmatpush.bf16.msrb.mxu2 %v956_v45  ;;  %v794_v45 = vld [vmem:[%s4124_s17 + $0x688] sm:$0xff] }
 0x1ab   : > { %v5237_v43 = vadd.f32 %v2058_v7, %v5146_v32  ;;  %v5240_v4 = vadd.f32 %v1929_v48, %v4989_v20  ;;  %v1968_v37 = vpop.f32.mrf.mxu1  ;;  %2329 = vmatpush.bf16.msra.mxu1 %v949_v40  ;;  %v799_v32 = vld [vmem:[%s4124_s17 + $0x6b0] sm:$0xff]  ;;  %v3725_v48 = vld [vmem:[%s6109_s1 + $0x74] sm:$0xf0] }
 0x1ac   : > { %v1969_v24 = vadd.f32 %v1968_v37, %v5119_v10  ;;  %v948_v20 = vpack.c.bf16 %v800_v46, %v799_v32  ;;  %v839_v10 = vld [vmem:[%s4124_s17 + $0x7f0] sm:$0xff]  ;;  %v833_v37 = vld [vmem:[%s4124_s17 + $0x7c0] sm:$0xff]  ;;  %v3226_v32 = vor.u32 %v3724_v31, %v3225_v18  ;;  %v826_v18 = vld [vmem:[%s4124_s17 + $0x788] sm:$0xff] }
 0x1ad   : > { %2124 = vmatmul.bf16.gmra.mxu0 %v3658_v36  ;;  %v968_v47 = vpack.c.bf16 %v840_v58, %v839_v10 }
 0x1ae   : > { %v5247_v27 = vadd.f32 %v5127_v19, %v1969_v24  ;;  %2163 = vmatmul.bf16.gmra.mxu1 %v3534_v44  ;;  %v5252_v2 = vpop.f32.mrf.mxu2  ;;  %2380 = vmatpush.bf16.msrb.mxu2 %v955_v60  ;;  %v3234_v44 = vor.u32 %v3725_v48, %v3233_v33  ;;  %v965_v60 = vpack.c.bf16 %v834_v52, %v833_v37 }
 0x1af   : > { %2256 = vmatmul.bf16.gmra.mxu3 %v3478_v54  ;;  %2330 = vmatpush.bf16.msra.mxu1 %v948_v20  ;;  %v793_v54 = vld [vmem:[%s4124_s17 + $0x680] sm:$0xff] }
 0x1b0   : > { %2424 = vmatpush.bf16.msra.mxu3 %v968_v47  ;;  %v945_v46 = vpack.c.bf16 %v794_v45, %v793_v54 }
 0x1b2   : > { %v2061_v19 = vpop.f32.mrf.mxu3  ;;  %v1931_v62 = vpop.f32.mrf.mxu0  ;;  %2381 = vmatpush.bf16.msrb.mxu2 %v954_v23 }
 0x1b3   : > { %v5261_v42 = vadd.f32 %v2061_v19, %v5183_v35  ;;  %v5264_v15 = vadd.f32 %v1931_v62, %v5024_v41  ;;  %v1970_v3 = vpop.f32.mrf.mxu1  ;;  %2331 = vmatpush.bf16.msra.mxu1 %v947_v8  ;;  %v3810_v35 = vld [vmem:[%s6109_s1 + $0x324] sm:$0xf]  ;;  %v810_v41 = vld [vmem:[%s4124_s17 + $0x708] sm:$0xff]  ;;  %v832_v19 = vld [vmem:[%s4124_s17 + $0x7b8] sm:$0xff] }
 0x1b4   : > { %v1971_v59 = vadd.f32 %v1970_v3, %v5134_v21  ;;  %2425 = vmatpush.bf16.msra.mxu3 %v967_v0  ;;  %v836_v21 = vld [vmem:[%s4124_s17 + $0x7d8] sm:$0xff]  ;;  %v953_v7 = vpack.c.bf16 %v810_v41, %v809_v13  ;;  %v3598_v10 = vor.u32 %v3810_v35, %v3595_v14  ;;  %v964_v8 = vpack.c.bf16 %v832_v19, %v831_v6  ;;  %v3740_v14 = vld [vmem:[%s6109_s1 + $0xec] sm:$0xf0] }
 0x1b5   : > { %v966_v36 = vpack.c.bf16 %v836_v21, %v835_v25  ;;  %v3741_v25 = vld [vmem:[%s6109_s1 + $0xf4] sm:$0xf0] }
 0x1b6   : > { %v5280_v61 = vadd.f32 %v5160_v16, %v1971_v59  ;;  %v3539_v16 = vld [vmem:[%s6109_s1 + $0x2e8] sm:$0xf0]  ;;  %v5294_v40 = vpop.f32.mrf.mxu2  ;;  %2382 = vmatpush.bf16.msrb.mxu2 %v953_v7  ;;  %v827_v59 = vld [vmem:[%s4124_s17 + $0x790] sm:$0xff]  ;;  %v3757_v6 = vld [vmem:[%s6109_s1 + $0x174] sm:$0xf0] }
 0x1b7   : > { %2332 = vmatpush.bf16.msra.mxu1 %v946_v22  ;;  %v3542_v58 = vor.u32 %v3795_v28, %v3539_v16  ;;  %v962_v13 = vpack.c.bf16 %v828_v57, %v827_v59  ;;  %v3603_v22 = vld [vmem:[%s6109_s1 + $0x368] sm:$0xf0]  ;;  %v825_v28 = vld [vmem:[%s4124_s17 + $0x780] sm:$0xff] }
 0x1b8   : > { %2426 = vmatpush.bf16.msra.mxu3 %v966_v36  ;;  %v961_v36 = vpack.c.bf16 %v826_v18, %v825_v28 }
 0x1b9   : > { %2383 = vmatmul.bf16.vlgmr.msrb.gmra.mxu2 %v3234_v44 }
 0x1ba   : > { %v2063_v24 = vpop.f32.mrf.mxu3  ;;  %v2090_v63 = vpop.f32.mrf.mxu0 }
 0x1bb   : > { %v5307_v20 = vadd.f32 %v2063_v24, %v5210_v30  ;;  %v1973_v47 = vpop.f32.mrf.mxu1  ;;  %v5310_v39 = vadd.f32 %v2090_v63, %v5032_v1  ;;  %2333 = vmatpush.bf16.msra.mxu1 %v945_v46  ;;  %v830_v1 = vld [vmem:[%s4124_s17 + $0x7a8] sm:$0xff]  ;;  %s399_s17 = scalar_lea.vmem %s6117_s9, %s4118_s13  ;;  %s386_s13 = scalar_lea.vmem [#allocation3], %s385_s2 }
 0x1bc   : > { %v1974_v56 = vadd.f32 %v1973_v47, %v5176_v55  ;;  %2427 = vmatpush.bf16.msra.mxu3 %v965_v60  ;;  %v963_v55 = vpack.c.bf16 %v830_v1, %v829_v29  ;;  %v3353_v60 = vld [vmem:[%s6109_s1 + $0x130] sm:$0xf]  ;;  %v3227_v47 = vld [vmem:[%s6109_s1 + $0x70] sm:$0xf0] }
 0x1bd   : > { %2285 = vmatmul.bf16.vlgmr.msrb.gmra.mxu0 %v3226_v32 }
 0x1be   : > { %v2023_v30 = vadd.f32 %v5186_v51, %v1974_v56  ;;  %2168 = vmatmul.bf16.gmra.mxu1 %v3598_v10  ;;  %v5316_v17 = vpop.f32.mrf.mxu2 }
 0x1bf   : > { %2261 = vmatmul.bf16.gmra.mxu3 %v3542_v58 }
 0x1c0   : > { %2428 = vmatpush.bf16.msra.mxu3 %v964_v8 }
 0x1c2   : > { %v2066_v53 = vpop.f32.mrf.mxu3  ;;  %v2092_v23 = vpop.f32.mrf.mxu0 }
 0x1c3   : > { %v5321_v62 = vadd.f32 %v2066_v53, %v5247_v27  ;;  %v1975_v0 = vpop.f32.mrf.mxu1  ;;  %v5324_v3 = vadd.f32 %v2092_v23, %v5064_v9  ;;  %v3659_v27 = vld [vmem:[%s6109_s1 + $0x3e0] sm:$0xf0]  ;;  %v3811_v9 = vld [vmem:[%s6109_s1 + $0x32c] sm:$0xf] }
 0x1c4   : > { %v1976_v51 = vadd.f32 %v1975_v0, %v5196_v50  ;;  %2429 = vmatpush.bf16.msra.mxu3 %v963_v55  ;;  %v3289_v50 = vld [vmem:[%s6109_s1 + $0xb0] sm:$0xf]  ;;  %v3662_v48 = vor.u32 %v3826_v49, %v3659_v27  ;;  %v3606_v44 = vor.u32 %v3811_v9, %v3603_v22  ;;  %v3235_v22 = vld [vmem:[%s6109_s1 + $0x78] sm:$0xf0] }
 0x1c5   : > { %v3290_v7 = vor.u32 %v3740_v14, %v3289_v50  ;;  %v3732_v14 = vld [vmem:[%s6109_s1 + $0xb4] sm:$0xf] }
 0x1c6   : > { %v2025_v35 = vadd.f32 %v5224_v34, %v1976_v51  ;;  %v5348_v41 = vpop.f32.mrf.mxu2  ;;  %v3297_v34 = vld [vmem:[%s6109_s1 + $0xb8] sm:$0xf] }
 0x1c7   : > { %v3298_v21 = vor.u32 %v3741_v25, %v3297_v34  ;;  %v3773_v25 = vld [vmem:[%s6109_s1 + $0x1f4] sm:$0xf0] }
 0x1c8   : > { %2430 = vmatpush.bf16.msra.mxu3 %v962_v13 }
 0x1c9   : > { %2388 = vmatmul.bf16.gmra.mxu2 %v3298_v21 }
 0x1ca   : > { %v2068_v31 = vpop.f32.mrf.mxu3  ;;  %v2095_v33 = vpop.f32.mrf.mxu0 }
 0x1cb   : > { %v5359_v16 = vadd.f32 %v2068_v31, %v5280_v61  ;;  %v1978_v54 = vpop.f32.mrf.mxu1  ;;  %v5362_v45 = vadd.f32 %v2095_v33, %v5077_v38 }
 0x1cc   : > { %v1979_v37 = vadd.f32 %v1978_v54, %v5240_v4  ;;  %2431 = vmatpush.bf16.msra.mxu3 %v961_v36  ;;  %v3827_v4 = vld [vmem:[%s6109_s1 + $0x3ac] sm:$0xf] }
 0x1cd   : > { %2290 = vmatmul.bf16.gmra.mxu0 %v3290_v7 }
 0x1ce   : > { %v2028_v24 = vadd.f32 %v5252_v2, %v1979_v37  ;;  %2173 = vmatmul.bf16.gmra.mxu1 %v3662_v48  ;;  %v2193_v32 = vpop.f32.mrf.mxu2  ;;  %v3667_v2 = vld [vmem:[%s6109_s1 + $0x3e8] sm:$0xf0] }
 0x1cf   : > { %2266 = vmatmul.bf16.gmra.mxu3 %v3606_v44  ;;  %v3670_v53 = vor.u32 %v3827_v4, %v3667_v2 }
 0x1d2   : > { %v2071_v46 = vpop.f32.mrf.mxu3  ;;  %v2097_v52 = vpop.f32.mrf.mxu0 }
 0x1d3   : > { %v5366_v61 = vadd.f32 %v2071_v46, %v2023_v30  ;;  %v1980_v63 = vpop.f32.mrf.mxu1  ;;  %v5369_v10 = vadd.f32 %v2097_v52, %v5116_v26  ;;  %v3756_v26 = vld [vmem:[%s6109_s1 + $0x16c] sm:$0xf0] }
 0x1d4   : > { %v1981_v38 = vadd.f32 %v1980_v63, %v5264_v15  ;;  %v3716_v15 = vld [vmem:[%s6109_s1 + $0x34] sm:$0xf]  ;;  %v3354_v8 = vor.u32 %v3756_v26, %v3353_v60  ;;  %v3299_v60 = vld [vmem:[%s6109_s1 + $0xf8] sm:$0xf0] }
 0x1d5   : > { %v3230_v55 = vor.u32 %v3716_v15, %v3227_v47  ;;  %v3489_v15 = vld [vmem:[%s6109_s1 + $0x238] sm:$0xf] }
 0x1d6   : > { %v2030_v58 = vadd.f32 %v5294_v40, %v1981_v38  ;;  %v2195_v56 = vpop.f32.mrf.mxu2  ;;  %v3361_v40 = vld [vmem:[%s6109_s1 + $0x138] sm:$0xf] }
 0x1d7   : > { %v3362_v19 = vor.u32 %v3757_v6, %v3361_v40  ;;  %v3789_v47 = vld [vmem:[%s6109_s1 + $0x274] sm:$0xf0] }
 0x1d9   : > { %2393 = vmatmul.bf16.gmra.mxu2 %v3362_v19 }
 0x1da   : > { %v2073_v30 = vpop.f32.mrf.mxu3  ;;  %v2100_v1 = vpop.f32.mrf.mxu0 }
 0x1db   : > { %v5397_v29 = vadd.f32 %v2073_v30, %v2025_v35  ;;  %v5400_v23 = vadd.f32 %v2100_v1, %v5131_v5  ;;  %v2139_v0 = vpop.f32.mrf.mxu1 }
 0x1dc   : > { %v2140_v51 = vadd.f32 %v2139_v0, %v5310_v39  ;;  %v3417_v39 = vld [vmem:[%s6109_s1 + $0x1b0] sm:$0xf] }
 0x1dd   : > { %2295 = vmatmul.bf16.gmra.mxu0 %v3354_v8 }
 0x1de   : > { %v2189_v59 = vadd.f32 %v5316_v17, %v2140_v51  ;;  %2334 = vmatmul.bf16.vlgmr.msra.gmra.mxu1 %v3230_v55  ;;  %v2198_v57 = vpop.f32.mrf.mxu2  ;;  %v3772_v17 = vld [vmem:[%s6109_s1 + $0x1ec] sm:$0xf0] }
 0x1df   : > { %2271 = vmatmul.bf16.gmra.mxu3 %v3670_v53  ;;  %v3418_v18 = vor.u32 %v3772_v17, %v3417_v39  ;;  %v3545_v39 = vld [vmem:[%s6109_s1 + $0x2b0] sm:$0xf]  ;;  %v3764_v17 = vld [vmem:[%s6109_s1 + $0x1b4] sm:$0xf] }
 0x1e2   : > { %v2076_v49 = vpop.f32.mrf.mxu3  ;;  %v2102_v13 = vpop.f32.mrf.mxu0 }
 0x1e3   : > { %v5404_v27 = vadd.f32 %v2076_v49, %v2028_v24  ;;  %v5407_v35 = vadd.f32 %v2102_v13, %v5173_v12  ;;  %v2141_v9 = vpop.f32.mrf.mxu1  ;;  %v3291_v12 = vld [vmem:[%s6109_s1 + $0xf0] sm:$0xf0] }
 0x1e4   : > { %v2142_v5 = vadd.f32 %v2141_v9, %v5324_v3  ;;  %v3717_v3 = vld [vmem:[%s6109_s1 + $0x3c] sm:$0xf]  ;;  %v3294_v36 = vor.u32 %v3732_v14, %v3291_v12 }
 0x1e5   : > { %v3238_v33 = vor.u32 %v3717_v3, %v3235_v22  ;;  %v3363_v14 = vld [vmem:[%s6109_s1 + $0x178] sm:$0xf0]  ;;  %v3553_v3 = vld [vmem:[%s6109_s1 + $0x2b8] sm:$0xf] }
 0x1e6   : > { %v2191_v50 = vadd.f32 %v5348_v41, %v2142_v5  ;;  %v2200_v34 = vpop.f32.mrf.mxu2  ;;  %v3425_v41 = vld [vmem:[%s6109_s1 + $0x1b8] sm:$0xf] }
 0x1e7   : > { %v3426_v21 = vor.u32 %v3773_v25, %v3425_v41  ;;  %v3805_v22 = vld [vmem:[%s6109_s1 + $0x2f4] sm:$0xf0] }
 0x1e9   : > { %2398 = vmatmul.bf16.gmra.mxu2 %v3426_v21 }
 0x1ea   : > { %v2078_v28 = vpop.f32.mrf.mxu3  ;;  %v2105_v7 = vpop.f32.mrf.mxu0 }
 0x1eb   : > { %v5435_v31 = vadd.f32 %v2078_v28, %v2030_v58  ;;  %v5438_v48 = vadd.f32 %v2105_v7, %v5193_v11  ;;  %v2144_v44 = vpop.f32.mrf.mxu1  ;;  %v3748_v58 = vld [vmem:[%s6109_s1 + $0x134] sm:$0xf] }
 0x1ec   : > { %v2145_v54 = vadd.f32 %v2144_v44, %v5362_v45  ;;  %v3481_v45 = vld [vmem:[%s6109_s1 + $0x230] sm:$0xf] }
 0x1ed   : > { %2300 = vmatmul.bf16.gmra.mxu0 %v3418_v18 }
 0x1ee   : > { %v2194_v37 = vadd.f32 %v2193_v32, %v2145_v54  ;;  %2339 = vmatmul.bf16.gmra.mxu1 %v3294_v36  ;;  %v2203_v24 = vpop.f32.mrf.mxu2  ;;  %v3788_v32 = vld [vmem:[%s6109_s1 + $0x26c] sm:$0xf0] }
 0x1ef   : > { %2432 = vmatmul.bf16.vlgmr.msra.gmra.mxu3 %v3238_v33  ;;  %v3482_v6 = vor.u32 %v3788_v32, %v3481_v45 }
 0x1f2   : > { %v2237_v46 = vpop.f32.mrf.mxu3  ;;  %v2107_v63 = vpop.f32.mrf.mxu0 }
 0x1f3   : > { %v5441_v52 = vadd.f32 %v2237_v46, %v2189_v59  ;;  %v5444_v38 = vadd.f32 %v2107_v63, %v5237_v43  ;;  %v2146_v4 = vpop.f32.mrf.mxu1  ;;  %v3355_v43 = vld [vmem:[%s6109_s1 + $0x170] sm:$0xf0] }
 0x1f4   : > { %v2147_v11 = vadd.f32 %v2146_v4, %v5369_v10  ;;  %v3733_v10 = vld [vmem:[%s6109_s1 + $0xbc] sm:$0xf]  ;;  %v3358_v8 = vor.u32 %v3748_v58, %v3355_v43  ;;  %v3617_v43 = vld [vmem:[%s6109_s1 + $0x338] sm:$0xf] }
 0x1f5   : > { %v3302_v1 = vor.u32 %v3733_v10, %v3299_v60  ;;  %v3427_v58 = vld [vmem:[%s6109_s1 + $0x1f8] sm:$0xf0]  ;;  %v3821_v10 = vld [vmem:[%s6109_s1 + $0x374] sm:$0xf0] }
 0x1f6   : > { %v2196_v2 = vadd.f32 %v2195_v56, %v2147_v11  ;;  %v2205_v26 = vpop.f32.mrf.mxu2  ;;  %v3490_v56 = vor.u32 %v3789_v47, %v3489_v15  ;;  %v3618_v60 = vor.u32 %v3821_v10, %v3617_v43 }
 0x1f9   : > { %2403 = vmatmul.bf16.gmra.mxu2 %v3490_v56 }
 0x1fa   : > { %v2239_v40 = vpop.f32.mrf.mxu3  ;;  %v5473_v30 = vpop.f32.mrf.mxu0 }
 0x1fb   : > { %v5471_v19 = vadd.f32 %v2239_v40, %v2191_v50  ;;  %v2149_v53 = vpop.f32.mrf.mxu1  ;;  %v3419_v50 = vld [vmem:[%s6109_s1 + $0x1f0] sm:$0xf0] }
 0x1fc   : > { %v2150_v55 = vadd.f32 %v2149_v53, %v5400_v23  ;;  %v3804_v23 = vld [vmem:[%s6109_s1 + $0x2ec] sm:$0xf0]  ;;  %v3422_v18 = vor.u32 %v3764_v17, %v3419_v50  ;;  %v3491_v50 = vld [vmem:[%s6109_s1 + $0x278] sm:$0xf0] }
 0x1fd   : > { %2305 = vmatmul.bf16.gmra.mxu0 %v3482_v6  ;;  %v3546_v25 = vor.u32 %v3804_v23, %v3545_v39  ;;  %v3836_v17 = vld [vmem:[%s6109_s1 + $0x3ec] sm:$0xf0] }
 0x1fe   : > { %v2199_v0 = vadd.f32 %v2198_v57, %v2150_v55  ;;  %2344 = vmatmul.bf16.gmra.mxu1 %v3358_v8  ;;  %v5476_v51 = vpop.f32.mrf.mxu2 }
 0x1ff   : > { %2437 = vmatmul.bf16.gmra.mxu3 %v3302_v1 }
 0x202   : > { %v2242_v59 = vpop.f32.mrf.mxu3  ;;  %v2112_v13 = vpop.f32.mrf.mxu0 }
 0x203   : > { %v5478_v49 = vadd.f32 %v2242_v59, %v2194_v37  ;;  %v2151_v9 = vpop.f32.mrf.mxu1 }
 0x204   : > { %v2152_v5 = vadd.f32 %v2151_v9, %v5407_v35  ;;  %v3749_v35 = vld [vmem:[%s6109_s1 + $0x13c] sm:$0xf] }
 0x205   : > { %v3366_v7 = vor.u32 %v3749_v35, %v3363_v14  ;;  %v3681_v35 = vld [vmem:[%s6109_s1 + $0x3b8] sm:$0xf] }
 0x206   : > { %v2201_v57 = vadd.f32 %v2200_v34, %v2152_v5  ;;  %v5499_v12 = vpop.f32.mrf.mxu2  ;;  %v3554_v34 = vor.u32 %v3805_v22, %v3553_v3  ;;  %v3837_v14 = vld [vmem:[%s6109_s1 + $0x3f4] sm:$0xf0]  ;;  %v2111_v22 = vadd.f32 %v5473_v30, %v5261_v42 }
 0x207   : > { %v3682_v3 = vor.u32 %v3837_v14, %v3681_v35 }
 0x209   : > { %2408 = vmatmul.bf16.gmra.mxu2 %v3554_v34 }
 0x20a   : > { %v2244_v41 = vpop.f32.mrf.mxu3  ;;  %v2115_v28 = vpop.f32.mrf.mxu0 }
 0x20b   : > { %v5507_v21 = vadd.f32 %v2244_v41, %v2196_v2  ;;  %v2154_v36 = vpop.f32.mrf.mxu1  ;;  %v3780_v2 = vld [vmem:[%s6109_s1 + $0x234] sm:$0xf] }
 0x20c   : > { %v2155_v33 = vadd.f32 %v2154_v36, %v5438_v48  ;;  %v3609_v48 = vld [vmem:[%s6109_s1 + $0x330] sm:$0xf] }
 0x20d   : > { %2310 = vmatmul.bf16.gmra.mxu0 %v3546_v25  ;;  %v2116_v25 = vadd.f32 %v2115_v28, %v5321_v62 }
 0x20e   : > { %v2204_v44 = vadd.f32 %v2203_v24, %v2155_v33  ;;  %2349 = vmatmul.bf16.gmra.mxu1 %v3422_v18  ;;  %v5510_v54 = vpop.f32.mrf.mxu2  ;;  %v3820_v24 = vld [vmem:[%s6109_s1 + $0x36c] sm:$0xf0] }
 0x20f   : > { %2442 = vmatmul.bf16.gmra.mxu3 %v3366_v7  ;;  %v3610_v15 = vor.u32 %v3820_v24, %v3609_v48 }
 0x212   : > { %v2247_v37 = vpop.f32.mrf.mxu3  ;;  %v2117_v63 = vpop.f32.mrf.mxu0 }
 0x213   : > { %v5512_v46 = vadd.f32 %v2247_v37, %v2199_v0  ;;  %v5515_v4 = vadd.f32 %v2117_v63, %v5359_v16  ;;  %v2156_v11 = vpop.f32.mrf.mxu1  ;;  %v3483_v16 = vld [vmem:[%s6109_s1 + $0x270] sm:$0xf0]  ;;  %v2113_v0 = vadd.f32 %v2112_v13, %v5307_v20  ;;  %v3781_v13 = vld [vmem:[%s6109_s1 + $0x23c] sm:$0xf] }
 0x214   : > { %v2157_v45 = vadd.f32 %v2156_v11, %v5444_v38  ;;  %v3765_v38 = vld [vmem:[%s6109_s1 + $0x1bc] sm:$0xf]  ;;  %v3486_v6 = vor.u32 %v3780_v2, %v3483_v16  ;;  %v3796_v20 = vld [vmem:[%s6109_s1 + $0x2b4] sm:$0xf]  ;;  %v3494_v33 = vor.u32 %v3781_v13, %v3491_v50 }
 0x215   : > { %v3430_v8 = vor.u32 %v3765_v38, %v3427_v58  ;;  %v3611_v2 = vld [vmem:[%s6109_s1 + $0x370] sm:$0xf0]  ;;  %v3555_v16 = vld [vmem:[%s6109_s1 + $0x2f8] sm:$0xf0] }
 0x216   : > { %v2206_v32 = vadd.f32 %v2205_v26, %v2157_v45  ;;  %v5542_v47 = vpop.f32.mrf.mxu2 }
 0x219   : > { %2413 = vmatmul.bf16.gmra.mxu2 %v3618_v60 }
 0x21a   : > { %v2249_v26 = vpop.f32.mrf.mxu3  ;;  %v2120_v40 = vpop.f32.mrf.mxu0 }
 0x21b   : > { %v5544_v56 = vadd.f32 %v2249_v26, %v2201_v57  ;;  %v2121_v1 = vadd.f32 %v2120_v40, %v5366_v61  ;;  %v2159_v53 = vpop.f32.mrf.mxu1  ;;  %v3673_v61 = vld [vmem:[%s6109_s1 + $0x3b0] sm:$0xf] }
 0x21c   : > { %v3674_v41 = vor.u32 %v3836_v17, %v3673_v61  ;;  %v2160_v63 = vadd.f32 %v2159_v53, %v2111_v22 }
 0x21d   : > { %2315 = vmatmul.bf16.gmra.mxu0 %v3610_v15 }
 0x21e   : > { %2354 = vmatmul.bf16.gmra.mxu1 %v3486_v6  ;;  %v5551_v23 = vpop.f32.mrf.mxu2  ;;  %v2209_v42 = vadd.f32 %v5476_v51, %v2160_v63  ;;  %v3797_v51 = vld [vmem:[%s6109_s1 + $0x2bc] sm:$0xf] }
 0x21f   : > { %2447 = vmatmul.bf16.gmra.mxu3 %v3430_v8  ;;  %v3558_v60 = vor.u32 %v3797_v51, %v3555_v16 }
 0x222   : > { %v2252_v55 = vpop.f32.mrf.mxu3  ;;  %v2122_v9 = vpop.f32.mrf.mxu0 }
 0x223   : > { %v5548_v59 = vadd.f32 %v2252_v55, %v2204_v44  ;;  %v2123_v5 = vadd.f32 %v2122_v9, %v5397_v29  ;;  %v2161_v39 = vpop.f32.mrf.mxu1  ;;  %v3547_v29 = vld [vmem:[%s6109_s1 + $0x2f0] sm:$0xf0] }
 0x224   : > { %v2162_v57 = vadd.f32 %v2161_v39, %v2113_v0  ;;  %v3550_v36 = vor.u32 %v3796_v20, %v3547_v29 }
 0x226   : > { %v2220_v45 = vpop.f32.mrf.mxu2  ;;  %v2211_v38 = vadd.f32 %v5499_v12, %v2162_v57  ;;  %v3828_v57 = vld [vmem:[%s6109_s1 + $0x3b4] sm:$0xf] }
 0x229   : > { %2418 = vmatmul.bf16.gmra.mxu2 %v3682_v3 }
 0x22a   : > { %v2254_v34 = vpop.f32.mrf.mxu3  ;;  %v2125_v7 = vpop.f32.mrf.mxu0 }
 0x22b   : > { %v5580_v18 = vadd.f32 %v2254_v34, %v2206_v32  ;;  %v2126_v44 = vadd.f32 %v2125_v7, %v5404_v27  ;;  %v2164_v37 = vpop.f32.mrf.mxu1  ;;  %v3812_v27 = vld [vmem:[%s6109_s1 + $0x334] sm:$0xf] }
 0x22c   : > { %v2165_v11 = vadd.f32 %v2164_v37, %v2116_v25  ;;  %v3614_v10 = vor.u32 %v3812_v27, %v3611_v2 }
 0x22d   : > { %2320 = vmatmul.bf16.gmra.mxu0 %v3674_v41 }
 0x22e   : > { %2359 = vmatmul.bf16.gmra.mxu1 %v3550_v36  ;;  %v2214_v6 = vadd.f32 %v5510_v54, %v2165_v11  ;;  %v3813_v54 = vld [vmem:[%s6109_s1 + $0x33c] sm:$0xf] }
 0x22f   : > { %2452 = vmatmul.bf16.gmra.mxu3 %v3494_v33  ;;  %v3829_v33 = vld [vmem:[%s6109_s1 + $0x3bc] sm:$0xf] }
 0x232   : > { %v2257_v30 = vpop.f32.mrf.mxu3  ;;  %v2127_v62 = vpop.f32.mrf.mxu0 }
 0x233   : > { %v5584_v48 = vadd.f32 %v2257_v30, %v2209_v42  ;;  %v2128_v28 = vadd.f32 %v2127_v62, %v5435_v31  ;;  %v2166_v24 = vpop.f32.mrf.mxu1  ;;  %v2223_v31 = vpop.f32.mrf.mxu2 }
 0x234   : > { %v2167_v32 = vadd.f32 %v2166_v24, %v5515_v4 }
 0x236   : > { %v2216_v61 = vadd.f32 %v5542_v47, %v2167_v32 }
 0x23a   : > { %v2259_v4 = vpop.f32.mrf.mxu3  ;;  %v2286_v43 = vpop.f32.mrf.mxu0 }
 0x23b   : > { %v5601_v58 = vadd.f32 %v2259_v4, %v2211_v38  ;;  %v2169_v26 = vpop.f32.mrf.mxu1  ;;  %v2287_v15 = vadd.f32 %v2286_v43, %v5441_v52  ;;  %v2225_v53 = vpop.f32.mrf.mxu2  ;;  %v3675_v52 = vld [vmem:[%s6109_s1 + $0x3f0] sm:$0xf0] }
 0x23c   : > { %v2170_v40 = vadd.f32 %v2169_v26, %v2121_v1  ;;  %v3619_v1 = vld [vmem:[%s6109_s1 + $0x378] sm:$0xf0]  ;;  %v3678_v20 = vor.u32 %v3828_v57, %v3675_v52 }
 0x23d   : > { %v3622_v29 = vor.u32 %v3813_v54, %v3619_v1 }
 0x23e   : > { %2364 = vmatmul.bf16.gmra.mxu1 %v3614_v10  ;;  %v2219_v3 = vadd.f32 %v5551_v23, %v2170_v40 }
 0x23f   : > { %2457 = vmatmul.bf16.gmra.mxu3 %v3558_v60 }
 0x242   : > { %v2262_v8 = vpop.f32.mrf.mxu3  ;;  %v2288_v0 = vpop.f32.mrf.mxu0 }
 0x243   : > { %v5605_v55 = vadd.f32 %v2262_v8, %v2214_v6  ;;  %v2171_v12 = vpop.f32.mrf.mxu1  ;;  %v2289_v9 = vadd.f32 %v2288_v0, %v5471_v19  ;;  %v2384_v35 = vpop.f32.mrf.mxu2 }
 0x244   : > { %v2172_v39 = vadd.f32 %v2171_v12, %v2123_v5 }
 0x24a   : > { %v2264_v19 = vpop.f32.mrf.mxu3  ;;  %v2291_v17 = vpop.f32.mrf.mxu0 }
 0x24b   : > { %v5621_v5 = vadd.f32 %v2264_v19, %v2216_v61  ;;  %v2174_v13 = vpop.f32.mrf.mxu1  ;;  %v2292_v50 = vadd.f32 %v2291_v17, %v5478_v49  ;;  %v2386_v36 = vpop.f32.mrf.mxu2  ;;  %v3683_v49 = vld [vmem:[%s6109_s1 + $0x3f8] sm:$0xf0] }
 0x24c   : > { %v2175_v14 = vadd.f32 %v2174_v13, %v2126_v44  ;;  %v2221_v44 = vadd.f32 %v2220_v45, %v2172_v39  ;;  %v3686_v11 = vor.u32 %v3829_v33, %v3683_v49 }
 0x24e   : > { %2369 = vmatmul.bf16.gmra.mxu1 %v3678_v20 }
 0x24f   : > { %2462 = vmatmul.bf16.gmra.mxu3 %v3622_v29 }
 0x252   : > { %v2267_v22 = vpop.f32.mrf.mxu3  ;;  %v2293_v41 = vpop.f32.mrf.mxu0 }
 0x253   : > { %v5625_v34 = vadd.f32 %v2267_v22, %v2219_v3  ;;  %v2176_v47 = vpop.f32.mrf.mxu1  ;;  %v2294_v25 = vadd.f32 %v2293_v41, %v5507_v21  ;;  %v2389_v62 = vpop.f32.mrf.mxu2 }
 0x254   : > { %v2177_v7 = vadd.f32 %v2176_v47, %v2128_v28  ;;  %v2224_v28 = vadd.f32 %v2223_v31, %v2175_v14 }
 0x256   : > { %v2226_v16 = vadd.f32 %v2225_v53, %v2177_v7 }
 0x25a   : > { %v2269_v37 = vpop.f32.mrf.mxu3  ;;  %v2296_v63 = vpop.f32.mrf.mxu0 }
 0x25b   : > { %v5634_v23 = vadd.f32 %v2269_v37, %v2221_v44  ;;  %v2297_v42 = vadd.f32 %v2296_v63, %v5512_v46  ;;  %v2335_v30 = vpop.f32.mrf.mxu1  ;;  %v2391_v4 = vpop.f32.mrf.mxu2 }
 0x25c   : > { %v2336_v21 = vadd.f32 %v2335_v30, %v2287_v15 }
 0x25e   : > { %v2385_v15 = vadd.f32 %v2384_v35, %v2336_v21 }
 0x25f   : > { %2467 = vmatmul.bf16.gmra.mxu3 %v3686_v11 }
 0x262   : > { %v2272_v24 = vpop.f32.mrf.mxu3  ;;  %v2298_v27 = vpop.f32.mrf.mxu0 }
 0x263   : > { %v5637_v32 = vadd.f32 %v2272_v24, %v2224_v28  ;;  %v2299_v2 = vadd.f32 %v2298_v27, %v5544_v56  ;;  %v2337_v51 = vpop.f32.mrf.mxu1  ;;  %v2394_v0 = vpop.f32.mrf.mxu2 }
 0x264   : > { %v2338_v45 = vadd.f32 %v2337_v51, %v2289_v9 }
 0x266   : > { %v2387_v53 = vadd.f32 %v2386_v36, %v2338_v45 }
 0x26a   : > { %v2274_v38 = vpop.f32.mrf.mxu3  ;;  %v2301_v10 = vpop.f32.mrf.mxu0 }
 0x26b   : > { %v5640_v43 = vadd.f32 %v2274_v38, %v2226_v16  ;;  %v2302_v46 = vadd.f32 %v2301_v10, %v5548_v59  ;;  %v2340_v60 = vpop.f32.mrf.mxu1  ;;  %v2396_v1 = vpop.f32.mrf.mxu2 }
 0x26c   : > { %v2341_v26 = vadd.f32 %v2340_v60, %v2292_v50 }
 0x26e   : > { %v2390_v61 = vadd.f32 %v2389_v62, %v2341_v26 }
 0x272   : > { %v2433_v31 = vpop.f32.mrf.mxu3  ;;  %v2303_v6 = vpop.f32.mrf.mxu0 }
 0x273   : > { %v5643_v40 = vadd.f32 %v2433_v31, %v2385_v15  ;;  %v2304_v8 = vadd.f32 %v2303_v6, %v5580_v18  ;;  %v2342_v56 = vpop.f32.mrf.mxu1  ;;  %v2399_v18 = vpop.f32.mrf.mxu2 }
 0x274   : > { %v2343_v12 = vadd.f32 %v2342_v56, %v2294_v25 }
 0x276   : > { %v2392_v13 = vadd.f32 %v2391_v4, %v2343_v12 }
 0x27a   : > { %v2435_v9 = vpop.f32.mrf.mxu3  ;;  %v2306_v57 = vpop.f32.mrf.mxu0 }
 0x27b   : > { %v5646_v39 = vadd.f32 %v2435_v9, %v2387_v53  ;;  %v2307_v52 = vadd.f32 %v2306_v57, %v5584_v48  ;;  %v2345_v59 = vpop.f32.mrf.mxu1  ;;  %v2401_v47 = vpop.f32.mrf.mxu2 }
 0x27c   : > { %v2346_v54 = vadd.f32 %v2345_v59, %v2297_v42 }
 0x27e   : > { %v2395_v22 = vadd.f32 %v2394_v0, %v2346_v54 }
 0x282   : > { %v2438_v19 = vpop.f32.mrf.mxu3  ;;  %v2308_v28 = vpop.f32.mrf.mxu0 }
 0x283   : > { %v5649_v17 = vadd.f32 %v2438_v19, %v2390_v61  ;;  %v2347_v20 = vpop.f32.mrf.mxu1  ;;  %v2404_v63 = vpop.f32.mrf.mxu2 }
 0x284   : > { %v2348_v29 = vadd.f32 %v2347_v20, %v2299_v2 }
 0x286   : > { %v2397_v33 = vadd.f32 %v2396_v1, %v2348_v29 }
 0x28a   : > { %v2440_v50 = vpop.f32.mrf.mxu3  ;;  %v2311_v45 = vpop.f32.mrf.mxu0 }
 0x28b   : > { %v5651_v35 = vadd.f32 %v2440_v50, %v2392_v13  ;;  %v2350_v14 = vpop.f32.mrf.mxu1  ;;  %v2406_v27 = vpop.f32.mrf.mxu2 }
 0x28c   : > { %v2351_v3 = vadd.f32 %v2350_v14, %v2302_v46 }
 0x28e   : > { %v2400_v30 = vadd.f32 %v2399_v18, %v2351_v3  ;;  %v2309_v18 = vadd.f32 %v2308_v28, %v5601_v58  ;;  %v2312_v58 = vadd.f32 %v2311_v45, %v5605_v55 }
 0x292   : > { %v2443_v41 = vpop.f32.mrf.mxu3  ;;  %v2313_v46 = vpop.f32.mrf.mxu0 }
 0x293   : > { %v5653_v48 = vadd.f32 %v2443_v41, %v2395_v22  ;;  %v2352_v25 = vpop.f32.mrf.mxu1  ;;  %v2409_v10 = vpop.f32.mrf.mxu2 }
 0x294   : > { %v2353_v7 = vadd.f32 %v2352_v25, %v2304_v8 }
 0x296   : > { %v2402_v36 = vadd.f32 %v2401_v47, %v2353_v7 }
 0x29a   : > { %v2445_v49 = vpop.f32.mrf.mxu3  ;;  %v2316_v31 = vpop.f32.mrf.mxu0 }
 0x29b   : > { %v5655_v44 = vadd.f32 %v2445_v49, %v2397_v33  ;;  %v2355_v37 = vpop.f32.mrf.mxu1  ;;  %v2411_v15 = vpop.f32.mrf.mxu2  ;;  %v2317_v12 = vadd.f32 %v2316_v31, %v5625_v34 }
 0x29c   : > { %v2356_v11 = vadd.f32 %v2355_v37, %v2307_v52 }
 0x29e   : > { %v2405_v42 = vadd.f32 %v2404_v63, %v2356_v11 }
 0x2a2   : > { %v2448_v21 = vpop.f32.mrf.mxu3  ;;  %v2318_v53 = vpop.f32.mrf.mxu0 }
 0x2a3   : > { %v5657_v62 = vadd.f32 %v2448_v21, %v2400_v30  ;;  %v2357_v24 = vpop.f32.mrf.mxu1  ;;  %v2414_v56 = vpop.f32.mrf.mxu2  ;;  %v2319_v1 = vadd.f32 %v2318_v53, %v5634_v23 }
 0x2a4   : > { %v2358_v50 = vadd.f32 %v2357_v24, %v2309_v18 }
 0x2a6   : > { %v2407_v47 = vadd.f32 %v2406_v27, %v2358_v50  ;;  %v2478_v50 = vmax.f32 %v5655_v44, 0.0 }
 0x2aa   : > { %v2450_v2 = vpop.f32.mrf.mxu3  ;;  %v2321_v29 = vpop.f32.mrf.mxu0 }
 0x2ab   : > { %v5659_v51 = vadd.f32 %v2450_v2, %v2402_v36  ;;  %v2360_v16 = vpop.f32.mrf.mxu1  ;;  %v2416_v59 = vpop.f32.mrf.mxu2  ;;  %v2322_v23 = vadd.f32 %v2321_v29, %v5637_v32  ;;  %v2314_v2 = vadd.f32 %v2313_v46, %v5621_v5  ;;  %v2479_v5 = vmax.f32 %v5657_v62, 0.0 }
 0x2ac   : > { %v2361_v37 = vadd.f32 %v2360_v16, %v2312_v58 }
 0x2ad   : > { %v2508_v53 = vsel %vm2489_vm0, %v2479_v5, 0.0 }
 0x2ae   : > { %v2410_v28 = vadd.f32 %v2409_v10, %v2361_v37 }
 0x2b2   : > { %v2453_v38 = vpop.f32.mrf.mxu3  ;;  %v2323_v49 = vpop.f32.mrf.mxu0 }
 0x2b3   : > { %v5661_v4 = vadd.f32 %v2453_v38, %v2405_v42  ;;  %v2362_v60 = vpop.f32.mrf.mxu1  ;;  %v2419_v41 = vpop.f32.mrf.mxu2  ;;  %v2324_v42 = vadd.f32 %v2323_v49, %v5640_v43 }
 0x2b4   : > { %v2363_v38 = vadd.f32 %v2362_v60, %v2314_v2 }
 0x2b6   : > { %v2412_v46 = vadd.f32 %v2411_v15, %v2363_v38  ;;  %v2480_v15 = vmax.f32 %v5659_v51, 0.0 }
 0x2ba   : > { %v2455_v26 = vpop.f32.mrf.mxu3 }
 0x2bb   : > { %v2365_v8 = vpop.f32.mrf.mxu1  ;;  %v5677_v36 = vadd.f32 %v2455_v26, %v2407_v47  ;;  %v2421_v27 = vpop.f32.mrf.mxu2 }
 0x2bc   : > { %v2366_v9 = vadd.f32 %v2365_v8, %v2317_v12 }
 0x2bd   : > { %v6125_v30 = vmax.f32 %v5677_v36, 0.0  ;;  %v6133_v62 = vmax.f32 %v5677_v36, 0.0 }
 0x2be   : > { %v2415_v52 = vadd.f32 %v2414_v56, %v2366_v9  ;;  %v2476_v9 = vmax.f32 %v5651_v35, 0.0 }
 0x2bf   : > { %v2517_v43 = vsel %vm2489_vm0, %v6125_v30, 0.0 }
 0x2c2   : > { %v2458_v6 = vpop.f32.mrf.mxu3 }
 0x2c3   : > { %v2367_v57 = vpop.f32.mrf.mxu1  ;;  %v5688_v45 = vadd.f32 %v2458_v6, %v2410_v28 }
 0x2c4   : > { %v2368_v19 = vadd.f32 %v2367_v57, %v2319_v1  ;;  %v2481_v1 = vmax.f32 %v5661_v4, 0.0 }
 0x2c5   : > { %v2483_v31 = vmax.f32 %v5688_v45, 0.0 }
 0x2c6   : > { %v2417_v14 = vadd.f32 %v2416_v59, %v2368_v19  ;;  %v2499_v59 = vsel %vm2489_vm0, %v2476_v9, 0.0  ;;  %v2473_v19 = vmax.f32 %v5643_v40, 0.0  ;;  %v2514_v29 = vsel %vm2489_vm0, %v2481_v1, 0.0 }
 0x2c7   : > { %v2520_v60 = vsel %vm2489_vm0, %v2483_v31, 0.0 }
 0x2ca   : > { %v2460_v0 = vpop.f32.mrf.mxu3 }
 0x2cb   : > { %v2370_v13 = vpop.f32.mrf.mxu1  ;;  %v5701_v56 = vadd.f32 %v2460_v0, %v2412_v46 }
 0x2cc   : > { %v2371_v25 = vadd.f32 %v2370_v13, %v2322_v23  ;;  %v2474_v13 = vmax.f32 %v5646_v39, 0.0  ;;  %v2475_v23 = vmax.f32 %v5649_v17, 0.0 }
 0x2cd   : > { %v6124_v0 = vmax.f32 %v5701_v56, 0.0  ;;  %v6134_v4 = vmax.f32 %v5701_v56, 0.0 }
 0x2ce   : > { %v2420_v63 = vadd.f32 %v2419_v41, %v2371_v25  ;;  %v2496_v41 = vsel %vm2489_vm0, %v2475_v23, 0.0 }
 0x2cf   : > { %v2523_v57 = vsel %vm2489_vm0, %v6124_v0, 0.0 }
 0x2d2   : > { %v2463_v54 = vpop.f32.mrf.mxu3 }
 0x2d3   : > { %v5665_v61 = vadd.f32 %v2463_v54, %v2415_v52  ;;  %v2372_v32 = vpop.f32.mrf.mxu1  ;;  %v2511_v52 = vsel %vm2489_vm0, %v2480_v15, 0.0  ;;  %v2477_v54 = vmax.f32 %v5653_v48, 0.0 }
 0x2d4   : > { %v2373_v55 = vadd.f32 %v2372_v32, %v2324_v42 }
 0x2d5   : > { %v6122_v20 = vmax.f32 %v5665_v61, 0.0  ;;  %v2502_v18 = vsel %vm2489_vm0, %v2477_v54, 0.0  ;;  %v6136_v36 = vmax.f32 %v5665_v61, 0.0 }
 0x2d6   : > { %v2422_v10 = vadd.f32 %v2421_v27, %v2373_v55 }
 0x2d7   : > { %v2526_v34 = vsel %vm2489_vm0, %v6122_v20, 0.0 }
 0x2d8   : > { %2527 = vadd.xlane.f32.xlu2 %v2526_v34  ;;  %v2490_v34 = vsel %vm2489_vm0, %v2473_v19, 0.0 }
 0x2da   : > { %v2465_v3 = vpop.f32.mrf.mxu3 }
 0x2db   : > { %v5673_v22 = vadd.f32 %v2465_v3, %v2417_v14  ;;  %v2505_v14 = vsel %vm2489_vm0, %v2478_v50, 0.0  ;;  %v2493_v3 = vsel %vm2489_vm0, %v2474_v13, 0.0 }
 0x2dd   : > { %v6123_v7 = vmax.f32 %v5673_v22, 0.0  ;;  %v6135_v45 = vmax.f32 %v5673_v22, 0.0 }
 0x2df   : > { %v2529_v33 = vsel %vm2489_vm0, %v6123_v7, 0.0 }
 0x2e0   : > { %2530 = vadd.xlane.f32.xlu0 %v2529_v33 }
 0x2e2   : > { %v2468_v11 = vpop.f32.mrf.mxu3 }
 0x2e3   : > { %v5684_v21 = vadd.f32 %v2468_v11, %v2420_v63 }
 0x2e5   : > { %v6121_v24 = vmax.f32 %v5684_v21, 0.0  ;;  %v6137_v56 = vmax.f32 %v5684_v21, 0.0 }
 0x2e7   : > { %v2532_v16 = vsel %vm2489_vm0, %v6121_v24, 0.0 }
 0x2e8   : > { %2533 = vadd.xlane.f32.xlu2 %v2532_v16  ;;  %2518 = vadd.xlane.f32.xlu0 %v2517_v43 }
 0x2ea   : > { %v2470_v26 = vpop.f32.mrf.mxu3 }
 0x2eb   : > { %v5697_v8 = vadd.f32 %v2470_v26, %v2422_v10 }
 0x2ed   : > { %v6120_v6 = vmax.f32 %v5697_v8, 0.0  ;;  %v6138_v22 = vmax.f32 %v5697_v8, 0.0 }
 0x2ef   : > { %v2535_v12 = vsel %vm2489_vm0, %v6120_v6, 0.0 }
 0x2f0   : > { %2536 = vadd.xlane.f32.xlu1 %v2535_v12  ;;  %2521 = vadd.xlane.f32.xlu2 %v2520_v60 }
 0x2f1   : > { %2509 = vadd.xlane.f32.xlu0 %v2508_v53 }
 0x2f8   : > { %2524 = vadd.xlane.f32.xlu1 %v2523_v57  ;;  %2512 = vadd.xlane.f32.xlu2 %v2511_v52 }
 0x2f9   : > { %2500 = vadd.xlane.f32.xlu0 %v2499_v59 }
 0x300   : > { %2515 = vadd.xlane.f32.xlu1 %v2514_v29  ;;  %2503 = vadd.xlane.f32.xlu2 %v2502_v18 }
 0x301   : > { %2491 = vadd.xlane.f32.xlu0 %v2490_v34 }
 0x308   : > { %2506 = vadd.xlane.f32.xlu1 %v2505_v14  ;;  %2494 = vadd.xlane.f32.xlu2 %v2493_v3 }
 0x310   : > { %2497 = vadd.xlane.f32.xlu1 %v2496_v41 }
 0x34b   : > { %v2528_v47 = vpop.xlane.xlu2 %2527 }
 0x34c   : > { %v2550_v28 = vmul.f32 0.015625, %v2528_v47 }
 0x353   : > { %v2531_v25 = vpop.xlane.xlu0 %2530 }
 0x354   : > { %v2551_v42 = vmul.f32 0.015625, %v2531_v25 }
 0x35b   : > { %v2534_v58 = vpop.xlane.xlu2 %2533  ;;  %v2519_v33 = vpop.xlane.xlu0 %2518 }
 0x35c   : > { %v2552_v32 = vmul.f32 0.015625, %v2534_v58  ;;  %v2547_v43 = vmul.f32 0.015625, %v2519_v33 }
 0x363   : > { %v2537_v49 = vpop.xlane.xlu1 %2536  ;;  %v2522_v37 = vpop.xlane.xlu2 %2521 }
 0x364   : > { %v2553_v63 = vmul.f32 0.015625, %v2537_v49  ;;  %v2510_v11 = vpop.xlane.xlu0 %2509  ;;  %v2548_v16 = vmul.f32 0.015625, %v2522_v37 }
 0x365   : > { %v2544_v60 = vmul.f32 0.015625, %v2510_v11 }
 0x366   : > { %2577 = vmatpush.msra.mxu0 %v2553_v63 }
 0x368   : > { %2578 = vmatpush.msra.mxu0 %v2552_v32 }
 0x36a   : > { %2579 = vmatpush.msra.mxu0 %v2551_v42 }
 0x36b   : > { %v2525_v55 = vpop.xlane.xlu1 %2524  ;;  %v2513_v27 = vpop.xlane.xlu2 %2512 }
 0x36c   : > { %v2549_v2 = vmul.f32 0.015625, %v2525_v55  ;;  %2580 = vmatpush.msra.mxu0 %v2550_v28  ;;  %v2501_v38 = vpop.xlane.xlu0 %2500  ;;  %v2545_v12 = vmul.f32 0.015625, %v2513_v27 }
 0x36d   : > { %v2541_v18 = vmul.f32 0.015625, %v2501_v38  ;;  %v547_v38 = vld [vmem:[%s6111_s3] sm:$0xff] }
 0x36e   : > { %2581 = vmatpush.msra.mxu0 %v2549_v2 }
 0x36f   : > { %v2557_v41 = vmax.f32 %v2541_v18, %v2545_v12 }
 0x370   : > { %2582 = vmatpush.msra.mxu0 %v2548_v16 }
 0x371   : > { %v2561_v49 = vmax.f32 %v2557_v41, %v2549_v2  ;;  %v554_v41 = vld [vmem:[%s6115_s7 + $0x8] sm:$0xff] }
 0x372   : > { %2583 = vmatpush.msra.mxu0 %v2547_v43 }
 0x373   : > { %v2516_v10 = vpop.xlane.xlu1 %2515  ;;  %v2504_v26 = vpop.xlane.xlu2 %2503 }
 0x374   : > { %v2546_v46 = vmul.f32 0.015625, %v2516_v10  ;;  %v2492_v53 = vpop.xlane.xlu0 %2491  ;;  %v2542_v34 = vmul.f32 0.015625, %v2504_v26  ;;  %v2565_v10 = vmax.f32 %v2561_v49, %v2553_v63  ;;  %v558_v49 = vld [vmem:[%s6115_s7 + $0x28] sm:$0xff] }
 0x375   : > { %v2538_v14 = vmul.f32 0.015625, %v2492_v53 }
 0x376   : > { %2584 = vmatpush.msra.mxu0 %v2546_v46 }
 0x377   : > { %v2554_v47 = vmax.f32 %v2538_v14, %v2542_v34 }
 0x378   : > { %2585 = vmatpush.msra.mxu0 %v2545_v12 }
 0x379   : > { %v2558_v37 = vmax.f32 %v2554_v47, %v2546_v46  ;;  %v553_v47 = vld [vmem:[%s6115_s7] sm:$0xff] }
 0x37a   : > { %2586 = vmatpush.msra.mxu0 %v2544_v60 }
 0x37b   : > { %v2507_v57 = vpop.xlane.xlu1 %2506  ;;  %v2495_v52 = vpop.xlane.xlu2 %2494  ;;  %v2562_v26 = vmax.f32 %v2558_v37, %v2550_v28  ;;  %v549_v28 = vld [vmem:[%s6112_s4] sm:$0xff]  ;;  %v559_v37 = vld [vmem:[%s6115_s7 + $0x30] sm:$0xff] }
 0x37c   : > { %v2543_v59 = vmul.f32 0.015625, %v2507_v57  ;;  %v2539_v29 = vmul.f32 0.015625, %v2495_v52 }
 0x37e   : > { %2587 = vmatpush.msra.mxu0 %v2543_v59  ;;  %v2555_v3 = vmax.f32 %v2539_v29, %v2543_v59  ;;  %v550_v59 = vld [vmem:[%s6112_s4 + $0x8] sm:$0xf] }
 0x380   : > { %2588 = vmatpush.msra.mxu0 %v2542_v34  ;;  %v2559_v58 = vmax.f32 %v2555_v3, %v2547_v43 }
 0x382   : > { %2589 = vmatpush.msra.mxu0 %v2541_v18  ;;  %v2563_v55 = vmax.f32 %v2559_v58, %v2551_v42  ;;  %v548_v42 = vld [vmem:[%s6111_s3 + $0x8] sm:$0xf]  ;;  %v556_v58 = vld [vmem:[%s6115_s7 + $0x18] sm:$0xff] }
 0x383   : > { %v2498_v25 = vpop.xlane.xlu1 %2497 }
 0x384   : > { %v2540_v33 = vmul.f32 0.015625, %v2498_v25  ;;  %v2566_v53 = vmax.f32 %v2562_v26, %v2563_v55  ;;  %v555_v25 = vld [vmem:[%s6115_s7 + $0x10] sm:$0xff]  ;;  %v561_v55 = vld [vmem:[%s6115_s7 + $0x40] sm:$0xff] }
 0x385   : > { %v565_v26 = vld [vmem:[%s6115_s7 + $0x60] sm:$0xff] }
 0x386   : > { %v2556_v11 = vmax.f32 %v2540_v33, %v2544_v60  ;;  %2590 = vmatpush.msra.mxu0 %v2540_v33  ;;  %v557_v33 = vld [vmem:[%s6115_s7 + $0x20] sm:$0xff] }
 0x388   : > { %v2560_v27 = vmax.f32 %v2556_v11, %v2548_v16  ;;  %2591 = vmatpush.msra.mxu0 %v2539_v29  ;;  %v560_v11 = vld [vmem:[%s6115_s7 + $0x38] sm:$0xff] }
 0x38a   : > { %v2564_v12 = vmax.f32 %v2560_v27, %v2552_v32  ;;  %2592 = vmatpush.msra.mxu0 %v2538_v14  ;;  %v562_v27 = vld [vmem:[%s6115_s7 + $0x48] sm:$0xff] }
 0x38b   : > { %2593 = vmatmul.f32.vlgmr.msra.gmra.mxu0 %v547_v38  ;;  %v563_v38 = vld [vmem:[%s6115_s7 + $0x50] sm:$0xff] }
 0x38c   : > { %v2567_v43 = vmax.f32 %v2564_v12, %v2565_v10  ;;  %v564_v10 = vld [vmem:[%s6115_s7 + $0x58] sm:$0xff]  ;;  %v566_v12 = vld [vmem:[%s6115_s7 + $0x68] sm:$0xff] }
 0x38e   : > { %v2568_v57 = vmax.f32 %v2566_v53, %v2567_v43  ;;  %v567_v53 = vld [vmem:[%s6115_s7 + $0x70] sm:$0xff]  ;;  %v568_v43 = vld [vmem:[%s6115_s7 + $0x78] sm:$0xff] }
 0x390   : > { %v2569_v2 = vrot.slane %v2568_v57, 4 }
 0x392   : > { %v2570_v16 = vmax.f32 %v2568_v57, %v2569_v2 }
 0x393   : > { %2596 = vmatmul.f32.gmra.mxu0 %v548_v42 }
 0x394   : > { %v2571_v46 = vrot.slane %v2570_v16, 2 }
 0x396   : > { %v2572_v60 = vmax.f32 %v2570_v16, %v2571_v46  ;;  %v570_v46 = vld [vmem:[%s6116_s8 + $0x8] sm:$0xff] }
 0x398   : > { %v2573_v52 = vrot.slane %v2572_v60, 1 }
 0x39a   : > { %v2574_v63 = vmax.f32 %v2572_v60, %v2573_v52  ;;  %v574_v60 = vld [vmem:[%s6116_s8 + $0x28] sm:$0xff] }
 0x39c   : > { %2576 = vst.msk [vmem:[%s402_s25] sm:$0x1] %vm2575_vm1, %v2574_v63  ;;  %s3071_s25 = sshll.u32 %s386_s13, 4  ;;  %s3072_s25 = int_to_ptr.vmem [resolvable:$true] %s3071_s25 }
 0x408   : > { %v2594_v32 = vpop.f32.mrf.mxu0 }
 0x409   : > { %v2595_v18 = vadd.f32 %v2594_v32, %v549_v28 }
 0x40b   : > { %v2600_v3 = vmax.f32 %v2595_v18, 0.0 }
 0x410   : > { %v2597_v29 = vpop.f32.mrf.mxu0 }
 0x411   : > { %v2598_v34 = vadd.f32 %v2597_v29, %v550_v59  ;;  %v571_v29 = vld [vmem:[%s6116_s8 + $0x10] sm:$0xff] }
 0x413   : > { %v2601_v14 = vmax.f32 %v2598_v34, 0.0  ;;  %v575_v34 = vld [vmem:[%s6116_s8 + $0x30] sm:$0xff] }
 0x415   : > { %3687 = vmatpush.msk.msrb.mxu1 %vm2606_vm2, %v2601_v14  ;;  %3689 = vmatpush.msk.msrb.mxu0 %vm2606_vm2, %v2601_v14 }
 0x416   : > { %3854 = vmatpush.msk.msra.mxu2 %vm2606_vm2, %v2601_v14 }
 0x417   : > { %2625 = vmatpush.msrb.mxu1 %v2600_v3  ;;  %2694 = vmatpush.msrb.mxu0 %v2600_v3 }
 0x418   : > { %3855 = vmatpush.msra.mxu2 %v2600_v3  ;;  %3690 = vmatmul.msk.f32.vlgmr.msrb.gmra.mxu0 %vm2602_vm3, %v553_v47 }
 0x419   : > { %3691 = vmatmul.msk.f32.vlgmr.msra.gmra.mxu2 %vm2602_vm3, %v554_v41 }
 0x421   : > { %3692 = vmatmul.msk.f32.gmra.mxu2 %vm2602_vm3, %v555_v25 }
 0x429   : > { %3693 = vmatmul.msk.f32.gmra.mxu2 %vm2602_vm3, %v556_v58 }
 0x431   : > { %3694 = vmatmul.msk.f32.gmra.mxu2 %vm2602_vm3, %v557_v33 }
 0x439   : > { %3695 = vmatmul.msk.f32.gmra.mxu2 %vm2602_vm3, %v558_v49 }
 0x441   : > { %3696 = vmatmul.msk.f32.gmra.mxu2 %vm2602_vm3, %v559_v37 }
 0x449   : > { %3697 = vmatmul.msk.f32.gmra.mxu2 %vm2602_vm3, %v560_v11 }
 0x451   : > { %3698 = vmatmul.msk.f32.gmra.mxu2 %vm2602_vm3, %v561_v55 }
 0x459   : > { %3699 = vmatmul.msk.f32.gmra.mxu2 %vm2602_vm3, %v562_v27  ;;  %v573_v27 = vld [vmem:[%s6116_s8 + $0x20] sm:$0xff] }
 0x461   : > { %3700 = vmatmul.msk.f32.gmra.mxu2 %vm2602_vm3, %v563_v38  ;;  %v569_v38 = vld [vmem:[%s6116_s8] sm:$0xff] }
 0x469   : > { %3701 = vmatmul.msk.f32.gmra.mxu2 %vm2602_vm3, %v564_v10 }
 0x471   : > { %3702 = vmatmul.msk.f32.gmra.mxu2 %vm2602_vm3, %v565_v26  ;;  %v577_v26 = vld [vmem:[%s6116_s8 + $0x40] sm:$0xff] }
 0x479   : > { %3703 = vmatmul.msk.f32.gmra.mxu2 %vm2602_vm3, %v566_v12  ;;  %v578_v12 = vld [vmem:[%s6116_s8 + $0x48] sm:$0xff] }
 0x481   : > { %3704 = vmatmul.msk.f32.gmra.mxu2 %vm2602_vm3, %v567_v53 }
 0x489   : > { %3705 = vmatmul.msk.f32.gmra.mxu2 %vm2602_vm3, %v568_v43 }
 0x495   : > { %v2696_v10 = vpop.f32.mrf.mxu0 }
 0x49c   : > { %v2699_v57 = vpop.f32.mrf.mxu2 }
 0x49d   : > { %v5835_v52 = vadd.f32 %v2699_v57, %v570_v46  ;;  %v2697_v57 = vadd.f32 %v2696_v10, %v569_v38 }
 0x49f   : > { %v2746_v28 = vsel %vm2744_vm4, %v5835_v52, -inf }
 0x4a4   : > { %v2702_v2 = vpop.f32.mrf.mxu2 }
 0x4a5   : > { %v5849_v14 = vadd.f32 %v2702_v2, %v571_v29  ;;  %v581_v2 = vld [vmem:[%s6116_s8 + $0x60] sm:$0xff] }
 0x4a7   : > { %v2747_v47 = vsel %vm2744_vm4, %v5849_v14, -inf }
 0x4ac   : > { %v2705_v42 = vpop.f32.mrf.mxu2 }
 0x4b4   : > { %v2708_v16 = vpop.f32.mrf.mxu2 }
 0x4b5   : > { %v5869_v43 = vadd.f32 %v2708_v16, %v573_v27  ;;  %v582_v16 = vld [vmem:[%s6116_s8 + $0x68] sm:$0xff] }
 0x4bc   : > { %v2711_v63 = vpop.f32.mrf.mxu2 }
 0x4bd   : > { %v5837_v32 = vadd.f32 %v2711_v63, %v574_v60  ;;  %v2749_v63 = vsel %vm2744_vm4, %v5869_v43, -inf }
 0x4bf   : > { %v2751_v59 = vsel %vm2744_vm4, %v5837_v32, -inf }
 0x4c0   : > { %v2752_v18 = vmax.f32 %v2746_v28, %v2751_v59  ;;  %v2745_v59 = vsel %vm2744_vm4, %v2697_v57, -inf }
 0x4c4   : > { %v2714_v3 = vpop.f32.mrf.mxu2 }
 0x4c5   : > { %v5851_v41 = vadd.f32 %v2714_v3, %v575_v34 }
 0x4c7   : > { %v2753_v25 = vsel %vm2744_vm4, %v5851_v41, -inf }
 0x4c8   : > { %v2754_v58 = vmax.f32 %v2747_v47, %v2753_v25  ;;  %v2750_v47 = vmax.f32 %v2745_v59, %v2749_v63  ;;  %v579_v63 = vld [vmem:[%s6116_s8 + $0x50] sm:$0xff] }
 0x4cc   : > { %v2717_v33 = vpop.f32.mrf.mxu2 }
 0x4d4   : > { %v2720_v49 = vpop.f32.mrf.mxu2 }
 0x4d5   : > { %v5874_v46 = vadd.f32 %v2720_v49, %v577_v26 }
 0x4d7   : > { %v2757_v29 = vsel %vm2744_vm4, %v5874_v46, -inf }
 0x4d8   : > { %v2758_v27 = vmax.f32 %v2750_v47, %v2757_v29  ;;  %v583_v29 = vld [vmem:[%s6116_s8 + $0x70] sm:$0xff] }
 0x4dc   : > { %v2723_v37 = vpop.f32.mrf.mxu2 }
 0x4dd   : > { %v5876_v60 = vadd.f32 %v2723_v37, %v578_v12  ;;  %v576_v12 = vld [vmem:[%s6116_s8 + $0x38] sm:$0xff] }
 0x4df   : > { %v2759_v34 = vsel %vm2744_vm4, %v5876_v60, -inf }
 0x4e0   : > { %v2760_v37 = vmax.f32 %v2752_v18, %v2759_v34  ;;  %v580_v18 = vld [vmem:[%s6116_s8 + $0x58] sm:$0xff] }
 0x4e4   : > { %v2726_v11 = vpop.f32.mrf.mxu2 }
 0x4ec   : > { %v2729_v55 = vpop.f32.mrf.mxu2 }
 0x4ed   : > { %v5913_v47 = vadd.f32 %v2729_v55, %v580_v18 }
 0x4f4   : > { %v2732_v53 = vpop.f32.mrf.mxu2 }
 0x4f5   : > { %v5880_v28 = vadd.f32 %v2732_v53, %v581_v2  ;;  %v572_v2 = vld [vmem:[%s6116_s8 + $0x18] sm:$0xff] }
 0x4f6   : > { %v2706_v34 = vadd.f32 %v2705_v42, %v572_v2  ;;  %v2763_v42 = vsel %vm2744_vm4, %v5913_v47, -inf }
 0x4f7   : > { %v2765_v25 = vsel %vm2744_vm4, %v5880_v28, -inf }
 0x4f8   : > { %v2766_v26 = vmax.f32 %v2758_v27, %v2765_v25  ;;  %v584_v27 = vld [vmem:[%s6116_s8 + $0x78] sm:$0xff] }
 0x4fc   : > { %v2735_v3 = vpop.f32.mrf.mxu2 }
 0x4fd   : > { %v5892_v49 = vadd.f32 %v2735_v3, %v582_v16  ;;  %v2718_v16 = vadd.f32 %v2717_v33, %v576_v12  ;;  %v5911_v3 = vadd.f32 %v2726_v11, %v579_v63 }
 0x4ff   : > { %v2767_v38 = vsel %vm2744_vm4, %v5892_v49, -inf  ;;  %v2755_v25 = vsel %vm2744_vm4, %v2718_v16, -inf  ;;  %v2761_v33 = vsel %vm2744_vm4, %v5911_v3, -inf }
 0x500   : > { %v2768_v10 = vmax.f32 %v2760_v37, %v2767_v38  ;;  %v2748_v38 = vsel %vm2744_vm4, %v2706_v34, -inf  ;;  %v2762_v12 = vmax.f32 %v2754_v58, %v2761_v33 }
 0x501   : > { %v2756_v11 = vmax.f32 %v2748_v38, %v2755_v25 }
 0x502   : > { %v2773_v53 = vmax.f32 %v2766_v26, %v2768_v10 }
 0x503   : > { %v2764_v2 = vmax.f32 %v2756_v11, %v2763_v42 }
 0x504   : > { %v2738_v59 = vpop.f32.mrf.mxu2 }
 0x505   : > { %v5916_v37 = vadd.f32 %v2738_v59, %v583_v29 }
 0x507   : > { %v2769_v55 = vsel %vm2744_vm4, %v5916_v37, -inf }
 0x508   : > { %v2770_v18 = vmax.f32 %v2762_v12, %v2769_v55 }
 0x50c   : > { %v2741_v10 = vpop.f32.mrf.mxu2 }
 0x50d   : > { %v5928_v26 = vadd.f32 %v2741_v10, %v584_v27 }
 0x50f   : > { %v2771_v63 = vsel %vm2744_vm4, %v5928_v26, -inf }
 0x510   : > { %v2772_v59 = vmax.f32 %v2764_v2, %v2771_v63 }
 0x512   : > { %v2774_v29 = vmax.f32 %v2770_v18, %v2772_v59 }
 0x514   : > { %v2775_v6 = vmax.f32 %v2773_v53, %v2774_v29 }
 0x516   : > { %v2776_v24 = vrot.slane %v2775_v6, 4 }
 0x518   : > { %v2777_v20 = vmax.f32 %v2775_v6, %v2776_v24 }
 0x51a   : > { %v2778_v7 = vrot.slane %v2777_v20, 2 }
 0x51c   : > { %v2779_v0 = vmax.f32 %v2777_v20, %v2778_v7 }
 0x51e   : > { %v2780_v25 = vrot.slane %v2779_v0, 1 }
 0x520   : > { %v5932_v38 = vmax.f32 %v2779_v0, %v2780_v25 }
 0x522   : > { %v2782_v30 = vsub.f32 %v2697_v57, %v5932_v38  ;;  %v2783_v58 = vsub.f32 %v5835_v52, %v5932_v38  ;;  %v2784_v27 = vsub.f32 %v5849_v14, %v5932_v38  ;;  %v2785_v33 = vsub.f32 %v2706_v34, %v5932_v38 }
 0x523   : > { %v2786_v53 = vsub.f32 %v5869_v43, %v5932_v38  ;;  %v2787_v24 = vsub.f32 %v5837_v32, %v5932_v38  ;;  %v2788_v20 = vsub.f32 %v5851_v41, %v5932_v38  ;;  %v2789_v14 = vsub.f32 %v2718_v16, %v5932_v38 }
 0x524   : > { %v2798_v7 = vmul.f32 1.442695, %v2782_v30  ;;  %v2800_v6 = vmul.f32 1.442695, %v2783_v58  ;;  %v2802_v0 = vmul.f32 1.442695, %v2784_v27  ;;  %v2790_v43 = vsub.f32 %v5874_v46, %v5932_v38 }
 0x525   : > { %v2804_v57 = vmul.f32 1.442695, %v2785_v33  ;;  %v2806_v52 = vmul.f32 1.442695, %v2786_v53  ;;  %v2808_v34 = vmul.f32 1.442695, %v2787_v24  ;;  %v2791_v30 = vsub.f32 %v5876_v60, %v5932_v38 }
 0x526   : > { %3899 = vpow2.f32 %v2798_v7  ;;  %v2810_v32 = vmul.f32 1.442695, %v2788_v20  ;;  %v2812_v11 = vmul.f32 1.442695, %v2789_v14  ;;  %v2792_v12 = vsub.f32 %v5911_v3, %v5932_v38 }
 0x527   : > { %3901 = vpow2.f32 %v2800_v6  ;;  %v2814_v2 = vmul.f32 1.442695, %v2790_v43  ;;  %v2793_v59 = vsub.f32 %v5913_v47, %v5932_v38  ;;  %v2816_v29 = vmul.f32 1.442695, %v2791_v30 }
 0x528   : > { %3903 = vpow2.f32 %v2802_v0  ;;  %v2794_v3 = vsub.f32 %v5880_v28, %v5932_v38  ;;  %v2818_v33 = vmul.f32 1.442695, %v2792_v12  ;;  %v2795_v47 = vsub.f32 %v5892_v49, %v5932_v38 }
 0x529   : > { %3905 = vpow2.f32 %v2804_v57  ;;  %v2820_v7 = vmul.f32 1.442695, %v2793_v59  ;;  %v2796_v28 = vsub.f32 %v5916_v37, %v5932_v38  ;;  %v2797_v49 = vsub.f32 %v5928_v26, %v5932_v38 }
 0x52a   : > { %3907 = vpow2.f32 %v2806_v52  ;;  %v2822_v52 = vmul.f32 1.442695, %v2794_v3 }
 0x52b   : > { %3909 = vpow2.f32 %v2808_v34  ;;  %v2826_v37 = vmul.f32 1.442695, %v2796_v28 }
 0x52c   : > { %v5949_v42 = vpop.eup %3899  ;;  %3911 = vpow2.f32 %v2810_v32  ;;  %v2824_v32 = vmul.f32 1.442695, %v2795_v47 }
 0x52d   : > { %v5951_v41 = vpop.eup %3901  ;;  %v2830_v10 = vsel %vm2744_vm4, %v5949_v42, 0.0  ;;  %3913 = vpow2.f32 %v2812_v11 }
 0x52e   : > { %v5957_v16 = vpop.eup %3903  ;;  %v2831_v55 = vsel %vm2744_vm4, %v5951_v41, 0.0  ;;  %3915 = vpow2.f32 %v2814_v2 }
 0x52f   : > { %v5961_v46 = vpop.eup %3905  ;;  %v2832_v63 = vadd.f32 %v2831_v55, %v2830_v10  ;;  %v2833_v60 = vsel %vm2744_vm4, %v5957_v16, 0.0  ;;  %3917 = vpow2.f32 %v2816_v29 }
 0x530   : > { %v5967_v18 = vpop.eup %3907  ;;  %v2835_v58 = vsel %vm2744_vm4, %v5961_v46, 0.0  ;;  %3919 = vpow2.f32 %v2818_v33 }
 0x531   : > { %v2834_v25 = vadd.f32 %v2833_v60, %v2832_v63  ;;  %v5973_v27 = vpop.eup %3909  ;;  %v2837_v24 = vsel %vm2744_vm4, %v5967_v18, 0.0  ;;  %3921 = vpow2.f32 %v2820_v7  ;;  %v2828_v63 = vmul.f32 1.442695, %v2797_v49 }
 0x532   : > { %v5979_v20 = vpop.eup %3911  ;;  %v2839_v0 = vsel %vm2744_vm4, %v5973_v27, 0.0  ;;  %3923 = vpow2.f32 %v2822_v52 }
 0x533   : > { %v2836_v53 = vadd.f32 %v2835_v58, %v2834_v25  ;;  %v5985_v57 = vpop.eup %3913  ;;  %v2841_v34 = vsel %vm2744_vm4, %v5979_v20, 0.0  ;;  %3925 = vpow2.f32 %v2824_v32 }
 0x534   : > { %v5991_v43 = vpop.eup %3915  ;;  %v2843_v11 = vsel %vm2744_vm4, %v5985_v57, 0.0  ;;  %3927 = vpow2.f32 %v2826_v37 }
 0x535   : > { %v2838_v6 = vadd.f32 %v2837_v24, %v2836_v53  ;;  %v5997_v10 = vpop.eup %3917  ;;  %v2845_v12 = vsel %vm2744_vm4, %v5991_v43, 0.0  ;;  %3929 = vpow2.f32 %v2828_v63 }
 0x536   : > { %v3920_v2 = vpop.eup %3919  ;;  %v2847_v26 = vsel %vm2744_vm4, %v5997_v10, 0.0 }
 0x537   : > { %v2840_v14 = vadd.f32 %v2839_v0, %v2838_v6  ;;  %v3922_v38 = vpop.eup %3921  ;;  %v2849_v29 = vsel %vm2744_vm4, %v3920_v2, 0.0 }
 0x538   : > { %v3924_v25 = vpop.eup %3923  ;;  %v2851_v3 = vsel %vm2744_vm4, %v3922_v38, 0.0 }
 0x539   : > { %v2842_v30 = vadd.f32 %v2841_v34, %v2840_v14  ;;  %v3926_v33 = vpop.eup %3925  ;;  %v2853_v24 = vsel %vm2744_vm4, %v3924_v25, 0.0 }
 0x53a   : > { %v3928_v47 = vpop.eup %3927  ;;  %v2855_v6 = vsel %vm2744_vm4, %v3926_v33, 0.0 }
 0x53b   : > { %v2844_v55 = vadd.f32 %v2843_v11, %v2842_v30  ;;  %v3930_v0 = vpop.eup %3929  ;;  %v2857_v52 = vsel %vm2744_vm4, %v3928_v47, 0.0 }
 0x53c   : > { %v2859_v34 = vsel %vm2744_vm4, %v3930_v0, 0.0 }
 0x53d   : > { %v2846_v60 = vadd.f32 %v2845_v12, %v2844_v55 }
 0x53f   : > { %v2848_v59 = vadd.f32 %v2847_v26, %v2846_v60 }
 0x541   : > { %v2850_v58 = vadd.f32 %v2849_v29, %v2848_v59 }
 0x543   : > { %v2852_v53 = vadd.f32 %v2851_v3, %v2850_v58 }
 0x545   : > { %v2854_v7 = vadd.f32 %v2853_v24, %v2852_v53 }
 0x547   : > { %v2856_v28 = vadd.f32 %v2855_v6, %v2854_v7 }
 0x549   : > { %v2858_v14 = vadd.f32 %v2857_v52, %v2856_v28 }
 0x54b   : > { %v2860_v49 = vadd.f32 %v2859_v34, %v2858_v14 }
 0x54d   : > { %v2861_v32 = vrot.slane %v2860_v49, 4 }
 0x54f   : > { %v2862_v30 = vadd.f32 %v2861_v32, %v2860_v49 }
 0x551   : > { %v2863_v11 = vrot.slane %v2862_v30, 2 }
 0x553   : > { %v2864_v37 = vadd.f32 %v2863_v11, %v2862_v30 }
 0x555   : > { %v2865_v55 = vrot.slane %v2864_v37, 1 }
 0x557   : > { %v2866_v12 = vadd.f32 %v2865_v55, %v2864_v37 }
 0x559   : > { %3931 = vrcp.f32 %v2866_v12  ;;  %v2878_v59 = vand.u32 2147483648, %v2866_v12  ;;  %v2876_v58 = vand.u32 2147483647, %v2866_v12  ;;  %vm2872_vm6 = vweird.f32 %v2866_v12 }
 0x55b   : > { %v2879_v53 = vor.u32 1.1754944e-38, %v2878_v59  ;;  %vm2877_vm8 = vcmp.eq.f32.partialorder %v2876_v58, 8.507059e+37 }
 0x55f   : > { %v3932_v63 = vpop.eup %3931 }
 0x560   : > { %v2868_v60 = vmul.f32 %v3932_v63, %v2866_v12  ;;  %vm2873_vm5 = vweird.f32 %v3932_v63 }
 0x561   : > { %vm2874_vm7 = vmor %vm2872_vm6, %vm2873_vm5 }
 0x562   : > { %v2869_v26 = vsub.f32 1.0, %v2868_v60 }
 0x564   : > { %v2870_v29 = vmul.f32 %v3932_v63, %v2869_v26 }
 0x566   : > { %v2871_v3 = vadd.f32 %v3932_v63, %v2870_v29 }
 0x568   : > { %v2875_v24 = vsel %vm2874_vm7, %v3932_v63, %v2871_v3 }
 0x569   : > { %v2880_v7 = vsel %vm2877_vm8, %v2879_v53, %v2875_v24 }
 0x56a   : > { %v2883_v6 = vmul.f32 %v5957_v16, %v2880_v7  ;;  %v2882_v28 = vmul.f32 %v5951_v41, %v2880_v7  ;;  %v2881_v52 = vmul.f32 %v5949_v42, %v2880_v7  ;;  %v2885_v14 = vmul.f32 %v5967_v18, %v2880_v7 }
 0x56b   : > { %v2886_v34 = vmul.f32 %v5973_v27, %v2880_v7  ;;  %v2884_v49 = vmul.f32 %v5961_v46, %v2880_v7  ;;  %v2888_v32 = vmul.f32 %v5985_v57, %v2880_v7  ;;  %v2889_v30 = vmul.f32 %v5991_v43, %v2880_v7  ;;  %v551_v27 = vld [vmem:[%s6113_s5] sm:$0x1] }
 0x56c   : > { %2909 = vperm.xlu0 %3896, %v2883_v6   ;;  %2904 = vperm.xlu2 %3898, %v2882_v28   ;;  %v2887_v11 = vmul.f32 %v5979_v20, %v2880_v7  ;;  %v2891_v37 = vmul.f32 %v3920_v2, %v2880_v7  ;;  %v2892_v16 = vmul.f32 %v3922_v38, %v2880_v7 }
 0x56d   : > { %2899 = vperm.xlu1 %3897, %v2881_v52   ;;  %v2890_v41 = vmul.f32 %v5997_v10, %v2880_v7  ;;  %v2894_v42 = vmul.f32 %v3926_v33, %v2880_v7  ;;  %v2895_v55 = vmul.f32 %v3928_v47, %v2880_v7  ;;  %v2893_v18 = vmul.f32 %v3924_v25, %v2880_v7 }
 0x56e   : > { %v2896_v46 = vmul.f32 %v3930_v0, %v2880_v7  ;;  %3688 = vmatmul.msk.f32.vlgmr.msrb.gmra.mxu1 %vm2602_vm3, %v551_v27 }
 0x574   : > { %2919 = vperm.xlu0 %3896, %v2885_v14   ;;  %2924 = vperm.xlu2 %3898, %v2886_v34  }
 0x575   : > { %2914 = vperm.xlu1 %3897, %v2884_v49  }
 0x57c   : > { %2934 = vperm.xlu0 %3896, %v2888_v32   ;;  %2939 = vperm.xlu2 %3898, %v2889_v30  }
 0x57d   : > { %2929 = vperm.xlu1 %3897, %v2887_v11  }
 0x584   : > { %2949 = vperm.xlu0 %3896, %v2891_v37   ;;  %2954 = vperm.xlu2 %3898, %v2892_v16  }
 0x585   : > { %2944 = vperm.xlu1 %3897, %v2890_v41  }
 0x58c   : > { %2964 = vperm.xlu0 %3896, %v2894_v42   ;;  %2969 = vperm.xlu2 %3898, %v2895_v55  }
 0x58d   : > { %2959 = vperm.xlu1 %3897, %v2893_v18  }
 0x595   : > { %2974 = vperm.xlu1 %3897, %v2896_v46  }
 0x5c6   : > { %v2905_v20 = vpop.permute.xlu2 %2904 }
 0x5c7   : > { %v2978_v10 = vmul.f32 %v2905_v20, %v2474_v13 }
 0x5c9   : > { %v2994_v33 = vsel %vm2489_vm0, %v2978_v10, 0.0 }
 0x5ce   : > { %v2925_v25 = vpop.permute.xlu2 %2924 }
 0x5cf   : > { %v2982_v59 = vmul.f32 %v2925_v25, %v2478_v50 }
 0x5d1   : > { %v3002_v53 = vsel %vm2489_vm0, %v2982_v59, 0.0 }
 0x5de   : > { %v2910_v57 = vpop.permute.xlu0 %2909 }
 0x5df   : > { %v2900_v43 = vpop.permute.xlu1 %2899  ;;  %v2979_v47 = vmul.f32 %v2910_v57, %v2475_v23  ;;  %v2940_v23 = vpop.permute.xlu2 %2939 }
 0x5e0   : > { %v2977_v2 = vmul.f32 %v2900_v43, %v2473_v19  ;;  %v2985_v44 = vmul.f32 %v2940_v23, %v2481_v1 }
 0x5e1   : > { %v2996_v60 = vsel %vm2489_vm0, %v2979_v47, 0.0 }
 0x5e2   : > { %v2993_v38 = vsel %vm2489_vm0, %v2977_v2, 0.0  ;;  %v3008_v14 = vsel %vm2489_vm0, %v2985_v44, 0.0 }
 0x5e3   : > { %v2995_v0 = vadd.f32 %v2994_v33, %v2993_v38 }
 0x5e5   : > { %v2997_v19 = vadd.f32 %v2996_v60, %v2995_v0 }
 0x5e6   : > { %v2920_v12 = vpop.permute.xlu0 %2919 }
 0x5e7   : > { %v2915_v63 = vpop.permute.xlu1 %2914  ;;  %v2981_v39 = vmul.f32 %v2920_v12, %v2477_v54  ;;  %v2955_v28 = vpop.permute.xlu2 %2954 }
 0x5e8   : > { %v2980_v40 = vmul.f32 %v2915_v63, %v2476_v9  ;;  %v2988_v1 = vmul.f32 %v2955_v28, %v6134_v4 }
 0x5e9   : > { %v3000_v17 = vsel %vm2489_vm0, %v2981_v39, 0.0  ;;  %v552_v39 = vld [vmem:[#allocation2] sm:$0x1] }
 0x5ea   : > { %v2998_v13 = vsel %vm2489_vm0, %v2980_v40, 0.0  ;;  %v3014_v16 = vsel %vm2489_vm0, %v2988_v1, 0.0 }
 0x5eb   : > { %v2999_v26 = vadd.f32 %v2998_v13, %v2997_v19  ;;  %v2627_v8 = vpop.f32.mrf.mxu1 }
 0x5ec   : > { %v2628_v40 = vadd.f32 %v2627_v8, %v552_v39 }
 0x5ed   : > { %v3001_v29 = vadd.f32 %v3000_v17, %v2999_v26 }
 0x5ee   : > { %v2935_v58 = vpop.permute.xlu0 %2934  ;;  %2630 = vst.msk [vmem:[%s399_s17] sm:$0x1] %vm2575_vm1, %v2628_v40 }
 0x5ef   : > { %v2930_v3 = vpop.permute.xlu1 %2929  ;;  %v2984_v48 = vmul.f32 %v2935_v58, %v2480_v15  ;;  %v3003_v9 = vadd.f32 %v3002_v53, %v3001_v29  ;;  %v2970_v42 = vpop.permute.xlu2 %2969 }
 0x5f0   : > { %v2983_v35 = vmul.f32 %v2930_v3, %v2479_v5  ;;  %v2991_v27 = vmul.f32 %v2970_v42, %v6137_v56 }
 0x5f1   : > { %v3006_v50 = vsel %vm2489_vm0, %v2984_v48, 0.0 }
 0x5f2   : > { %v3004_v54 = vsel %vm2489_vm0, %v2983_v35, 0.0  ;;  %v3020_v10 = vsel %vm2489_vm0, %v2991_v27, 0.0 }
 0x5f3   : > { %v3005_v24 = vadd.f32 %v3004_v54, %v3003_v9 }
 0x5f5   : > { %v3007_v7 = vadd.f32 %v3006_v50, %v3005_v24 }
 0x5f6   : > { %v2950_v6 = vpop.permute.xlu0 %2949 }
 0x5f7   : > { %v2945_v52 = vpop.permute.xlu1 %2944  ;;  %v2987_v51 = vmul.f32 %v2950_v6, %v2483_v31  ;;  %v3009_v15 = vadd.f32 %v3008_v14, %v3007_v7 }
 0x5f8   : > { %v2986_v5 = vmul.f32 %v2945_v52, %v6133_v62 }
 0x5f9   : > { %v3012_v32 = vsel %vm2489_vm0, %v2987_v51, 0.0 }
 0x5fa   : > { %v3010_v34 = vsel %vm2489_vm0, %v2986_v5, 0.0 }
 0x5fb   : > { %v3011_v49 = vadd.f32 %v3010_v34, %v3009_v15 }
 0x5fd   : > { %v3013_v30 = vadd.f32 %v3012_v32, %v3011_v49 }
 0x5fe   : > { %v2965_v11 = vpop.permute.xlu0 %2964 }
 0x5ff   : > { %v2960_v37 = vpop.permute.xlu1 %2959  ;;  %v2990_v31 = vmul.f32 %v2965_v11, %v6135_v45  ;;  %v3015_v55 = vadd.f32 %v3014_v16, %v3013_v30 }
 0x600   : > { %v2989_v41 = vmul.f32 %v2960_v37, %v6136_v36 }
 0x601   : > { %v3018_v20 = vsel %vm2489_vm0, %v2990_v31, 0.0 }
 0x602   : > { %v3016_v18 = vsel %vm2489_vm0, %v2989_v41, 0.0 }
 0x603   : > { %v3017_v46 = vadd.f32 %v3016_v18, %v3015_v55 }
 0x605   : > { %v3019_v57 = vadd.f32 %v3018_v20, %v3017_v46 }
 0x607   : > { %v2975_v43 = vpop.permute.xlu1 %2974  ;;  %v3021_v61 = vadd.f32 %v3020_v10, %v3019_v57 }
 0x608   : > { %v2992_v2 = vmul.f32 %v2975_v43, %v6138_v22 }
 0x60a   : > { %v3022_v38 = vsel %vm2489_vm0, %v2992_v2, 0.0 }
 0x60b   : > { %v3023_v25 = vadd.f32 %v3022_v38, %v3021_v61 }
 0x60d   : > { %v3024_v33 = vrot.slane %v3023_v25, 4 }
 0x60f   : > { %v3025_v47 = vadd.f32 %v3024_v33, %v3023_v25 }
 0x611   : > { %v3026_v0 = vrot.slane %v3025_v47, 2 }
 0x613   : > { %v3027_v21 = vadd.f32 %v3026_v0, %v3025_v47 }
 0x615   : > { %v3028_v12 = vrot.slane %v3027_v21, 1 }
 0x617   : > { %v3029_v63 = vadd.f32 %v3028_v12, %v3027_v21 }
 0x619   : > { %v3706_v60 = vmul.f32 -1.442695, %v3029_v63 }
 0x61b   : > { %3933 = vpow2.f32 %v3706_v60 }
 0x621   : > { %v3934_v19 = vpop.eup %3933 }
 0x622   : > { %v3033_v13 = vadd.f32 1.0, %v3934_v19 }
 0x624   : > { %3935 = vrcp.f32 %v3033_v13  ;;  %v3045_v23 = vand.u32 2147483648, %v3033_v13  ;;  %v3043_v58 = vand.u32 2147483647, %v3033_v13  ;;  %vm3039_vm10 = vweird.f32 %v3033_v13 }
 0x626   : > { %v3046_v53 = vor.u32 1.1754944e-38, %v3045_v23  ;;  %vm3044_vm13 = vcmp.eq.f32.partialorder %v3043_v58, 8.507059e+37 }
 0x62a   : > { %v3936_v26 = vpop.eup %3935 }
 0x62b   : > { %v3035_v59 = vmul.f32 %v3936_v26, %v3033_v13  ;;  %vm3040_vm9 = vweird.f32 %v3936_v26 }
 0x62c   : > { %vm3041_vm11 = vmor %vm3039_vm10, %vm3040_vm9 }
 0x62d   : > { %v3036_v17 = vsub.f32 1.0, %v3035_v59 }
 0x62f   : > { %v3037_v29 = vmul.f32 %v3936_v26, %v3036_v17 }
 0x631   : > { %v3038_v3 = vadd.f32 %v3936_v26, %v3037_v29 }
 0x633   : > { %v3042_v48 = vsel %vm3041_vm11, %v3936_v26, %v3038_v3 }
 0x634   : > { %v3047_v35 = vsel %vm3044_vm13, %v3046_v53, %v3042_v48 }
 0x635   : > { %3050 = vst.msk [vmem:[%s386_s13] sm:$0x1] %vm3049_vm12, %v3047_v35 }
 0x636   : > { %3964 = shalt.err (!%p3961_p3)
}
 0x637   : > { %3856 = dma.vmem_to_hbm [thread:$0]  (%p4103_p5), %s3072_s25, 16, %s3074_s26, %s3055_s6  }
 0x638 PF: > { %p3862_p4 = scmp.ge.s32.totalorder %s3999_s22, 2  ;;  %s3094_s2 = sand.u32 1, %s3987_s19  }
 0x639   : > { %s3095_s27 = scalar_lea.sflag [#allocation4], %s3094_s2 }
 0x63a   : > { %p3859_p7 = pnand %p3862_p4, %p4107_p6 }
 0x63c   : > { %p3860_p8 = pneg %p3859_p7 }
 0x63e   : > { %3982 = dma.done.wait (%p3860_p8), %s3095_s27, 16  }
 0x63f   : > { %3984 = vsyncadd (%p3860_p8), %s3095_s27, 4294967280  ;;  %s6139_s18 = sld [smem:[#allocation6_spill]]  ;;  %p24_p9 = scmp.ge.s32.totalorder %s4090_s24, 4  }
 0x640   : > { %s6140_s19 = smov %s3991_s20  ;;  %s6141_s20 = smov %s3995_s21 }
 0x641   : > { %s6143_s22 = smov %s4090_s24  ;;  %26 = sbr.rel (!%p24_p9) target bundleno = 6 (0x6), region = 115 }
 0x645   : > { %s6142_s21 = smov %s6139_s18 }
 0x646   :  { %3106 = vsyncpa [#allocation4], 1 }
 0x647   :  { %3108 = vsyncpa [#allocation4 + $0x1], 1 }

</bundles_post_ra>
